<compile_context>
chip_gen: v7x
topology: tpu7x:2x2x1
jax: 0.10.0
libtpu: 0.0.40
codegen_flags: <defaults>
</compile_context>

<pallas_src>
import jax
import jax.numpy as jnp
from jax import lax
from jax.experimental import pallas as pl
from jax.experimental.pallas import tpu as pltpu


# ----------------------------------------------------------------------------
# Network geometry (fixed by the PyTorch module with input_dims = (12, 48, 48))
# ----------------------------------------------------------------------------
_C_IN, _H_IN, _W_IN = 12, 48, 48
_K1, _S1, _OC1 = 8, 4, 32            # conv1: 48 -> 11 (only 10x10 used below)
_K2, _S2, _OC2 = 4, 2, 64            # conv2: -> 4x4
_K3, _S3, _OC3 = 3, 1, 64            # conv3: -> 2x2
_OH2 = 4                             # conv2 spatial size
_OH3 = 2                             # conv3 spatial size
_P1 = 10                             # conv1 positions conv2 actually consumes
_WHALF = _P1 // 2                    # 5 (w1 split by parity for contiguity)
_FC_IN = _OC3 * _OH3 * _OH3          # 256
_FC_H = 512
_LANE = 128                          # padded channel width (lanes)
_K1_COLS = _C_IN * _K1 * _K1         # 768
_TILE_N = 8                          # samples per grid step (multiple of 8)


# ----------------------------------------------------------------------------
# Fused Pallas kernel: conv1 -> conv2 -> conv3 -> fc1 -> fc2 (one batch tile)
# ----------------------------------------------------------------------------
def _critic_fused_kernel(p1_ref, w1_ref, b1_ref, w2_ref, b2_ref, w3_ref, b3_ref,
                         wfc1_ref, bfc1_ref, wfc2_ref, bfc2_ref,
                         out_ref, y1_ref, x2_ref, y2_ref, x3_ref, y3_ref, x4_ref):
    f32, bf16 = jnp.float32, jnp.bfloat16
    tn = out_ref.shape[0]                      # TILE_N

    # conv1: one (100*TILE_N, 768) @ (768, 128) matmul, bias+ReLU on the f32
    # accumulator, single cast to bf16 at the store.
    a1 = jnp.dot(p1_ref[...], w1_ref[...], preferred_element_type=f32)
    y1_ref[...] = jnp.maximum(a1 + b1_ref[...], 0.0).astype(bf16)

    # conv2: build the K-stacked LHS (16*TILE_N, 16*128).  y1 rows are ordered
    # (w1%2, h1, w1//2, n), so for each (tap, oh2) the 4*TILE_N source rows
    # (ow2, n) are one contiguous block -> 64 contiguous copies total.
    for i2 in range(_K2):
        for j2 in range(_K2):
            t = i2 * _K2 + j2
            wp, wh = j2 % 2, j2 // 2
            for oh2 in range(_OH2):
                h1 = _S2 * oh2 + i2
                src = (wp * (_P1 * _WHALF) + h1 * _WHALF + wh) * tn
                dst = oh2 * _OH2 * tn
                x2_ref[pl.ds(dst, _OH2 * tn), pl.ds(t * _LANE, _LANE)] = \
                    y1_ref[pl.ds(src, _OH2 * tn), :]
    a2 = jnp.dot(x2_ref[...], w2_ref[...], preferred_element_type=f32)
    y2_ref[...] = jnp.maximum(a2 + b2_ref[...], 0.0).astype(bf16)

    # conv3: K-stacked LHS (4*TILE_N, 9*128); y2 rows are (oh2, ow2, n) so
    # each (tap, oh3) is one contiguous 2*TILE_N-row copy (18 copies).
    for i3 in range(_K3):
        for j3 in range(_K3):
            u = i3 * _K3 + j3
            for oh3 in range(_OH3):
                src = ((oh3 + i3) * _OH2 + j3) * tn
                dst = oh3 * _OH3 * tn
                x3_ref[pl.ds(dst, _OH3 * tn), pl.ds(u * _LANE, _LANE)] = \
                    y2_ref[pl.ds(src, _OH3 * tn), :]
    a3 = jnp.dot(x3_ref[...], w3_ref[...], preferred_element_type=f32)
    y3_ref[...] = jnp.maximum(a3 + b3_ref[...], 0.0).astype(bf16)

    # fc1: LHS (TILE_N, 4*128).  PyTorch's NCHW .view(N,-1) flatten is folded
    # into the fc1 weight row permutation in prepare_params.
    for p in range(_OH3 * _OH3):
        x4_ref[:, pl.ds(p * _LANE, _LANE)] = y3_ref[pl.ds(p * tn, tn), :]
    h = jnp.dot(x4_ref[...], wfc1_ref[...], preferred_element_type=f32)
    h = jnp.maximum(h + bfc1_ref[...], 0.0)

    # fc2 (output lane-padded to 128; column 0 carries the scalar value).
    v = jnp.dot(h.astype(bf16), wfc2_ref[...], preferred_element_type=f32)
    out_ref[...] = (v + bfc2_ref[...]).astype(out_ref.dtype)


# ----------------------------------------------------------------------------
# One-time parameter repacking (done OUTSIDE the jitted forward)
# ----------------------------------------------------------------------------
def prepare_params(params):
    f32, bf16 = jnp.float32, jnp.bfloat16

    def pad_bias(b, width):
        return jnp.zeros((1, width), f32).at[0, : b.shape[0]].set(b.astype(f32))

    # conv1: (32,12,8,8) -> (768, 128); row index = c_in*64 + ki*8 + kj.
    w1 = params["w_c1"].reshape(_OC1, _K1_COLS).T
    w1p = jnp.zeros((_K1_COLS, _LANE), f32).at[:, :_OC1].set(w1).astype(bf16)

    # conv2: (64,32,4,4) -> K-stacked (16*128, 128).
    w2 = jnp.transpose(params["w_c2"], (2, 3, 1, 0)).reshape(_K2 * _K2, _OC1, _OC2)
    w2p = (jnp.zeros((_K2 * _K2, _LANE, _LANE), f32)
           .at[:, :_OC1, :_OC2].set(w2).astype(bf16)
           .reshape(_K2 * _K2 * _LANE, _LANE))

    # conv3: (64,64,3,3) -> K-stacked (9*128, 128).
    w3 = jnp.transpose(params["w_c3"], (2, 3, 1, 0)).reshape(_K3 * _K3, _OC2, _OC3)
    w3p = (jnp.zeros((_K3 * _K3, _LANE, _LANE), f32)
           .at[:, :_OC2, :_OC3].set(w3).astype(bf16)
           .reshape(_K3 * _K3 * _LANE, _LANE))

    # fc1: (256, 512).  PyTorch flatten index = c*4 + p; kernel column is
    # p*128 + c, so permute rows accordingly and K-stack to (4*128, 512).
    wfc1 = params["w_fc1"].reshape(_OC3, _OH3 * _OH3, _FC_H)     # (c, p, 512)
    wfc1 = jnp.transpose(wfc1, (1, 0, 2))                        # (p, c, 512)
    wfc1p = (jnp.zeros((_OH3 * _OH3, _LANE, _FC_H), f32)
             .at[:, :_OC3, :].set(wfc1).astype(bf16)
             .reshape(_OH3 * _OH3 * _LANE, _FC_H))

    # fc2: (512, 1) -> (512, 128) (lane-dense output).
    wfc2p = (jnp.zeros((_FC_H, _LANE), f32)
             .at[:, :1].set(params["w_fc2"]).astype(bf16))

    return {
        "w1": w1p, "b1": pad_bias(params["b_c1"], _LANE),
        "w2": w2p, "b2": pad_bias(params["b_c2"], _LANE),
        "w3": w3p, "b3": pad_bias(params["b_c3"], _LANE),
        "wfc1": wfc1p, "bfc1": params["b_fc1"].astype(f32).reshape(1, _FC_H),
        "wfc2": wfc2p, "bfc2": pad_bias(params["b_fc2"], _LANE),
    }


# ----------------------------------------------------------------------------
# Wrapper-side im2col (static slices only, NO gather, NO duplication)
# ----------------------------------------------------------------------------
def _conv1_patches(state, n_pad):
    """(N,12,48,48) f32 -> (n_tiles*100*TILE_N, 768) bf16.

    Row order within a tile: (w1%2, h1, w1//2, n_in_tile)  -- this makes every
    in-kernel duplication step a contiguous row-block copy.
    Column order: c_in*64 + ki*8 + kj (matches the conv1 weight repack).
    """
    n = state.shape[0]
    x = state.astype(jnp.bfloat16)
    if n_pad != n:
        x = jnp.concatenate(
            [x, jnp.zeros((n_pad - n,) + state.shape[1:], jnp.bfloat16)], axis=0)
    span = _S1 * (_P1 - 1) + 1                      # 37
    taps = []
    for ki in range(_K1):
        for kj in range(_K1):
            taps.append(x[:, :, ki:ki + span:_S1, kj:kj + span:_S1])
    p = jnp.stack(taps, axis=2)                     # (n_pad, 12, 64, 10, 10)
    p = p.transpose(0, 3, 4, 1, 2)                  # (n_pad, h1, w1, 12, 64)
    p = p.reshape(n_pad, _P1, _WHALF, 2, _K1_COLS)  # w1 = 2*w_half + w_par
    n_tiles = n_pad // _TILE_N
    p = p.reshape(n_tiles, _TILE_N, _P1, _WHALF, 2, _K1_COLS)
    p = p.transpose(0, 4, 2, 3, 1, 5)               # (tile, wpar, h1, whalf, n, 768)
    return p.reshape(n_tiles * _P1 * _P1 * _TILE_N, _K1_COLS)


# ----------------------------------------------------------------------------
# Forward
# ----------------------------------------------------------------------------
def critic_forward(state, prep):
    """state: (N, 12, 48, 48) f32 -> value (N, 1) f32."""
    n = state.shape[0]
    n_pad = ((n + _TILE_N - 1) // _TILE_N) * _TILE_N
    n_tiles = n_pad // _TILE_N
    rows1 = _P1 * _P1 * _TILE_N                      # conv1 rows per tile

    p1 = _conv1_patches(state, n_pad)

    def const_spec(shape):
        return pl.BlockSpec(shape, lambda i: (0, 0))

    macs_per_tile = (rows1 * _K1_COLS * _LANE
                     + (_OH2 * _OH2 * _TILE_N) * (_K2 * _K2 * _LANE) * _LANE
                     + (_OH3 * _OH3 * _TILE_N) * (_K3 * _K3 * _LANE) * _LANE
                     + _TILE_N * (_OH3 * _OH3 * _LANE) * _FC_H
                     + _TILE_N * _FC_H * _LANE)
    weight_bytes = sum(int(v.size) * v.dtype.itemsize for v in prep.values())
    cost = pl.CostEstimate(
        flops=2 * macs_per_tile * n_tiles,
        transcendentals=0,
        bytes_accessed=int(p1.size) * 2 + weight_bytes + n_pad * _LANE * 4)

    out = pl.pallas_call(
        _critic_fused_kernel,
        out_shape=jax.ShapeDtypeStruct((n_pad, _LANE), jnp.float32),
        grid=(n_tiles,),
        in_specs=[
            pl.BlockSpec((rows1, _K1_COLS), lambda i: (i, 0)),      # p1 (batch tiled)
            const_spec((_K1_COLS, _LANE)),                          # w1
            const_spec((1, _LANE)),                                 # b1
            const_spec((_K2 * _K2 * _LANE, _LANE)),                 # w2 (K-stacked)
            const_spec((1, _LANE)),                                 # b2
            const_spec((_K3 * _K3 * _LANE, _LANE)),                 # w3 (K-stacked)
            const_spec((1, _LANE)),                                 # b3
            const_spec((_OH3 * _OH3 * _LANE, _FC_H)),               # wfc1 (K-stacked)
            const_spec((1, _FC_H)),                                 # bfc1
            const_spec((_FC_H, _LANE)),                             # wfc2
            const_spec((1, _LANE)),                                 # bfc2
        ],
        out_specs=pl.BlockSpec((_TILE_N, _LANE), lambda i: (i, 0)),
        scratch_shapes=[
            pltpu.VMEM((rows1, _LANE), jnp.bfloat16),                     # y1
            pltpu.VMEM((_OH2 * _OH2 * _TILE_N, _K2 * _K2 * _LANE),
                       jnp.bfloat16),                                     # x2 (conv2 LHS)
            pltpu.VMEM((_OH2 * _OH2 * _TILE_N, _LANE), jnp.bfloat16),     # y2
            pltpu.VMEM((_OH3 * _OH3 * _TILE_N, _K3 * _K3 * _LANE),
                       jnp.bfloat16),                                     # x3 (conv3 LHS)
            pltpu.VMEM((_OH3 * _OH3 * _TILE_N, _LANE), jnp.bfloat16),     # y3
            pltpu.VMEM((_TILE_N, _OH3 * _OH3 * _LANE), jnp.bfloat16),     # x4 (fc1 LHS)
        ],
        compiler_params=pltpu.CompilerParams(
            dimension_semantics=("parallel",),
            vmem_limit_bytes=32 * 1024 * 1024),
        cost_estimate=cost,
    )(p1, prep["w1"], prep["b1"], prep["w2"], prep["b2"],
      prep["w3"], prep["b3"], prep["wfc1"], prep["bfc1"],
      prep["wfc2"], prep["bfc2"])
    return out[:n, :1]


# ----------------------------------------------------------------------------
# Params + pure-XLA reference (mirrors the kernel's bf16-operand / f32-accum)
# ----------------------------------------------------------------------------
def init_params(key, fc_input_dims):
    ks = jax.random.split(key, 10)
    scale = 0.05
    return {
        "w_c1": jax.random.normal(ks[0], (32, 12, 8, 8), jnp.float32) * scale,
        "b_c1": jax.random.normal(ks[1], (32,), jnp.float32) * scale,
        "w_c2": jax.random.normal(ks[2], (64, 32, 4, 4), jnp.float32) * scale,
        "b_c2": jax.random.normal(ks[3], (64,), jnp.float32) * scale,
        "w_c3": jax.random.normal(ks[4], (64, 64, 3, 3), jnp.float32) * scale,
        "b_c3": jax.random.normal(ks[5], (64,), jnp.float32) * scale,
        "w_fc1": jax.random.normal(ks[6], (fc_input_dims, 512), jnp.float32) * scale,
        "b_fc1": jax.random.normal(ks[7], (512,), jnp.float32) * scale,
        "w_fc2": jax.random.normal(ks[8], (512, 1), jnp.float32) * scale,
        "b_fc2": jax.random.normal(ks[9], (1,), jnp.float32) * scale,
    }


def reference_forward(state, params):
    bf16, f32 = jnp.bfloat16, jnp.float32

    def conv(x, w, b, s):
        y = lax.conv_general_dilated(
            x.astype(bf16), w.astype(bf16), window_strides=(s, s),
            padding="VALID", dimension_numbers=("NCHW", "OIHW", "NCHW"),
            preferred_element_type=f32)
        return jnp.maximum(y + b[None, :, None, None], 0.0)

    y = conv(state, params["w_c1"], params["b_c1"], _S1)
    y = conv(y, params["w_c2"], params["b_c2"], _S2)
    y = conv(y, params["w_c3"], params["b_c3"], _S3)
    flat = y.reshape(y.shape[0], -1)
    h = jnp.dot(flat.astype(bf16), params["w_fc1"].astype(bf16),
                preferred_element_type=f32) + params["b_fc1"]
    h = jnp.maximum(h, 0.0)
    return jnp.dot(h.astype(bf16), params["w_fc2"].astype(bf16),
                   preferred_element_type=f32) + params["b_fc2"]


if __name__ == "__main__":
    batch = 2
    key = jax.random.PRNGKey(0)
    k_x, k_p = jax.random.split(key)
    state = jax.random.normal(k_x, (batch, _C_IN, _H_IN, _W_IN), jnp.float32)
    params = init_params(k_p, _FC_IN)

    prep = prepare_params(params)          # one-time weight repack (off hot path)

    fwd = jax.jit(critic_forward)
    value = jax.block_until_ready(fwd(state, prep))
    assert value.shape == (batch, 1), value.shape

    ref = jax.block_until_ready(jax.jit(reference_forward)(state, params))
    if not jnp.allclose(value, ref, rtol=5e-3, atol=5e-3):
        raise AssertionError(f"mismatch:\n pallas={value}\n ref={ref}")

    print("KERNEL_OK")
</pallas_src>

<mosaic_0001>
module attributes {stable_mosaic.version = 11 : i64} {
  func.func @_critic_fused_kernel(%arg0: i32, %arg1: memref<800x768xbf16, #tpu.memory_space<vmem>>, %arg2: memref<768x128xbf16, #tpu.memory_space<vmem>>, %arg3: memref<1x128xf32, #tpu.memory_space<vmem>>, %arg4: memref<2048x128xbf16, #tpu.memory_space<vmem>>, %arg5: memref<1x128xf32, #tpu.memory_space<vmem>>, %arg6: memref<1152x128xbf16, #tpu.memory_space<vmem>>, %arg7: memref<1x128xf32, #tpu.memory_space<vmem>>, %arg8: memref<512x512xbf16, #tpu.memory_space<vmem>>, %arg9: memref<1x512xf32, #tpu.memory_space<vmem>>, %arg10: memref<512x128xbf16, #tpu.memory_space<vmem>>, %arg11: memref<1x128xf32, #tpu.memory_space<vmem>>, %arg12: memref<8x128xf32, #tpu.memory_space<vmem>>, %arg13: memref<800x128xbf16, #tpu.memory_space<vmem>>, %arg14: memref<128x2048xbf16, #tpu.memory_space<vmem>>, %arg15: memref<128x128xbf16, #tpu.memory_space<vmem>>, %arg16: memref<32x1152xbf16, #tpu.memory_space<vmem>>, %arg17: memref<32x128xbf16, #tpu.memory_space<vmem>>, %arg18: memref<8x512xbf16, #tpu.memory_space<vmem>>) attributes {dimension_semantics = [#tpu.dimension_semantics<parallel>], iteration_bounds = array<i64: 1>, scalar_prefetch = 0 : i64, scratch_operands = 6 : i64, tpu.core_type = #tpu.core_type<tc>, window_params = [{transform_indices = @transform_0, window_bounds = array<i64: 800, 768>}, {pipeline_mode = #tpu.pipeline_mode<synchronous>, transform_indices = @transform_1, window_bounds = array<i64: 768, 128>}, {pipeline_mode = #tpu.pipeline_mode<synchronous>, transform_indices = @transform_2, window_bounds = array<i64: 1, 128>}, {pipeline_mode = #tpu.pipeline_mode<synchronous>, transform_indices = @transform_3, window_bounds = array<i64: 2048, 128>}, {pipeline_mode = #tpu.pipeline_mode<synchronous>, transform_indices = @transform_4, window_bounds = array<i64: 1, 128>}, {pipeline_mode = #tpu.pipeline_mode<synchronous>, transform_indices = @transform_5, window_bounds = array<i64: 1152, 128>}, {pipeline_mode = #tpu.pipeline_mode<synchronous>, transform_indices = @transform_6, window_bounds = array<i64: 1, 128>}, {pipeline_mode = #tpu.pipeline_mode<synchronous>, transform_indices = @transform_7, window_bounds = array<i64: 512, 512>}, {pipeline_mode = #tpu.pipeline_mode<synchronous>, transform_indices = @transform_8, window_bounds = array<i64: 1, 512>}, {pipeline_mode = #tpu.pipeline_mode<synchronous>, transform_indices = @transform_9, window_bounds = array<i64: 512, 128>}, {pipeline_mode = #tpu.pipeline_mode<synchronous>, transform_indices = @transform_10, window_bounds = array<i64: 1, 128>}, {transform_indices = @transform_11, window_bounds = array<i64: 8, 128>}]} {
    %c0 = arith.constant 0 : index
    %c0_0 = arith.constant 0 : index
    %0 = vector.load %arg1[%c0, %c0_0] : memref<800x768xbf16, #tpu.memory_space<vmem>>, vector<800x768xbf16>
    %c0_1 = arith.constant 0 : index
    %c0_2 = arith.constant 0 : index
    %1 = vector.load %arg2[%c0_1, %c0_2] : memref<768x128xbf16, #tpu.memory_space<vmem>>, vector<768x128xbf16>
    %cst = arith.constant dense<0.000000e+00> : vector<800x128xf32>
    %2 = tpu.matmul %0, %1, %cst {dimension_numbers = #tpu.dot_dimension_numbers<[1], [0], [0], [1], [0, 0, 1, 1], [], []>} : vector<800x768xbf16>, vector<768x128xbf16>, vector<800x128xf32> -> vector<800x128xf32>
    %c0_3 = arith.constant 0 : index
    %c0_4 = arith.constant 0 : index
    %3 = vector.load %arg3[%c0_3, %c0_4] : memref<1x128xf32, #tpu.memory_space<vmem>>, vector<1x128xf32>
    %4 = vector.broadcast %3 : vector<1x128xf32> to vector<800x128xf32>
    %5 = arith.addf %2, %4 : vector<800x128xf32>
    %cst_5 = arith.constant 0.000000e+00 : f32
    %6 = vector.broadcast %cst_5 : f32 to vector<800x128xf32>
    %7 = arith.maximumf %5, %6 : vector<800x128xf32>
    %8 = arith.truncf %7 : vector<800x128xf32> to vector<800x128xbf16>
    %c0_6 = arith.constant 0 : index
    %c0_7 = arith.constant 0 : index
    %9 = vector.load %arg13[%c0_6, %c0_7] : memref<800x128xbf16, #tpu.memory_space<vmem>>, vector<800x128xbf16>
    tpu.vector_store %arg13[%c0_6, %c0_7], %8 {strides = array<i32>} : memref<800x128xbf16, #tpu.memory_space<vmem>>, vector<800x128xbf16>,
    %c0_8 = arith.constant 0 : index
    %c0_9 = arith.constant 0 : index
    %10 = vector.load %arg13[%c0_8, %c0_9] : memref<800x128xbf16, #tpu.memory_space<vmem>>, vector<32x128xbf16>
    %c0_10 = arith.constant 0 : index
    %c0_11 = arith.constant 0 : index
    %11 = vector.load %arg14[%c0_10, %c0_11] : memref<128x2048xbf16, #tpu.memory_space<vmem>>, vector<32x128xbf16>
    tpu.vector_store %arg14[%c0_10, %c0_11], %10 {strides = array<i32>} : memref<128x2048xbf16, #tpu.memory_space<vmem>>, vector<32x128xbf16>,
    %c80 = arith.constant 80 : index
    %c0_12 = arith.constant 0 : index
    %12 = vector.load %arg13[%c80, %c0_12] : memref<800x128xbf16, #tpu.memory_space<vmem>>, vector<32x128xbf16>
    %c32 = arith.constant 32 : index
    %c0_13 = arith.constant 0 : index
    %13 = vector.load %arg14[%c32, %c0_13] : memref<128x2048xbf16, #tpu.memory_space<vmem>>, vector<32x128xbf16>
    tpu.vector_store %arg14[%c32, %c0_13], %12 {strides = array<i32>} : memref<128x2048xbf16, #tpu.memory_space<vmem>>, vector<32x128xbf16>,
    %c160 = arith.constant 160 : index
    %c0_14 = arith.constant 0 : index
    %14 = vector.load %arg13[%c160, %c0_14] : memref<800x128xbf16, #tpu.memory_space<vmem>>, vector<32x128xbf16>
    %c64 = arith.constant 64 : index
    %c0_15 = arith.constant 0 : index
    %15 = vector.load %arg14[%c64, %c0_15] : memref<128x2048xbf16, #tpu.memory_space<vmem>>, vector<32x128xbf16>
    tpu.vector_store %arg14[%c64, %c0_15], %14 {strides = array<i32>} : memref<128x2048xbf16, #tpu.memory_space<vmem>>, vector<32x128xbf16>,
    %c240 = arith.constant 240 : index
    %c0_16 = arith.constant 0 : index
    %16 = vector.load %arg13[%c240, %c0_16] : memref<800x128xbf16, #tpu.memory_space<vmem>>, vector<32x128xbf16>
    %c96 = arith.constant 96 : index
    %c0_17 = arith.constant 0 : index
    %17 = vector.load %arg14[%c96, %c0_17] : memref<128x2048xbf16, #tpu.memory_space<vmem>>, vector<32x128xbf16>
    tpu.vector_store %arg14[%c96, %c0_17], %16 {strides = array<i32>} : memref<128x2048xbf16, #tpu.memory_space<vmem>>, vector<32x128xbf16>,
    %c400 = arith.constant 400 : index
    %c0_18 = arith.constant 0 : index
    %18 = vector.load %arg13[%c400, %c0_18] : memref<800x128xbf16, #tpu.memory_space<vmem>>, vector<32x128xbf16>
    %c0_19 = arith.constant 0 : index
    %c128 = arith.constant 128 : index
    %19 = vector.load %arg14[%c0_19, %c128] : memref<128x2048xbf16, #tpu.memory_space<vmem>>, vector<32x128xbf16>
    tpu.vector_store %arg14[%c0_19, %c128], %18 {strides = array<i32>} : memref<128x2048xbf16, #tpu.memory_space<vmem>>, vector<32x128xbf16>,
    %c480 = arith.constant 480 : index
    %c0_20 = arith.constant 0 : index
    %20 = vector.load %arg13[%c480, %c0_20] : memref<800x128xbf16, #tpu.memory_space<vmem>>, vector<32x128xbf16>
    %c32_21 = arith.constant 32 : index
    %c128_22 = arith.constant 128 : index
    %21 = vector.load %arg14[%c32_21, %c128_22] : memref<128x2048xbf16, #tpu.memory_space<vmem>>, vector<32x128xbf16>
    tpu.vector_store %arg14[%c32_21, %c128_22], %20 {strides = array<i32>} : memref<128x2048xbf16, #tpu.memory_space<vmem>>, vector<32x128xbf16>,
    %c560 = arith.constant 560 : index
    %c0_23 = arith.constant 0 : index
    %22 = vector.load %arg13[%c560, %c0_23] : memref<800x128xbf16, #tpu.memory_space<vmem>>, vector<32x128xbf16>
    %c64_24 = arith.constant 64 : index
    %c128_25 = arith.constant 128 : index
    %23 = vector.load %arg14[%c64_24, %c128_25] : memref<128x2048xbf16, #tpu.memory_space<vmem>>, vector<32x128xbf16>
    tpu.vector_store %arg14[%c64_24, %c128_25], %22 {strides = array<i32>} : memref<128x2048xbf16, #tpu.memory_space<vmem>>, vector<32x128xbf16>,
    %c640 = arith.constant 640 : index
    %c0_26 = arith.constant 0 : index
    %24 = vector.load %arg13[%c640, %c0_26] : memref<800x128xbf16, #tpu.memory_space<vmem>>, vector<32x128xbf16>
    %c96_27 = arith.constant 96 : index
    %c128_28 = arith.constant 128 : index
    %25 = vector.load %arg14[%c96_27, %c128_28] : memref<128x2048xbf16, #tpu.memory_space<vmem>>, vector<32x128xbf16>
    tpu.vector_store %arg14[%c96_27, %c128_28], %24 {strides = array<i32>} : memref<128x2048xbf16, #tpu.memory_space<vmem>>, vector<32x128xbf16>,
    %c8 = arith.constant 8 : index
    %c0_29 = arith.constant 0 : index
    %26 = vector.load %arg13[%c8, %c0_29] : memref<800x128xbf16, #tpu.memory_space<vmem>>, vector<32x128xbf16>
    %c0_30 = arith.constant 0 : index
    %c256 = arith.constant 256 : index
    %27 = vector.load %arg14[%c0_30, %c256] : memref<128x2048xbf16, #tpu.memory_space<vmem>>, vector<32x128xbf16>
    tpu.vector_store %arg14[%c0_30, %c256], %26 {strides = array<i32>} : memref<128x2048xbf16, #tpu.memory_space<vmem>>, vector<32x128xbf16>,
    %c88 = arith.constant 88 : index
    %c0_31 = arith.constant 0 : index
    %28 = vector.load %arg13[%c88, %c0_31] : memref<800x128xbf16, #tpu.memory_space<vmem>>, vector<32x128xbf16>
    %c32_32 = arith.constant 32 : index
    %c256_33 = arith.constant 256 : index
    %29 = vector.load %arg14[%c32_32, %c256_33] : memref<128x2048xbf16, #tpu.memory_space<vmem>>, vector<32x128xbf16>
    tpu.vector_store %arg14[%c32_32, %c256_33], %28 {strides = array<i32>} : memref<128x2048xbf16, #tpu.memory_space<vmem>>, vector<32x128xbf16>,
    %c168 = arith.constant 168 : index
    %c0_34 = arith.constant 0 : index
    %30 = vector.load %arg13[%c168, %c0_34] : memref<800x128xbf16, #tpu.memory_space<vmem>>, vector<32x128xbf16>
    %c64_35 = arith.constant 64 : index
    %c256_36 = arith.constant 256 : index
    %31 = vector.load %arg14[%c64_35, %c256_36] : memref<128x2048xbf16, #tpu.memory_space<vmem>>, vector<32x128xbf16>
    tpu.vector_store %arg14[%c64_35, %c256_36], %30 {strides = array<i32>} : memref<128x2048xbf16, #tpu.memory_space<vmem>>, vector<32x128xbf16>,
    %c248 = arith.constant 248 : index
    %c0_37 = arith.constant 0 : index
    %32 = vector.load %arg13[%c248, %c0_37] : memref<800x128xbf16, #tpu.memory_space<vmem>>, vector<32x128xbf16>
    %c96_38 = arith.constant 96 : index
    %c256_39 = arith.constant 256 : index
    %33 = vector.load %arg14[%c96_38, %c256_39] : memref<128x2048xbf16, #tpu.memory_space<vmem>>, vector<32x128xbf16>
    tpu.vector_store %arg14[%c96_38, %c256_39], %32 {strides = array<i32>} : memref<128x2048xbf16, #tpu.memory_space<vmem>>, vector<32x128xbf16>,
    %c408 = arith.constant 408 : index
    %c0_40 = arith.constant 0 : index
    %34 = vector.load %arg13[%c408, %c0_40] : memref<800x128xbf16, #tpu.memory_space<vmem>>, vector<32x128xbf16>
    %c0_41 = arith.constant 0 : index
    %c384 = arith.constant 384 : index
    %35 = vector.load %arg14[%c0_41, %c384] : memref<128x2048xbf16, #tpu.memory_space<vmem>>, vector<32x128xbf16>
    tpu.vector_store %arg14[%c0_41, %c384], %34 {strides = array<i32>} : memref<128x2048xbf16, #tpu.memory_space<vmem>>, vector<32x128xbf16>,
    %c488 = arith.constant 488 : index
    %c0_42 = arith.constant 0 : index
    %36 = vector.load %arg13[%c488, %c0_42] : memref<800x128xbf16, #tpu.memory_space<vmem>>, vector<32x128xbf16>
    %c32_43 = arith.constant 32 : index
    %c384_44 = arith.constant 384 : index
    %37 = vector.load %arg14[%c32_43, %c384_44] : memref<128x2048xbf16, #tpu.memory_space<vmem>>, vector<32x128xbf16>
    tpu.vector_store %arg14[%c32_43, %c384_44], %36 {strides = array<i32>} : memref<128x2048xbf16, #tpu.memory_space<vmem>>, vector<32x128xbf16>,
    %c568 = arith.constant 568 : index
    %c0_45 = arith.constant 0 : index
    %38 = vector.load %arg13[%c568, %c0_45] : memref<800x128xbf16, #tpu.memory_space<vmem>>, vector<32x128xbf16>
    %c64_46 = arith.constant 64 : index
    %c384_47 = arith.constant 384 : index
    %39 = vector.load %arg14[%c64_46, %c384_47] : memref<128x2048xbf16, #tpu.memory_space<vmem>>, vector<32x128xbf16>
    tpu.vector_store %arg14[%c64_46, %c384_47], %38 {strides = array<i32>} : memref<128x2048xbf16, #tpu.memory_space<vmem>>, vector<32x128xbf16>,
    %c648 = arith.constant 648 : index
    %c0_48 = arith.constant 0 : index
    %40 = vector.load %arg13[%c648, %c0_48] : memref<800x128xbf16, #tpu.memory_space<vmem>>, vector<32x128xbf16>
    %c96_49 = arith.constant 96 : index
    %c384_50 = arith.constant 384 : index
    %41 = vector.load %arg14[%c96_49, %c384_50] : memref<128x2048xbf16, #tpu.memory_space<vmem>>, vector<32x128xbf16>
    tpu.vector_store %arg14[%c96_49, %c384_50], %40 {strides = array<i32>} : memref<128x2048xbf16, #tpu.memory_space<vmem>>, vector<32x128xbf16>,
    %c40 = arith.constant 40 : index
    %c0_51 = arith.constant 0 : index
    %42 = vector.load %arg13[%c40, %c0_51] : memref<800x128xbf16, #tpu.memory_space<vmem>>, vector<32x128xbf16>
    %c0_52 = arith.constant 0 : index
    %c512 = arith.constant 512 : index
    %43 = vector.load %arg14[%c0_52, %c512] : memref<128x2048xbf16, #tpu.memory_space<vmem>>, vector<32x128xbf16>
    tpu.vector_store %arg14[%c0_52, %c512], %42 {strides = array<i32>} : memref<128x2048xbf16, #tpu.memory_space<vmem>>, vector<32x128xbf16>,
    %c120 = arith.constant 120 : index
    %c0_53 = arith.constant 0 : index
    %44 = vector.load %arg13[%c120, %c0_53] : memref<800x128xbf16, #tpu.memory_space<vmem>>, vector<32x128xbf16>
    %c32_54 = arith.constant 32 : index
    %c512_55 = arith.constant 512 : index
    %45 = vector.load %arg14[%c32_54, %c512_55] : memref<128x2048xbf16, #tpu.memory_space<vmem>>, vector<32x128xbf16>
    tpu.vector_store %arg14[%c32_54, %c512_55], %44 {strides = array<i32>} : memref<128x2048xbf16, #tpu.memory_space<vmem>>, vector<32x128xbf16>,
    %c200 = arith.constant 200 : index
    %c0_56 = arith.constant 0 : index
    %46 = vector.load %arg13[%c200, %c0_56] : memref<800x128xbf16, #tpu.memory_space<vmem>>, vector<32x128xbf16>
    %c64_57 = arith.constant 64 : index
    %c512_58 = arith.constant 512 : index
    %47 = vector.load %arg14[%c64_57, %c512_58] : memref<128x2048xbf16, #tpu.memory_space<vmem>>, vector<32x128xbf16>
    tpu.vector_store %arg14[%c64_57, %c512_58], %46 {strides = array<i32>} : memref<128x2048xbf16, #tpu.memory_space<vmem>>, vector<32x128xbf16>,
    %c280 = arith.constant 280 : index
    %c0_59 = arith.constant 0 : index
    %48 = vector.load %arg13[%c280, %c0_59] : memref<800x128xbf16, #tpu.memory_space<vmem>>, vector<32x128xbf16>
    %c96_60 = arith.constant 96 : index
    %c512_61 = arith.constant 512 : index
    %49 = vector.load %arg14[%c96_60, %c512_61] : memref<128x2048xbf16, #tpu.memory_space<vmem>>, vector<32x128xbf16>
    tpu.vector_store %arg14[%c96_60, %c512_61], %48 {strides = array<i32>} : memref<128x2048xbf16, #tpu.memory_space<vmem>>, vector<32x128xbf16>,
    %c440 = arith.constant 440 : index
    %c0_62 = arith.constant 0 : index
    %50 = vector.load %arg13[%c440, %c0_62] : memref<800x128xbf16, #tpu.memory_space<vmem>>, vector<32x128xbf16>
    %c0_63 = arith.constant 0 : index
    %c640_64 = arith.constant 640 : index
    %51 = vector.load %arg14[%c0_63, %c640_64] : memref<128x2048xbf16, #tpu.memory_space<vmem>>, vector<32x128xbf16>
    tpu.vector_store %arg14[%c0_63, %c640_64], %50 {strides = array<i32>} : memref<128x2048xbf16, #tpu.memory_space<vmem>>, vector<32x128xbf16>,
    %c520 = arith.constant 520 : index
    %c0_65 = arith.constant 0 : index
    %52 = vector.load %arg13[%c520, %c0_65] : memref<800x128xbf16, #tpu.memory_space<vmem>>, vector<32x128xbf16>
    %c32_66 = arith.constant 32 : index
    %c640_67 = arith.constant 640 : index
    %53 = vector.load %arg14[%c32_66, %c640_67] : memref<128x2048xbf16, #tpu.memory_space<vmem>>, vector<32x128xbf16>
    tpu.vector_store %arg14[%c32_66, %c640_67], %52 {strides = array<i32>} : memref<128x2048xbf16, #tpu.memory_space<vmem>>, vector<32x128xbf16>,
    %c600 = arith.constant 600 : index
    %c0_68 = arith.constant 0 : index
    %54 = vector.load %arg13[%c600, %c0_68] : memref<800x128xbf16, #tpu.memory_space<vmem>>, vector<32x128xbf16>
    %c64_69 = arith.constant 64 : index
    %c640_70 = arith.constant 640 : index
    %55 = vector.load %arg14[%c64_69, %c640_70] : memref<128x2048xbf16, #tpu.memory_space<vmem>>, vector<32x128xbf16>
    tpu.vector_store %arg14[%c64_69, %c640_70], %54 {strides = array<i32>} : memref<128x2048xbf16, #tpu.memory_space<vmem>>, vector<32x128xbf16>,
    %c680 = arith.constant 680 : index
    %c0_71 = arith.constant 0 : index
    %56 = vector.load %arg13[%c680, %c0_71] : memref<800x128xbf16, #tpu.memory_space<vmem>>, vector<32x128xbf16>
    %c96_72 = arith.constant 96 : index
    %c640_73 = arith.constant 640 : index
    %57 = vector.load %arg14[%c96_72, %c640_73] : memref<128x2048xbf16, #tpu.memory_space<vmem>>, vector<32x128xbf16>
    tpu.vector_store %arg14[%c96_72, %c640_73], %56 {strides = array<i32>} : memref<128x2048xbf16, #tpu.memory_space<vmem>>, vector<32x128xbf16>,
    %c48 = arith.constant 48 : index
    %c0_74 = arith.constant 0 : index
    %58 = vector.load %arg13[%c48, %c0_74] : memref<800x128xbf16, #tpu.memory_space<vmem>>, vector<32x128xbf16>
    %c0_75 = arith.constant 0 : index
    %c768 = arith.constant 768 : index
    %59 = vector.load %arg14[%c0_75, %c768] : memref<128x2048xbf16, #tpu.memory_space<vmem>>, vector<32x128xbf16>
    tpu.vector_store %arg14[%c0_75, %c768], %58 {strides = array<i32>} : memref<128x2048xbf16, #tpu.memory_space<vmem>>, vector<32x128xbf16>,
    %c128_76 = arith.constant 128 : index
    %c0_77 = arith.constant 0 : index
    %60 = vector.load %arg13[%c128_76, %c0_77] : memref<800x128xbf16, #tpu.memory_space<vmem>>, vector<32x128xbf16>
    %c32_78 = arith.constant 32 : index
    %c768_79 = arith.constant 768 : index
    %61 = vector.load %arg14[%c32_78, %c768_79] : memref<128x2048xbf16, #tpu.memory_space<vmem>>, vector<32x128xbf16>
    tpu.vector_store %arg14[%c32_78, %c768_79], %60 {strides = array<i32>} : memref<128x2048xbf16, #tpu.memory_space<vmem>>, vector<32x128xbf16>,
    %c208 = arith.constant 208 : index
    %c0_80 = arith.constant 0 : index
    %62 = vector.load %arg13[%c208, %c0_80] : memref<800x128xbf16, #tpu.memory_space<vmem>>, vector<32x128xbf16>
    %c64_81 = arith.constant 64 : index
    %c768_82 = arith.constant 768 : index
    %63 = vector.load %arg14[%c64_81, %c768_82] : memref<128x2048xbf16, #tpu.memory_space<vmem>>, vector<32x128xbf16>
    tpu.vector_store %arg14[%c64_81, %c768_82], %62 {strides = array<i32>} : memref<128x2048xbf16, #tpu.memory_space<vmem>>, vector<32x128xbf16>,
    %c288 = arith.constant 288 : index
    %c0_83 = arith.constant 0 : index
    %64 = vector.load %arg13[%c288, %c0_83] : memref<800x128xbf16, #tpu.memory_space<vmem>>, vector<32x128xbf16>
    %c96_84 = arith.constant 96 : index
    %c768_85 = arith.constant 768 : index
    %65 = vector.load %arg14[%c96_84, %c768_85] : memref<128x2048xbf16, #tpu.memory_space<vmem>>, vector<32x128xbf16>
    tpu.vector_store %arg14[%c96_84, %c768_85], %64 {strides = array<i32>} : memref<128x2048xbf16, #tpu.memory_space<vmem>>, vector<32x128xbf16>,
    %c448 = arith.constant 448 : index
    %c0_86 = arith.constant 0 : index
    %66 = vector.load %arg13[%c448, %c0_86] : memref<800x128xbf16, #tpu.memory_space<vmem>>, vector<32x128xbf16>
    %c0_87 = arith.constant 0 : index
    %c896 = arith.constant 896 : index
    %67 = vector.load %arg14[%c0_87, %c896] : memref<128x2048xbf16, #tpu.memory_space<vmem>>, vector<32x128xbf16>
    tpu.vector_store %arg14[%c0_87, %c896], %66 {strides = array<i32>} : memref<128x2048xbf16, #tpu.memory_space<vmem>>, vector<32x128xbf16>,
    %c528 = arith.constant 528 : index
    %c0_88 = arith.constant 0 : index
    %68 = vector.load %arg13[%c528, %c0_88] : memref<800x128xbf16, #tpu.memory_space<vmem>>, vector<32x128xbf16>
    %c32_89 = arith.constant 32 : index
    %c896_90 = arith.constant 896 : index
    %69 = vector.load %arg14[%c32_89, %c896_90] : memref<128x2048xbf16, #tpu.memory_space<vmem>>, vector<32x128xbf16>
    tpu.vector_store %arg14[%c32_89, %c896_90], %68 {strides = array<i32>} : memref<128x2048xbf16, #tpu.memory_space<vmem>>, vector<32x128xbf16>,
    %c608 = arith.constant 608 : index
    %c0_91 = arith.constant 0 : index
    %70 = vector.load %arg13[%c608, %c0_91] : memref<800x128xbf16, #tpu.memory_space<vmem>>, vector<32x128xbf16>
    %c64_92 = arith.constant 64 : index
    %c896_93 = arith.constant 896 : index
    %71 = vector.load %arg14[%c64_92, %c896_93] : memref<128x2048xbf16, #tpu.memory_space<vmem>>, vector<32x128xbf16>
    tpu.vector_store %arg14[%c64_92, %c896_93], %70 {strides = array<i32>} : memref<128x2048xbf16, #tpu.memory_space<vmem>>, vector<32x128xbf16>,
    %c688 = arith.constant 688 : index
    %c0_94 = arith.constant 0 : index
    %72 = vector.load %arg13[%c688, %c0_94] : memref<800x128xbf16, #tpu.memory_space<vmem>>, vector<32x128xbf16>
    %c96_95 = arith.constant 96 : index
    %c896_96 = arith.constant 896 : index
    %73 = vector.load %arg14[%c96_95, %c896_96] : memref<128x2048xbf16, #tpu.memory_space<vmem>>, vector<32x128xbf16>
    tpu.vector_store %arg14[%c96_95, %c896_96], %72 {strides = array<i32>} : memref<128x2048xbf16, #tpu.memory_space<vmem>>, vector<32x128xbf16>,
    %c80_97 = arith.constant 80 : index
    %c0_98 = arith.constant 0 : index
    %74 = vector.load %arg13[%c80_97, %c0_98] : memref<800x128xbf16, #tpu.memory_space<vmem>>, vector<32x128xbf16>
    %c0_99 = arith.constant 0 : index
    %c1024 = arith.constant 1024 : index
    %75 = vector.load %arg14[%c0_99, %c1024] : memref<128x2048xbf16, #tpu.memory_space<vmem>>, vector<32x128xbf16>
    tpu.vector_store %arg14[%c0_99, %c1024], %74 {strides = array<i32>} : memref<128x2048xbf16, #tpu.memory_space<vmem>>, vector<32x128xbf16>,
    %c160_100 = arith.constant 160 : index
    %c0_101 = arith.constant 0 : index
    %76 = vector.load %arg13[%c160_100, %c0_101] : memref<800x128xbf16, #tpu.memory_space<vmem>>, vector<32x128xbf16>
    %c32_102 = arith.constant 32 : index
    %c1024_103 = arith.constant 1024 : index
    %77 = vector.load %arg14[%c32_102, %c1024_103] : memref<128x2048xbf16, #tpu.memory_space<vmem>>, vector<32x128xbf16>
    tpu.vector_store %arg14[%c32_102, %c1024_103], %76 {strides = array<i32>} : memref<128x2048xbf16, #tpu.memory_space<vmem>>, vector<32x128xbf16>,
    %c240_104 = arith.constant 240 : index
    %c0_105 = arith.constant 0 : index
    %78 = vector.load %arg13[%c240_104, %c0_105] : memref<800x128xbf16, #tpu.memory_space<vmem>>, vector<32x128xbf16>
    %c64_106 = arith.constant 64 : index
    %c1024_107 = arith.constant 1024 : index
    %79 = vector.load %arg14[%c64_106, %c1024_107] : memref<128x2048xbf16, #tpu.memory_space<vmem>>, vector<32x128xbf16>
    tpu.vector_store %arg14[%c64_106, %c1024_107], %78 {strides = array<i32>} : memref<128x2048xbf16, #tpu.memory_space<vmem>>, vector<32x128xbf16>,
    %c320 = arith.constant 320 : index
    %c0_108 = arith.constant 0 : index
    %80 = vector.load %arg13[%c320, %c0_108] : memref<800x128xbf16, #tpu.memory_space<vmem>>, vector<32x128xbf16>
    %c96_109 = arith.constant 96 : index
    %c1024_110 = arith.constant 1024 : index
    %81 = vector.load %arg14[%c96_109, %c1024_110] : memref<128x2048xbf16, #tpu.memory_space<vmem>>, vector<32x128xbf16>
    tpu.vector_store %arg14[%c96_109, %c1024_110], %80 {strides = array<i32>} : memref<128x2048xbf16, #tpu.memory_space<vmem>>, vector<32x128xbf16>,
    %c480_111 = arith.constant 480 : index
    %c0_112 = arith.constant 0 : index
    %82 = vector.load %arg13[%c480_111, %c0_112] : memref<800x128xbf16, #tpu.memory_space<vmem>>, vector<32x128xbf16>
    %c0_113 = arith.constant 0 : index
    %c1152 = arith.constant 1152 : index
    %83 = vector.load %arg14[%c0_113, %c1152] : memref<128x2048xbf16, #tpu.memory_space<vmem>>, vector<32x128xbf16>
    tpu.vector_store %arg14[%c0_113, %c1152], %82 {strides = array<i32>} : memref<128x2048xbf16, #tpu.memory_space<vmem>>, vector<32x128xbf16>,
    %c560_114 = arith.constant 560 : index
    %c0_115 = arith.constant 0 : index
    %84 = vector.load %arg13[%c560_114, %c0_115] : memref<800x128xbf16, #tpu.memory_space<vmem>>, vector<32x128xbf16>
    %c32_116 = arith.constant 32 : index
    %c1152_117 = arith.constant 1152 : index
    %85 = vector.load %arg14[%c32_116, %c1152_117] : memref<128x2048xbf16, #tpu.memory_space<vmem>>, vector<32x128xbf16>
    tpu.vector_store %arg14[%c32_116, %c1152_117], %84 {strides = array<i32>} : memref<128x2048xbf16, #tpu.memory_space<vmem>>, vector<32x128xbf16>,
    %c640_118 = arith.constant 640 : index
    %c0_119 = arith.constant 0 : index
    %86 = vector.load %arg13[%c640_118, %c0_119] : memref<800x128xbf16, #tpu.memory_space<vmem>>, vector<32x128xbf16>
    %c64_120 = arith.constant 64 : index
    %c1152_121 = arith.constant 1152 : index
    %87 = vector.load %arg14[%c64_120, %c1152_121] : memref<128x2048xbf16, #tpu.memory_space<vmem>>, vector<32x128xbf16>
    tpu.vector_store %arg14[%c64_120, %c1152_121], %86 {strides = array<i32>} : memref<128x2048xbf16, #tpu.memory_space<vmem>>, vector<32x128xbf16>,
    %c720 = arith.constant 720 : index
    %c0_122 = arith.constant 0 : index
    %88 = vector.load %arg13[%c720, %c0_122] : memref<800x128xbf16, #tpu.memory_space<vmem>>, vector<32x128xbf16>
    %c96_123 = arith.constant 96 : index
    %c1152_124 = arith.constant 1152 : index
    %89 = vector.load %arg14[%c96_123, %c1152_124] : memref<128x2048xbf16, #tpu.memory_space<vmem>>, vector<32x128xbf16>
    tpu.vector_store %arg14[%c96_123, %c1152_124], %88 {strides = array<i32>} : memref<128x2048xbf16, #tpu.memory_space<vmem>>, vector<32x128xbf16>,
    %c88_125 = arith.constant 88 : index
    %c0_126 = arith.constant 0 : index
    %90 = vector.load %arg13[%c88_125, %c0_126] : memref<800x128xbf16, #tpu.memory_space<vmem>>, vector<32x128xbf16>
    %c0_127 = arith.constant 0 : index
    %c1280 = arith.constant 1280 : index
    %91 = vector.load %arg14[%c0_127, %c1280] : memref<128x2048xbf16, #tpu.memory_space<vmem>>, vector<32x128xbf16>
    tpu.vector_store %arg14[%c0_127, %c1280], %90 {strides = array<i32>} : memref<128x2048xbf16, #tpu.memory_space<vmem>>, vector<32x128xbf16>,
    %c168_128 = arith.constant 168 : index
    %c0_129 = arith.constant 0 : index
    %92 = vector.load %arg13[%c168_128, %c0_129] : memref<800x128xbf16, #tpu.memory_space<vmem>>, vector<32x128xbf16>
    %c32_130 = arith.constant 32 : index
    %c1280_131 = arith.constant 1280 : index
    %93 = vector.load %arg14[%c32_130, %c1280_131] : memref<128x2048xbf16, #tpu.memory_space<vmem>>, vector<32x128xbf16>
    tpu.vector_store %arg14[%c32_130, %c1280_131], %92 {strides = array<i32>} : memref<128x2048xbf16, #tpu.memory_space<vmem>>, vector<32x128xbf16>,
    %c248_132 = arith.constant 248 : index
    %c0_133 = arith.constant 0 : index
    %94 = vector.load %arg13[%c248_132, %c0_133] : memref<800x128xbf16, #tpu.memory_space<vmem>>, vector<32x128xbf16>
    %c64_134 = arith.constant 64 : index
    %c1280_135 = arith.constant 1280 : index
    %95 = vector.load %arg14[%c64_134, %c1280_135] : memref<128x2048xbf16, #tpu.memory_space<vmem>>, vector<32x128xbf16>
    tpu.vector_store %arg14[%c64_134, %c1280_135], %94 {strides = array<i32>} : memref<128x2048xbf16, #tpu.memory_space<vmem>>, vector<32x128xbf16>,
    %c328 = arith.constant 328 : index
    %c0_136 = arith.constant 0 : index
    %96 = vector.load %arg13[%c328, %c0_136] : memref<800x128xbf16, #tpu.memory_space<vmem>>, vector<32x128xbf16>
    %c96_137 = arith.constant 96 : index
    %c1280_138 = arith.constant 1280 : index
    %97 = vector.load %arg14[%c96_137, %c1280_138] : memref<128x2048xbf16, #tpu.memory_space<vmem>>, vector<32x128xbf16>
    tpu.vector_store %arg14[%c96_137, %c1280_138], %96 {strides = array<i32>} : memref<128x2048xbf16, #tpu.memory_space<vmem>>, vector<32x128xbf16>,
    %c488_139 = arith.constant 488 : index
    %c0_140 = arith.constant 0 : index
    %98 = vector.load %arg13[%c488_139, %c0_140] : memref<800x128xbf16, #tpu.memory_space<vmem>>, vector<32x128xbf16>
    %c0_141 = arith.constant 0 : index
    %c1408 = arith.constant 1408 : index
    %99 = vector.load %arg14[%c0_141, %c1408] : memref<128x2048xbf16, #tpu.memory_space<vmem>>, vector<32x128xbf16>
    tpu.vector_store %arg14[%c0_141, %c1408], %98 {strides = array<i32>} : memref<128x2048xbf16, #tpu.memory_space<vmem>>, vector<32x128xbf16>,
    %c568_142 = arith.constant 568 : index
    %c0_143 = arith.constant 0 : index
    %100 = vector.load %arg13[%c568_142, %c0_143] : memref<800x128xbf16, #tpu.memory_space<vmem>>, vector<32x128xbf16>
    %c32_144 = arith.constant 32 : index
    %c1408_145 = arith.constant 1408 : index
    %101 = vector.load %arg14[%c32_144, %c1408_145] : memref<128x2048xbf16, #tpu.memory_space<vmem>>, vector<32x128xbf16>
    tpu.vector_store %arg14[%c32_144, %c1408_145], %100 {strides = array<i32>} : memref<128x2048xbf16, #tpu.memory_space<vmem>>, vector<32x128xbf16>,
    %c648_146 = arith.constant 648 : index
    %c0_147 = arith.constant 0 : index
    %102 = vector.load %arg13[%c648_146, %c0_147] : memref<800x128xbf16, #tpu.memory_space<vmem>>, vector<32x128xbf16>
    %c64_148 = arith.constant 64 : index
    %c1408_149 = arith.constant 1408 : index
    %103 = vector.load %arg14[%c64_148, %c1408_149] : memref<128x2048xbf16, #tpu.memory_space<vmem>>, vector<32x128xbf16>
    tpu.vector_store %arg14[%c64_148, %c1408_149], %102 {strides = array<i32>} : memref<128x2048xbf16, #tpu.memory_space<vmem>>, vector<32x128xbf16>,
    %c728 = arith.constant 728 : index
    %c0_150 = arith.constant 0 : index
    %104 = vector.load %arg13[%c728, %c0_150] : memref<800x128xbf16, #tpu.memory_space<vmem>>, vector<32x128xbf16>
    %c96_151 = arith.constant 96 : index
    %c1408_152 = arith.constant 1408 : index
    %105 = vector.load %arg14[%c96_151, %c1408_152] : memref<128x2048xbf16, #tpu.memory_space<vmem>>, vector<32x128xbf16>
    tpu.vector_store %arg14[%c96_151, %c1408_152], %104 {strides = array<i32>} : memref<128x2048xbf16, #tpu.memory_space<vmem>>, vector<32x128xbf16>,
    %c120_153 = arith.constant 120 : index
    %c0_154 = arith.constant 0 : index
    %106 = vector.load %arg13[%c120_153, %c0_154] : memref<800x128xbf16, #tpu.memory_space<vmem>>, vector<32x128xbf16>
    %c0_155 = arith.constant 0 : index
    %c1536 = arith.constant 1536 : index
    %107 = vector.load %arg14[%c0_155, %c1536] : memref<128x2048xbf16, #tpu.memory_space<vmem>>, vector<32x128xbf16>
    tpu.vector_store %arg14[%c0_155, %c1536], %106 {strides = array<i32>} : memref<128x2048xbf16, #tpu.memory_space<vmem>>, vector<32x128xbf16>,
    %c200_156 = arith.constant 200 : index
    %c0_157 = arith.constant 0 : index
    %108 = vector.load %arg13[%c200_156, %c0_157] : memref<800x128xbf16, #tpu.memory_space<vmem>>, vector<32x128xbf16>
    %c32_158 = arith.constant 32 : index
    %c1536_159 = arith.constant 1536 : index
    %109 = vector.load %arg14[%c32_158, %c1536_159] : memref<128x2048xbf16, #tpu.memory_space<vmem>>, vector<32x128xbf16>
    tpu.vector_store %arg14[%c32_158, %c1536_159], %108 {strides = array<i32>} : memref<128x2048xbf16, #tpu.memory_space<vmem>>, vector<32x128xbf16>,
    %c280_160 = arith.constant 280 : index
    %c0_161 = arith.constant 0 : index
    %110 = vector.load %arg13[%c280_160, %c0_161] : memref<800x128xbf16, #tpu.memory_space<vmem>>, vector<32x128xbf16>
    %c64_162 = arith.constant 64 : index
    %c1536_163 = arith.constant 1536 : index
    %111 = vector.load %arg14[%c64_162, %c1536_163] : memref<128x2048xbf16, #tpu.memory_space<vmem>>, vector<32x128xbf16>
    tpu.vector_store %arg14[%c64_162, %c1536_163], %110 {strides = array<i32>} : memref<128x2048xbf16, #tpu.memory_space<vmem>>, vector<32x128xbf16>,
    %c360 = arith.constant 360 : index
    %c0_164 = arith.constant 0 : index
    %112 = vector.load %arg13[%c360, %c0_164] : memref<800x128xbf16, #tpu.memory_space<vmem>>, vector<32x128xbf16>
    %c96_165 = arith.constant 96 : index
    %c1536_166 = arith.constant 1536 : index
    %113 = vector.load %arg14[%c96_165, %c1536_166] : memref<128x2048xbf16, #tpu.memory_space<vmem>>, vector<32x128xbf16>
    tpu.vector_store %arg14[%c96_165, %c1536_166], %112 {strides = array<i32>} : memref<128x2048xbf16, #tpu.memory_space<vmem>>, vector<32x128xbf16>,
    %c520_167 = arith.constant 520 : index
    %c0_168 = arith.constant 0 : index
    %114 = vector.load %arg13[%c520_167, %c0_168] : memref<800x128xbf16, #tpu.memory_space<vmem>>, vector<32x128xbf16>
    %c0_169 = arith.constant 0 : index
    %c1664 = arith.constant 1664 : index
    %115 = vector.load %arg14[%c0_169, %c1664] : memref<128x2048xbf16, #tpu.memory_space<vmem>>, vector<32x128xbf16>
    tpu.vector_store %arg14[%c0_169, %c1664], %114 {strides = array<i32>} : memref<128x2048xbf16, #tpu.memory_space<vmem>>, vector<32x128xbf16>,
    %c600_170 = arith.constant 600 : index
    %c0_171 = arith.constant 0 : index
    %116 = vector.load %arg13[%c600_170, %c0_171] : memref<800x128xbf16, #tpu.memory_space<vmem>>, vector<32x128xbf16>
    %c32_172 = arith.constant 32 : index
    %c1664_173 = arith.constant 1664 : index
    %117 = vector.load %arg14[%c32_172, %c1664_173] : memref<128x2048xbf16, #tpu.memory_space<vmem>>, vector<32x128xbf16>
    tpu.vector_store %arg14[%c32_172, %c1664_173], %116 {strides = array<i32>} : memref<128x2048xbf16, #tpu.memory_space<vmem>>, vector<32x128xbf16>,
    %c680_174 = arith.constant 680 : index
    %c0_175 = arith.constant 0 : index
    %118 = vector.load %arg13[%c680_174, %c0_175] : memref<800x128xbf16, #tpu.memory_space<vmem>>, vector<32x128xbf16>
    %c64_176 = arith.constant 64 : index
    %c1664_177 = arith.constant 1664 : index
    %119 = vector.load %arg14[%c64_176, %c1664_177] : memref<128x2048xbf16, #tpu.memory_space<vmem>>, vector<32x128xbf16>
    tpu.vector_store %arg14[%c64_176, %c1664_177], %118 {strides = array<i32>} : memref<128x2048xbf16, #tpu.memory_space<vmem>>, vector<32x128xbf16>,
    %c760 = arith.constant 760 : index
    %c0_178 = arith.constant 0 : index
    %120 = vector.load %arg13[%c760, %c0_178] : memref<800x128xbf16, #tpu.memory_space<vmem>>, vector<32x128xbf16>
    %c96_179 = arith.constant 96 : index
    %c1664_180 = arith.constant 1664 : index
    %121 = vector.load %arg14[%c96_179, %c1664_180] : memref<128x2048xbf16, #tpu.memory_space<vmem>>, vector<32x128xbf16>
    tpu.vector_store %arg14[%c96_179, %c1664_180], %120 {strides = array<i32>} : memref<128x2048xbf16, #tpu.memory_space<vmem>>, vector<32x128xbf16>,
    %c128_181 = arith.constant 128 : index
    %c0_182 = arith.constant 0 : index
    %122 = vector.load %arg13[%c128_181, %c0_182] : memref<800x128xbf16, #tpu.memory_space<vmem>>, vector<32x128xbf16>
    %c0_183 = arith.constant 0 : index
    %c1792 = arith.constant 1792 : index
    %123 = vector.load %arg14[%c0_183, %c1792] : memref<128x2048xbf16, #tpu.memory_space<vmem>>, vector<32x128xbf16>
    tpu.vector_store %arg14[%c0_183, %c1792], %122 {strides = array<i32>} : memref<128x2048xbf16, #tpu.memory_space<vmem>>, vector<32x128xbf16>,
    %c208_184 = arith.constant 208 : index
    %c0_185 = arith.constant 0 : index
    %124 = vector.load %arg13[%c208_184, %c0_185] : memref<800x128xbf16, #tpu.memory_space<vmem>>, vector<32x128xbf16>
    %c32_186 = arith.constant 32 : index
    %c1792_187 = arith.constant 1792 : index
    %125 = vector.load %arg14[%c32_186, %c1792_187] : memref<128x2048xbf16, #tpu.memory_space<vmem>>, vector<32x128xbf16>
    tpu.vector_store %arg14[%c32_186, %c1792_187], %124 {strides = array<i32>} : memref<128x2048xbf16, #tpu.memory_space<vmem>>, vector<32x128xbf16>,
    %c288_188 = arith.constant 288 : index
    %c0_189 = arith.constant 0 : index
    %126 = vector.load %arg13[%c288_188, %c0_189] : memref<800x128xbf16, #tpu.memory_space<vmem>>, vector<32x128xbf16>
    %c64_190 = arith.constant 64 : index
    %c1792_191 = arith.constant 1792 : index
    %127 = vector.load %arg14[%c64_190, %c1792_191] : memref<128x2048xbf16, #tpu.memory_space<vmem>>, vector<32x128xbf16>
    tpu.vector_store %arg14[%c64_190, %c1792_191], %126 {strides = array<i32>} : memref<128x2048xbf16, #tpu.memory_space<vmem>>, vector<32x128xbf16>,
    %c368 = arith.constant 368 : index
    %c0_192 = arith.constant 0 : index
    %128 = vector.load %arg13[%c368, %c0_192] : memref<800x128xbf16, #tpu.memory_space<vmem>>, vector<32x128xbf16>
    %c96_193 = arith.constant 96 : index
    %c1792_194 = arith.constant 1792 : index
    %129 = vector.load %arg14[%c96_193, %c1792_194] : memref<128x2048xbf16, #tpu.memory_space<vmem>>, vector<32x128xbf16>
    tpu.vector_store %arg14[%c96_193, %c1792_194], %128 {strides = array<i32>} : memref<128x2048xbf16, #tpu.memory_space<vmem>>, vector<32x128xbf16>,
    %c528_195 = arith.constant 528 : index
    %c0_196 = arith.constant 0 : index
    %130 = vector.load %arg13[%c528_195, %c0_196] : memref<800x128xbf16, #tpu.memory_space<vmem>>, vector<32x128xbf16>
    %c0_197 = arith.constant 0 : index
    %c1920 = arith.constant 1920 : index
    %131 = vector.load %arg14[%c0_197, %c1920] : memref<128x2048xbf16, #tpu.memory_space<vmem>>, vector<32x128xbf16>
    tpu.vector_store %arg14[%c0_197, %c1920], %130 {strides = array<i32>} : memref<128x2048xbf16, #tpu.memory_space<vmem>>, vector<32x128xbf16>,
    %c608_198 = arith.constant 608 : index
    %c0_199 = arith.constant 0 : index
    %132 = vector.load %arg13[%c608_198, %c0_199] : memref<800x128xbf16, #tpu.memory_space<vmem>>, vector<32x128xbf16>
    %c32_200 = arith.constant 32 : index
    %c1920_201 = arith.constant 1920 : index
    %133 = vector.load %arg14[%c32_200, %c1920_201] : memref<128x2048xbf16, #tpu.memory_space<vmem>>, vector<32x128xbf16>
    tpu.vector_store %arg14[%c32_200, %c1920_201], %132 {strides = array<i32>} : memref<128x2048xbf16, #tpu.memory_space<vmem>>, vector<32x128xbf16>,
    %c688_202 = arith.constant 688 : index
    %c0_203 = arith.constant 0 : index
    %134 = vector.load %arg13[%c688_202, %c0_203] : memref<800x128xbf16, #tpu.memory_space<vmem>>, vector<32x128xbf16>
    %c64_204 = arith.constant 64 : index
    %c1920_205 = arith.constant 1920 : index
    %135 = vector.load %arg14[%c64_204, %c1920_205] : memref<128x2048xbf16, #tpu.memory_space<vmem>>, vector<32x128xbf16>
    tpu.vector_store %arg14[%c64_204, %c1920_205], %134 {strides = array<i32>} : memref<128x2048xbf16, #tpu.memory_space<vmem>>, vector<32x128xbf16>,
    %c768_206 = arith.constant 768 : index
    %c0_207 = arith.constant 0 : index
    %136 = vector.load %arg13[%c768_206, %c0_207] : memref<800x128xbf16, #tpu.memory_space<vmem>>, vector<32x128xbf16>
    %c96_208 = arith.constant 96 : index
    %c1920_209 = arith.constant 1920 : index
    %137 = vector.load %arg14[%c96_208, %c1920_209] : memref<128x2048xbf16, #tpu.memory_space<vmem>>, vector<32x128xbf16>
    tpu.vector_store %arg14[%c96_208, %c1920_209], %136 {strides = array<i32>} : memref<128x2048xbf16, #tpu.memory_space<vmem>>, vector<32x128xbf16>,
    %c0_210 = arith.constant 0 : index
    %c0_211 = arith.constant 0 : index
    %138 = vector.load %arg14[%c0_210, %c0_211] : memref<128x2048xbf16, #tpu.memory_space<vmem>>, vector<128x2048xbf16>
    %c0_212 = arith.constant 0 : index
    %c0_213 = arith.constant 0 : index
    %139 = vector.load %arg4[%c0_212, %c0_213] : memref<2048x128xbf16, #tpu.memory_space<vmem>>, vector<2048x128xbf16>
    %cst_214 = arith.constant dense<0.000000e+00> : vector<128x128xf32>
    %140 = tpu.matmul %138, %139, %cst_214 {dimension_numbers = #tpu.dot_dimension_numbers<[1], [0], [0], [1], [0, 0, 1, 1], [], []>} : vector<128x2048xbf16>, vector<2048x128xbf16>, vector<128x128xf32> -> vector<128x128xf32>
    %c0_215 = arith.constant 0 : index
    %c0_216 = arith.constant 0 : index
    %141 = vector.load %arg5[%c0_215, %c0_216] : memref<1x128xf32, #tpu.memory_space<vmem>>, vector<1x128xf32>
    %142 = vector.broadcast %141 : vector<1x128xf32> to vector<128x128xf32>
    %143 = arith.addf %140, %142 : vector<128x128xf32>
    %cst_217 = arith.constant 0.000000e+00 : f32
    %144 = vector.broadcast %cst_217 : f32 to vector<128x128xf32>
    %145 = arith.maximumf %143, %144 : vector<128x128xf32>
    %146 = arith.truncf %145 : vector<128x128xf32> to vector<128x128xbf16>
    %c0_218 = arith.constant 0 : index
    %c0_219 = arith.constant 0 : index
    %147 = vector.load %arg15[%c0_218, %c0_219] : memref<128x128xbf16, #tpu.memory_space<vmem>>, vector<128x128xbf16>
    tpu.vector_store %arg15[%c0_218, %c0_219], %146 {strides = array<i32>} : memref<128x128xbf16, #tpu.memory_space<vmem>>, vector<128x128xbf16>,
    %c0_220 = arith.constant 0 : index
    %c0_221 = arith.constant 0 : index
    %148 = vector.load %arg15[%c0_220, %c0_221] : memref<128x128xbf16, #tpu.memory_space<vmem>>, vector<16x128xbf16>
    %c0_222 = arith.constant 0 : index
    %c0_223 = arith.constant 0 : index
    %149 = vector.load %arg16[%c0_222, %c0_223] : memref<32x1152xbf16, #tpu.memory_space<vmem>>, vector<16x128xbf16>
    tpu.vector_store %arg16[%c0_222, %c0_223], %148 {strides = array<i32>} : memref<32x1152xbf16, #tpu.memory_space<vmem>>, vector<16x128xbf16>,
    %c32_224 = arith.constant 32 : index
    %c0_225 = arith.constant 0 : index
    %150 = vector.load %arg15[%c32_224, %c0_225] : memref<128x128xbf16, #tpu.memory_space<vmem>>, vector<16x128xbf16>
    %c16 = arith.constant 16 : index
    %c0_226 = arith.constant 0 : index
    %151 = vector.load %arg16[%c16, %c0_226] : memref<32x1152xbf16, #tpu.memory_space<vmem>>, vector<16x128xbf16>
    tpu.vector_store %arg16[%c16, %c0_226], %150 {strides = array<i32>} : memref<32x1152xbf16, #tpu.memory_space<vmem>>, vector<16x128xbf16>,
    %c8_227 = arith.constant 8 : index
    %c0_228 = arith.constant 0 : index
    %152 = vector.load %arg15[%c8_227, %c0_228] : memref<128x128xbf16, #tpu.memory_space<vmem>>, vector<16x128xbf16>
    %c0_229 = arith.constant 0 : index
    %c128_230 = arith.constant 128 : index
    %153 = vector.load %arg16[%c0_229, %c128_230] : memref<32x1152xbf16, #tpu.memory_space<vmem>>, vector<16x128xbf16>
    tpu.vector_store %arg16[%c0_229, %c128_230], %152 {strides = array<i32>} : memref<32x1152xbf16, #tpu.memory_space<vmem>>, vector<16x128xbf16>,
    %c40_231 = arith.constant 40 : index
    %c0_232 = arith.constant 0 : index
    %154 = vector.load %arg15[%c40_231, %c0_232] : memref<128x128xbf16, #tpu.memory_space<vmem>>, vector<16x128xbf16>
    %c16_233 = arith.constant 16 : index
    %c128_234 = arith.constant 128 : index
    %155 = vector.load %arg16[%c16_233, %c128_234] : memref<32x1152xbf16, #tpu.memory_space<vmem>>, vector<16x128xbf16>
    tpu.vector_store %arg16[%c16_233, %c128_234], %154 {strides = array<i32>} : memref<32x1152xbf16, #tpu.memory_space<vmem>>, vector<16x128xbf16>,
    %c16_235 = arith.constant 16 : index
    %c0_236 = arith.constant 0 : index
    %156 = vector.load %arg15[%c16_235, %c0_236] : memref<128x128xbf16, #tpu.memory_space<vmem>>, vector<16x128xbf16>
    %c0_237 = arith.constant 0 : index
    %c256_238 = arith.constant 256 : index
    %157 = vector.load %arg16[%c0_237, %c256_238] : memref<32x1152xbf16, #tpu.memory_space<vmem>>, vector<16x128xbf16>
    tpu.vector_store %arg16[%c0_237, %c256_238], %156 {strides = array<i32>} : memref<32x1152xbf16, #tpu.memory_space<vmem>>, vector<16x128xbf16>,
    %c48_239 = arith.constant 48 : index
    %c0_240 = arith.constant 0 : index
    %158 = vector.load %arg15[%c48_239, %c0_240] : memref<128x128xbf16, #tpu.memory_space<vmem>>, vector<16x128xbf16>
    %c16_241 = arith.constant 16 : index
    %c256_242 = arith.constant 256 : index
    %159 = vector.load %arg16[%c16_241, %c256_242] : memref<32x1152xbf16, #tpu.memory_space<vmem>>, vector<16x128xbf16>
    tpu.vector_store %arg16[%c16_241, %c256_242], %158 {strides = array<i32>} : memref<32x1152xbf16, #tpu.memory_space<vmem>>, vector<16x128xbf16>,
    %c32_243 = arith.constant 32 : index
    %c0_244 = arith.constant 0 : index
    %160 = vector.load %arg15[%c32_243, %c0_244] : memref<128x128xbf16, #tpu.memory_space<vmem>>, vector<16x128xbf16>
    %c0_245 = arith.constant 0 : index
    %c384_246 = arith.constant 384 : index
    %161 = vector.load %arg16[%c0_245, %c384_246] : memref<32x1152xbf16, #tpu.memory_space<vmem>>, vector<16x128xbf16>
    tpu.vector_store %arg16[%c0_245, %c384_246], %160 {strides = array<i32>} : memref<32x1152xbf16, #tpu.memory_space<vmem>>, vector<16x128xbf16>,
    %c64_247 = arith.constant 64 : index
    %c0_248 = arith.constant 0 : index
    %162 = vector.load %arg15[%c64_247, %c0_248] : memref<128x128xbf16, #tpu.memory_space<vmem>>, vector<16x128xbf16>
    %c16_249 = arith.constant 16 : index
    %c384_250 = arith.constant 384 : index
    %163 = vector.load %arg16[%c16_249, %c384_250] : memref<32x1152xbf16, #tpu.memory_space<vmem>>, vector<16x128xbf16>
    tpu.vector_store %arg16[%c16_249, %c384_250], %162 {strides = array<i32>} : memref<32x1152xbf16, #tpu.memory_space<vmem>>, vector<16x128xbf16>,
    %c40_251 = arith.constant 40 : index
    %c0_252 = arith.constant 0 : index
    %164 = vector.load %arg15[%c40_251, %c0_252] : memref<128x128xbf16, #tpu.memory_space<vmem>>, vector<16x128xbf16>
    %c0_253 = arith.constant 0 : index
    %c512_254 = arith.constant 512 : index
    %165 = vector.load %arg16[%c0_253, %c512_254] : memref<32x1152xbf16, #tpu.memory_space<vmem>>, vector<16x128xbf16>
    tpu.vector_store %arg16[%c0_253, %c512_254], %164 {strides = array<i32>} : memref<32x1152xbf16, #tpu.memory_space<vmem>>, vector<16x128xbf16>,
    %c72 = arith.constant 72 : index
    %c0_255 = arith.constant 0 : index
    %166 = vector.load %arg15[%c72, %c0_255] : memref<128x128xbf16, #tpu.memory_space<vmem>>, vector<16x128xbf16>
    %c16_256 = arith.constant 16 : index
    %c512_257 = arith.constant 512 : index
    %167 = vector.load %arg16[%c16_256, %c512_257] : memref<32x1152xbf16, #tpu.memory_space<vmem>>, vector<16x128xbf16>
    tpu.vector_store %arg16[%c16_256, %c512_257], %166 {strides = array<i32>} : memref<32x1152xbf16, #tpu.memory_space<vmem>>, vector<16x128xbf16>,
    %c48_258 = arith.constant 48 : index
    %c0_259 = arith.constant 0 : index
    %168 = vector.load %arg15[%c48_258, %c0_259] : memref<128x128xbf16, #tpu.memory_space<vmem>>, vector<16x128xbf16>
    %c0_260 = arith.constant 0 : index
    %c640_261 = arith.constant 640 : index
    %169 = vector.load %arg16[%c0_260, %c640_261] : memref<32x1152xbf16, #tpu.memory_space<vmem>>, vector<16x128xbf16>
    tpu.vector_store %arg16[%c0_260, %c640_261], %168 {strides = array<i32>} : memref<32x1152xbf16, #tpu.memory_space<vmem>>, vector<16x128xbf16>,
    %c80_262 = arith.constant 80 : index
    %c0_263 = arith.constant 0 : index
    %170 = vector.load %arg15[%c80_262, %c0_263] : memref<128x128xbf16, #tpu.memory_space<vmem>>, vector<16x128xbf16>
    %c16_264 = arith.constant 16 : index
    %c640_265 = arith.constant 640 : index
    %171 = vector.load %arg16[%c16_264, %c640_265] : memref<32x1152xbf16, #tpu.memory_space<vmem>>, vector<16x128xbf16>
    tpu.vector_store %arg16[%c16_264, %c640_265], %170 {strides = array<i32>} : memref<32x1152xbf16, #tpu.memory_space<vmem>>, vector<16x128xbf16>,
    %c64_266 = arith.constant 64 : index
    %c0_267 = arith.constant 0 : index
    %172 = vector.load %arg15[%c64_266, %c0_267] : memref<128x128xbf16, #tpu.memory_space<vmem>>, vector<16x128xbf16>
    %c0_268 = arith.constant 0 : index
    %c768_269 = arith.constant 768 : index
    %173 = vector.load %arg16[%c0_268, %c768_269] : memref<32x1152xbf16, #tpu.memory_space<vmem>>, vector<16x128xbf16>
    tpu.vector_store %arg16[%c0_268, %c768_269], %172 {strides = array<i32>} : memref<32x1152xbf16, #tpu.memory_space<vmem>>, vector<16x128xbf16>,
    %c96_270 = arith.constant 96 : index
    %c0_271 = arith.constant 0 : index
    %174 = vector.load %arg15[%c96_270, %c0_271] : memref<128x128xbf16, #tpu.memory_space<vmem>>, vector<16x128xbf16>
    %c16_272 = arith.constant 16 : index
    %c768_273 = arith.constant 768 : index
    %175 = vector.load %arg16[%c16_272, %c768_273] : memref<32x1152xbf16, #tpu.memory_space<vmem>>, vector<16x128xbf16>
    tpu.vector_store %arg16[%c16_272, %c768_273], %174 {strides = array<i32>} : memref<32x1152xbf16, #tpu.memory_space<vmem>>, vector<16x128xbf16>,
    %c72_274 = arith.constant 72 : index
    %c0_275 = arith.constant 0 : index
    %176 = vector.load %arg15[%c72_274, %c0_275] : memref<128x128xbf16, #tpu.memory_space<vmem>>, vector<16x128xbf16>
    %c0_276 = arith.constant 0 : index
    %c896_277 = arith.constant 896 : index
    %177 = vector.load %arg16[%c0_276, %c896_277] : memref<32x1152xbf16, #tpu.memory_space<vmem>>, vector<16x128xbf16>
    tpu.vector_store %arg16[%c0_276, %c896_277], %176 {strides = array<i32>} : memref<32x1152xbf16, #tpu.memory_space<vmem>>, vector<16x128xbf16>,
    %c104 = arith.constant 104 : index
    %c0_278 = arith.constant 0 : index
    %178 = vector.load %arg15[%c104, %c0_278] : memref<128x128xbf16, #tpu.memory_space<vmem>>, vector<16x128xbf16>
    %c16_279 = arith.constant 16 : index
    %c896_280 = arith.constant 896 : index
    %179 = vector.load %arg16[%c16_279, %c896_280] : memref<32x1152xbf16, #tpu.memory_space<vmem>>, vector<16x128xbf16>
    tpu.vector_store %arg16[%c16_279, %c896_280], %178 {strides = array<i32>} : memref<32x1152xbf16, #tpu.memory_space<vmem>>, vector<16x128xbf16>,
    %c80_281 = arith.constant 80 : index
    %c0_282 = arith.constant 0 : index
    %180 = vector.load %arg15[%c80_281, %c0_282] : memref<128x128xbf16, #tpu.memory_space<vmem>>, vector<16x128xbf16>
    %c0_283 = arith.constant 0 : index
    %c1024_284 = arith.constant 1024 : index
    %181 = vector.load %arg16[%c0_283, %c1024_284] : memref<32x1152xbf16, #tpu.memory_space<vmem>>, vector<16x128xbf16>
    tpu.vector_store %arg16[%c0_283, %c1024_284], %180 {strides = array<i32>} : memref<32x1152xbf16, #tpu.memory_space<vmem>>, vector<16x128xbf16>,
    %c112 = arith.constant 112 : index
    %c0_285 = arith.constant 0 : index
    %182 = vector.load %arg15[%c112, %c0_285] : memref<128x128xbf16, #tpu.memory_space<vmem>>, vector<16x128xbf16>
    %c16_286 = arith.constant 16 : index
    %c1024_287 = arith.constant 1024 : index
    %183 = vector.load %arg16[%c16_286, %c1024_287] : memref<32x1152xbf16, #tpu.memory_space<vmem>>, vector<16x128xbf16>
    tpu.vector_store %arg16[%c16_286, %c1024_287], %182 {strides = array<i32>} : memref<32x1152xbf16, #tpu.memory_space<vmem>>, vector<16x128xbf16>,
    %c0_288 = arith.constant 0 : index
    %c0_289 = arith.constant 0 : index
    %184 = vector.load %arg16[%c0_288, %c0_289] : memref<32x1152xbf16, #tpu.memory_space<vmem>>, vector<32x1152xbf16>
    %c0_290 = arith.constant 0 : index
    %c0_291 = arith.constant 0 : index
    %185 = vector.load %arg6[%c0_290, %c0_291] : memref<1152x128xbf16, #tpu.memory_space<vmem>>, vector<1152x128xbf16>
    %cst_292 = arith.constant dense<0.000000e+00> : vector<32x128xf32>
    %186 = tpu.matmul %184, %185, %cst_292 {dimension_numbers = #tpu.dot_dimension_numbers<[1], [0], [0], [1], [0, 0, 1, 1], [], []>} : vector<32x1152xbf16>, vector<1152x128xbf16>, vector<32x128xf32> -> vector<32x128xf32>
    %c0_293 = arith.constant 0 : index
    %c0_294 = arith.constant 0 : index
    %187 = vector.load %arg7[%c0_293, %c0_294] : memref<1x128xf32, #tpu.memory_space<vmem>>, vector<1x128xf32>
    %188 = vector.broadcast %187 : vector<1x128xf32> to vector<32x128xf32>
    %189 = arith.addf %186, %188 : vector<32x128xf32>
    %cst_295 = arith.constant 0.000000e+00 : f32
    %190 = vector.broadcast %cst_295 : f32 to vector<32x128xf32>
    %191 = arith.maximumf %189, %190 : vector<32x128xf32>
    %192 = arith.truncf %191 : vector<32x128xf32> to vector<32x128xbf16>
    %c0_296 = arith.constant 0 : index
    %c0_297 = arith.constant 0 : index
    %193 = vector.load %arg17[%c0_296, %c0_297] : memref<32x128xbf16, #tpu.memory_space<vmem>>, vector<32x128xbf16>
    tpu.vector_store %arg17[%c0_296, %c0_297], %192 {strides = array<i32>} : memref<32x128xbf16, #tpu.memory_space<vmem>>, vector<32x128xbf16>,
    %c0_298 = arith.constant 0 : index
    %c0_299 = arith.constant 0 : index
    %194 = vector.load %arg17[%c0_298, %c0_299] : memref<32x128xbf16, #tpu.memory_space<vmem>>, vector<8x128xbf16>
    %c0_300 = arith.constant 0 : index
    %c0_301 = arith.constant 0 : index
    %195 = vector.load %arg18[%c0_300, %c0_301] : memref<8x512xbf16, #tpu.memory_space<vmem>>, vector<8x128xbf16>
    tpu.vector_store %arg18[%c0_300, %c0_301], %194 {strides = array<i32>} : memref<8x512xbf16, #tpu.memory_space<vmem>>, vector<8x128xbf16>,
    %c8_302 = arith.constant 8 : index
    %c0_303 = arith.constant 0 : index
    %196 = vector.load %arg17[%c8_302, %c0_303] : memref<32x128xbf16, #tpu.memory_space<vmem>>, vector<8x128xbf16>
    %c0_304 = arith.constant 0 : index
    %c128_305 = arith.constant 128 : index
    %197 = vector.load %arg18[%c0_304, %c128_305] : memref<8x512xbf16, #tpu.memory_space<vmem>>, vector<8x128xbf16>
    tpu.vector_store %arg18[%c0_304, %c128_305], %196 {strides = array<i32>} : memref<8x512xbf16, #tpu.memory_space<vmem>>, vector<8x128xbf16>,
    %c16_306 = arith.constant 16 : index
    %c0_307 = arith.constant 0 : index
    %198 = vector.load %arg17[%c16_306, %c0_307] : memref<32x128xbf16, #tpu.memory_space<vmem>>, vector<8x128xbf16>
    %c0_308 = arith.constant 0 : index
    %c256_309 = arith.constant 256 : index
    %199 = vector.load %arg18[%c0_308, %c256_309] : memref<8x512xbf16, #tpu.memory_space<vmem>>, vector<8x128xbf16>
    tpu.vector_store %arg18[%c0_308, %c256_309], %198 {strides = array<i32>} : memref<8x512xbf16, #tpu.memory_space<vmem>>, vector<8x128xbf16>,
    %c24 = arith.constant 24 : index
    %c0_310 = arith.constant 0 : index
    %200 = vector.load %arg17[%c24, %c0_310] : memref<32x128xbf16, #tpu.memory_space<vmem>>, vector<8x128xbf16>
    %c0_311 = arith.constant 0 : index
    %c384_312 = arith.constant 384 : index
    %201 = vector.load %arg18[%c0_311, %c384_312] : memref<8x512xbf16, #tpu.memory_space<vmem>>, vector<8x128xbf16>
    tpu.vector_store %arg18[%c0_311, %c384_312], %200 {strides = array<i32>} : memref<8x512xbf16, #tpu.memory_space<vmem>>, vector<8x128xbf16>,
    %c0_313 = arith.constant 0 : index
    %c0_314 = arith.constant 0 : index
    %202 = vector.load %arg18[%c0_313, %c0_314] : memref<8x512xbf16, #tpu.memory_space<vmem>>, vector<8x512xbf16>
    %c0_315 = arith.constant 0 : index
    %c0_316 = arith.constant 0 : index
    %203 = vector.load %arg8[%c0_315, %c0_316] : memref<512x512xbf16, #tpu.memory_space<vmem>>, vector<512x512xbf16>
    %cst_317 = arith.constant dense<0.000000e+00> : vector<8x512xf32>
    %204 = tpu.matmul %202, %203, %cst_317 {dimension_numbers = #tpu.dot_dimension_numbers<[1], [0], [0], [1], [0, 0, 1, 1], [], []>} : vector<8x512xbf16>, vector<512x512xbf16>, vector<8x512xf32> -> vector<8x512xf32>
    %c0_318 = arith.constant 0 : index
    %c0_319 = arith.constant 0 : index
    %205 = vector.load %arg9[%c0_318, %c0_319] : memref<1x512xf32, #tpu.memory_space<vmem>>, vector<1x512xf32>
    %206 = vector.broadcast %205 : vector<1x512xf32> to vector<8x512xf32>
    %207 = arith.addf %204, %206 : vector<8x512xf32>
    %cst_320 = arith.constant 0.000000e+00 : f32
    %208 = vector.broadcast %cst_320 : f32 to vector<8x512xf32>
    %209 = arith.maximumf %207, %208 : vector<8x512xf32>
    %210 = arith.truncf %209 : vector<8x512xf32> to vector<8x512xbf16>
    %c0_321 = arith.constant 0 : index
    %c0_322 = arith.constant 0 : index
    %211 = vector.load %arg10[%c0_321, %c0_322] : memref<512x128xbf16, #tpu.memory_space<vmem>>, vector<512x128xbf16>
    %cst_323 = arith.constant dense<0.000000e+00> : vector<8x128xf32>
    %212 = tpu.matmul %210, %211, %cst_323 {dimension_numbers = #tpu.dot_dimension_numbers<[1], [0], [0], [1], [0, 0, 1, 1], [], []>} : vector<8x512xbf16>, vector<512x128xbf16>, vector<8x128xf32> -> vector<8x128xf32>
    %c0_324 = arith.constant 0 : index
    %c0_325 = arith.constant 0 : index
    %213 = vector.load %arg11[%c0_324, %c0_325] : memref<1x128xf32, #tpu.memory_space<vmem>>, vector<1x128xf32>
    %214 = vector.broadcast %213 : vector<1x128xf32> to vector<8x128xf32>
    %215 = arith.addf %212, %214 : vector<8x128xf32>
    %c0_326 = arith.constant 0 : index
    %c0_327 = arith.constant 0 : index
    %216 = vector.load %arg12[%c0_326, %c0_327] : memref<8x128xf32, #tpu.memory_space<vmem>>, vector<8x128xf32>
    tpu.vector_store %arg12[%c0_326, %c0_327], %215 {strides = array<i32>} : memref<8x128xf32, #tpu.memory_space<vmem>>, vector<8x128xf32>,
    return
  }
  func.func @transform_0(%arg0: i32) -> (i32, i32) {
    %c0_i32 = arith.constant 0 : i32
    %c0_i32_0 = arith.constant 0 : i32
    return %arg0, %c0_i32 : i32, i32
  }
  func.func @transform_1(%arg0: i32) -> (i32, i32) {
    %c0_i32 = arith.constant 0 : i32
    %c0_i32_0 = arith.constant 0 : i32
    %c0_i32_1 = arith.constant 0 : i32
    return %c0_i32, %c0_i32_0 : i32, i32
  }
  func.func @transform_2(%arg0: i32) -> (i32, i32) {
    %c0_i32 = arith.constant 0 : i32
    %c0_i32_0 = arith.constant 0 : i32
    %c0_i32_1 = arith.constant 0 : i32
    return %c0_i32, %c0_i32_0 : i32, i32
  }
  func.func @transform_3(%arg0: i32) -> (i32, i32) {
    %c0_i32 = arith.constant 0 : i32
    %c0_i32_0 = arith.constant 0 : i32
    %c0_i32_1 = arith.constant 0 : i32
    return %c0_i32, %c0_i32_0 : i32, i32
  }
  func.func @transform_4(%arg0: i32) -> (i32, i32) {
    %c0_i32 = arith.constant 0 : i32
    %c0_i32_0 = arith.constant 0 : i32
    %c0_i32_1 = arith.constant 0 : i32
    return %c0_i32, %c0_i32_0 : i32, i32
  }
  func.func @transform_5(%arg0: i32) -> (i32, i32) {
    %c0_i32 = arith.constant 0 : i32
    %c0_i32_0 = arith.constant 0 : i32
    %c0_i32_1 = arith.constant 0 : i32
    return %c0_i32, %c0_i32_0 : i32, i32
  }
  func.func @transform_6(%arg0: i32) -> (i32, i32) {
    %c0_i32 = arith.constant 0 : i32
    %c0_i32_0 = arith.constant 0 : i32
    %c0_i32_1 = arith.constant 0 : i32
    return %c0_i32, %c0_i32_0 : i32, i32
  }
  func.func @transform_7(%arg0: i32) -> (i32, i32) {
    %c0_i32 = arith.constant 0 : i32
    %c0_i32_0 = arith.constant 0 : i32
    %c0_i32_1 = arith.constant 0 : i32
    return %c0_i32, %c0_i32_0 : i32, i32
  }
  func.func @transform_8(%arg0: i32) -> (i32, i32) {
    %c0_i32 = arith.constant 0 : i32
    %c0_i32_0 = arith.constant 0 : i32
    %c0_i32_1 = arith.constant 0 : i32
    return %c0_i32, %c0_i32_0 : i32, i32
  }
  func.func @transform_9(%arg0: i32) -> (i32, i32) {
    %c0_i32 = arith.constant 0 : i32
    %c0_i32_0 = arith.constant 0 : i32
    %c0_i32_1 = arith.constant 0 : i32
    return %c0_i32, %c0_i32_0 : i32, i32
  }
  func.func @transform_10(%arg0: i32) -> (i32, i32) {
    %c0_i32 = arith.constant 0 : i32
    %c0_i32_0 = arith.constant 0 : i32
    %c0_i32_1 = arith.constant 0 : i32
    return %c0_i32, %c0_i32_0 : i32, i32
  }
  func.func @transform_11(%arg0: i32) -> (i32, i32) {
    %c0_i32 = arith.constant 0 : i32
    %c0_i32_0 = arith.constant 0 : i32
    return %arg0, %c0_i32 : i32, i32
  }
}

</mosaic_0001>

<bundles_post_ra>
// kernel: critic_forward.1
= control target key start
LH: loop header
LB: loop body
LE: loop exit
PB: predicated region body
PF: predicated region fallthrough
CT: control target
= control target key end

     0   :  { %v11442_v0 = vmov 0   ;;  %vm3767_vm0 = vcmask 1043456   ;;  %s14518_s1 = inlined_call_operand.vmem [shape: bf16[768,128], index: 1, kind: input, shape index: {}]   ;;  %s14519_s0 = inlined_call_operand.vmem [shape: bf16[800,768], index: 0, kind: input, shape index: {}]   ;;  %s14520_s2 = inlined_call_operand.vmem [shape: f32[1,128], index: 2, kind: input, shape index: {}]   ;;  %s14521_s3 = inlined_call_operand.vmem [shape: bf16[2048,128], index: 3, kind: input, shape index: {}]   ;;  %s14522_s4 = inlined_call_operand.vmem [shape: f32[1,128], index: 4, kind: input, shape index: {}]   ;;  %s14523_s5 = inlined_call_operand.vmem [shape: bf16[1152,128], index: 5, kind: input, shape index: {}]   ;;  %s14524_s7 = inlined_call_operand.vmem [shape: bf16[512,512], index: 7, kind: input, shape index: {}]   ;;  %s14525_s6 = inlined_call_operand.vmem [shape: f32[1,128], index: 6, kind: input, shape index: {}]   ;;  %s14526_s9 = inlined_call_operand.vmem [shape: bf16[512,128], index: 9, kind: input, shape index: {}]   ;;  %s14527_s8 = inlined_call_operand.vmem [shape: f32[1,512], index: 8, kind: input, shape index: {}]   ;;  %s14528_s10 = inlined_call_operand.vmem [shape: f32[1,128], index: 10, kind: input, shape index: {}]   ;;  %s14529_s11 = inlined_call_operand.vmem [shape: f32[8,128], index: 11, kind: output, shape index: {}]  }
   0x1   :  { %2230 = vmatprep.subr.bf16.mxu0 %v11442_v0  ;;  %v10512_v1 = vld [vmem:[%s14518_s1] sm:$0xff]   ;;  %9995 = vmatprep.subr.bf16.mxu1 %v11442_v0  ;;  %v10513_v2 = vld [vmem:[%s14518_s1 + $0x8] sm:$0xff]   ;;  %v10514_v3 = vld [vmem:[%s14518_s1 + $0x10] sm:$0xff]  }
   0x2   :  { %2231 = vmatpush1.bf16.msra.mxu0 %v10512_v1  ;;  %10011 = vmatpush1.bf16.msra.mxu1 %v10512_v1  ;;  %v10515_v4 = vld [vmem:[%s14518_s1 + $0x18] sm:$0xff]   ;;  %v10516_v5 = vld [vmem:[%s14518_s1 + $0x20] sm:$0xff]   ;;  %v10517_v7 = vld [vmem:[%s14518_s1 + $0x28] sm:$0xff]  }
   0x3   :  { %2232 = vmatprep.subr.bf16.mxu0 %v11442_v0  ;;  %9996 = vmatprep.subr.bf16.mxu1 %v11442_v0  ;;  %v10530_v6 = vld [vmem:[%s14519_s0 + $0x4] ss:$24 sps:$4 sm:$0xff]   ;;  %v10518_v8 = vld [vmem:[%s14518_s1 + $0x30] sm:$0xff]   ;;  %v10521_v11 = vld [vmem:[%s14518_s1 + $0x48] sm:$0xff]  }
   0x4   :  { %2262 = vmatprep.mubr.bf16.mxu0 %v10530_v6  ;;  %v10519_v9 = vld [vmem:[%s14518_s1 + $0x38] sm:$0xff]   ;;  %v10520_v10 = vld [vmem:[%s14518_s1 + $0x40] sm:$0xff]   ;;  %v10522_v12 = vld [vmem:[%s14518_s1 + $0x50] sm:$0xff]  }
   0x5   :  { %v10523_v13 = vld [vmem:[%s14518_s1 + $0x58] sm:$0xff]   ;;  %v10524_v14 = vld [vmem:[%s14518_s1 + $0x60] sm:$0xff]   ;;  %v10525_v15 = vld [vmem:[%s14518_s1 + $0x68] sm:$0xff]  }
   0x6   :  { %2233 = vmatpush1.bf16.msra.mxu0 %v10513_v2  ;;  %10012 = vmatpush1.bf16.msra.mxu1 %v10513_v2  ;;  %v10526_v16 = vld [vmem:[%s14518_s1 + $0x70] sm:$0xff]   ;;  %v10527_v17 = vld [vmem:[%s14518_s1 + $0x78] sm:$0xff]   ;;  %v10531_v19 = vld [vmem:[%s14518_s1 + $0x80] sm:$0xff]  }
   0x7   :  { %2234 = vmatprep.subr.bf16.mxu0 %v11442_v0  ;;  %9997 = vmatprep.subr.bf16.mxu1 %v11442_v0  ;;  %v10528_v18 = vld [vmem:[%s14519_s0] ss:$24 sps:$4 sm:$0xff]   ;;  %v10532_v20 = vld [vmem:[%s14519_s0 + $0x34] ss:$24 sps:$4 sm:$0xff]   ;;  %v10534_v22 = vld [vmem:[%s14519_s0 + $0x30] ss:$24 sps:$4 sm:$0xff]  }
   0x8   :  { %v10538_v21 = vld [vmem:[%s14518_s1 + $0x88] sm:$0xff]   ;;  %v10535_v23 = vld [vmem:[%s14519_s0 + $0x64] ss:$24 sps:$4 sm:$0xff]   ;;  %v10545_v24 = vld [vmem:[%s14518_s1 + $0x90] sm:$0xff]  }
   0x9   :  { %v10554_v25 = vld [vmem:[%s14518_s1 + $0x98] sm:$0xff]   ;;  %v10539_v27 = vld [vmem:[%s14519_s0 + $0x94] ss:$24 sps:$4 sm:$0xff]   ;;  %v10562_v28 = vld [vmem:[%s14518_s1 + $0xa0] sm:$0xff]  }
   0xa   :  { %2235 = vmatpush1.bf16.msra.mxu0 %v10514_v3  ;;  %10013 = vmatpush1.bf16.msra.mxu1 %v10514_v3  ;;  %v10537_v26 = vld [vmem:[%s14519_s0 + $0x60] ss:$24 sps:$4 sm:$0xff]   ;;  %v10569_v29 = vld [vmem:[%s14518_s1 + $0xa8] sm:$0xff]   ;;  %v10542_v31 = vld [vmem:[%s14519_s0 + $0xc4] ss:$24 sps:$4 sm:$0xff]  }
   0xb   :  { %2236 = vmatprep.subr.bf16.mxu0 %v11442_v0  ;;  %9998 = vmatprep.subr.bf16.mxu1 %v11442_v0  ;;  %v10541_v30 = vld [vmem:[%s14519_s0 + $0x90] ss:$24 sps:$4 sm:$0xff]   ;;  %v10585_v33 = vld [vmem:[%s14518_s1 + $0xb8] sm:$0xff]   ;;  %v10546_v35 = vld [vmem:[%s14519_s0 + $0xf4] ss:$24 sps:$4 sm:$0xff]  }
   0xc   :  { %v10576_v32 = vld [vmem:[%s14518_s1 + $0xb0] sm:$0xff]   ;;  %v10544_v34 = vld [vmem:[%s14519_s0 + $0xc0] ss:$24 sps:$4 sm:$0xff]   ;;  %v10600_v37 = vld [vmem:[%s14518_s1 + $0xc8] sm:$0xff]  }
   0xd   :  { %v10593_v36 = vld [vmem:[%s14518_s1 + $0xc0] sm:$0xff]   ;;  %v10548_v38 = vld [vmem:[%s14519_s0 + $0xf0] ss:$24 sps:$4 sm:$0xff]   ;;  %v10552_v41 = vld [vmem:[%s14519_s0 + $0x154] ss:$24 sps:$4 sm:$0xff]  }
   0xe   :  { %2237 = vmatpush1.bf16.msra.mxu0 %v10515_v4  ;;  %10014 = vmatpush1.bf16.msra.mxu1 %v10515_v4  ;;  %v10549_v39 = vld [vmem:[%s14519_s0 + $0x124] ss:$24 sps:$4 sm:$0xff]   ;;  %v10551_v40 = vld [vmem:[%s14519_s0 + $0x120] ss:$24 sps:$4 sm:$0xff]   ;;  %v10607_v42 = vld [vmem:[%s14518_s1 + $0xd0] sm:$0xff]  }
   0xf   :  { %2238 = vmatprep.subr.bf16.mxu0 %v11442_v0  ;;  %9999 = vmatprep.subr.bf16.mxu1 %v11442_v0  ;;  %v10555_v43 = vld [vmem:[%s14519_s0 + $0x150] ss:$24 sps:$4 sm:$0xff]   ;;  %v10556_v44 = vld [vmem:[%s14519_s0 + $0x184] ss:$24 sps:$4 sm:$0xff]   ;;  %v10558_v45 = vld [vmem:[%s14519_s0 + $0x180] ss:$24 sps:$4 sm:$0xff]  }
  0x10   :  { %v10559_v46 = vld [vmem:[%s14519_s0 + $0x1b4] ss:$24 sps:$4 sm:$0xff]   ;;  %v10616_v47 = vld [vmem:[%s14518_s1 + $0xd8] sm:$0xff]   ;;  %v10561_v48 = vld [vmem:[%s14519_s0 + $0x1b0] ss:$24 sps:$4 sm:$0xff]  }
  0x11   :  { %v10563_v49 = vld [vmem:[%s14519_s0 + $0x1e4] ss:$24 sps:$4 sm:$0xff]   ;;  %v10565_v50 = vld [vmem:[%s14519_s0 + $0x1e0] ss:$24 sps:$4 sm:$0xff]   ;;  %v10566_v51 = vld [vmem:[%s14519_s0 + $0x214] ss:$24 sps:$4 sm:$0xff]  }
  0x12   :  { %2239 = vmatpush1.bf16.msra.mxu0 %v10516_v5  ;;  %10015 = vmatpush1.bf16.msra.mxu1 %v10516_v5  ;;  %v10568_v52 = vld [vmem:[%s14519_s0 + $0x210] ss:$24 sps:$4 sm:$0xff]   ;;  %v10570_v53 = vld [vmem:[%s14519_s0 + $0x244] ss:$24 sps:$4 sm:$0xff]   ;;  %v10572_v55 = vld [vmem:[%s14519_s0 + $0x240] ss:$24 sps:$4 sm:$0xff]  }
  0x13   :  { %2240 = vmatprep.subr.bf16.mxu0 %v11442_v0  ;;  %10000 = vmatprep.subr.bf16.mxu1 %v11442_v0  ;;  %v10624_v54 = vld [vmem:[%s14518_s1 + $0xe0] sm:$0xff]   ;;  %v10573_v56 = vld [vmem:[%s14519_s0 + $0x274] ss:$24 sps:$4 sm:$0xff]   ;;  %v10575_v57 = vld [vmem:[%s14519_s0 + $0x270] ss:$24 sps:$4 sm:$0xff]  }
  0x14   :  { %v10577_v58 = vld [vmem:[%s14519_s0 + $0x2a4] ss:$24 sps:$4 sm:$0xff]   ;;  %v10631_v59 = vld [vmem:[%s14518_s1 + $0xe8] sm:$0xff]   ;;  %v10579_v60 = vld [vmem:[%s14519_s0 + $0x2a0] ss:$24 sps:$4 sm:$0xff]  }
  0x15   :  { %v10580_v61 = vld [vmem:[%s14519_s0 + $0x2d4] ss:$24 sps:$4 sm:$0xff]   ;;  %v10582_v62 = vld [vmem:[%s14519_s0 + $0x2d0] ss:$24 sps:$4 sm:$0xff]   ;;  %v10583_v63 = vld [vmem:[%s14519_s0 + $0x304] ss:$24 sps:$4 sm:$0xff]  }
  0x16   :  { %2241 = vmatpush1.bf16.msra.mxu0 %v10517_v7  ;;  %10016 = vmatpush1.bf16.msra.mxu1 %v10517_v7  ;;  %v10638_v1 = vld [vmem:[%s14518_s1 + $0xf0] sm:$0xff]   ;;  %v10586_v2 = vld [vmem:[%s14519_s0 + $0x300] ss:$24 sps:$4 sm:$0xff]   ;;  %v10590_v5 = vld [vmem:[%s14519_s0 + $0x364] ss:$24 sps:$4 sm:$0xff]  }
  0x17   :  { %2242 = vmatprep.subr.bf16.mxu0 %v11442_v0  ;;  %10001 = vmatprep.subr.bf16.mxu1 %v11442_v0  ;;  %v10587_v3 = vld [vmem:[%s14519_s0 + $0x334] ss:$24 sps:$4 sm:$0xff]   ;;  %v10589_v4 = vld [vmem:[%s14519_s0 + $0x330] ss:$24 sps:$4 sm:$0xff]   ;;  %v10647_v6 = vld [vmem:[%s14518_s1 + $0xf8] sm:$0xff]  }
  0x18   :  { %v10592_v7 = vld [vmem:[%s14519_s0 + $0x360] ss:$24 sps:$4 sm:$0xff]  }
  0x1a   :  { %2243 = vmatpush1.bf16.msra.mxu0 %v10518_v8  ;;  %10017 = vmatpush1.bf16.msra.mxu1 %v10518_v8  ;;  %v10594_v8 = vld [vmem:[%s14519_s0 + $0x394] ss:$24 sps:$4 sm:$0xff]  }
  0x1b   :  { %2244 = vmatprep.subr.bf16.mxu0 %v11442_v0  ;;  %10002 = vmatprep.subr.bf16.mxu1 %v11442_v0 }
  0x1e   :  { %2245 = vmatpush1.bf16.msra.mxu0 %v10519_v9  ;;  %10018 = vmatpush1.bf16.msra.mxu1 %v10519_v9  ;;  %v10596_v9 = vld [vmem:[%s14519_s0 + $0x390] ss:$24 sps:$4 sm:$0xff]  }
  0x1f   :  { %2246 = vmatprep.subr.bf16.mxu0 %v11442_v0  ;;  %10003 = vmatprep.subr.bf16.mxu1 %v11442_v0 }
  0x22   :  { %2247 = vmatpush1.bf16.msra.mxu0 %v10520_v10  ;;  %10019 = vmatpush1.bf16.msra.mxu1 %v10520_v10  ;;  %v10597_v10 = vld [vmem:[%s14519_s0 + $0x3c4] ss:$24 sps:$4 sm:$0xff]  }
  0x23   :  { %2248 = vmatprep.subr.bf16.mxu0 %v11442_v0  ;;  %10004 = vmatprep.subr.bf16.mxu1 %v11442_v0 }
  0x26   :  { %2249 = vmatpush1.bf16.msra.mxu0 %v10521_v11  ;;  %10020 = vmatpush1.bf16.msra.mxu1 %v10521_v11  ;;  %v10599_v11 = vld [vmem:[%s14519_s0 + $0x3c0] ss:$24 sps:$4 sm:$0xff]  }
  0x27   :  { %2250 = vmatprep.subr.bf16.mxu0 %v11442_v0  ;;  %10005 = vmatprep.subr.bf16.mxu1 %v11442_v0 }
  0x2a   :  { %2251 = vmatpush1.bf16.msra.mxu0 %v10522_v12  ;;  %10021 = vmatpush1.bf16.msra.mxu1 %v10522_v12  ;;  %v10601_v12 = vld [vmem:[%s14519_s0 + $0x3f4] ss:$24 sps:$4 sm:$0xff]  }
  0x2b   :  { %2252 = vmatprep.subr.bf16.mxu0 %v11442_v0  ;;  %10006 = vmatprep.subr.bf16.mxu1 %v11442_v0 }
  0x2e   :  { %2253 = vmatpush1.bf16.msra.mxu0 %v10523_v13  ;;  %10022 = vmatpush1.bf16.msra.mxu1 %v10523_v13  ;;  %v10603_v13 = vld [vmem:[%s14519_s0 + $0x3f0] ss:$24 sps:$4 sm:$0xff]  }
  0x2f   :  { %2254 = vmatprep.subr.bf16.mxu0 %v11442_v0  ;;  %10007 = vmatprep.subr.bf16.mxu1 %v11442_v0 }
  0x32   :  { %2255 = vmatpush1.bf16.msra.mxu0 %v10524_v14  ;;  %10023 = vmatpush1.bf16.msra.mxu1 %v10524_v14  ;;  %v10604_v14 = vld [vmem:[%s14519_s0 + $0x424] ss:$24 sps:$4 sm:$0xff]  }
  0x33   :  { %2256 = vmatprep.subr.bf16.mxu0 %v11442_v0  ;;  %10008 = vmatprep.subr.bf16.mxu1 %v11442_v0 }
  0x36   :  { %2257 = vmatpush1.bf16.msra.mxu0 %v10525_v15  ;;  %10024 = vmatpush1.bf16.msra.mxu1 %v10525_v15  ;;  %v10606_v15 = vld [vmem:[%s14519_s0 + $0x420] ss:$24 sps:$4 sm:$0xff]  }
  0x37   :  { %2258 = vmatprep.subr.bf16.mxu0 %v11442_v0  ;;  %10009 = vmatprep.subr.bf16.mxu1 %v11442_v0 }
  0x3a   :  { %2259 = vmatpush1.bf16.msra.mxu0 %v10526_v16  ;;  %10025 = vmatpush1.bf16.msra.mxu1 %v10526_v16  ;;  %v10608_v16 = vld [vmem:[%s14519_s0 + $0x454] ss:$24 sps:$4 sm:$0xff]  }
  0x3b   :  { %2260 = vmatprep.subr.bf16.mxu0 %v11442_v0  ;;  %10010 = vmatprep.subr.bf16.mxu1 %v11442_v0 }
  0x3e   :  { %2261 = vmatpush1.bf16.msra.mxu0 %v10527_v17  ;;  %10026 = vmatpush1.bf16.msra.mxu1 %v10527_v17  ;;  %v10610_v17 = vld [vmem:[%s14519_s0 + $0x450] ss:$24 sps:$4 sm:$0xff]  }
  0x3f   :  { %2663 = vmatprep.subr.bf16.mxu0 %v11442_v0 }
  0x41   :  { %2263 = vmatmul.mubr.bf16.vlgmr.msra.gmra.mrb[0].mxu0 %v10528_v18  ;;  %v10611_v18 = vld [vmem:[%s14519_s0 + $0x484] ss:$24 sps:$4 sm:$0xff]  }
  0x42   :  { %2664 = vmatpush1.bf16.msra.mxu0 %v10531_v19  ;;  %2270 = vmatprep.mubr.bf16.mxu0 %v10532_v20  ;;  %v10613_v19 = vld [vmem:[%s14519_s0 + $0x480] ss:$24 sps:$4 sm:$0xff]   ;;  %v10614_v20 = vld [vmem:[%s14519_s0 + $0x4b4] ss:$24 sps:$4 sm:$0xff]  }
  0x43   :  { %2665 = vmatprep.subr.bf16.mxu0 %v11442_v0 }
  0x46   :  { %2666 = vmatpush1.bf16.msra.mxu0 %v10538_v21  ;;  %v10617_v21 = vld [vmem:[%s14519_s0 + $0x4b0] ss:$24 sps:$4 sm:$0xff]  }
  0x47   :  { %2667 = vmatprep.subr.bf16.mxu0 %v11442_v0 }
  0x49   :  { %2271 = vmatmul.mubr.bf16.gmra.mrb[4].mxu0 %v10534_v22  ;;  %v10618_v22 = vld [vmem:[%s14519_s0 + $0x4e4] ss:$24 sps:$4 sm:$0xff]  }
  0x4a   :  { %2278 = vmatprep.mubr.bf16.mxu0 %v10535_v23  ;;  %2668 = vmatpush1.bf16.msra.mxu0 %v10545_v24  ;;  %v10620_v23 = vld [vmem:[%s14519_s0 + $0x4e0] ss:$24 sps:$4 sm:$0xff]   ;;  %v10621_v24 = vld [vmem:[%s14519_s0 + $0x514] ss:$24 sps:$4 sm:$0xff]  }
  0x4b   :  { %2669 = vmatprep.subr.bf16.mxu0 %v11442_v0 }
  0x4e   :  { %2670 = vmatpush1.bf16.msra.mxu0 %v10554_v25  ;;  %v10623_v25 = vld [vmem:[%s14519_s0 + $0x510] ss:$24 sps:$4 sm:$0xff]  }
  0x4f   :  { %2671 = vmatprep.subr.bf16.mxu0 %v11442_v0 }
  0x51   :  { %2279 = vmatmul.mubr.bf16.gmra.mrb[8].mxu0 %v10537_v26  ;;  %v10625_v26 = vld [vmem:[%s14519_s0 + $0x544] ss:$24 sps:$4 sm:$0xff]  }
  0x52   :  { %2286 = vmatprep.mubr.bf16.mxu0 %v10539_v27  ;;  %2672 = vmatpush1.bf16.msra.mxu0 %v10562_v28  ;;  %v10627_v27 = vld [vmem:[%s14519_s0 + $0x540] ss:$24 sps:$4 sm:$0xff]   ;;  %v10628_v28 = vld [vmem:[%s14519_s0 + $0x574] ss:$24 sps:$4 sm:$0xff]  }
  0x53   :  { %2673 = vmatprep.subr.bf16.mxu0 %v11442_v0 }
  0x56   :  { %2674 = vmatpush1.bf16.msra.mxu0 %v10569_v29  ;;  %v10630_v29 = vld [vmem:[%s14519_s0 + $0x570] ss:$24 sps:$4 sm:$0xff]  }
  0x57   :  { %2675 = vmatprep.subr.bf16.mxu0 %v11442_v0 }
  0x59   :  { %2287 = vmatmul.mubr.bf16.gmra.mrb[12].mxu0 %v10541_v30  ;;  %v10632_v30 = vld [vmem:[%s14519_s0 + $0x5a4] ss:$24 sps:$4 sm:$0xff]  }
  0x5a   :  { %2294 = vmatprep.mubr.bf16.mxu0 %v10542_v31  ;;  %2676 = vmatpush1.bf16.msra.mxu0 %v10576_v32  ;;  %v10634_v31 = vld [vmem:[%s14519_s0 + $0x5a0] ss:$24 sps:$4 sm:$0xff]   ;;  %v10635_v32 = vld [vmem:[%s14519_s0 + $0x5d4] ss:$24 sps:$4 sm:$0xff]  }
  0x5b   :  { %2677 = vmatprep.subr.bf16.mxu0 %v11442_v0 }
  0x5e   :  { %2678 = vmatpush1.bf16.msra.mxu0 %v10585_v33  ;;  %v10637_v33 = vld [vmem:[%s14519_s0 + $0x5d0] ss:$24 sps:$4 sm:$0xff]  }
  0x5f   :  { %2679 = vmatprep.subr.bf16.mxu0 %v11442_v0 }
  0x61   :  { %2295 = vmatmul.mubr.bf16.gmra.mrb[16].mxu0 %v10544_v34  ;;  %v10639_v34 = vld [vmem:[%s14519_s0 + $0x604] ss:$24 sps:$4 sm:$0xff]  }
  0x62   :  { %2302 = vmatprep.mubr.bf16.mxu0 %v10546_v35  ;;  %2680 = vmatpush1.bf16.msra.mxu0 %v10593_v36  ;;  %v10641_v35 = vld [vmem:[%s14519_s0 + $0x600] ss:$24 sps:$4 sm:$0xff]   ;;  %v10642_v36 = vld [vmem:[%s14519_s0 + $0x634] ss:$24 sps:$4 sm:$0xff]  }
  0x63   :  { %2681 = vmatprep.subr.bf16.mxu0 %v11442_v0 }
  0x66   :  { %2682 = vmatpush1.bf16.msra.mxu0 %v10600_v37  ;;  %v10644_v37 = vld [vmem:[%s14519_s0 + $0x630] ss:$24 sps:$4 sm:$0xff]  }
  0x67   :  { %2683 = vmatprep.subr.bf16.mxu0 %v11442_v0 }
  0x69   :  { %2303 = vmatmul.mubr.bf16.gmra.mrb[20].mxu0 %v10548_v38  ;;  %v10645_v38 = vld [vmem:[%s14519_s0 + $0x664] ss:$24 sps:$4 sm:$0xff]  }
  0x6a   :  { %2310 = vmatprep.mubr.bf16.mxu0 %v10549_v39  ;;  %2684 = vmatpush1.bf16.msra.mxu0 %v10607_v42  ;;  %v10648_v39 = vld [vmem:[%s14519_s0 + $0x660] ss:$24 sps:$4 sm:$0xff]   ;;  %v10654_v42 = vld [vmem:[%s14519_s0 + $0xc] ss:$24 sps:$4 sm:$0xff]  }
  0x6b   :  { %2685 = vmatprep.subr.bf16.mxu0 %v11442_v0 }
  0x6e   :  { %2686 = vmatpush1.bf16.msra.mxu0 %v10616_v47  ;;  %v10658_v47 = vld [vmem:[%s14519_s0 + $0x38] ss:$24 sps:$4 sm:$0xff]  }
  0x6f   :  { %2687 = vmatprep.subr.bf16.mxu0 %v11442_v0 }
  0x71   :  { %2311 = vmatmul.mubr.bf16.gmra.mrb[24].mxu0 %v10551_v40  ;;  %v10649_v40 = vld [vmem:[%s14519_s0 + $0x694] ss:$24 sps:$4 sm:$0xff]  }
  0x72   :  { %2318 = vmatprep.mubr.bf16.mxu0 %v10552_v41  ;;  %2688 = vmatpush1.bf16.msra.mxu0 %v10624_v54  ;;  %v10651_v41 = vld [vmem:[%s14519_s0 + $0x690] ss:$24 sps:$4 sm:$0xff]  }
  0x73   :  { %2689 = vmatprep.subr.bf16.mxu0 %v11442_v0  ;;  %v10705_v54 = vld [vmem:[%s14518_s1 + $0x128] sm:$0xff]  }
  0x76   :  { %2690 = vmatpush1.bf16.msra.mxu0 %v10631_v59  ;;  %v10669_v59 = vld [vmem:[%s14519_s0 + $0xfc] ss:$24 sps:$4 sm:$0xff]  }
  0x77   :  { %2691 = vmatprep.subr.bf16.mxu0 %v11442_v0 }
  0x79   :  { %2319 = vmatmul.mubr.bf16.gmra.mrb[28].mxu0 %v10555_v43  ;;  %v10652_v43 = vld [vmem:[%s14519_s0 + $0x8] ss:$24 sps:$4 sm:$0xff]  }
  0x7a   :  { %2326 = vmatprep.mubr.bf16.mxu0 %v10556_v44  ;;  %2692 = vmatpush1.bf16.msra.mxu0 %v10638_v1  ;;  %v10655_v44 = vld [vmem:[%s14518_s1 + $0x100] sm:$0xff]   ;;  %v10728_v1 = vld [vmem:[%s14518_s1 + $0x138] sm:$0xff]  }
  0x7b   :  { %2693 = vmatprep.subr.bf16.mxu0 %v11442_v0 }
  0x7e   :  { %2694 = vmatpush1.bf16.msra.mxu0 %v10647_v6  ;;  %v10684_v6 = vld [vmem:[%s14519_s0 + $0x1b8] ss:$24 sps:$4 sm:$0xff]  }
  0x7f   :  { %3096 = vmatprep.subr.bf16.mxu0 %v11442_v0 }
  0x81   :  { %2327 = vmatmul.mubr.bf16.gmra.mrb[32].mxu0 %v10558_v45  ;;  %v10656_v45 = vld [vmem:[%s14519_s0 + $0x3c] ss:$24 sps:$4 sm:$0xff]  }
  0x82   :  { %2334 = vmatprep.mubr.bf16.mxu0 %v10559_v46  ;;  %v10665_v46 = vld [vmem:[%s14518_s1 + $0x108] sm:$0xff]  }
  0x89   :  { %2335 = vmatmul.mubr.bf16.gmra.mrb[36].mxu0 %v10561_v48  ;;  %v10659_v48 = vld [vmem:[%s14519_s0 + $0x6c] ss:$24 sps:$4 sm:$0xff]  }
  0x8a   :  { %2342 = vmatprep.mubr.bf16.mxu0 %v10563_v49  ;;  %v10675_v49 = vld [vmem:[%s14518_s1 + $0x110] sm:$0xff]  }
  0x91   :  { %2343 = vmatmul.mubr.bf16.gmra.mrb[40].mxu0 %v10565_v50  ;;  %v10685_v50 = vld [vmem:[%s14518_s1 + $0x118] sm:$0xff]  }
  0x92   :  { %2350 = vmatprep.mubr.bf16.mxu0 %v10566_v51  ;;  %v10661_v51 = vld [vmem:[%s14519_s0 + $0x68] ss:$24 sps:$4 sm:$0xff]  }
  0x99   :  { %2351 = vmatmul.mubr.bf16.gmra.mrb[44].mxu0 %v10568_v52  ;;  %v10662_v52 = vld [vmem:[%s14519_s0 + $0x9c] ss:$24 sps:$4 sm:$0xff]  }
  0x9a   :  { %2358 = vmatprep.mubr.bf16.mxu0 %v10570_v53  ;;  %v10695_v53 = vld [vmem:[%s14518_s1 + $0x120] sm:$0xff]  }
  0xa1   :  { %2359 = vmatmul.mubr.bf16.gmra.mrb[48].mxu0 %v10572_v55  ;;  %v10664_v55 = vld [vmem:[%s14519_s0 + $0x98] ss:$24 sps:$4 sm:$0xff]  }
  0xa2   :  { %2366 = vmatprep.mubr.bf16.mxu0 %v10573_v56  ;;  %v10666_v56 = vld [vmem:[%s14519_s0 + $0xcc] ss:$24 sps:$4 sm:$0xff]  }
  0xa9   :  { %2367 = vmatmul.mubr.bf16.gmra.mrb[52].mxu0 %v10575_v57  ;;  %v10717_v57 = vld [vmem:[%s14518_s1 + $0x130] sm:$0xff]  }
  0xaa   :  { %2374 = vmatprep.mubr.bf16.mxu0 %v10577_v58  ;;  %v10668_v58 = vld [vmem:[%s14519_s0 + $0xc8] ss:$24 sps:$4 sm:$0xff]  }
  0xb1   :  { %2375 = vmatmul.mubr.bf16.gmra.mrb[56].mxu0 %v10579_v60  ;;  %v10671_v60 = vld [vmem:[%s14519_s0 + $0xf8] ss:$24 sps:$4 sm:$0xff]  }
  0xb2   :  { %2382 = vmatprep.mubr.bf16.mxu0 %v10580_v61  ;;  %v10672_v61 = vld [vmem:[%s14519_s0 + $0x12c] ss:$24 sps:$4 sm:$0xff]  }
  0xb9   :  { %2383 = vmatmul.mubr.bf16.gmra.mrb[60].mxu0 %v10582_v62  ;;  %v10674_v62 = vld [vmem:[%s14519_s0 + $0x128] ss:$24 sps:$4 sm:$0xff]  }
  0xba   :  { %2390 = vmatprep.mubr.bf16.mxu0 %v10583_v63  ;;  %v10676_v63 = vld [vmem:[%s14519_s0 + $0x15c] ss:$24 sps:$4 sm:$0xff]  }
  0xc1   :  { %2391 = vmatmul.mubr.bf16.gmra.mrb[64].mxu0 %v10586_v2  ;;  %v10678_v2 = vld [vmem:[%s14519_s0 + $0x158] ss:$24 sps:$4 sm:$0xff]  }
  0xc2   :  { %2398 = vmatprep.mubr.bf16.mxu0 %v10587_v3  ;;  %v10679_v3 = vld [vmem:[%s14519_s0 + $0x18c] ss:$24 sps:$4 sm:$0xff]  }
  0xc9   :  { %2399 = vmatmul.mubr.bf16.gmra.mrb[68].mxu0 %v10589_v4  ;;  %v10681_v4 = vld [vmem:[%s14519_s0 + $0x188] ss:$24 sps:$4 sm:$0xff]  }
  0xca   :  { %2406 = vmatprep.mubr.bf16.mxu0 %v10590_v5  ;;  %v10682_v5 = vld [vmem:[%s14519_s0 + $0x1bc] ss:$24 sps:$4 sm:$0xff]  }
  0xd1   :  { %2407 = vmatmul.mubr.bf16.gmra.mrb[72].mxu0 %v10592_v7  ;;  %v10686_v7 = vld [vmem:[%s14519_s0 + $0x1ec] ss:$24 sps:$4 sm:$0xff]  }
  0xd2   :  { %2414 = vmatprep.mubr.bf16.mxu0 %v10594_v8  ;;  %v10738_v8 = vld [vmem:[%s14518_s1 + $0x140] sm:$0xff]  }
  0xd9   :  { %2415 = vmatmul.mubr.bf16.gmra.mrb[76].mxu0 %v10596_v9  ;;  %v10688_v9 = vld [vmem:[%s14519_s0 + $0x1e8] ss:$24 sps:$4 sm:$0xff]  }
  0xda   :  { %2422 = vmatprep.mubr.bf16.mxu0 %v10597_v10  ;;  %v10689_v10 = vld [vmem:[%s14519_s0 + $0x21c] ss:$24 sps:$4 sm:$0xff]  }
  0xe1   :  { %2423 = vmatmul.mubr.bf16.gmra.mrb[80].mxu0 %v10599_v11  ;;  %v10691_v11 = vld [vmem:[%s14519_s0 + $0x218] ss:$24 sps:$4 sm:$0xff]  }
  0xe2   :  { %2430 = vmatprep.mubr.bf16.mxu0 %v10601_v12  ;;  %v10692_v12 = vld [vmem:[%s14519_s0 + $0x24c] ss:$24 sps:$4 sm:$0xff]  }
  0xe9   :  { %2431 = vmatmul.mubr.bf16.gmra.mrb[84].mxu0 %v10603_v13  ;;  %v10694_v13 = vld [vmem:[%s14519_s0 + $0x248] ss:$24 sps:$4 sm:$0xff]  }
  0xea   :  { %2438 = vmatprep.mubr.bf16.mxu0 %v10604_v14  ;;  %v10696_v14 = vld [vmem:[%s14519_s0 + $0x27c] ss:$24 sps:$4 sm:$0xff]  }
  0xf1   :  { %2439 = vmatmul.mubr.bf16.gmra.mrb[88].mxu0 %v10606_v15  ;;  %v10748_v15 = vld [vmem:[%s14518_s1 + $0x148] sm:$0xff]  }
  0xf2   :  { %2446 = vmatprep.mubr.bf16.mxu0 %v10608_v16  ;;  %v10698_v16 = vld [vmem:[%s14519_s0 + $0x278] ss:$24 sps:$4 sm:$0xff]  }
  0xf9   :  { %2447 = vmatmul.mubr.bf16.gmra.mrb[92].mxu0 %v10610_v17  ;;  %v10699_v17 = vld [vmem:[%s14519_s0 + $0x2ac] ss:$24 sps:$4 sm:$0xff]  }
  0xfa   :  { %2454 = vmatprep.mubr.bf16.mxu0 %v10611_v18  ;;  %v10701_v18 = vld [vmem:[%s14519_s0 + $0x2a8] ss:$24 sps:$4 sm:$0xff]  }
 0x101   :  { %2455 = vmatmul.mubr.bf16.gmra.mrb[96].mxu0 %v10613_v19  ;;  %v10702_v19 = vld [vmem:[%s14519_s0 + $0x2dc] ss:$24 sps:$4 sm:$0xff]  }
 0x102   :  { %2462 = vmatprep.mubr.bf16.mxu0 %v10614_v20  ;;  %v10704_v20 = vld [vmem:[%s14519_s0 + $0x2d8] ss:$24 sps:$4 sm:$0xff]  }
 0x109   :  { %2463 = vmatmul.mubr.bf16.gmra.mrb[100].mxu0 %v10617_v21  ;;  %v10706_v21 = vld [vmem:[%s14519_s0 + $0x30c] ss:$24 sps:$4 sm:$0xff]  }
 0x10a   :  { %2470 = vmatprep.mubr.bf16.mxu0 %v10618_v22  ;;  %v10758_v22 = vld [vmem:[%s14518_s1 + $0x150] sm:$0xff]  }
 0x111   :  { %2471 = vmatmul.mubr.bf16.gmra.mrb[104].mxu0 %v10620_v23  ;;  %v10708_v23 = vld [vmem:[%s14519_s0 + $0x308] ss:$24 sps:$4 sm:$0xff]  }
 0x112   :  { %2478 = vmatprep.mubr.bf16.mxu0 %v10621_v24  ;;  %v10709_v24 = vld [vmem:[%s14519_s0 + $0x33c] ss:$24 sps:$4 sm:$0xff]  }
 0x119   :  { %2479 = vmatmul.mubr.bf16.gmra.mrb[108].mxu0 %v10623_v25  ;;  %v10711_v25 = vld [vmem:[%s14519_s0 + $0x338] ss:$24 sps:$4 sm:$0xff]  }
 0x11a   :  { %2486 = vmatprep.mubr.bf16.mxu0 %v10625_v26  ;;  %v10712_v26 = vld [vmem:[%s14519_s0 + $0x36c] ss:$24 sps:$4 sm:$0xff]  }
 0x121   :  { %2487 = vmatmul.mubr.bf16.gmra.mrb[112].mxu0 %v10627_v27  ;;  %v10714_v27 = vld [vmem:[%s14519_s0 + $0x368] ss:$24 sps:$4 sm:$0xff]  }
 0x122   :  { %2494 = vmatprep.mubr.bf16.mxu0 %v10628_v28  ;;  %v10715_v28 = vld [vmem:[%s14519_s0 + $0x39c] ss:$24 sps:$4 sm:$0xff]  }
 0x129   :  { %2495 = vmatmul.mubr.bf16.gmra.mrb[116].mxu0 %v10630_v29  ;;  %v10768_v29 = vld [vmem:[%s14518_s1 + $0x158] sm:$0xff]  }
 0x12a   :  { %2502 = vmatprep.mubr.bf16.mxu0 %v10632_v30  ;;  %v10718_v30 = vld [vmem:[%s14519_s0 + $0x398] ss:$24 sps:$4 sm:$0xff]  }
 0x131   :  { %2503 = vmatmul.mubr.bf16.gmra.mrb[120].mxu0 %v10634_v31  ;;  %v10719_v31 = vld [vmem:[%s14519_s0 + $0x3cc] ss:$24 sps:$4 sm:$0xff]  }
 0x132   :  { %2510 = vmatprep.mubr.bf16.mxu0 %v10635_v32  ;;  %v10721_v32 = vld [vmem:[%s14519_s0 + $0x3c8] ss:$24 sps:$4 sm:$0xff]  }
 0x139   :  { %2511 = vmatmul.mubr.bf16.gmra.mrb[124].mxu0 %v10637_v33  ;;  %v10722_v33 = vld [vmem:[%s14519_s0 + $0x3fc] ss:$24 sps:$4 sm:$0xff]  }
 0x13a   :  { %2518 = vmatprep.mubr.bf16.mxu0 %v10639_v34  ;;  %v10724_v34 = vld [vmem:[%s14519_s0 + $0x3f8] ss:$24 sps:$4 sm:$0xff]  }
 0x141   :  { %2519 = vmatmul.mubr.bf16.gmra.mrb[128].mxu0 %v10641_v35  ;;  %v10725_v35 = vld [vmem:[%s14519_s0 + $0x42c] ss:$24 sps:$4 sm:$0xff]  }
 0x142   :  { %2526 = vmatprep.mubr.bf16.mxu0 %v10642_v36  ;;  %v10778_v36 = vld [vmem:[%s14518_s1 + $0x160] sm:$0xff]  }
 0x149   :  { %2527 = vmatmul.mubr.bf16.gmra.mrb[132].mxu0 %v10644_v37  ;;  %v10727_v37 = vld [vmem:[%s14519_s0 + $0x428] ss:$24 sps:$4 sm:$0xff]  }
 0x14a   :  { %2534 = vmatprep.mubr.bf16.mxu0 %v10645_v38  ;;  %v10729_v38 = vld [vmem:[%s14519_s0 + $0x45c] ss:$24 sps:$4 sm:$0xff]  }
 0x151   :  { %2535 = vmatmul.mubr.bf16.gmra.mrb[136].mxu0 %v10648_v39  ;;  %v10731_v39 = vld [vmem:[%s14519_s0 + $0x458] ss:$24 sps:$4 sm:$0xff]  }
 0x152   :  { %2542 = vmatprep.mubr.bf16.mxu0 %v10649_v40  ;;  %v10732_v40 = vld [vmem:[%s14519_s0 + $0x48c] ss:$24 sps:$4 sm:$0xff]  }
 0x159   :  { %2543 = vmatmul.mubr.bf16.gmra.mrb[140].mxu0 %v10651_v41  ;;  %v10734_v41 = vld [vmem:[%s14519_s0 + $0x488] ss:$24 sps:$4 sm:$0xff]  }
 0x15a   :  { %2695 = vmatprep.mubr.bf16.mxu0 %v10654_v42  ;;  %v10735_v42 = vld [vmem:[%s14519_s0 + $0x4bc] ss:$24 sps:$4 sm:$0xff]  }
 0x161   :  { %2696 = vmatmul.mubr.bf16.vlgmr.msra.gmra.mrb[0].mxu0 %v10652_v43  ;;  %v10788_v43 = vld [vmem:[%s14518_s1 + $0x168] sm:$0xff]  }
 0x162   :  { %3097 = vmatpush1.bf16.msra.mxu0 %v10655_v44  ;;  %2703 = vmatprep.mubr.bf16.mxu0 %v10656_v45  ;;  %v10737_v44 = vld [vmem:[%s14519_s0 + $0x4b8] ss:$24 sps:$4 sm:$0xff]   ;;  %v10739_v45 = vld [vmem:[%s14519_s0 + $0x4ec] ss:$24 sps:$4 sm:$0xff]  }
 0x163   :  { %3098 = vmatprep.subr.bf16.mxu0 %v11442_v0 }
 0x166   :  { %3099 = vmatpush1.bf16.msra.mxu0 %v10665_v46  ;;  %v10741_v46 = vld [vmem:[%s14519_s0 + $0x4e8] ss:$24 sps:$4 sm:$0xff]  }
 0x167   :  { %3100 = vmatprep.subr.bf16.mxu0 %v11442_v0 }
 0x169   :  { %2704 = vmatmul.mubr.bf16.gmra.mrb[4].mxu0 %v10658_v47  ;;  %v10742_v47 = vld [vmem:[%s14519_s0 + $0x51c] ss:$24 sps:$4 sm:$0xff]  }
 0x16a   :  { %2711 = vmatprep.mubr.bf16.mxu0 %v10659_v48  ;;  %3101 = vmatpush1.bf16.msra.mxu0 %v10675_v49  ;;  %v10744_v48 = vld [vmem:[%s14519_s0 + $0x518] ss:$24 sps:$4 sm:$0xff]   ;;  %v10745_v49 = vld [vmem:[%s14519_s0 + $0x54c] ss:$24 sps:$4 sm:$0xff]  }
 0x16b   :  { %3102 = vmatprep.subr.bf16.mxu0 %v11442_v0 }
 0x16e   :  { %3103 = vmatpush1.bf16.msra.mxu0 %v10685_v50  ;;  %v10800_v50 = vld [vmem:[%s14518_s1 + $0x170] sm:$0xff]  }
 0x16f   :  { %3104 = vmatprep.subr.bf16.mxu0 %v11442_v0 }
 0x171   :  { %2712 = vmatmul.mubr.bf16.gmra.mrb[8].mxu0 %v10661_v51  ;;  %v10747_v51 = vld [vmem:[%s14519_s0 + $0x548] ss:$24 sps:$4 sm:$0xff]  }
 0x172   :  { %2719 = vmatprep.mubr.bf16.mxu0 %v10662_v52  ;;  %3105 = vmatpush1.bf16.msra.mxu0 %v10695_v53  ;;  %v10749_v52 = vld [vmem:[%s14519_s0 + $0x57c] ss:$24 sps:$4 sm:$0xff]   ;;  %v10751_v53 = vld [vmem:[%s14519_s0 + $0x578] ss:$24 sps:$4 sm:$0xff]  }
 0x173   :  { %3106 = vmatprep.subr.bf16.mxu0 %v11442_v0 }
 0x176   :  { %3107 = vmatpush1.bf16.msra.mxu0 %v10705_v54  ;;  %v10752_v54 = vld [vmem:[%s14519_s0 + $0x5ac] ss:$24 sps:$4 sm:$0xff]  }
 0x177   :  { %3108 = vmatprep.subr.bf16.mxu0 %v11442_v0 }
 0x179   :  { %2720 = vmatmul.mubr.bf16.gmra.mrb[12].mxu0 %v10664_v55  ;;  %v10755_v55 = vld [vmem:[%s14519_s0 + $0x5dc] ss:$24 sps:$4 sm:$0xff]  }
 0x17a   :  { %2727 = vmatprep.mubr.bf16.mxu0 %v10666_v56  ;;  %3109 = vmatpush1.bf16.msra.mxu0 %v10717_v57  ;;  %v10757_v56 = vld [vmem:[%s14519_s0 + $0x5d8] ss:$24 sps:$4 sm:$0xff]   ;;  %v10759_v57 = vld [vmem:[%s14519_s0 + $0x60c] ss:$24 sps:$4 sm:$0xff]  }
 0x17b   :  { %3110 = vmatprep.subr.bf16.mxu0 %v11442_v0 }
 0x17e   :  { %3111 = vmatpush1.bf16.msra.mxu0 %v10728_v1  ;;  %v10769_v1 = vld [vmem:[%s14519_s0 + $0x69c] ss:$24 sps:$4 sm:$0xff]  }
 0x17f   :  { %3112 = vmatprep.subr.bf16.mxu0 %v11442_v0 }
 0x181   :  { %2728 = vmatmul.mubr.bf16.gmra.mrb[16].mxu0 %v10668_v58  ;;  %v10811_v58 = vld [vmem:[%s14518_s1 + $0x178] sm:$0xff]  }
 0x182   :  { %2735 = vmatprep.mubr.bf16.mxu0 %v10669_v59  ;;  %3113 = vmatpush1.bf16.msra.mxu0 %v10738_v8  ;;  %v10761_v59 = vld [vmem:[%s14519_s0 + $0x608] ss:$24 sps:$4 sm:$0xff]  }
 0x183   :  { %3114 = vmatprep.subr.bf16.mxu0 %v11442_v0  ;;  %v10781_v8 = vld [vmem:[%s14519_s0 + $0x728] ss:$24 sps:$4 sm:$0xff]  }
 0x186   :  { %3115 = vmatpush1.bf16.msra.mxu0 %v10748_v15  ;;  %v10792_v15 = vld [vmem:[%s14519_s0 + $0x7ec] ss:$24 sps:$4 sm:$0xff]  }
 0x187   :  { %3116 = vmatprep.subr.bf16.mxu0 %v11442_v0 }
 0x189   :  { %2736 = vmatmul.mubr.bf16.gmra.mrb[20].mxu0 %v10671_v60  ;;  %v10762_v60 = vld [vmem:[%s14519_s0 + $0x63c] ss:$24 sps:$4 sm:$0xff]  }
 0x18a   :  { %2743 = vmatprep.mubr.bf16.mxu0 %v10672_v61  ;;  %3117 = vmatpush1.bf16.msra.mxu0 %v10758_v22  ;;  %v10764_v61 = vld [vmem:[%s14519_s0 + $0x638] ss:$24 sps:$4 sm:$0xff]  }
 0x18b   :  { %3118 = vmatprep.subr.bf16.mxu0 %v11442_v0  ;;  %v10804_v22 = vld [vmem:[%s14519_s0 + $0x878] ss:$24 sps:$4 sm:$0xff]  }
 0x18e   :  { %3119 = vmatpush1.bf16.msra.mxu0 %v10768_v29  ;;  %v10815_v29 = vld [vmem:[%s14519_s0 + $0x93c] ss:$24 sps:$4 sm:$0xff]  }
 0x18f   :  { %3120 = vmatprep.subr.bf16.mxu0 %v11442_v0 }
 0x191   :  { %2744 = vmatmul.mubr.bf16.gmra.mrb[24].mxu0 %v10674_v62  ;;  %v10765_v62 = vld [vmem:[%s14519_s0 + $0x66c] ss:$24 sps:$4 sm:$0xff]  }
 0x192   :  { %2751 = vmatprep.mubr.bf16.mxu0 %v10676_v63  ;;  %3121 = vmatpush1.bf16.msra.mxu0 %v10778_v36  ;;  %v10767_v63 = vld [vmem:[%s14519_s0 + $0x668] ss:$24 sps:$4 sm:$0xff]  }
 0x193   :  { %3122 = vmatprep.subr.bf16.mxu0 %v11442_v0  ;;  %v10826_v36 = vld [vmem:[%s14519_s0 + $0x70] ss:$24 sps:$4 sm:$0xff]  }
 0x196   :  { %3123 = vmatpush1.bf16.msra.mxu0 %v10788_v43  ;;  %v10836_v43 = vld [vmem:[%s14519_s0 + $0x134] ss:$24 sps:$4 sm:$0xff]  }
 0x197   :  { %3124 = vmatprep.subr.bf16.mxu0 %v11442_v0 }
 0x199   :  { %2752 = vmatmul.mubr.bf16.gmra.mrb[28].mxu0 %v10678_v2  ;;  %v10771_v2 = vld [vmem:[%s14519_s0 + $0x698] ss:$24 sps:$4 sm:$0xff]  }
 0x19a   :  { %2759 = vmatprep.mubr.bf16.mxu0 %v10679_v3  ;;  %3125 = vmatpush1.bf16.msra.mxu0 %v10800_v50  ;;  %v10772_v3 = vld [vmem:[%s14519_s0 + $0x6cc] ss:$24 sps:$4 sm:$0xff]   ;;  %v10847_v50 = vld [vmem:[%s14519_s0 + $0x1c0] ss:$24 sps:$4 sm:$0xff]  }
 0x19b   :  { %3126 = vmatprep.subr.bf16.mxu0 %v11442_v0  ;;  %v10754_v0 = vld [vmem:[%s14519_s0 + $0x5a8] ss:$24 sps:$4 sm:$0xff]  }
 0x19e   :  { %3127 = vmatpush1.bf16.msra.mxu0 %v10811_v58  ;;  %v10860_v58 = vld [vmem:[%s14519_s0 + $0x2b4] ss:$24 sps:$4 sm:$0xff]  }
 0x1a1   :  { %2760 = vmatmul.mubr.bf16.gmra.mrb[32].mxu0 %v10681_v4  ;;  %v10774_v4 = vld [vmem:[%s14519_s0 + $0x6c8] ss:$24 sps:$4 sm:$0xff]  }
 0x1a2   :  { %2767 = vmatprep.mubr.bf16.mxu0 %v10682_v5  ;;  %v10775_v5 = vld [vmem:[%s14519_s0 + $0x6fc] ss:$24 sps:$4 sm:$0xff]  }
 0x1a9   :  { %2768 = vmatmul.mubr.bf16.gmra.mrb[36].mxu0 %v10684_v6  ;;  %v10777_v6 = vld [vmem:[%s14519_s0 + $0x6f8] ss:$24 sps:$4 sm:$0xff]  }
 0x1aa   :  { %2775 = vmatprep.mubr.bf16.mxu0 %v10686_v7  ;;  %v10779_v7 = vld [vmem:[%s14519_s0 + $0x72c] ss:$24 sps:$4 sm:$0xff]  }
 0x1b1   :  { %2776 = vmatmul.mubr.bf16.gmra.mrb[40].mxu0 %v10688_v9  ;;  %v10782_v9 = vld [vmem:[%s14519_s0 + $0x75c] ss:$24 sps:$4 sm:$0xff]  }
 0x1b2   :  { %2783 = vmatprep.mubr.bf16.mxu0 %v10689_v10  ;;  %v10784_v10 = vld [vmem:[%s14519_s0 + $0x758] ss:$24 sps:$4 sm:$0xff]  }
 0x1b9   :  { %2784 = vmatmul.mubr.bf16.gmra.mrb[44].mxu0 %v10691_v11  ;;  %v10785_v11 = vld [vmem:[%s14519_s0 + $0x78c] ss:$24 sps:$4 sm:$0xff]  }
 0x1ba   :  { %2791 = vmatprep.mubr.bf16.mxu0 %v10692_v12  ;;  %v10787_v12 = vld [vmem:[%s14519_s0 + $0x788] ss:$24 sps:$4 sm:$0xff]  }
 0x1c1   :  { %2792 = vmatmul.mubr.bf16.gmra.mrb[48].mxu0 %v10694_v13  ;;  %v10789_v13 = vld [vmem:[%s14519_s0 + $0x7bc] ss:$24 sps:$4 sm:$0xff]  }
 0x1c2   :  { %2799 = vmatprep.mubr.bf16.mxu0 %v10696_v14  ;;  %v10791_v14 = vld [vmem:[%s14519_s0 + $0x7b8] ss:$24 sps:$4 sm:$0xff]  }
 0x1c9   :  { %2800 = vmatmul.mubr.bf16.gmra.mrb[52].mxu0 %v10698_v16  ;;  %v10794_v16 = vld [vmem:[%s14519_s0 + $0x7e8] ss:$24 sps:$4 sm:$0xff]  }
 0x1ca   :  { %2807 = vmatprep.mubr.bf16.mxu0 %v10699_v17  ;;  %v10795_v17 = vld [vmem:[%s14519_s0 + $0x81c] ss:$24 sps:$4 sm:$0xff]  }
 0x1d1   :  { %2808 = vmatmul.mubr.bf16.gmra.mrb[56].mxu0 %v10701_v18  ;;  %v10797_v18 = vld [vmem:[%s14519_s0 + $0x818] ss:$24 sps:$4 sm:$0xff]  }
 0x1d2   :  { %2815 = vmatprep.mubr.bf16.mxu0 %v10702_v19  ;;  %v10798_v19 = vld [vmem:[%s14519_s0 + $0x84c] ss:$24 sps:$4 sm:$0xff]  }
 0x1d9   :  { %2816 = vmatmul.mubr.bf16.gmra.mrb[60].mxu0 %v10704_v20  ;;  %v10801_v20 = vld [vmem:[%s14519_s0 + $0x848] ss:$24 sps:$4 sm:$0xff]  }
 0x1da   :  { %2823 = vmatprep.mubr.bf16.mxu0 %v10706_v21  ;;  %v10802_v21 = vld [vmem:[%s14519_s0 + $0x87c] ss:$24 sps:$4 sm:$0xff]  }
 0x1e1   :  { %2824 = vmatmul.mubr.bf16.gmra.mrb[64].mxu0 %v10708_v23  ;;  %v10805_v23 = vld [vmem:[%s14519_s0 + $0x8ac] ss:$24 sps:$4 sm:$0xff]  }
 0x1e2   :  { %2831 = vmatprep.mubr.bf16.mxu0 %v10709_v24  ;;  %v10807_v24 = vld [vmem:[%s14519_s0 + $0x8a8] ss:$24 sps:$4 sm:$0xff]  }
 0x1e9   :  { %2832 = vmatmul.mubr.bf16.gmra.mrb[68].mxu0 %v10711_v25  ;;  %v10808_v25 = vld [vmem:[%s14519_s0 + $0x8dc] ss:$24 sps:$4 sm:$0xff]  }
 0x1ea   :  { %2839 = vmatprep.mubr.bf16.mxu0 %v10712_v26  ;;  %v10810_v26 = vld [vmem:[%s14519_s0 + $0x8d8] ss:$24 sps:$4 sm:$0xff]  }
 0x1f1   :  { %2840 = vmatmul.mubr.bf16.gmra.mrb[72].mxu0 %v10714_v27  ;;  %v10812_v27 = vld [vmem:[%s14519_s0 + $0x90c] ss:$24 sps:$4 sm:$0xff]  }
 0x1f2   :  { %2847 = vmatprep.mubr.bf16.mxu0 %v10715_v28  ;;  %v10814_v28 = vld [vmem:[%s14519_s0 + $0x908] ss:$24 sps:$4 sm:$0xff]  }
 0x1f9   :  { %2848 = vmatmul.mubr.bf16.gmra.mrb[76].mxu0 %v10718_v30  ;;  %v10817_v30 = vld [vmem:[%s14519_s0 + $0x938] ss:$24 sps:$4 sm:$0xff]  }
 0x1fa   :  { %2855 = vmatprep.mubr.bf16.mxu0 %v10719_v31  ;;  %v10820_v31 = vld [vmem:[%s14519_s0 + $0x14] ss:$24 sps:$4 sm:$0xff]  }
 0x201   :  { %2856 = vmatmul.mubr.bf16.gmra.mrb[80].mxu0 %v10721_v32  ;;  %v10818_v32 = vld [vmem:[%s14519_s0 + $0x10] ss:$24 sps:$4 sm:$0xff]  }
 0x202   :  { %2863 = vmatprep.mubr.bf16.mxu0 %v10722_v33  ;;  %v10821_v33 = vld [vmem:[%s14519_s0 + $0x44] ss:$24 sps:$4 sm:$0xff]  }
 0x209   :  { %2864 = vmatmul.mubr.bf16.gmra.mrb[84].mxu0 %v10724_v34  ;;  %v10823_v34 = vld [vmem:[%s14519_s0 + $0x40] ss:$24 sps:$4 sm:$0xff]  }
 0x20a   :  { %2871 = vmatprep.mubr.bf16.mxu0 %v10725_v35  ;;  %v10824_v35 = vld [vmem:[%s14519_s0 + $0x74] ss:$24 sps:$4 sm:$0xff]  }
 0x211   :  { %2872 = vmatmul.mubr.bf16.gmra.mrb[88].mxu0 %v10727_v37  ;;  %v10827_v37 = vld [vmem:[%s14519_s0 + $0xa4] ss:$24 sps:$4 sm:$0xff]  }
 0x212   :  { %2879 = vmatprep.mubr.bf16.mxu0 %v10729_v38  ;;  %v10829_v38 = vld [vmem:[%s14519_s0 + $0xa0] ss:$24 sps:$4 sm:$0xff]  }
 0x219   :  { %2880 = vmatmul.mubr.bf16.gmra.mrb[92].mxu0 %v10731_v39  ;;  %v10830_v39 = vld [vmem:[%s14519_s0 + $0xd4] ss:$24 sps:$4 sm:$0xff]  }
 0x21a   :  { %2887 = vmatprep.mubr.bf16.mxu0 %v10732_v40  ;;  %v10832_v40 = vld [vmem:[%s14519_s0 + $0xd0] ss:$24 sps:$4 sm:$0xff]  }
 0x221   :  { %2888 = vmatmul.mubr.bf16.gmra.mrb[96].mxu0 %v10734_v41  ;;  %v10833_v41 = vld [vmem:[%s14519_s0 + $0x104] ss:$24 sps:$4 sm:$0xff]  }
 0x222   :  { %2895 = vmatprep.mubr.bf16.mxu0 %v10735_v42  ;;  %v10835_v42 = vld [vmem:[%s14519_s0 + $0x100] ss:$24 sps:$4 sm:$0xff]  }
 0x229   :  { %2896 = vmatmul.mubr.bf16.gmra.mrb[100].mxu0 %v10737_v44  ;;  %v10838_v44 = vld [vmem:[%s14519_s0 + $0x130] ss:$24 sps:$4 sm:$0xff]  }
 0x22a   :  { %2903 = vmatprep.mubr.bf16.mxu0 %v10739_v45  ;;  %v10839_v45 = vld [vmem:[%s14519_s0 + $0x164] ss:$24 sps:$4 sm:$0xff]  }
 0x231   :  { %2904 = vmatmul.mubr.bf16.gmra.mrb[104].mxu0 %v10741_v46  ;;  %v10841_v46 = vld [vmem:[%s14519_s0 + $0x160] ss:$24 sps:$4 sm:$0xff]  }
 0x232   :  { %2911 = vmatprep.mubr.bf16.mxu0 %v10742_v47  ;;  %v10842_v47 = vld [vmem:[%s14519_s0 + $0x194] ss:$24 sps:$4 sm:$0xff]  }
 0x239   :  { %2912 = vmatmul.mubr.bf16.gmra.mrb[108].mxu0 %v10744_v48  ;;  %v10844_v48 = vld [vmem:[%s14519_s0 + $0x190] ss:$24 sps:$4 sm:$0xff]  }
 0x23a   :  { %2919 = vmatprep.mubr.bf16.mxu0 %v10745_v49  ;;  %v10845_v49 = vld [vmem:[%s14519_s0 + $0x1c4] ss:$24 sps:$4 sm:$0xff]  }
 0x241   :  { %2920 = vmatmul.mubr.bf16.gmra.mrb[112].mxu0 %v10747_v51  ;;  %v10848_v51 = vld [vmem:[%s14519_s0 + $0x1f4] ss:$24 sps:$4 sm:$0xff]  }
 0x242   :  { %2927 = vmatprep.mubr.bf16.mxu0 %v10749_v52  ;;  %v10850_v52 = vld [vmem:[%s14519_s0 + $0x1f0] ss:$24 sps:$4 sm:$0xff]  }
 0x249   :  { %2928 = vmatmul.mubr.bf16.gmra.mrb[116].mxu0 %v10751_v53  ;;  %v10851_v53 = vld [vmem:[%s14519_s0 + $0x224] ss:$24 sps:$4 sm:$0xff]  }
 0x24a   :  { %2935 = vmatprep.mubr.bf16.mxu0 %v10752_v54  ;;  %v10853_v54 = vld [vmem:[%s14519_s0 + $0x220] ss:$24 sps:$4 sm:$0xff]  }
 0x251   :  { %2936 = vmatmul.mubr.bf16.gmra.mrb[120].mxu0 %v10754_v0  ;;  %v10854_v0 = vld [vmem:[%s14519_s0 + $0x254] ss:$24 sps:$4 sm:$0xff]  }
 0x252   :  { %2943 = vmatprep.mubr.bf16.mxu0 %v10755_v55  ;;  %v10856_v55 = vld [vmem:[%s14519_s0 + $0x250] ss:$24 sps:$4 sm:$0xff]  }
 0x259   :  { %2944 = vmatmul.mubr.bf16.gmra.mrb[124].mxu0 %v10757_v56  ;;  %v10857_v56 = vld [vmem:[%s14519_s0 + $0x284] ss:$24 sps:$4 sm:$0xff]  }
 0x25a   :  { %2951 = vmatprep.mubr.bf16.mxu0 %v10759_v57  ;;  %v10859_v57 = vld [vmem:[%s14519_s0 + $0x280] ss:$24 sps:$4 sm:$0xff]  }
 0x261   :  { %2952 = vmatmul.mubr.bf16.gmra.mrb[128].mxu0 %v10761_v59  ;;  %v10862_v59 = vld [vmem:[%s14519_s0 + $0x2b0] ss:$24 sps:$4 sm:$0xff]  }
 0x262   :  { %2959 = vmatprep.mubr.bf16.mxu0 %v10762_v60  ;;  %v10863_v60 = vld [vmem:[%s14519_s0 + $0x2e4] ss:$24 sps:$4 sm:$0xff]  }
 0x269   :  { %2960 = vmatmul.mubr.bf16.gmra.mrb[132].mxu0 %v10764_v61  ;;  %v10865_v61 = vld [vmem:[%s14519_s0 + $0x2e0] ss:$24 sps:$4 sm:$0xff]  }
 0x26a   :  { %2967 = vmatprep.mubr.bf16.mxu0 %v10765_v62  ;;  %v10866_v62 = vld [vmem:[%s14519_s0 + $0x314] ss:$24 sps:$4 sm:$0xff]  }
 0x271   :  { %2968 = vmatmul.mubr.bf16.gmra.mrb[136].mxu0 %v10767_v63  ;;  %v10868_v63 = vld [vmem:[%s14519_s0 + $0x310] ss:$24 sps:$4 sm:$0xff]  }
 0x272   :  { %2975 = vmatprep.mubr.bf16.mxu0 %v10769_v1  ;;  %v10869_v1 = vld [vmem:[%s14519_s0 + $0x344] ss:$24 sps:$4 sm:$0xff]  }
 0x279   :  { %2976 = vmatmul.mubr.bf16.gmra.mrb[140].mxu0 %v10771_v2  ;;  %v10871_v2 = vld [vmem:[%s14519_s0 + $0x340] ss:$24 sps:$4 sm:$0xff]  }
 0x27a   :  { %2983 = vmatprep.mubr.bf16.mxu0 %v10772_v3  ;;  %v10872_v3 = vld [vmem:[%s14519_s0 + $0x374] ss:$24 sps:$4 sm:$0xff]  }
 0x281   :  { %2984 = vmatmul.mubr.bf16.gmra.mrb[144].mxu0 %v10774_v4  ;;  %v10874_v4 = vld [vmem:[%s14519_s0 + $0x370] ss:$24 sps:$4 sm:$0xff]  }
 0x282   :  { %2991 = vmatprep.mubr.bf16.mxu0 %v10775_v5  ;;  %v10875_v5 = vld [vmem:[%s14519_s0 + $0x3a4] ss:$24 sps:$4 sm:$0xff]  }
 0x289   :  { %2992 = vmatmul.mubr.bf16.gmra.mrb[148].mxu0 %v10777_v6  ;;  %v10877_v6 = vld [vmem:[%s14519_s0 + $0x3a0] ss:$24 sps:$4 sm:$0xff]  }
 0x28a   :  { %2999 = vmatprep.mubr.bf16.mxu0 %v10779_v7  ;;  %v10878_v7 = vld [vmem:[%s14519_s0 + $0x3d4] ss:$24 sps:$4 sm:$0xff]  }
 0x291   :  { %3000 = vmatmul.mubr.bf16.gmra.mrb[152].mxu0 %v10781_v8  ;;  %v10928_v8 = vld [vmem:[%s14519_s0 + $0x6c4] ss:$24 sps:$4 sm:$0xff]  }
 0x292   :  { %3007 = vmatprep.mubr.bf16.mxu0 %v10782_v9  ;;  %v10926_v9 = vld [vmem:[%s14519_s0 + $0x6c0] ss:$24 sps:$4 sm:$0xff]   ;;  %2550 = vmatprep.mubr.bf16.mxu1 %v10928_v8 }
 0x293   :  { %2551 = vmatmul.mubr.bf16.vlgmr.msra.gmra.mrb[0].mxu1 %v10926_v9 }
 0x299   :  { %3008 = vmatmul.mubr.bf16.gmra.mrb[156].mxu0 %v10784_v10  ;;  %v10880_v10 = vld [vmem:[%s14519_s0 + $0x3d0] ss:$24 sps:$4 sm:$0xff]  }
 0x29a   :  { %3015 = vmatprep.mubr.bf16.mxu0 %v10785_v11  ;;  %v10881_v11 = vld [vmem:[%s14519_s0 + $0x404] ss:$24 sps:$4 sm:$0xff]  }
 0x2a1   :  { %3016 = vmatmul.mubr.bf16.gmra.mrb[160].mxu0 %v10787_v12  ;;  %v10932_v12 = vld [vmem:[%s14519_s0 + $0x6f4] ss:$24 sps:$4 sm:$0xff]  }
 0x2a2   :  { %3023 = vmatprep.mubr.bf16.mxu0 %v10789_v13  ;;  %v10934_v13 = vld [vmem:[%s14519_s0 + $0x6f0] ss:$24 sps:$4 sm:$0xff]   ;;  %2558 = vmatprep.mubr.bf16.mxu1 %v10932_v12 }
 0x2a3   :  { %2559 = vmatmul.mubr.bf16.gmra.mrb[4].mxu1 %v10934_v13  ;;  %v10986_v13 = vld [vmem:[%s14519_s0 + $0x8a4] ss:$24 sps:$4 sm:$0xff]  }
 0x2a9   :  { %3024 = vmatmul.mubr.bf16.gmra.mrb[164].mxu0 %v10791_v14  ;;  %v10883_v14 = vld [vmem:[%s14519_s0 + $0x400] ss:$24 sps:$4 sm:$0xff]  }
 0x2aa   :  { %3031 = vmatprep.mubr.bf16.mxu0 %v10792_v15  ;;  %v10884_v15 = vld [vmem:[%s14519_s0 + $0x434] ss:$24 sps:$4 sm:$0xff]  }
 0x2b1   :  { %3032 = vmatmul.mubr.bf16.gmra.mrb[168].mxu0 %v10794_v16  ;;  %v10938_v16 = vld [vmem:[%s14519_s0 + $0x724] ss:$24 sps:$4 sm:$0xff]  }
 0x2b2   :  { %3039 = vmatprep.mubr.bf16.mxu0 %v10795_v17  ;;  %v10940_v17 = vld [vmem:[%s14519_s0 + $0x720] ss:$24 sps:$4 sm:$0xff]   ;;  %2566 = vmatprep.mubr.bf16.mxu1 %v10938_v16  ;;  %v10910_v16 = vld [vmem:[%s14519_s0 + $0x5b0] ss:$24 sps:$4 sm:$0xff]  }
 0x2b3   :  { %2567 = vmatmul.mubr.bf16.gmra.mrb[8].mxu1 %v10940_v17  ;;  %v10988_v17 = vld [vmem:[%s14519_s0 + $0x8a0] ss:$24 sps:$4 sm:$0xff]  }
 0x2b9   :  { %3040 = vmatmul.mubr.bf16.gmra.mrb[172].mxu0 %v10797_v18  ;;  %v10886_v18 = vld [vmem:[%s14519_s0 + $0x430] ss:$24 sps:$4 sm:$0xff]  }
 0x2ba   :  { %3047 = vmatprep.mubr.bf16.mxu0 %v10798_v19  ;;  %v10887_v19 = vld [vmem:[%s14519_s0 + $0x464] ss:$24 sps:$4 sm:$0xff]  }
 0x2c1   :  { %3048 = vmatmul.mubr.bf16.gmra.mrb[176].mxu0 %v10801_v20  ;;  %v10944_v20 = vld [vmem:[%s14519_s0 + $0x754] ss:$24 sps:$4 sm:$0xff]  }
 0x2c2   :  { %3055 = vmatprep.mubr.bf16.mxu0 %v10802_v21  ;;  %v10946_v21 = vld [vmem:[%s14519_s0 + $0x750] ss:$24 sps:$4 sm:$0xff]   ;;  %2574 = vmatprep.mubr.bf16.mxu1 %v10944_v20 }
 0x2c3   :  { %2575 = vmatmul.mubr.bf16.gmra.mrb[12].mxu1 %v10946_v21 }
 0x2c9   :  { %3056 = vmatmul.mubr.bf16.gmra.mrb[180].mxu0 %v10804_v22  ;;  %v10889_v22 = vld [vmem:[%s14519_s0 + $0x460] ss:$24 sps:$4 sm:$0xff]  }
 0x2ca   :  { %3063 = vmatprep.mubr.bf16.mxu0 %v10805_v23  ;;  %v10890_v23 = vld [vmem:[%s14519_s0 + $0x494] ss:$24 sps:$4 sm:$0xff]  }
 0x2d1   :  { %3064 = vmatmul.mubr.bf16.gmra.mrb[184].mxu0 %v10807_v24  ;;  %v10950_v24 = vld [vmem:[%s14519_s0 + $0x784] ss:$24 sps:$4 sm:$0xff]  }
 0x2d2   :  { %3071 = vmatprep.mubr.bf16.mxu0 %v10808_v25  ;;  %v10952_v25 = vld [vmem:[%s14519_s0 + $0x780] ss:$24 sps:$4 sm:$0xff]   ;;  %2582 = vmatprep.mubr.bf16.mxu1 %v10950_v24 }
 0x2d3   :  { %2583 = vmatmul.mubr.bf16.gmra.mrb[16].mxu1 %v10952_v25 }
 0x2d9   :  { %3072 = vmatmul.mubr.bf16.gmra.mrb[188].mxu0 %v10810_v26  ;;  %v10892_v26 = vld [vmem:[%s14519_s0 + $0x490] ss:$24 sps:$4 sm:$0xff]  }
 0x2da   :  { %3079 = vmatprep.mubr.bf16.mxu0 %v10812_v27  ;;  %v10893_v27 = vld [vmem:[%s14519_s0 + $0x4c4] ss:$24 sps:$4 sm:$0xff]  }
 0x2e1   :  { %3080 = vmatmul.mubr.bf16.gmra.mrb[192].mxu0 %v10814_v28  ;;  %v10956_v28 = vld [vmem:[%s14519_s0 + $0x7b4] ss:$24 sps:$4 sm:$0xff]  }
 0x2e2   :  { %3087 = vmatprep.mubr.bf16.mxu0 %v10815_v29  ;;  %v10958_v29 = vld [vmem:[%s14519_s0 + $0x7b0] ss:$24 sps:$4 sm:$0xff]   ;;  %2590 = vmatprep.mubr.bf16.mxu1 %v10956_v28 }
 0x2e3   :  { %2591 = vmatmul.mubr.bf16.gmra.mrb[20].mxu1 %v10958_v29  ;;  %v10913_v29 = vld [vmem:[%s14519_s0 + $0x5e0] ss:$24 sps:$4 sm:$0xff]  }
 0x2e9   :  { %3088 = vmatmul.mubr.bf16.gmra.mrb[196].mxu0 %v10817_v30  ;;  %v10895_v30 = vld [vmem:[%s14519_s0 + $0x4c0] ss:$24 sps:$4 sm:$0xff]  }
 0x2ea   :  { %3128 = vmatprep.mubr.bf16.mxu0 %v10820_v31  ;;  %v10896_v31 = vld [vmem:[%s14519_s0 + $0x4f4] ss:$24 sps:$4 sm:$0xff]  }
 0x2f1   :  { %3129 = vmatmul.mubr.bf16.vlgmr.msra.gmra.mrb[0].mxu0 %v10818_v32  ;;  %v10962_v32 = vld [vmem:[%s14519_s0 + $0x7e4] ss:$24 sps:$4 sm:$0xff]  }
 0x2f2   :  { %3136 = vmatprep.mubr.bf16.mxu0 %v10821_v33  ;;  %v10898_v33 = vld [vmem:[%s14519_s0 + $0x4f0] ss:$24 sps:$4 sm:$0xff]   ;;  %2598 = vmatprep.mubr.bf16.mxu1 %v10962_v32  ;;  %v10914_v32 = vld [vmem:[%s14519_s0 + $0x614] ss:$24 sps:$4 sm:$0xff]  }
 0x2f9   :  { %3137 = vmatmul.mubr.bf16.gmra.mrb[4].mxu0 %v10823_v34  ;;  %v10964_v34 = vld [vmem:[%s14519_s0 + $0x7e0] ss:$24 sps:$4 sm:$0xff]  }
 0x2fa   :  { %3144 = vmatprep.mubr.bf16.mxu0 %v10824_v35  ;;  %v10899_v35 = vld [vmem:[%s14519_s0 + $0x524] ss:$24 sps:$4 sm:$0xff]   ;;  %2599 = vmatmul.mubr.bf16.gmra.mrb[24].mxu1 %v10964_v34 }
 0x301   :  { %3145 = vmatmul.mubr.bf16.gmra.mrb[8].mxu0 %v10826_v36  ;;  %v12437_v36 = vld [vmem:[%s14520_s2] ss:$0 sm:$0xff] }
 0x302   :  { %3152 = vmatprep.mubr.bf16.mxu0 %v10827_v37 }
 0x309   :  { %3153 = vmatmul.mubr.bf16.gmra.mrb[12].mxu0 %v10829_v38  ;;  %v10968_v38 = vld [vmem:[%s14519_s0 + $0x814] ss:$24 sps:$4 sm:$0xff]  }
 0x30a   :  { %3160 = vmatprep.mubr.bf16.mxu0 %v10830_v39  ;;  %2606 = vmatprep.mubr.bf16.mxu1 %v10968_v38 }
 0x311   :  { %3161 = vmatmul.mubr.bf16.gmra.mrb[16].mxu0 %v10832_v40 }
 0x312   :  { %3168 = vmatprep.mubr.bf16.mxu0 %v10833_v41  ;;  %v10901_v41 = vld [vmem:[%s14519_s0 + $0x520] ss:$24 sps:$4 sm:$0xff]  }
 0x319   :  { %3169 = vmatmul.mubr.bf16.gmra.mrb[20].mxu0 %v10835_v42  ;;  %v10970_v42 = vld [vmem:[%s14519_s0 + $0x810] ss:$24 sps:$4 sm:$0xff]  }
 0x31a   :  { %3176 = vmatprep.mubr.bf16.mxu0 %v10836_v43  ;;  %2607 = vmatmul.mubr.bf16.gmra.mrb[28].mxu1 %v10970_v42 }
 0x321   :  { %3177 = vmatmul.mubr.bf16.gmra.mrb[24].mxu0 %v10838_v44  ;;  %v10902_v44 = vld [vmem:[%s14519_s0 + $0x554] ss:$24 sps:$4 sm:$0xff]  }
 0x322   :  { %3184 = vmatprep.mubr.bf16.mxu0 %v10839_v45 }
 0x329   :  { %3185 = vmatmul.mubr.bf16.gmra.mrb[28].mxu0 %v10841_v46 }
 0x32a   :  { %3192 = vmatprep.mubr.bf16.mxu0 %v10842_v47 }
 0x331   :  { %3193 = vmatmul.mubr.bf16.gmra.mrb[32].mxu0 %v10844_v48 }
 0x332   :  { %3200 = vmatprep.mubr.bf16.mxu0 %v10845_v49 }
 0x339   :  { %3201 = vmatmul.mubr.bf16.gmra.mrb[36].mxu0 %v10847_v50 }
 0x33a   :  { %3208 = vmatprep.mubr.bf16.mxu0 %v10848_v51  ;;  %v10974_v51 = vld [vmem:[%s14519_s0 + $0x844] ss:$24 sps:$4 sm:$0xff]  }
 0x33b   :  { %2614 = vmatprep.mubr.bf16.mxu1 %v10974_v51 }
 0x341   :  { %3209 = vmatmul.mubr.bf16.gmra.mrb[40].mxu0 %v10850_v52 }
 0x342   :  { %3216 = vmatprep.mubr.bf16.mxu0 %v10851_v53 }
 0x349   :  { %3217 = vmatmul.mubr.bf16.gmra.mrb[44].mxu0 %v10853_v54  ;;  %v10904_v54 = vld [vmem:[%s14519_s0 + $0x550] ss:$24 sps:$4 sm:$0xff]  }
 0x34a   :  { %3224 = vmatprep.mubr.bf16.mxu0 %v10854_v0  ;;  %v10976_v0 = vld [vmem:[%s14519_s0 + $0x840] ss:$24 sps:$4 sm:$0xff]  }
 0x34b   :  { %2615 = vmatmul.mubr.bf16.gmra.mrb[32].mxu1 %v10976_v0  ;;  %v11004_v0 = vld [vmem:[%s14519_s0 + $0x934] ss:$24 sps:$4 sm:$0xff]  }
 0x351   :  { %3225 = vmatmul.mubr.bf16.gmra.mrb[48].mxu0 %v10856_v55 }
 0x352   :  { %3232 = vmatprep.mubr.bf16.mxu0 %v10857_v56  ;;  %v10905_v56 = vld [vmem:[%s14519_s0 + $0x584] ss:$24 sps:$4 sm:$0xff]  }
 0x359   :  { %3233 = vmatmul.mubr.bf16.gmra.mrb[52].mxu0 %v10859_v57 }
 0x35a   :  { %3240 = vmatprep.mubr.bf16.mxu0 %v10860_v58 }
 0x361   :  { %3241 = vmatmul.mubr.bf16.gmra.mrb[56].mxu0 %v10862_v59 }
 0x362   :  { %3248 = vmatprep.mubr.bf16.mxu0 %v10863_v60 }
 0x369   :  { %3249 = vmatmul.mubr.bf16.gmra.mrb[60].mxu0 %v10865_v61 }
 0x36a   :  { %3256 = vmatprep.mubr.bf16.mxu0 %v10866_v62 }
 0x371   :  { %3257 = vmatmul.mubr.bf16.gmra.mrb[64].mxu0 %v10868_v63  ;;  %v10980_v63 = vld [vmem:[%s14519_s0 + $0x874] ss:$24 sps:$4 sm:$0xff]  }
 0x372   :  { %3264 = vmatprep.mubr.bf16.mxu0 %v10869_v1  ;;  %2622 = vmatprep.mubr.bf16.mxu1 %v10980_v63 }
 0x379   :  { %3265 = vmatmul.mubr.bf16.gmra.mrb[68].mxu0 %v10871_v2 }
 0x37a   :  { %3272 = vmatprep.mubr.bf16.mxu0 %v10872_v3  ;;  %v10907_v3 = vld [vmem:[%s14519_s0 + $0x580] ss:$24 sps:$4 sm:$0xff]  }
 0x381   :  { %3273 = vmatmul.mubr.bf16.gmra.mrb[72].mxu0 %v10874_v4  ;;  %v10982_v4 = vld [vmem:[%s14519_s0 + $0x870] ss:$24 sps:$4 sm:$0xff]  }
 0x382   :  { %3280 = vmatprep.mubr.bf16.mxu0 %v10875_v5  ;;  %2623 = vmatmul.mubr.bf16.gmra.mrb[36].mxu1 %v10982_v4 }
 0x383   :  { %2630 = vmatprep.mubr.bf16.mxu1 %v10986_v13 }
 0x389   :  { %3281 = vmatmul.mubr.bf16.gmra.mrb[76].mxu0 %v10877_v6  ;;  %v10908_v6 = vld [vmem:[%s14519_s0 + $0x5b4] ss:$24 sps:$4 sm:$0xff]  }
 0x38a   :  { %3288 = vmatprep.mubr.bf16.mxu0 %v10878_v7  ;;  %2631 = vmatmul.mubr.bf16.gmra.mrb[40].mxu1 %v10988_v17 }
 0x391   :  { %3289 = vmatmul.mubr.bf16.gmra.mrb[80].mxu0 %v10880_v10 }
 0x392   :  { %3296 = vmatprep.mubr.bf16.mxu0 %v10881_v11 }
 0x399   :  { %3297 = vmatmul.mubr.bf16.gmra.mrb[84].mxu0 %v10883_v14 }
 0x39a   :  { %3304 = vmatprep.mubr.bf16.mxu0 %v10884_v15 }
 0x3a1   :  { %3305 = vmatmul.mubr.bf16.gmra.mrb[88].mxu0 %v10886_v18 }
 0x3a2   :  { %3312 = vmatprep.mubr.bf16.mxu0 %v10887_v19  ;;  %v10911_v19 = vld [vmem:[%s14519_s0 + $0x5e4] ss:$24 sps:$4 sm:$0xff]  }
 0x3a9   :  { %3313 = vmatmul.mubr.bf16.gmra.mrb[92].mxu0 %v10889_v22 }
 0x3aa   :  { %3320 = vmatprep.mubr.bf16.mxu0 %v10890_v23 }
 0x3b1   :  { %3321 = vmatmul.mubr.bf16.gmra.mrb[96].mxu0 %v10892_v26  ;;  %v10992_v26 = vld [vmem:[%s14519_s0 + $0x8d4] ss:$24 sps:$4 sm:$0xff]  }
 0x3b2   :  { %3328 = vmatprep.mubr.bf16.mxu0 %v10893_v27  ;;  %2638 = vmatprep.mubr.bf16.mxu1 %v10992_v26  ;;  %v11019_v26 = vld [vmem:[%s14521_s3 + $0x20] sm:$0xff]  }
 0x3b9   :  { %3329 = vmatmul.mubr.bf16.gmra.mrb[100].mxu0 %v10895_v30  ;;  %v10994_v30 = vld [vmem:[%s14519_s0 + $0x8d0] ss:$24 sps:$4 sm:$0xff]  }
 0x3ba   :  { %3336 = vmatprep.mubr.bf16.mxu0 %v10896_v31  ;;  %2639 = vmatmul.mubr.bf16.gmra.mrb[44].mxu1 %v10994_v30 }
 0x3c1   :  { %3337 = vmatmul.mubr.bf16.gmra.mrb[104].mxu0 %v10898_v33 }
 0x3c2   :  { %3344 = vmatprep.mubr.bf16.mxu0 %v10899_v35 }
 0x3c4   :  { %v3130_v37 = vpop.f32.mrb[0].mxu0 }
 0x3c5   :  { %v10027_v39 = vadd.f32 %v12437_v36, %v3130_v37  ;;  %v3132_v40 = vpop.f32.mrb[1].mxu0 }
 0x3c6   :  { %v3133_v43 = vpop.f32.mrb[2].mxu0  ;;  %v10998_v40 = vld [vmem:[%s14519_s0 + $0x904] ss:$24 sps:$4 sm:$0xff]  }
 0x3c7   :  { %v10028_v45 = vadd.f32 %v12437_v36, %v3133_v43  ;;  %v3135_v46 = vpop.f32.mrb[3].mxu0  ;;  %v3529_v47 = vmax.f32 %v10027_v39, 0.0  ;;  %v10916_v43 = vld [vmem:[%s14519_s0 + $0x610] ss:$24 sps:$4 sm:$0xff]   ;;  %2646 = vmatprep.mubr.bf16.mxu1 %v10998_v40 }
 0x3c8   :  { %v10917_v46 = vld [vmem:[%s14519_s0 + $0x644] ss:$24 sps:$4 sm:$0xff]  }
 0x3c9   :  { %v3530_v48 = vmax.f32 %v10028_v45, 0.0  ;;  %3345 = vmatmul.mubr.bf16.gmra.mrb[108].mxu0 %v10901_v41 }
 0x3ca   :  { %3352 = vmatprep.mubr.bf16.mxu0 %v10902_v44  ;;  %v11000_v44 = vld [vmem:[%s14519_s0 + $0x900] ss:$24 sps:$4 sm:$0xff]  }
 0x3cb   :  { %v3629_v49 = vpack.c.bf16 %v3530_v48, %v3529_v47  ;;  %2647 = vmatmul.mubr.bf16.gmra.mrb[48].mxu1 %v11000_v44 }
 0x3cc   :  { %v3138_v50 = vpop.f32.mrb[4].mxu0  ;;  %2654 = vmatprep.mubr.bf16.mxu1 %v11004_v0 }
 0x3cd   :  { %3679 = vst [vmem:[#allocation2] sm:$0xff] %v3629_v49  ;;  %v10029_v52 = vadd.f32 %v12437_v36, %v3138_v50  ;;  %v3140_v53 = vpop.f32.mrb[5].mxu0 }
 0x3ce   :  { %v3141_v55 = vpop.f32.mrb[6].mxu0 }
 0x3cf   :  { %v10030_v57 = vadd.f32 %v12437_v36, %v3141_v55  ;;  %v3143_v58 = vpop.f32.mrb[7].mxu0  ;;  %v3531_v59 = vmax.f32 %v10029_v52, 0.0  ;;  %v10919_v52 = vld [vmem:[%s14519_s0 + $0x640] ss:$24 sps:$4 sm:$0xff]  }
 0x3d0   :  { %v11006_v55 = vld [vmem:[%s14521_s3 + $0x40] sm:$0xff]   ;;  %v11007_v58 = vld [vmem:[%s14519_s0 + $0x930] ss:$24 sps:$4 sm:$0xff]  }
 0x3d1   :  { %v3532_v60 = vmax.f32 %v10030_v57, 0.0  ;;  %3353 = vmatmul.mubr.bf16.gmra.mrb[112].mxu0 %v10904_v54  ;;  %v10920_v54 = vld [vmem:[%s14519_s0 + $0x674] ss:$24 sps:$4 sm:$0xff]   ;;  %9297 = vmatprep.subr.bf16.mxu1 %v11006_v55 }
 0x3d2   :  { %3360 = vmatprep.mubr.bf16.mxu0 %v10905_v56  ;;  %v10941_v55 = vld [vmem:[%s14519_s0 + $0x734] ss:$24 sps:$4 sm:$0xff]  }
 0x3d3   :  { %v3630_v61 = vpack.c.bf16 %v3532_v60, %v3531_v59  ;;  %v11008_v59 = vld [vmem:[%s14521_s3] sm:$0xff]   ;;  %2655 = vmatmul.mubr.bf16.gmra.mrb[52].mxu1 %v11007_v58 }
 0x3d4   :  { %v3146_v62 = vpop.f32.mrb[8].mxu0  ;;  %9298 = vmatpush3.bf16.msra.mxu1 %v11008_v59 }
 0x3d5   :  { %3680 = vst [vmem:[#allocation2 + $0x8] sm:$0xff] %v3630_v61  ;;  %v10031_v1 = vadd.f32 %v12437_v36, %v3146_v62  ;;  %v3148_v2 = vpop.f32.mrb[9].mxu0 }
 0x3d6   :  { %v3149_v5 = vpop.f32.mrb[10].mxu0 }
 0x3d7   :  { %v10032_v7 = vadd.f32 %v12437_v36, %v3149_v5  ;;  %v3151_v8 = vpop.f32.mrb[11].mxu0  ;;  %v3533_v9 = vmax.f32 %v10031_v1, 0.0  ;;  %v11012_v1 = vld [vmem:[%s14521_s3 + $0x48] sm:$0xff]  }
 0x3d8   :  { %9299 = vmatprep.subr.bf16.mxu1 %v11012_v1  ;;  %v10922_v5 = vld [vmem:[%s14519_s0 + $0x670] ss:$24 sps:$4 sm:$0xff]  }
 0x3d9   :  { %v3534_v10 = vmax.f32 %v10032_v7, 0.0  ;;  %3361 = vmatmul.mubr.bf16.gmra.mrb[116].mxu0 %v10907_v3  ;;  %v11013_v3 = vld [vmem:[%s14521_s3 + $0x8] sm:$0xff]   ;;  %v10923_v7 = vld [vmem:[%s14519_s0 + $0x6a4] ss:$24 sps:$4 sm:$0xff]   ;;  %v11014_v8 = vld [vmem:[%s14521_s3 + $0x50] sm:$0xff]  }
 0x3da   :  { %3368 = vmatprep.mubr.bf16.mxu0 %v10908_v6  ;;  %9300 = vmatpush3.bf16.msra.mxu1 %v11013_v3 }
 0x3db   :  { %v3631_v11 = vpack.c.bf16 %v3534_v10, %v3533_v9  ;;  %9301 = vmatprep.subr.bf16.mxu1 %v11014_v8 }
 0x3dc   :  { %v3154_v12 = vpop.f32.mrb[12].mxu0 }
 0x3dd   :  { %3681 = vst [vmem:[#allocation2 + $0x10] sm:$0xff] %v3631_v11  ;;  %v10033_v14 = vadd.f32 %v12437_v36, %v3154_v12  ;;  %v3156_v15 = vpop.f32.mrb[13].mxu0  ;;  %v11015_v11 = vld [vmem:[%s14521_s3 + $0x10] sm:$0xff]  }
 0x3de   :  { %v3157_v18 = vpop.f32.mrb[14].mxu0  ;;  %9302 = vmatpush3.bf16.msra.mxu1 %v11015_v11  ;;  %v10953_v11 = vld [vmem:[%s14519_s0 + $0x794] ss:$24 sps:$4 sm:$0xff]  }
 0x3df   :  { %v10034_v20 = vadd.f32 %v12437_v36, %v3157_v18  ;;  %v3159_v21 = vpop.f32.mrb[15].mxu0  ;;  %v3535_v22 = vmax.f32 %v10033_v14, 0.0  ;;  %v11017_v18 = vld [vmem:[%s14521_s3 + $0x18] sm:$0xff]  }
 0x3e1   :  { %v3536_v23 = vmax.f32 %v10034_v20, 0.0  ;;  %3369 = vmatmul.mubr.bf16.gmra.mrb[120].mxu0 %v10910_v16  ;;  %v11016_v16 = vld [vmem:[%s14521_s3 + $0x58] sm:$0xff]  }
 0x3e2   :  { %3376 = vmatprep.mubr.bf16.mxu0 %v10911_v19  ;;  %9303 = vmatprep.subr.bf16.mxu1 %v11016_v16  ;;  %v10925_v20 = vld [vmem:[%s14519_s0 + $0x6a0] ss:$24 sps:$4 sm:$0xff]  }
 0x3e3   :  { %v3632_v24 = vpack.c.bf16 %v3536_v23, %v3535_v22  ;;  %v10929_v22 = vld [vmem:[%s14519_s0 + $0x6d4] ss:$24 sps:$4 sm:$0xff]   ;;  %9304 = vmatpush3.bf16.msra.mxu1 %v11017_v18  ;;  %v11018_v23 = vld [vmem:[%s14521_s3 + $0x60] sm:$0xff]  }
 0x3e4   :  { %v3162_v25 = vpop.f32.mrb[16].mxu0  ;;  %9305 = vmatprep.subr.bf16.mxu1 %v11018_v23 }
 0x3e5   :  { %3682 = vst [vmem:[#allocation2 + $0x18] sm:$0xff] %v3632_v24  ;;  %v10035_v27 = vadd.f32 %v12437_v36, %v3162_v25  ;;  %v3164_v28 = vpop.f32.mrb[17].mxu0 }
 0x3e6   :  { %v3165_v31 = vpop.f32.mrb[18].mxu0 }
 0x3e7   :  { %v10036_v33 = vadd.f32 %v12437_v36, %v3165_v31  ;;  %v3167_v34 = vpop.f32.mrb[19].mxu0  ;;  %v3537_v35 = vmax.f32 %v10035_v27, 0.0  ;;  %9306 = vmatpush3.bf16.msra.mxu1 %v11019_v26  ;;  %v11020_v31 = vld [vmem:[%s14521_s3 + $0x68] sm:$0xff]  }
 0x3e8   :  { %9307 = vmatprep.subr.bf16.mxu1 %v11020_v31 }
 0x3e9   :  { %v3538_v37 = vmax.f32 %v10036_v33, 0.0  ;;  %3377 = vmatmul.mubr.bf16.gmra.mrb[124].mxu0 %v10913_v29  ;;  %v11021_v33 = vld [vmem:[%s14521_s3 + $0x28] sm:$0xff]  }
 0x3ea   :  { %3384 = vmatprep.mubr.bf16.mxu0 %v10914_v32 }
 0x3eb   :  { %v3633_v38 = vpack.c.bf16 %v3538_v37, %v3537_v35  ;;  %v10931_v35 = vld [vmem:[%s14519_s0 + $0x6d0] ss:$24 sps:$4 sm:$0xff]   ;;  %9308 = vmatpush3.bf16.msra.mxu1 %v11021_v33 }
 0x3ec   :  { %v3170_v39 = vpop.f32.mrb[20].mxu0 }
 0x3ed   :  { %3683 = vst [vmem:[#allocation2 + $0x20] sm:$0xff] %v3633_v38  ;;  %v10037_v41 = vadd.f32 %v12437_v36, %v3170_v39  ;;  %v3172_v42 = vpop.f32.mrb[21].mxu0  ;;  %v10935_v38 = vld [vmem:[%s14519_s0 + $0x704] ss:$24 sps:$4 sm:$0xff]   ;;  %v11022_v39 = vld [vmem:[%s14521_s3 + $0x70] sm:$0xff]  }
 0x3ee   :  { %v3173_v45 = vpop.f32.mrb[22].mxu0  ;;  %v11023_v42 = vld [vmem:[%s14521_s3 + $0x30] sm:$0xff]   ;;  %9309 = vmatprep.subr.bf16.mxu1 %v11022_v39 }
 0x3ef   :  { %v10038_v47 = vadd.f32 %v12437_v36, %v3173_v45  ;;  %v3175_v48 = vpop.f32.mrb[23].mxu0  ;;  %v3539_v49 = vmax.f32 %v10037_v41, 0.0  ;;  %9310 = vmatpush3.bf16.msra.mxu1 %v11023_v42 }
 0x3f1   :  { %v3540_v50 = vmax.f32 %v10038_v47, 0.0  ;;  %3385 = vmatmul.mubr.bf16.gmra.mrb[128].mxu0 %v10916_v43  ;;  %v11024_v47 = vld [vmem:[%s14521_s3 + $0x78] sm:$0xff]  }
 0x3f2   :  { %3392 = vmatprep.mubr.bf16.mxu0 %v10917_v46  ;;  %9311 = vmatprep.subr.bf16.mxu1 %v11024_v47 }
 0x3f3   :  { %v3634_v51 = vpack.c.bf16 %v3540_v50, %v3539_v49  ;;  %v11025_v49 = vld [vmem:[%s14521_s3 + $0x38] sm:$0xff]  }
 0x3f4   :  { %v3178_v53 = vpop.f32.mrb[24].mxu0  ;;  %9312 = vmatpush3.bf16.msra.mxu1 %v11025_v49 }
 0x3f5   :  { %3684 = vst [vmem:[#allocation2 + $0x28] sm:$0xff] %v3634_v51  ;;  %v10039_v56 = vadd.f32 %v12437_v36, %v3178_v53  ;;  %v3180_v57 = vpop.f32.mrb[25].mxu0  ;;  %v10937_v51 = vld [vmem:[%s14519_s0 + $0x700] ss:$24 sps:$4 sm:$0xff]  }
 0x3f6   :  { %v3181_v60 = vpop.f32.mrb[26].mxu0 }
 0x3f7   :  { %v10040_v61 = vadd.f32 %v12437_v36, %v3181_v60  ;;  %v3183_v62 = vpop.f32.mrb[27].mxu0  ;;  %v3541_v63 = vmax.f32 %v10039_v56, 0.0 }
 0x3f9   :  { %v3542_v2 = vmax.f32 %v10040_v61, 0.0  ;;  %3393 = vmatmul.mubr.bf16.gmra.mrb[132].mxu0 %v10919_v52  ;;  %v10943_v61 = vld [vmem:[%s14519_s0 + $0x730] ss:$24 sps:$4 sm:$0xff]  }
 0x3fa   :  { %3400 = vmatprep.mubr.bf16.mxu0 %v10920_v54 }
 0x3fb   :  { %v3635_v4 = vpack.c.bf16 %v3542_v2, %v3541_v63  ;;  %v10947_v63 = vld [vmem:[%s14519_s0 + $0x764] ss:$24 sps:$4 sm:$0xff]  }
 0x3fc   :  { %v3186_v6 = vpop.f32.mrb[28].mxu0 }
 0x3fd   :  { %3685 = vst [vmem:[#allocation2 + $0x30] sm:$0xff] %v3635_v4  ;;  %v10041_v9 = vadd.f32 %v12437_v36, %v3186_v6  ;;  %v3188_v10 = vpop.f32.mrb[29].mxu0 }
 0x3fe   :  { %v3189_v12 = vpop.f32.mrb[30].mxu0  ;;  %v10949_v10 = vld [vmem:[%s14519_s0 + $0x760] ss:$24 sps:$4 sm:$0xff]  }
 0x3ff   :  { %v10042_v13 = vadd.f32 %v12437_v36, %v3189_v12  ;;  %v3191_v14 = vpop.f32.mrb[31].mxu0  ;;  %v3543_v15 = vmax.f32 %v10041_v9, 0.0 }
 0x401   :  { %v3544_v17 = vmax.f32 %v10042_v13, 0.0  ;;  %3401 = vmatmul.mubr.bf16.gmra.mrb[136].mxu0 %v10922_v5 }
 0x402   :  { %3408 = vmatprep.mubr.bf16.mxu0 %v10923_v7 }
 0x403   :  { %v3636_v19 = vpack.c.bf16 %v3544_v17, %v3543_v15 }
 0x404   :  { %v3194_v21 = vpop.f32.mrb[32].mxu0 }
 0x405   :  { %3686 = vst [vmem:[#allocation2 + $0x38] sm:$0xff] %v3636_v19  ;;  %v10043_v24 = vadd.f32 %v12437_v36, %v3194_v21  ;;  %v3196_v25 = vpop.f32.mrb[33].mxu0 }
 0x406   :  { %v3197_v27 = vpop.f32.mrb[34].mxu0 }
 0x407   :  { %v10044_v28 = vadd.f32 %v12437_v36, %v3197_v27  ;;  %v3199_v29 = vpop.f32.mrb[35].mxu0  ;;  %v3545_v30 = vmax.f32 %v10043_v24, 0.0 }
 0x409   :  { %v3546_v32 = vmax.f32 %v10044_v28, 0.0  ;;  %3409 = vmatmul.mubr.bf16.gmra.mrb[140].mxu0 %v10925_v20  ;;  %v10955_v20 = vld [vmem:[%s14519_s0 + $0x790] ss:$24 sps:$4 sm:$0xff]  }
 0x40a   :  { %3416 = vmatprep.mubr.bf16.mxu0 %v10929_v22  ;;  %v10959_v22 = vld [vmem:[%s14519_s0 + $0x7c4] ss:$24 sps:$4 sm:$0xff]  }
 0x40b   :  { %v3637_v34 = vpack.c.bf16 %v3546_v32, %v3545_v30  ;;  %v10961_v32 = vld [vmem:[%s14519_s0 + $0x7c0] ss:$24 sps:$4 sm:$0xff]  }
 0x40c   :  { %v3202_v37 = vpop.f32.mrb[36].mxu0 }
 0x40d   :  { %3687 = vst [vmem:[#allocation2 + $0x40] sm:$0xff] %v3637_v34  ;;  %v10045_v40 = vadd.f32 %v12437_v36, %v3202_v37  ;;  %v3204_v41 = vpop.f32.mrb[37].mxu0 }
 0x40e   :  { %v3205_v43 = vpop.f32.mrb[38].mxu0 }
 0x40f   :  { %v10046_v44 = vadd.f32 %v12437_v36, %v3205_v43  ;;  %v3207_v45 = vpop.f32.mrb[39].mxu0  ;;  %v3547_v46 = vmax.f32 %v10045_v40, 0.0  ;;  %v10967_v43 = vld [vmem:[%s14519_s0 + $0x7f0] ss:$24 sps:$4 sm:$0xff]  }
 0x410   :  { %v10971_v45 = vld [vmem:[%s14519_s0 + $0x824] ss:$24 sps:$4 sm:$0xff]  }
 0x411   :  { %v3548_v48 = vmax.f32 %v10046_v44, 0.0  ;;  %3417 = vmatmul.mubr.bf16.gmra.mrb[144].mxu0 %v10931_v35  ;;  %v10965_v35 = vld [vmem:[%s14519_s0 + $0x7f4] ss:$24 sps:$4 sm:$0xff]  }
 0x412   :  { %3424 = vmatprep.mubr.bf16.mxu0 %v10935_v38 }
 0x413   :  { %v3638_v50 = vpack.c.bf16 %v3548_v48, %v3547_v46 }
 0x414   :  { %v3210_v52 = vpop.f32.mrb[40].mxu0 }
 0x415   :  { %3688 = vst [vmem:[#allocation2 + $0x48] sm:$0xff] %v3638_v50  ;;  %v10047_v53 = vadd.f32 %v12437_v36, %v3210_v52  ;;  %v3212_v54 = vpop.f32.mrb[41].mxu0 }
 0x416   :  { %v3213_v0 = vpop.f32.mrb[42].mxu0  ;;  %v10973_v54 = vld [vmem:[%s14519_s0 + $0x820] ss:$24 sps:$4 sm:$0xff]  }
 0x417   :  { %v10048_v56 = vadd.f32 %v12437_v36, %v3213_v0  ;;  %v3215_v57 = vpop.f32.mrb[43].mxu0  ;;  %v3549_v58 = vmax.f32 %v10047_v53, 0.0 }
 0x419   :  { %v3550_v59 = vmax.f32 %v10048_v56, 0.0  ;;  %3425 = vmatmul.mubr.bf16.gmra.mrb[148].mxu0 %v10937_v51 }
 0x41a   :  { %3432 = vmatprep.mubr.bf16.mxu0 %v10941_v55  ;;  %v10977_v55 = vld [vmem:[%s14519_s0 + $0x854] ss:$24 sps:$4 sm:$0xff]  }
 0x41b   :  { %v3639_v60 = vpack.c.bf16 %v3550_v59, %v3549_v58 }
 0x41c   :  { %v3218_v62 = vpop.f32.mrb[44].mxu0 }
 0x41d   :  { %3689 = vst [vmem:[#allocation2 + $0x50] sm:$0xff] %v3639_v60  ;;  %v10049_v1 = vadd.f32 %v12437_v36, %v3218_v62  ;;  %v3220_v2 = vpop.f32.mrb[45].mxu0 }
 0x41e   :  { %v3221_v3 = vpop.f32.mrb[46].mxu0  ;;  %v10979_v2 = vld [vmem:[%s14519_s0 + $0x850] ss:$24 sps:$4 sm:$0xff]  }
 0x41f   :  { %v10050_v4 = vadd.f32 %v12437_v36, %v3221_v3  ;;  %v3223_v5 = vpop.f32.mrb[47].mxu0  ;;  %v3551_v6 = vmax.f32 %v10049_v1, 0.0  ;;  %v10983_v3 = vld [vmem:[%s14519_s0 + $0x884] ss:$24 sps:$4 sm:$0xff]  }
 0x421   :  { %v3552_v7 = vmax.f32 %v10050_v4, 0.0  ;;  %3433 = vmatmul.mubr.bf16.gmra.mrb[152].mxu0 %v10943_v61 }
 0x422   :  { %3440 = vmatprep.mubr.bf16.mxu0 %v10947_v63 }
 0x423   :  { %v3640_v8 = vpack.c.bf16 %v3552_v7, %v3551_v6 }
 0x424   :  { %v3226_v9 = vpop.f32.mrb[48].mxu0 }
 0x425   :  { %3690 = vst [vmem:[#allocation2 + $0x58] sm:$0xff] %v3640_v8  ;;  %v10051_v12 = vadd.f32 %v12437_v36, %v3226_v9  ;;  %v3228_v13 = vpop.f32.mrb[49].mxu0 }
 0x426   :  { %v3229_v14 = vpop.f32.mrb[50].mxu0  ;;  %v10985_v13 = vld [vmem:[%s14519_s0 + $0x880] ss:$24 sps:$4 sm:$0xff]  }
 0x427   :  { %v10052_v15 = vadd.f32 %v12437_v36, %v3229_v14  ;;  %v3231_v16 = vpop.f32.mrb[51].mxu0  ;;  %v3553_v17 = vmax.f32 %v10051_v12, 0.0  ;;  %v12679_v14 = vld [vmem:[%s14520_s2] ss:$0 sm:$0xff] }
 0x428   :  { %v10989_v16 = vld [vmem:[%s14519_s0 + $0x8b4] ss:$24 sps:$4 sm:$0xff]  }
 0x429   :  { %v3554_v18 = vmax.f32 %v10052_v15, 0.0  ;;  %3441 = vmatmul.mubr.bf16.gmra.mrb[156].mxu0 %v10949_v10 }
 0x42a   :  { %3448 = vmatprep.mubr.bf16.mxu0 %v10953_v11 }
 0x42b   :  { %v3641_v19 = vpack.c.bf16 %v3554_v18, %v3553_v17 }
 0x42c   :  { %v3234_v21 = vpop.f32.mrb[52].mxu0 }
 0x42d   :  { %3691 = vst [vmem:[#allocation2 + $0x60] sm:$0xff] %v3641_v19  ;;  %v10053_v23 = vadd.f32 %v12437_v36, %v3234_v21  ;;  %v3236_v24 = vpop.f32.mrb[53].mxu0 }
 0x42e   :  { %v3237_v25 = vpop.f32.mrb[54].mxu0 }
 0x42f   :  { %v10054_v26 = vadd.f32 %v12437_v36, %v3237_v25  ;;  %v3239_v27 = vpop.f32.mrb[55].mxu0  ;;  %v3555_v28 = vmax.f32 %v10053_v23, 0.0 }
 0x430   :  { %v10995_v27 = vld [vmem:[%s14519_s0 + $0x8e4] ss:$24 sps:$4 sm:$0xff]  }
 0x431   :  { %v3556_v29 = vmax.f32 %v10054_v26, 0.0  ;;  %3449 = vmatmul.mubr.bf16.gmra.mrb[160].mxu0 %v10955_v20  ;;  %v10991_v26 = vld [vmem:[%s14519_s0 + $0x8b0] ss:$24 sps:$4 sm:$0xff]  }
 0x432   :  { %3456 = vmatprep.mubr.bf16.mxu0 %v10959_v22 }
 0x433   :  { %v3642_v30 = vpack.c.bf16 %v3556_v29, %v3555_v28 }
 0x434   :  { %v3242_v31 = vpop.f32.mrb[56].mxu0 }
 0x435   :  { %3692 = vst [vmem:[#allocation2 + $0x68] sm:$0xff] %v3642_v30  ;;  %v10055_v33 = vadd.f32 %v12437_v36, %v3242_v31  ;;  %v3244_v34 = vpop.f32.mrb[57].mxu0 }
 0x436   :  { %v3245_v37 = vpop.f32.mrb[58].mxu0 }
 0x437   :  { %v10056_v38 = vadd.f32 %v12437_v36, %v3245_v37  ;;  %v3247_v39 = vpop.f32.mrb[59].mxu0  ;;  %v3557_v40 = vmax.f32 %v10055_v33, 0.0  ;;  %v12694_v33 = vpop.f32.mrb[0].mxu1 }
 0x438   :  { %v2554_v34 = vpop.f32.mrb[1].mxu1  ;;  %v10997_v39 = vld [vmem:[%s14519_s0 + $0x8e0] ss:$24 sps:$4 sm:$0xff]  }
 0x439   :  { %v3558_v41 = vmax.f32 %v10056_v38, 0.0  ;;  %3457 = vmatmul.mubr.bf16.gmra.mrb[164].mxu0 %v10961_v32  ;;  %v12696_v37 = vpop.f32.mrb[2].mxu1 }
 0x43a   :  { %3464 = vmatprep.mubr.bf16.mxu0 %v10965_v35 }
 0x43b   :  { %v3643_v42 = vpack.c.bf16 %v3558_v41, %v3557_v40  ;;  %v2557_v40 = vpop.f32.mrb[3].mxu1 }
 0x43c   :  { %v3250_v44 = vpop.f32.mrb[60].mxu0 }
 0x43d   :  { %3693 = vst [vmem:[#allocation2 + $0x70] sm:$0xff] %v3643_v42  ;;  %v10057_v46 = vadd.f32 %v12437_v36, %v3250_v44  ;;  %v3252_v47 = vpop.f32.mrb[61].mxu0  ;;  %v11001_v44 = vld [vmem:[%s14519_s0 + $0x914] ss:$24 sps:$4 sm:$0xff]  }
 0x43e   :  { %v3253_v48 = vpop.f32.mrb[62].mxu0 }
 0x43f   :  { %v10058_v49 = vadd.f32 %v12437_v36, %v3253_v48  ;;  %v3255_v50 = vpop.f32.mrb[63].mxu0  ;;  %v3559_v51 = vmax.f32 %v10057_v46, 0.0 }
 0x441   :  { %v3560_v52 = vmax.f32 %v10058_v49, 0.0  ;;  %3465 = vmatmul.mubr.bf16.gmra.mrb[168].mxu0 %v10967_v43  ;;  %v12706_v49 = vpop.f32.mrb[4].mxu1 }
 0x442   :  { %3472 = vmatprep.mubr.bf16.mxu0 %v10971_v45  ;;  %v2562_v50 = vpop.f32.mrb[5].mxu1 }
 0x443   :  { %v3644_v53 = vpack.c.bf16 %v3560_v52, %v3559_v51  ;;  %v12708_v52 = vpop.f32.mrb[6].mxu1 }
 0x444   :  { %v3258_v0 = vpop.f32.mrb[64].mxu0 }
 0x445   :  { %3694 = vst [vmem:[#allocation2 + $0x78] sm:$0xff] %v3644_v53  ;;  %v10059_v56 = vadd.f32 %v12437_v36, %v3258_v0  ;;  %v3260_v57 = vpop.f32.mrb[65].mxu0  ;;  %v2565_v0 = vpop.f32.mrb[7].mxu1 }
 0x446   :  { %v3261_v58 = vpop.f32.mrb[66].mxu0  ;;  %v11009_v57 = vld [vmem:[%s14519_s0 + $0x944] ss:$24 sps:$4 sm:$0xff]  }
 0x447   :  { %v10060_v59 = vadd.f32 %v12437_v36, %v3261_v58  ;;  %v3263_v60 = vpop.f32.mrb[67].mxu0  ;;  %v3561_v61 = vmax.f32 %v10059_v56, 0.0  ;;  %v11026_v58 = vld [vmem:[%s14521_s3 + $0xc0] sm:$0xff]  }
 0x448   :  { %9361 = vmatprep.subr.bf16.mxu1 %v11026_v58 }
 0x449   :  { %v3562_v62 = vmax.f32 %v10060_v59, 0.0  ;;  %3473 = vmatmul.mubr.bf16.gmra.mrb[172].mxu0 %v10973_v54  ;;  %v11003_v54 = vld [vmem:[%s14519_s0 + $0x910] ss:$24 sps:$4 sm:$0xff]  }
 0x44a   :  { %3480 = vmatprep.mubr.bf16.mxu0 %v10977_v55 }
 0x44b   :  { %v3645_v63 = vpack.c.bf16 %v3562_v62, %v3561_v61 }
 0x44c   :  { %v3266_v1 = vpop.f32.mrb[68].mxu0 }
 0x44d   :  { %3695 = vst [vmem:[#allocation2 + $0x80] sm:$0xff] %v3645_v63  ;;  %v10061_v4 = vadd.f32 %v12437_v36, %v3266_v1  ;;  %v3268_v5 = vpop.f32.mrb[69].mxu0  ;;  %v12721_v1 = vpop.f32.mrb[8].mxu1 }
 0x44e   :  { %v3269_v6 = vpop.f32.mrb[70].mxu0 }
 0x44f   :  { %v10062_v7 = vadd.f32 %v12437_v36, %v3269_v6  ;;  %v3271_v8 = vpop.f32.mrb[71].mxu0  ;;  %v3563_v9 = vmax.f32 %v10061_v4, 0.0 }
 0x451   :  { %v3564_v10 = vmax.f32 %v10062_v7, 0.0  ;;  %3481 = vmatmul.mubr.bf16.gmra.mrb[176].mxu0 %v10979_v2  ;;  %v2570_v2 = vpop.f32.mrb[9].mxu1 }
 0x452   :  { %3488 = vmatprep.mubr.bf16.mxu0 %v10983_v3  ;;  %v12723_v4 = vpop.f32.mrb[10].mxu1 }
 0x453   :  { %v3646_v11 = vpack.c.bf16 %v3564_v10, %v3563_v9  ;;  %v2573_v6 = vpop.f32.mrb[11].mxu1  ;;  %v11011_v9 = vld [vmem:[%s14519_s0 + $0x940] ss:$24 sps:$4 sm:$0xff]  }
 0x454   :  { %v3274_v12 = vpop.f32.mrb[72].mxu0 }
 0x455   :  { %3696 = vst [vmem:[#allocation2 + $0x88] sm:$0xff] %v3646_v11  ;;  %v10063_v15 = vadd.f32 %v12679_v14, %v3274_v12  ;;  %v3276_v36 = vpop.f32.mrb[73].mxu0 }
 0x456   :  { %v3277_v17 = vpop.f32.mrb[74].mxu0  ;;  %v12730_v36 = vpop.f32.mrb[12].mxu1 }
 0x457   :  { %v10064_v18 = vadd.f32 %v12679_v14, %v3277_v17  ;;  %v3279_v19 = vpop.f32.mrb[75].mxu0  ;;  %v3565_v20 = vmax.f32 %v10063_v15, 0.0 }
 0x459   :  { %v3566_v21 = vmax.f32 %v10064_v18, 0.0  ;;  %3489 = vmatmul.mubr.bf16.gmra.mrb[180].mxu0 %v10985_v13 }
 0x45a   :  { %3496 = vmatprep.mubr.bf16.mxu0 %v10989_v16  ;;  %v2578_v16 = vpop.f32.mrb[13].mxu1 }
 0x45b   :  { %v3647_v22 = vpack.c.bf16 %v3566_v21, %v3565_v20  ;;  %v12732_v18 = vpop.f32.mrb[14].mxu1 }
 0x45c   :  { %v3282_v23 = vpop.f32.mrb[76].mxu0  ;;  %v2581_v20 = vpop.f32.mrb[15].mxu1 }
 0x45d   :  { %3697 = vst [vmem:[#allocation2 + $0x90] sm:$0xff] %v3647_v22  ;;  %v10065_v24 = vadd.f32 %v12679_v14, %v3282_v23  ;;  %v3284_v25 = vpop.f32.mrb[77].mxu0  ;;  %v11032_v20 = vld [vmem:[%s14521_s3 + $0xd8] sm:$0xff]  }
 0x45e   :  { %v3285_v28 = vpop.f32.mrb[78].mxu0 }
 0x45f   :  { %v3567_v29 = vmax.f32 %v10065_v24, 0.0  ;;  %v10066_v30 = vadd.f32 %v12679_v14, %v3285_v28  ;;  %v3287_v31 = vpop.f32.mrb[79].mxu0  ;;  %v12736_v28 = vpop.f32.mrb[16].mxu1 }
 0x461   :  { %v3568_v32 = vmax.f32 %v10066_v30, 0.0  ;;  %3497 = vmatmul.mubr.bf16.gmra.mrb[184].mxu0 %v10991_v26 }
 0x462   :  { %3504 = vmatprep.mubr.bf16.mxu0 %v10995_v27 }
 0x463   :  { %v3648_v35 = vpack.c.bf16 %v3568_v32, %v3567_v29  ;;  %v2586_v29 = vpop.f32.mrb[17].mxu1 }
 0x464   :  { %v3290_v38 = vpop.f32.mrb[80].mxu0  ;;  %v12738_v31 = vpop.f32.mrb[18].mxu1 }
 0x465   :  { %3698 = vst [vmem:[#allocation2 + $0x98] sm:$0xff] %v3648_v35  ;;  %v10067_v41 = vadd.f32 %v12679_v14, %v3290_v38  ;;  %v3292_v42 = vpop.f32.mrb[81].mxu0  ;;  %v2589_v34 = vpop.f32.mrb[19].mxu1 }
 0x466   :  { %v3293_v43 = vpop.f32.mrb[82].mxu0 }
 0x467   :  { %v10068_v45 = vadd.f32 %v12679_v14, %v3293_v43  ;;  %v3295_v46 = vpop.f32.mrb[83].mxu0  ;;  %v3569_v47 = vmax.f32 %v10067_v41, 0.0 }
 0x469   :  { %v3570_v48 = vmax.f32 %v10068_v45, 0.0  ;;  %3505 = vmatmul.mubr.bf16.gmra.mrb[188].mxu0 %v10997_v39 }
 0x46a   :  { %3512 = vmatprep.mubr.bf16.mxu0 %v11001_v44  ;;  %v12742_v44 = vpop.f32.mrb[20].mxu1 }
 0x46b   :  { %v3649_v51 = vpack.c.bf16 %v3570_v48, %v3569_v47  ;;  %v2594_v45 = vpop.f32.mrb[21].mxu1 }
 0x46c   :  { %v3298_v53 = vpop.f32.mrb[84].mxu0  ;;  %v12744_v47 = vpop.f32.mrb[22].mxu1 }
 0x46d   :  { %3699 = vst [vmem:[#allocation2 + $0xa0] sm:$0xff] %v3649_v51  ;;  %v10069_v55 = vadd.f32 %v12679_v14, %v3298_v53  ;;  %v3300_v56 = vpop.f32.mrb[85].mxu0  ;;  %v2597_v50 = vpop.f32.mrb[23].mxu1 }
 0x46e   :  { %v3301_v59 = vpop.f32.mrb[86].mxu0 }
 0x46f   :  { %v10070_v60 = vadd.f32 %v12679_v14, %v3301_v59  ;;  %v3303_v61 = vpop.f32.mrb[87].mxu0  ;;  %v3571_v62 = vmax.f32 %v10069_v55, 0.0  ;;  %v11027_v59 = vld [vmem:[%s14521_s3 + $0x80] sm:$0xff]  }
 0x470   :  { %v11028_v61 = vld [vmem:[%s14521_s3 + $0xc8] sm:$0xff]  }
 0x471   :  { %v3572_v63 = vmax.f32 %v10070_v60, 0.0  ;;  %3513 = vmatmul.mubr.bf16.gmra.mrb[192].mxu0 %v11003_v54 }
 0x472   :  { %3520 = vmatprep.mubr.bf16.mxu0 %v11009_v57 }
 0x473   :  { %v3650_v3 = vpack.c.bf16 %v3572_v63, %v3571_v62  ;;  %v12754_v62 = vpop.f32.mrb[24].mxu1 }
 0x474   :  { %v3306_v5 = vpop.f32.mrb[88].mxu0 }
 0x475   :  { %3700 = vst [vmem:[#allocation2 + $0xa8] sm:$0xff] %v3650_v3  ;;  %v10071_v7 = vadd.f32 %v12679_v14, %v3306_v5  ;;  %v3308_v8 = vpop.f32.mrb[89].mxu0  ;;  %v3729_v3 = vld [vmem:[#allocation2] sm:$0xff]  ;;  %v2602_v5 = vpop.f32.mrb[25].mxu1 }
 0x476   :  { %v3309_v10 = vpop.f32.mrb[90].mxu0 }
 0x477   :  { %v10072_v11 = vadd.f32 %v12679_v14, %v3309_v10  ;;  %v3311_v12 = vpop.f32.mrb[91].mxu0  ;;  %v3573_v13 = vmax.f32 %v10071_v7, 0.0  ;;  %v12757_v7 = vpop.f32.mrb[26].mxu1  ;;  %v11029_v10 = vld [vmem:[%s14521_s3 + $0x88] sm:$0xff]  }
 0x478   :  { %v11030_v12 = vld [vmem:[%s14521_s3 + $0xd0] sm:$0xff]  }
 0x479   :  { %v3574_v15 = vmax.f32 %v10072_v11, 0.0  ;;  %3521 = vmatmul.mubr.bf16.gmra.mrb[196].mxu0 %v11011_v9  ;;  %v2605_v11 = vpop.f32.mrb[27].mxu1 }
 0x47b   :  { %v3651_v17 = vpack.c.bf16 %v3574_v15, %v3573_v13 }
 0x47c   :  { %v3314_v19 = vpop.f32.mrb[92].mxu0 }
 0x47d   :  { %3701 = vst [vmem:[#allocation2 + $0xb0] sm:$0xff] %v3651_v17  ;;  %v10073_v21 = vadd.f32 %v12679_v14, %v3314_v19  ;;  %v3316_v22 = vpop.f32.mrb[93].mxu0  ;;  %v11031_v17 = vld [vmem:[%s14521_s3 + $0x90] sm:$0xff]  }
 0x47e   :  { %v3317_v23 = vpop.f32.mrb[94].mxu0 }
 0x47f   :  { %v10074_v24 = vadd.f32 %v12679_v14, %v3317_v23  ;;  %v3319_v25 = vpop.f32.mrb[95].mxu0  ;;  %v3575_v26 = vmax.f32 %v10073_v21, 0.0  ;;  %v12774_v21 = vpop.f32.mrb[28].mxu1 }
 0x480   :  { %v2610_v25 = vpop.f32.mrb[29].mxu1 }
 0x481   :  { %v3576_v27 = vmax.f32 %v10074_v24, 0.0  ;;  %v12778_v24 = vld [vmem:[#allocation2 + $0x8] sm:$0xff] }
 0x483   :  { %v3652_v30 = vpack.c.bf16 %v3576_v27, %v3575_v26  ;;  %v12781_v27 = vpop.f32.mrb[30].mxu1 }
 0x484   :  { %v3322_v32 = vpop.f32.mrb[96].mxu0  ;;  %v2613_v34 = vpop.f32.mrb[31].mxu1 }
 0x485   :  { %3702 = vst [vmem:[#allocation2 + $0xb8] sm:$0xff] %v3652_v30  ;;  %v10075_v35 = vadd.f32 %v12679_v14, %v3322_v32  ;;  %v3324_v38 = vpop.f32.mrb[97].mxu0  ;;  %v11033_v32 = vld [vmem:[%s14521_s3 + $0x98] sm:$0xff]   ;;  %v12796_v45 = vpop.f32.mrb[32].mxu1 }
 0x486   :  { %v3325_v39 = vpop.f32.mrb[98].mxu0  ;;  %v2618_v50 = vpop.f32.mrb[33].mxu1 }
 0x487   :  { %v10076_v40 = vadd.f32 %v12679_v14, %v3325_v39  ;;  %v3327_v41 = vpop.f32.mrb[99].mxu0  ;;  %v3577_v42 = vmax.f32 %v10075_v35, 0.0  ;;  %v11034_v35 = vld [vmem:[%s14521_s3 + $0xe0] sm:$0xff]   ;;  %v3733_v50 = vld [vmem:[#allocation2 + $0x28] sm:$0xff] }
 0x488   :  { %v11035_v41 = vld [vmem:[%s14521_s3 + $0xa0] sm:$0xff]  }
 0x489   :  { %v3578_v43 = vmax.f32 %v10076_v40, 0.0 }
 0x48b   :  { %v3653_v46 = vpack.c.bf16 %v3578_v43, %v3577_v42  ;;  %v11036_v43 = vld [vmem:[%s14521_s3 + $0xe8] sm:$0xff]  }
 0x48c   :  { %v3330_v48 = vpop.f32.mrb[100].mxu0 }
 0x48d   :  { %3703 = vst [vmem:[#allocation2 + $0xc0] sm:$0xff] %v3653_v46  ;;  %v10077_v51 = vadd.f32 %v12679_v14, %v3330_v48  ;;  %v3332_v53 = vpop.f32.mrb[101].mxu0 }
 0x48e   :  { %v3333_v54 = vpop.f32.mrb[102].mxu0  ;;  %v12799_v53 = vpop.f32.mrb[34].mxu1 }
 0x48f   :  { %v10078_v0 = vadd.f32 %v12679_v14, %v3333_v54  ;;  %v3335_v55 = vpop.f32.mrb[103].mxu0  ;;  %v3579_v56 = vmax.f32 %v10077_v51, 0.0 }
 0x490   :  { %v11037_v55 = vld [vmem:[%s14521_s3 + $0xa8] sm:$0xff]  }
 0x491   :  { %v3580_v57 = vmax.f32 %v10078_v0, 0.0 }
 0x493   :  { %v3654_v58 = vpack.c.bf16 %v3580_v57, %v3579_v56  ;;  %v2621_v56 = vpop.f32.mrb[35].mxu1  ;;  %v11038_v57 = vld [vmem:[%s14521_s3 + $0xf0] sm:$0xff]  }
 0x494   :  { %v3338_v60 = vpop.f32.mrb[104].mxu0 }
 0x495   :  { %3704 = vst [vmem:[#allocation2 + $0xc8] sm:$0xff] %v3654_v58  ;;  %v10079_v63 = vadd.f32 %v12679_v14, %v3338_v60  ;;  %v3340_v2 = vpop.f32.mrb[105].mxu0  ;;  %5529 = vmatprep.mubr.bf16.mxu1 %v3654_v58 }
 0x496   :  { %v3341_v6 = vpop.f32.mrb[106].mxu0  ;;  %5530 = vmatmul.mubr.bf16.vlgmr.msra.gmra.mrb[56].mxu1 %v3729_v3  ;;  %v11040_v2 = vld [vmem:[%s14521_s3 + $0xf8] sm:$0xff]   ;;  %v12814_v3 = vpop.f32.mrb[36].mxu1 }
 0x497   :  { %v10080_v8 = vadd.f32 %v12679_v14, %v3341_v6  ;;  %v3343_v9 = vpop.f32.mrb[107].mxu0  ;;  %9362 = vmatpush3.bf16.msra.mxu1 %v11027_v59  ;;  %v3581_v13 = vmax.f32 %v10079_v63, 0.0 }
 0x498   :  { %9363 = vmatprep.subr.bf16.mxu1 %v11028_v61  ;;  %v11039_v61 = vld [vmem:[%s14521_s3 + $0xb0] sm:$0xff]  }
 0x499   :  { %v3582_v15 = vmax.f32 %v10080_v8, 0.0  ;;  %v2626_v8 = vpop.f32.mrb[37].mxu1 }
 0x49b   :  { %v12766_v16 = vpack.c.bf16 %v3582_v15, %v3581_v13  ;;  %9364 = vmatpush3.bf16.msra.mxu1 %v11029_v10  ;;  %v12817_v10 = vpop.f32.mrb[38].mxu1  ;;  %v11041_v13 = vld [vmem:[%s14521_s3 + $0xb8] sm:$0xff]  }
 0x49c   :  { %v3346_v19 = vpop.f32.mrb[108].mxu0  ;;  %9365 = vmatprep.subr.bf16.mxu1 %v11030_v12  ;;  %v2629_v15 = vpop.f32.mrb[39].mxu1 }
 0x49d   :  { %v10081_v22 = vadd.f32 %v12679_v14, %v3346_v19  ;;  %v3348_v23 = vpop.f32.mrb[109].mxu0  ;;  %5537 = vmatprep.mubr.bf16.mxu1 %v12766_v16  ;;  %v12826_v25 = vpop.f32.mrb[40].mxu1 }
 0x49e   :  { %v3349_v26 = vpop.f32.mrb[110].mxu0  ;;  %5538 = vmatmul.mubr.bf16.gmra.mrb[60].mxu1 %v12778_v24 }
 0x49f   :  { %v10082_v29 = vadd.f32 %v12679_v14, %v3349_v26  ;;  %v3351_v30 = vpop.f32.mrb[111].mxu0  ;;  %9366 = vmatpush3.bf16.msra.mxu1 %v11031_v17  ;;  %v3583_v38 = vmax.f32 %v10081_v22, 0.0  ;;  %v11042_v17 = vld [vmem:[%s14521_s3 + $0x140] sm:$0xff]  }
 0x4a0   :  { %9367 = vmatprep.subr.bf16.mxu1 %v11032_v20  ;;  %v2634_v30 = vpop.f32.mrb[41].mxu1 }
 0x4a1   :  { %v3584_v39 = vmax.f32 %v10082_v29, 0.0  ;;  %v12829_v34 = vpop.f32.mrb[42].mxu1 }
 0x4a3   :  { %v3656_v40 = vpack.c.bf16 %v3584_v39, %v3583_v38  ;;  %9368 = vmatpush3.bf16.msra.mxu1 %v11033_v32  ;;  %v2637_v39 = vpop.f32.mrb[43].mxu1 }
 0x4a4   :  { %v3354_v42 = vpop.f32.mrb[112].mxu0  ;;  %9369 = vmatprep.subr.bf16.mxu1 %v11034_v35 }
 0x4a5   :  { %3706 = vst [vmem:[#allocation2 + $0xd8] sm:$0xff] %v3656_v40  ;;  %v10083_v46 = vadd.f32 %v12679_v14, %v3354_v42  ;;  %v3356_v48 = vpop.f32.mrb[113].mxu0 }
 0x4a6   :  { %v3357_v51 = vpop.f32.mrb[114].mxu0 }
 0x4a7   :  { %v10084_v54 = vadd.f32 %v12679_v14, %v3357_v51  ;;  %v3359_v0 = vpop.f32.mrb[115].mxu0  ;;  %9370 = vmatpush3.bf16.msra.mxu1 %v11035_v41  ;;  %v3585_v58 = vmax.f32 %v10083_v46, 0.0  ;;  %v12833_v51 = vpop.f32.mrb[44].mxu1 }
 0x4a8   :  { %9371 = vmatprep.subr.bf16.mxu1 %v11036_v43  ;;  %v2642_v0 = vpop.f32.mrb[45].mxu1 }
 0x4a9   :  { %v3586_v59 = vmax.f32 %v10084_v54, 0.0 }
 0x4ab   :  { %v3657_v60 = vpack.c.bf16 %v3586_v59, %v3585_v58  ;;  %9372 = vmatpush3.bf16.msra.mxu1 %v11037_v55 }
 0x4ac   :  { %v3362_v63 = vpop.f32.mrb[116].mxu0  ;;  %9373 = vmatprep.subr.bf16.mxu1 %v11038_v57  ;;  %v12836_v57 = vpop.f32.mrb[46].mxu1 }
 0x4ad   :  { %3707 = vst [vmem:[#allocation2 + $0xe0] sm:$0xff] %v3657_v60  ;;  %v10085_v5 = vadd.f32 %v12679_v14, %v3362_v63  ;;  %v3364_v6 = vpop.f32.mrb[117].mxu0  ;;  %v2645_v58 = vpop.f32.mrb[47].mxu1 }
 0x4ae   :  { %v3365_v9 = vpop.f32.mrb[118].mxu0  ;;  %v12843_v6 = vld [vmem:[#allocation2 + $0x30] sm:$0xff]  ;;  %v12845_v8 = vpop.f32.mrb[48].mxu1 }
 0x4af   :  { %v10086_v11 = vadd.f32 %v12679_v14, %v3365_v9  ;;  %v3367_v12 = vpop.f32.mrb[119].mxu0  ;;  %9374 = vmatpush3.bf16.msra.mxu1 %v11039_v61  ;;  %v3587_v19 = vmax.f32 %v10085_v5, 0.0 }
 0x4b0   :  { %9375 = vmatprep.subr.bf16.mxu1 %v11040_v2 }
 0x4b1   :  { %v3588_v20 = vmax.f32 %v10086_v11, 0.0  ;;  %v2650_v11 = vpop.f32.mrb[49].mxu1 }
 0x4b2   :  { %v12849_v15 = vpop.f32.mrb[50].mxu1 }
 0x4b3   :  { %v3658_v22 = vpack.c.bf16 %v3588_v20, %v3587_v19  ;;  %9376 = vmatpush3.bf16.msra.mxu1 %v11041_v13 }
 0x4b4   :  { %v3370_v23 = vpop.f32.mrb[120].mxu0  ;;  %9425 = vmatprep.subr.bf16.mxu1 %v11042_v17  ;;  %v2653_v17 = vpop.f32.mrb[51].mxu1 }
 0x4b5   :  { %3708 = vst [vmem:[#allocation2 + $0xe8] sm:$0xff] %v3658_v22  ;;  %v10087_v26 = vadd.f32 %v12679_v14, %v3370_v23  ;;  %v3372_v29 = vpop.f32.mrb[121].mxu0  ;;  %v12852_v30 = vpop.f32.mrb[52].mxu1 }
 0x4b6   :  { %v3373_v32 = vpop.f32.mrb[122].mxu0 }
 0x4b7   :  { %v10088_v35 = vadd.f32 %v12679_v14, %v3373_v32  ;;  %v3375_v38 = vpop.f32.mrb[123].mxu0  ;;  %v3589_v40 = vmax.f32 %v10087_v26, 0.0 }
 0x4b9   :  { %v3590_v41 = vmax.f32 %v10088_v35, 0.0  ;;  %v2658_v35 = vpop.f32.mrb[53].mxu1 }
 0x4bb   :  { %v3659_v42 = vpack.c.bf16 %v3590_v41, %v3589_v40  ;;  %v12855_v40 = vpop.f32.mrb[54].mxu1 }
 0x4bc   :  { %v3378_v43 = vpop.f32.mrb[124].mxu0  ;;  %v2661_v41 = vpop.f32.mrb[55].mxu1 }
 0x4bd   :  { %3709 = vst [vmem:[#allocation2 + $0xf0] sm:$0xff] %v3659_v42  ;;  %v10089_v46 = vadd.f32 %v12679_v14, %v3378_v43  ;;  %v3380_v48 = vpop.f32.mrb[125].mxu0  ;;  %5545 = vmatprep.mubr.bf16.mxu1 %v3659_v42 }
 0x4be   :  { %v3381_v54 = vpop.f32.mrb[126].mxu0  ;;  %5546 = vmatmul.mubr.bf16.gmra.mrb[64].mxu1 %v3733_v50 }
 0x4bf   :  { %v10090_v55 = vadd.f32 %v12679_v14, %v3381_v54  ;;  %v3383_v56 = vpop.f32.mrb[127].mxu0  ;;  %v3591_v59 = vmax.f32 %v10089_v46, 0.0 }
 0x4c1   :  { %v3592_v60 = vmax.f32 %v10090_v55, 0.0 }
 0x4c3   :  { %v12838_v61 = vpack.c.bf16 %v3592_v60, %v3591_v59 }
 0x4c4   :  { %v3386_v63 = vpop.f32.mrb[128].mxu0 }
 0x4c5   :  { %3710 = vst [vmem:[#allocation2 + $0xf8] sm:$0xff] %v12838_v61  ;;  %v10091_v2 = vadd.f32 %v12679_v14, %v3386_v63  ;;  %v3388_v5 = vpop.f32.mrb[129].mxu0  ;;  %5553 = vmatprep.mubr.bf16.mxu1 %v12838_v61 }
 0x4c6   :  { %v3389_v9 = vpop.f32.mrb[130].mxu0  ;;  %5554 = vmatmul.mubr.bf16.gmra.mrb[68].mxu1 %v12843_v6 }
 0x4c7   :  { %v10092_v12 = vadd.f32 %v12679_v14, %v3389_v9  ;;  %v3391_v13 = vpop.f32.mrb[131].mxu0  ;;  %v3593_v19 = vmax.f32 %v10091_v2, 0.0 }
 0x4c9   :  { %v3594_v20 = vmax.f32 %v10092_v12, 0.0 }
 0x4cb   :  { %v3661_v22 = vpack.c.bf16 %v3594_v20, %v3593_v19  ;;  %v2553_v19 = vadd.f32 %v12679_v14, %v12694_v33 }
 0x4cc   :  { %v3394_v23 = vpop.f32.mrb[132].mxu0 }
 0x4cd   :  { %3711 = vst [vmem:[#allocation2 + $0x100] sm:$0xff] %v3661_v22  ;;  %v10093_v26 = vadd.f32 %v12679_v14, %v3394_v23  ;;  %v3396_v29 = vpop.f32.mrb[133].mxu0 }
 0x4ce   :  { %v3397_v32 = vpop.f32.mrb[134].mxu0  ;;  %v2556_v29 = vadd.f32 %v12679_v14, %v12696_v37  ;;  %v2564_v37 = vadd.f32 %v12679_v14, %v12708_v52  ;;  %v2572_v52 = vadd.f32 %v12679_v14, %v12723_v4 }
 0x4cf   :  { %v10094_v38 = vadd.f32 %v12679_v14, %v3397_v32  ;;  %v3399_v39 = vpop.f32.mrb[135].mxu0  ;;  %v3595_v42 = vmax.f32 %v10093_v26, 0.0  ;;  %v3737_v32 = vld [vmem:[#allocation2 + $0x50] sm:$0xff] }
 0x4d1   :  { %v3596_v43 = vmax.f32 %v10094_v38, 0.0 }
 0x4d3   :  { %v12857_v46 = vpack.c.bf16 %v3596_v43, %v3595_v42  ;;  %v2561_v43 = vadd.f32 %v12679_v14, %v12706_v49 }
 0x4d4   :  { %v3402_v48 = vpop.f32.mrb[136].mxu0 }
 0x4d5   :  { %3712 = vst [vmem:[#allocation2 + $0x108] sm:$0xff] %v12857_v46  ;;  %v10095_v50 = vadd.f32 %v12679_v14, %v3402_v48  ;;  %v3404_v54 = vpop.f32.mrb[137].mxu0 }
 0x4d6   :  { %v3405_v0 = vpop.f32.mrb[138].mxu0 }
 0x4d7   :  { %v10096_v55 = vadd.f32 %v12679_v14, %v3405_v0  ;;  %v3407_v56 = vpop.f32.mrb[139].mxu0  ;;  %v3597_v58 = vmax.f32 %v10095_v50, 0.0  ;;  %v12876_v0 = vld [vmem:[#allocation2 + $0x58] sm:$0xff] }
 0x4d9   :  { %v3598_v59 = vmax.f32 %v10096_v55, 0.0 }
 0x4db   :  { %v3663_v60 = vpack.c.bf16 %v3598_v59, %v3597_v58 }
 0x4dc   :  { %v3410_v63 = vpop.f32.mrb[140].mxu0 }
 0x4dd   :  { %3713 = vst [vmem:[#allocation2 + $0x110] sm:$0xff] %v3663_v60  ;;  %v10097_v2 = vadd.f32 %v12679_v14, %v3410_v63  ;;  %v3412_v5 = vpop.f32.mrb[141].mxu0  ;;  %v2569_v60 = vadd.f32 %v12679_v14, %v12721_v1 }
 0x4de   :  { %v3413_v9 = vpop.f32.mrb[142].mxu0 }
 0x4df   :  { %v10098_v11 = vadd.f32 %v12679_v14, %v3413_v9  ;;  %v3415_v12 = vpop.f32.mrb[143].mxu0  ;;  %v3599_v13 = vmax.f32 %v10097_v2, 0.0 }
 0x4e1   :  { %v3600_v17 = vmax.f32 %v10098_v11, 0.0 }
 0x4e3   :  { %v3664_v20 = vpack.c.bf16 %v3600_v17, %v3599_v13 }
 0x4e4   :  { %v3418_v22 = vpop.f32.mrb[144].mxu0 }
 0x4e5   :  { %3714 = vst [vmem:[#allocation2 + $0x118] sm:$0xff] %v3664_v20  ;;  %v10100_v23 = vadd.f32 %v3418_v22, %v2553_v19  ;;  %v3420_v26 = vpop.f32.mrb[145].mxu0  ;;  %5561 = vmatprep.mubr.bf16.mxu1 %v3664_v20  ;;  %v2577_v20 = vadd.f32 %v12679_v14, %v12730_v36 }
 0x4e6   :  { %v3421_v35 = vpop.f32.mrb[146].mxu0  ;;  %5562 = vmatmul.mubr.bf16.gmra.mrb[72].mxu1 %v3737_v32 }
 0x4e7   :  { %v10102_v38 = vadd.f32 %v3421_v35, %v2556_v29  ;;  %v3423_v39 = vpop.f32.mrb[147].mxu0  ;;  %v3601_v41 = vmax.f32 %v10100_v23, 0.0  ;;  %v2580_v29 = vadd.f32 %v12679_v14, %v12732_v18 }
 0x4e9   :  { %v3602_v42 = vmax.f32 %v10102_v38, 0.0 }
 0x4eb   :  { %v12870_v33 = vpack.c.bf16 %v3602_v42, %v3601_v41  ;;  %v2585_v41 = vadd.f32 %v12679_v14, %v12736_v28 }
 0x4ec   :  { %v3426_v48 = vpop.f32.mrb[148].mxu0 }
 0x4ed   :  { %3715 = vst [vmem:[#allocation2 + $0x120] sm:$0xff] %v12870_v33  ;;  %v10104_v50 = vadd.f32 %v3426_v48, %v2561_v43  ;;  %v3428_v54 = vpop.f32.mrb[149].mxu0  ;;  %5569 = vmatprep.mubr.bf16.mxu1 %v12870_v33 }
 0x4ee   :  { %v3429_v55 = vpop.f32.mrb[150].mxu0  ;;  %5570 = vmatmul.mubr.bf16.gmra.mrb[76].mxu1 %v12876_v0 }
 0x4ef   :  { %v10106_v56 = vadd.f32 %v3429_v55, %v2564_v37  ;;  %v3431_v58 = vpop.f32.mrb[151].mxu0  ;;  %v3603_v49 = vmax.f32 %v10104_v50, 0.0  ;;  %v2588_v50 = vadd.f32 %v12679_v14, %v12738_v31 }
 0x4f0   :  { %v2593_v58 = vadd.f32 %v12679_v14, %v12742_v44  ;;  %v2601_v44 = vadd.f32 %v12679_v14, %v12754_v62 }
 0x4f1   :  { %v3604_v59 = vmax.f32 %v10106_v56, 0.0 }
 0x4f3   :  { %v3666_v63 = vpack.c.bf16 %v3604_v59, %v3603_v49 }
 0x4f4   :  { %v3434_v2 = vpop.f32.mrb[152].mxu0 }
 0x4f5   :  { %3716 = vst [vmem:[#allocation2 + $0x128] sm:$0xff] %v3666_v63  ;;  %v10108_v5 = vadd.f32 %v3434_v2, %v2569_v60  ;;  %v3436_v9 = vpop.f32.mrb[153].mxu0  ;;  %v2596_v63 = vadd.f32 %v12679_v14, %v12744_v47  ;;  %v3741_v2 = vld [vmem:[#allocation2 + $0x78] sm:$0xff]  ;;  %v2604_v47 = vadd.f32 %v12679_v14, %v12757_v7  ;;  %v3761_v7 = vld [vmem:[#allocation2] sm:$0xf0] }
 0x4f6   :  { %v3437_v11 = vpop.f32.mrb[154].mxu0 }
 0x4f7   :  { %v10110_v12 = vadd.f32 %v3437_v11, %v2572_v52  ;;  %v3439_v13 = vpop.f32.mrb[155].mxu0  ;;  %v3605_v17 = vmax.f32 %v10108_v5, 0.0  ;;  %v3822_v52 = vld [vmem:[#allocation2 + $0xc8] sm:$0xf0] }
 0x4f8   :  { %v3828_v13 = vrot.slane %v3822_v52, 4  ;;  %v3844_v52 = vrot.slane %v12838_v61, 4 }
 0x4f9   :  { %v3606_v19 = vmax.f32 %v10110_v12, 0.0 }
 0x4fb   :  { %v12885_v22 = vpack.c.bf16 %v3606_v19, %v3605_v17  ;;  %v3829_v17 = vrot.slane %v12766_v16, 4 }
 0x4fc   :  { %v3442_v23 = vpop.f32.mrb[156].mxu0 }
 0x4fd   :  { %3717 = vst [vmem:[#allocation2 + $0x130] sm:$0xff] %v12885_v22  ;;  %v10112_v1 = vadd.f32 %v3442_v23, %v2577_v20  ;;  %v3444_v26 = vpop.f32.mrb[157].mxu0  ;;  %v3830_v62 = vsel %vm3767_vm0, %v3828_v13, %v3829_v17 }
 0x4fe   :  { %v3445_v32 = vpop.f32.mrb[158].mxu0  ;;  %v12907_v26 = vld [vmem:[#allocation2 + $0x80] sm:$0xff] }
 0x4ff   :  { %v10114_v4 = vadd.f32 %v3445_v32, %v2580_v29  ;;  %v3447_v35 = vpop.f32.mrb[159].mxu0  ;;  %v3607_v38 = vmax.f32 %v10112_v1, 0.0 }
 0x501   :  { %v3608_v39 = vmax.f32 %v10114_v4, 0.0  ;;  %v3824_v4 = vld [vmem:[#allocation2 + $0xd8] sm:$0xf] }
 0x503   :  { %v3668_v42 = vpack.c.bf16 %v3608_v39, %v3607_v38  ;;  %v2609_v39 = vadd.f32 %v12679_v14, %v12774_v21 }
 0x504   :  { %v3450_v36 = vpop.f32.mrb[160].mxu0 }
 0x505   :  { %3718 = vst [vmem:[#allocation2 + $0x138] sm:$0xff] %v3668_v42  ;;  %v10116_v43 = vadd.f32 %v3450_v36, %v2585_v41  ;;  %v3452_v48 = vpop.f32.mrb[161].mxu0  ;;  %v3769_v41 = vrot.slane %v12778_v24, 4  ;;  %v3831_v42 = vrot.slane %v3824_v4, 4 }
 0x506   :  { %v3453_v54 = vpop.f32.mrb[162].mxu0  ;;  %v3768_v48 = vrot.slane %v3761_v7, 4  ;;  %v12955_v7 = vld [vmem:[%s14520_s2] ss:$0 sm:$0xff] }
 0x507   :  { %v10118_v37 = vadd.f32 %v3453_v54, %v2588_v50  ;;  %v3455_v55 = vpop.f32.mrb[163].mxu0  ;;  %v3609_v18 = vmax.f32 %v10116_v43, 0.0  ;;  %v2612_v43 = vadd.f32 %v12679_v14, %v12781_v27  ;;  %v11043_v50 = vld [vmem:[%s14521_s3 + $0x100] sm:$0xff]   ;;  %v3763_v27 = vld [vmem:[#allocation2 + $0x10] sm:$0xf] }
 0x508   :  { %v3770_v24 = vsel %vm3767_vm0, %v3768_v48, %v3769_v41 }
 0x509   :  { %v3610_v56 = vmax.f32 %v10118_v37, 0.0  ;;  %v11044_v37 = vld [vmem:[%s14521_s3 + $0x148] sm:$0xff]  }
 0x50b   :  { %v3669_v49 = vpack.c.bf16 %v3610_v56, %v3609_v18  ;;  %v3832_v56 = vsel %vm3767_vm0, %v3829_v17, %v3831_v42  ;;  %v2628_v42 = vadd.f32 %v12955_v7, %v12817_v10 }
 0x50c   :  { %v3458_v59 = vpop.f32.mrb[164].mxu0 }
 0x50d   :  { %3719 = vst [vmem:[#allocation2 + $0x140] sm:$0xff] %v3669_v49  ;;  %v10120_v28 = vadd.f32 %v3458_v59, %v2593_v58  ;;  %v3460_v60 = vpop.f32.mrb[165].mxu0  ;;  %5577 = vmatprep.mubr.bf16.mxu1 %v3669_v49  ;;  %v3837_v59 = vld [vmem:[#allocation2 + $0xf0] sm:$0xf0] }
 0x50e   :  { %v3461_v5 = vpop.f32.mrb[166].mxu0  ;;  %5578 = vmatmul.mubr.bf16.gmra.mrb[80].mxu1 %v3741_v2  ;;  %v11046_v60 = vld [vmem:[%s14521_s3 + $0x150] sm:$0xff]  }
 0x50f   :  { %v10122_v31 = vadd.f32 %v3461_v5, %v2596_v63  ;;  %v3463_v9 = vpop.f32.mrb[167].mxu0  ;;  %v3611_v11 = vmax.f32 %v10120_v28, 0.0  ;;  %v11045_v28 = vld [vmem:[%s14521_s3 + $0x108] sm:$0xff]   ;;  %v2617_v5 = vadd.f32 %v12679_v14, %v12796_v45  ;;  %v11048_v45 = vld [vmem:[%s14521_s3 + $0x158] sm:$0xff]  }
 0x510   :  { %v3843_v9 = vrot.slane %v3837_v59, 4  ;;  %v2633_v59 = vadd.f32 %v12955_v7, %v12826_v25 }
 0x511   :  { %v3612_v12 = vmax.f32 %v10122_v31, 0.0  ;;  %v3771_v31 = vrot.slane %v3763_v27, 4  ;;  %v11054_v27 = vld [vmem:[%s14521_s3 + $0x170] sm:$0xff]  }
 0x513   :  { %v12901_v19 = vpack.c.bf16 %v3612_v12, %v3611_v11  ;;  %v2620_v12 = vadd.f32 %v12679_v14, %v12799_v53  ;;  %v3845_v14 = vsel %vm3767_vm0, %v3843_v9, %v3844_v52 }
 0x514   :  { %v3466_v20 = vpop.f32.mrb[168].mxu0 }
 0x515   :  { %3720 = vst [vmem:[#allocation2 + $0x148] sm:$0xff] %v12901_v19  ;;  %v10124_v23 = vadd.f32 %v3466_v20, %v2601_v44  ;;  %v3468_v1 = vpop.f32.mrb[169].mxu0  ;;  %5585 = vmatprep.mubr.bf16.mxu1 %v12901_v19  ;;  %v11047_v44 = vld [vmem:[%s14521_s3 + $0x110] sm:$0xff]  }
 0x516   :  { %v3469_v29 = vpop.f32.mrb[170].mxu0  ;;  %5586 = vmatmul.mubr.bf16.gmra.mrb[84].mxu1 %v12907_v26  ;;  %v3839_v1 = vld [vmem:[#allocation2 + $0x100] sm:$0xf] }
 0x517   :  { %v10126_v16 = vadd.f32 %v3469_v29, %v2604_v47  ;;  %v3471_v32 = vpop.f32.mrb[171].mxu0  ;;  %5626 = vmatprep.mubr.bf16.mxu1 %v3830_v62  ;;  %v3613_v35 = vmax.f32 %v10124_v23, 0.0  ;;  %v3772_v47 = vsel %vm3767_vm0, %v3769_v41, %v3771_v31  ;;  %v11049_v29 = vld [vmem:[%s14521_s3 + $0x118] sm:$0xff]   ;;  %v3777_v62 = vld [vmem:[#allocation2 + $0x28] sm:$0xf0]  ;;  %v11055_v31 = vld [vmem:[%s14521_s3 + $0x130] sm:$0xff]  }
 0x519   :  { %v3614_v38 = vmax.f32 %v10126_v16, 0.0  ;;  %v11050_v16 = vld [vmem:[%s14521_s3 + $0x160] sm:$0xff]  }
 0x51b   :  { %v3671_v36 = vpack.c.bf16 %v3614_v38, %v3613_v35  ;;  %v2625_v35 = vadd.f32 %v12955_v7, %v12814_v3  ;;  %v3784_v38 = vrot.slane %v12843_v6, 4  ;;  %v11052_v3 = vld [vmem:[%s14521_s3 + $0x168] sm:$0xff]  }
 0x51c   :  { %v3474_v54 = vpop.f32.mrb[172].mxu0 }
 0x51d   :  { %3721 = vst [vmem:[#allocation2 + $0x150] sm:$0xff] %v3671_v36  ;;  %v10128_v55 = vadd.f32 %v3474_v54, %v2609_v39  ;;  %v3476_v21 = vpop.f32.mrb[173].mxu0  ;;  %v3846_v39 = vrot.slane %v3839_v1, 4  ;;  %v3783_v36 = vrot.slane %v3777_v62, 4  ;;  %v3799_v1 = vrot.slane %v12876_v0, 4 }
 0x51e   :  { %v3477_v18 = vpop.f32.mrb[174].mxu0  ;;  %5627 = vmatmul.mubr.bf16.vlgmr.msra.gmra.mrb[88].mxu1 %v3770_v24 }
 0x51f   :  { %v10130_v58 = vadd.f32 %v3477_v18, %v2612_v43  ;;  %v3479_v49 = vpop.f32.mrb[175].mxu0  ;;  %5634 = vmatprep.mubr.bf16.mxu1 %v3832_v56  ;;  %9426 = vmatpush3.bf16.msra.mxu1 %v11043_v50  ;;  %v3615_v63 = vmax.f32 %v10128_v55, 0.0  ;;  %v11051_v43 = vld [vmem:[%s14521_s3 + $0x120] sm:$0xff]   ;;  %v3785_v54 = vsel %vm3767_vm0, %v3783_v36, %v3784_v38  ;;  %v3847_v10 = vsel %vm3767_vm0, %v3844_v52, %v3846_v39  ;;  %v3779_v55 = vld [vmem:[#allocation2 + $0x38] sm:$0xf]  ;;  %v11053_v56 = vld [vmem:[%s14521_s3 + $0x128] sm:$0xff]  }
 0x520   :  { %9427 = vmatprep.subr.bf16.mxu1 %v11044_v37  ;;  %v3852_v18 = vld [vmem:[#allocation2 + $0x118] sm:$0xf0]  ;;  %v3794_v36 = vld [vmem:[#allocation2 + $0x60] sm:$0xf] }
 0x521   :  { %v3616_v2 = vmax.f32 %v10130_v58, 0.0  ;;  %v11056_v52 = vld [vmem:[%s14521_s3 + $0x178] sm:$0xff]  }
 0x523   :  { %v12933_v11 = vpack.c.bf16 %v3616_v2, %v3615_v63  ;;  %9428 = vmatpush3.bf16.msra.mxu1 %v11045_v28  ;;  %v3786_v28 = vrot.slane %v3779_v55, 4  ;;  %v3859_v63 = vrot.slane %v12870_v33, 4  ;;  %v2652_v55 = vadd.f32 %v12955_v7, %v12849_v15 }
 0x524   :  { %v3482_v13 = vpop.f32.mrb[176].mxu0  ;;  %9429 = vmatprep.subr.bf16.mxu1 %v11046_v60  ;;  %v3858_v60 = vrot.slane %v3852_v18, 4  ;;  %v2657_v15 = vadd.f32 %v12955_v7, %v12852_v30 }
 0x525   :  { %3722 = vst [vmem:[#allocation2 + $0x158] sm:$0xff] %v12933_v11  ;;  %v10132_v17 = vadd.f32 %v3482_v13, %v2617_v5  ;;  %v3484_v61 = vpop.f32.mrb[177].mxu0  ;;  %v2636_v5 = vadd.f32 %v12955_v7, %v12829_v34  ;;  %v3787_v33 = vsel %vm3767_vm0, %v3784_v38, %v3786_v28  ;;  %v3807_v28 = vld [vmem:[#allocation2 + $0x78] sm:$0xf0] }
 0x526   :  { %v3485_v20 = vpop.f32.mrb[178].mxu0  ;;  %5635 = vmatmul.mubr.bf16.gmra.mrb[92].mxu1 %v3772_v47  ;;  %v3860_v34 = vsel %vm3767_vm0, %v3858_v60, %v3859_v63  ;;  %v11057_v61 = vld [vmem:[%s14521_s3 + $0x138] sm:$0xff]   ;;  %v3792_v47 = vld [vmem:[#allocation2 + $0x50] sm:$0xf0] }
 0x527   :  { %v10134_v53 = vadd.f32 %v3485_v20, %v2620_v12  ;;  %v3487_v23 = vpop.f32.mrb[179].mxu0  ;;  %5642 = vmatprep.mubr.bf16.mxu1 %v3845_v14  ;;  %9430 = vmatpush3.bf16.msra.mxu1 %v11047_v44  ;;  %v3617_v32 = vmax.f32 %v10132_v17, 0.0  ;;  %v3854_v17 = vld [vmem:[#allocation2 + $0x128] sm:$0xf]  ;;  %v11058_v20 = vld [vmem:[%s14521_s3 + $0x1c0] sm:$0xff]  }
 0x528   :  { %9431 = vmatprep.subr.bf16.mxu1 %v11048_v45  ;;  %v2641_v23 = vadd.f32 %v12955_v7, %v12833_v51 }
 0x529   :  { %v3618_v4 = vmax.f32 %v10134_v53, 0.0 }
 0x52b   :  { %v12960_v41 = vpack.c.bf16 %v3618_v4, %v3617_v32  ;;  %9432 = vmatpush3.bf16.msra.mxu1 %v11049_v29  ;;  %v3861_v29 = vrot.slane %v3854_v17, 4  ;;  %v3798_v32 = vrot.slane %v3792_v47, 4 }
 0x52c   :  { %v3490_v48 = vpop.f32.mrb[180].mxu0  ;;  %9433 = vmatprep.subr.bf16.mxu1 %v11050_v16  ;;  %v2644_v16 = vadd.f32 %v12955_v7, %v12836_v57 }
 0x52d   :  { %3723 = vst [vmem:[#allocation2 + $0x160] sm:$0xff] %v12960_v41  ;;  %v10136_v6 = vadd.f32 %v3490_v48, %v2625_v35  ;;  %v3492_v50 = vpop.f32.mrb[181].mxu0  ;;  %v3800_v39 = vsel %vm3767_vm0, %v3798_v32, %v3799_v1  ;;  %v3862_v51 = vsel %vm3767_vm0, %v3859_v63, %v3861_v29  ;;  %v3867_v48 = vld [vmem:[#allocation2 + $0x140] sm:$0xf0]  ;;  %v3814_v63 = vrot.slane %v12907_v26, 4 }
 0x52e   :  { %v3493_v37 = vpop.f32.mrb[182].mxu0  ;;  %5643 = vmatmul.mubr.bf16.gmra.mrb[96].mxu1 %v3785_v54  ;;  %v3801_v50 = vrot.slane %v3794_v36, 4  ;;  %v3873_v54 = vrot.slane %v3867_v48, 4  ;;  %v13019_v26 = vld [vmem:[#allocation2 + $0xe0] sm:$0xff]  ;;  %v3944_v29 = vld [vmem:[#allocation2 + $0xe8] sm:$0xf] }
 0x52f   :  { %v10138_v21 = vadd.f32 %v3493_v37, %v2628_v42  ;;  %v3495_v24 = vpop.f32.mrb[183].mxu0  ;;  %5650 = vmatprep.mubr.bf16.mxu1 %v3847_v10  ;;  %9434 = vmatpush3.bf16.msra.mxu1 %v11051_v43  ;;  %v3619_v58 = vmax.f32 %v10136_v6, 0.0  ;;  %v2649_v6 = vadd.f32 %v12955_v7, %v12845_v8  ;;  %v3874_v37 = vrot.slane %v12901_v19, 4  ;;  %v3957_v36 = vld [vmem:[#allocation2 + $0x100] sm:$0xf0] }
 0x530   :  { %9435 = vmatprep.subr.bf16.mxu1 %v11052_v3  ;;  %v3949_v47 = vrot.slane %v13019_v26, 4  ;;  %v3951_v32 = vrot.slane %v3944_v29, 4 }
 0x531   :  { %v3620_v49 = vmax.f32 %v10138_v21, 0.0 }
 0x533   :  { %v3674_v2 = vpack.c.bf16 %v3620_v49, %v3619_v58  ;;  %9436 = vmatpush3.bf16.msra.mxu1 %v11053_v56  ;;  %v3802_v56 = vsel %vm3767_vm0, %v3799_v1, %v3801_v50  ;;  %v3875_v58 = vsel %vm3767_vm0, %v3873_v54, %v3874_v37  ;;  %v13024_v1 = vld [vmem:[#allocation2 + $0x18] sm:$0xff] }
 0x534   :  { %v3498_v9 = vpop.f32.mrb[184].mxu0  ;;  %9437 = vmatprep.subr.bf16.mxu1 %v11054_v27  ;;  %v11064_v50 = vld [vmem:[%s14521_s3 + $0x1d8] sm:$0xff]  }
 0x535   :  { %3724 = vst [vmem:[#allocation2 + $0x168] sm:$0xff] %v3674_v2  ;;  %v10140_v25 = vadd.f32 %v3498_v9, %v2633_v59  ;;  %v3500_v12 = vpop.f32.mrb[185].mxu0  ;;  %v3869_v59 = vld [vmem:[#allocation2 + $0x150] sm:$0xf]  ;;  %v3813_v9 = vrot.slane %v3807_v28, 4  ;;  %v11067_v28 = vld [vmem:[%s14521_s3 + $0x1a0] sm:$0xff]  }
 0x536   :  { %v3501_v44 = vpop.f32.mrb[186].mxu0  ;;  %5651 = vmatmul.mubr.bf16.gmra.mrb[100].mxu1 %v3787_v33  ;;  %v3876_v2 = vrot.slane %v3869_v59, 4 }
 0x537   :  { %v10142_v13 = vadd.f32 %v3501_v44, %v2636_v5  ;;  %v3503_v45 = vpop.f32.mrb[187].mxu0  ;;  %5658 = vmatprep.mubr.bf16.mxu1 %v3860_v34  ;;  %9438 = vmatpush3.bf16.msra.mxu1 %v11055_v31  ;;  %v3621_v14 = vmax.f32 %v10140_v25, 0.0  ;;  %v2660_v31 = vadd.f32 %v12955_v7, %v12855_v40  ;;  %v3815_v33 = vsel %vm3767_vm0, %v3813_v9, %v3814_v63  ;;  %v3942_v7 = vld [vmem:[#allocation2 + $0xd8] sm:$0xf0]  ;;  %v11069_v9 = vld [vmem:[%s14521_s3 + $0x1a8] sm:$0xff]  }
 0x538   :  { %9439 = vmatprep.subr.bf16.mxu1 %v11056_v52  ;;  %v3877_v34 = vsel %vm3767_vm0, %v3874_v37, %v3876_v2 }
 0x539   :  { %v3622_v53 = vmax.f32 %v10142_v13, 0.0  ;;  %v3809_v13 = vld [vmem:[#allocation2 + $0x88] sm:$0xf] }
 0x53a   :  { %v3816_v40 = vrot.slane %v3809_v13, 4 }
 0x53b   :  { %v3675_v62 = vpack.c.bf16 %v3622_v53, %v3621_v14  ;;  %9440 = vmatpush3.bf16.msra.mxu1 %v11057_v61  ;;  %v3948_v14 = vrot.slane %v3942_v7, 4 }
 0x53c   :  { %v3506_v4 = vpop.f32.mrb[188].mxu0  ;;  %9489 = vmatprep.subr.bf16.mxu1 %v11058_v20  ;;  %v3817_v53 = vsel %vm3767_vm0, %v3814_v63, %v3816_v40 }
 0x53d   :  { %3725 = vst [vmem:[#allocation2 + $0x170] sm:$0xff] %v3675_v62  ;;  %v10144_v35 = vadd.f32 %v3506_v4, %v2641_v23  ;;  %v3508_v38 = vpop.f32.mrb[189].mxu0  ;;  %v3950_v23 = vsel %vm3767_vm0, %v3948_v14, %v3949_v47  ;;  %v3882_v62 = vld [vmem:[#allocation2 + $0x10] sm:$0xf0]  ;;  %v11073_v14 = vld [vmem:[%s14521_s3 + $0x1b8] sm:$0xff]  }
 0x53e   :  { %v3509_v42 = vpop.f32.mrb[190].mxu0  ;;  %5659 = vmatmul.mubr.bf16.gmra.mrb[104].mxu1 %v3800_v39  ;;  %v3888_v4 = vrot.slane %v3882_v62, 4  ;;  %v11060_v38 = vld [vmem:[%s14521_s3 + $0x1c8] sm:$0xff]  }
 0x53f   :  { %v10146_v0 = vadd.f32 %v3509_v42, %v2644_v16  ;;  %v3511_v43 = vpop.f32.mrb[191].mxu0  ;;  %5666 = vmatprep.mubr.bf16.mxu1 %v3862_v51  ;;  %v3623_v3 = vmax.f32 %v10144_v35, 0.0  ;;  %v3889_v16 = vrot.slane %v13024_v1, 4  ;;  %v11059_v35 = vld [vmem:[%s14521_s3 + $0x180] sm:$0xff]   ;;  %v3952_v42 = vsel %vm3767_vm0, %v3949_v47, %v3951_v32  ;;  %v13090_v47 = vld [vmem:[#allocation2 + $0x68] sm:$0xff] }
 0x540   :  { %v3884_v51 = vld [vmem:[#allocation2 + $0x20] sm:$0xf]  ;;  %v11062_v43 = vld [vmem:[%s14521_s3 + $0x1d0] sm:$0xff]   ;;  %v3919_v29 = vrot.slane %v13090_v47, 4 }
 0x541   :  { %v3624_v57 = vmax.f32 %v10146_v0, 0.0  ;;  %v3890_v39 = vsel %vm3767_vm0, %v3888_v4, %v3889_v16  ;;  %v11061_v0 = vld [vmem:[%s14521_s3 + $0x188] sm:$0xff]   ;;  %v3891_v48 = vrot.slane %v3884_v51, 4  ;;  %v3994_v51 = vrot.slane %v12933_v11, 4  ;;  %v3929_v11 = vld [vmem:[#allocation2 + $0x98] sm:$0xf] }
 0x543   :  { %v3676_v10 = vpack.c.bf16 %v3624_v57, %v3623_v3  ;;  %v3963_v3 = vrot.slane %v3957_v36, 4  ;;  %v3964_v57 = vrot.slane %v12857_v46, 4  ;;  %v3892_v54 = vsel %vm3767_vm0, %v3889_v16, %v3891_v48  ;;  %v11065_v46 = vld [vmem:[%s14521_s3 + $0x198] sm:$0xff]   ;;  %v3989_v48 = vld [vmem:[#allocation2 + $0x160] sm:$0xf] }
 0x544   :  { %v3514_v21 = vpop.f32.mrb[192].mxu0 }
 0x545   :  { %3726 = vst [vmem:[#allocation2 + $0x178] sm:$0xff] %v3676_v10  ;;  %v10148_v24 = vadd.f32 %v3514_v21, %v2649_v6  ;;  %v3516_v18 = vpop.f32.mrb[193].mxu0  ;;  %v11063_v6 = vld [vmem:[%s14521_s3 + $0x190] sm:$0xff]   ;;  %v3965_v37 = vsel %vm3767_vm0, %v3963_v3, %v3964_v57  ;;  %v13050_v10 = vld [vmem:[#allocation2 + $0x40] sm:$0xff]  ;;  %v3897_v21 = vld [vmem:[#allocation2 + $0x38] sm:$0xf0] }
 0x546   :  { %v3517_v27 = vpop.f32.mrb[194].mxu0  ;;  %5667 = vmatmul.mubr.bf16.gmra.mrb[108].mxu1 %v3802_v56  ;;  %v3904_v56 = vrot.slane %v13050_v10, 4  ;;  %v3903_v59 = vrot.slane %v3897_v21, 4  ;;  %v3927_v3 = vld [vmem:[#allocation2 + $0x88] sm:$0xf0] }
 0x547   :  { %v10150_v49 = vadd.f32 %v3517_v27, %v2652_v55  ;;  %v3519_v8 = vpop.f32.mrb[195].mxu0  ;;  %5674 = vmatprep.mubr.bf16.mxu1 %v3875_v58  ;;  %v3625_v19 = vmax.f32 %v10148_v24, 0.0  ;;  %v3959_v55 = vld [vmem:[#allocation2 + $0x110] sm:$0xf]  ;;  %v11066_v24 = vld [vmem:[%s14521_s3 + $0x1e0] sm:$0xff]  }
 0x548   :  { %v3966_v58 = vrot.slane %v3959_v55, 4  ;;  %v3905_v63 = vsel %vm3767_vm0, %v3903_v59, %v3904_v56 }
 0x549   :  { %v3626_v60 = vmax.f32 %v10150_v49, 0.0 }
 0x54a   :  { %v3967_v2 = vsel %vm3767_vm0, %v3964_v57, %v3966_v58 }
 0x54b   :  { %v3677_v5 = vpack.c.bf16 %v3626_v60, %v3625_v19  ;;  %v11068_v60 = vld [vmem:[%s14521_s3 + $0x1e8] sm:$0xff]  }
 0x54c   :  { %v3522_v52 = vpop.f32.mrb[196].mxu0 }
 0x54d   :  { %3727 = vst [vmem:[#allocation2 + $0x180] sm:$0xff] %v3677_v5  ;;  %v10152_v25 = vadd.f32 %v3522_v52, %v2657_v15  ;;  %v3524_v12 = vpop.f32.mrb[197].mxu0  ;;  %v3899_v5 = vld [vmem:[#allocation2 + $0x48] sm:$0xf]  ;;  %v11070_v52 = vld [vmem:[%s14521_s3 + $0x1f0] sm:$0xff]  }
 0x54e   :  { %v3525_v44 = vpop.f32.mrb[198].mxu0  ;;  %5675 = vmatmul.mubr.bf16.gmra.mrb[112].mxu1 %v3815_v33  ;;  %v3906_v12 = vrot.slane %v3899_v5, 4 }
 0x54f   :  { %v10154_v30 = vadd.f32 %v3525_v44, %v2660_v31  ;;  %v3527_v45 = vpop.f32.mrb[199].mxu0  ;;  %5682 = vmatprep.mubr.bf16.mxu1 %v3877_v34  ;;  %v3627_v17 = vmax.f32 %v10152_v25, 0.0  ;;  %v3972_v31 = vld [vmem:[#allocation2 + $0x128] sm:$0xf0]  ;;  %v3979_v34 = vrot.slane %v12885_v22, 4 }
 0x550   :  { %v3978_v44 = vrot.slane %v3972_v31, 4  ;;  %v11071_v45 = vld [vmem:[%s14521_s3 + $0x1b0] sm:$0xff]   ;;  %v3907_v7 = vsel %vm3767_vm0, %v3904_v56, %v3906_v12  ;;  %v4019_v31 = vld [vmem:[#allocation2 + $0xe8] sm:$0xff] }
 0x551   :  { %v3628_v61 = vmax.f32 %v10154_v30, 0.0  ;;  %v13138_v12 = vld [vmem:[#allocation2 + $0x108] sm:$0xff] }
 0x552   :  { %v3980_v22 = vsel %vm3767_vm0, %v3978_v44, %v3979_v34  ;;  %v11082_v44 = vld [vmem:[%s14521_s3 + $0x260] sm:$0xff]  }
 0x553   :  { %v3678_v20 = vpack.c.bf16 %v3628_v61, %v3627_v17  ;;  %v11072_v61 = vld [vmem:[%s14521_s3 + $0x1f8] sm:$0xff]  }
 0x555   :  { %3728 = vst [vmem:[#allocation2 + $0x188] sm:$0xff] %v3678_v20  ;;  %v3974_v20 = vld [vmem:[#allocation2 + $0x138] sm:$0xf] }
 0x556   :  { %5683 = vmatmul.mubr.bf16.gmra.mrb[116].mxu1 %v3817_v53  ;;  %v3912_v53 = vld [vmem:[#allocation2 + $0x60] sm:$0xf0]  ;;  %v3981_v62 = vrot.slane %v3974_v20, 4  ;;  %v13166_v20 = vld [vmem:[#allocation2 + $0x130] sm:$0xff] }
 0x557   :  { %5723 = vmatprep.mubr.bf16.mxu1 %v3950_v23  ;;  %v11074_v23 = vld [vmem:[%s14521_s3 + $0x240] sm:$0xff]   ;;  %v3918_v16 = vrot.slane %v3912_v53, 4 }
 0x558   :  { %v3982_v4 = vsel %vm3767_vm0, %v3979_v34, %v3981_v62  ;;  %v11083_v34 = vld [vmem:[%s14521_s3 + $0x220] sm:$0xff]  }
 0x559   :  { %v3920_v32 = vsel %vm3767_vm0, %v3918_v16, %v3919_v29  ;;  %v11090_v53 = vld [vmem:[%s14521_s3 + $0x2c0] sm:$0xff]  }
 0x55e   :  { %5724 = vmatmul.mubr.bf16.vlgmr.msra.gmra.mrb[120].mxu1 %v3890_v39 }
 0x55f   :  { %5731 = vmatprep.mubr.bf16.mxu1 %v3952_v42  ;;  %9490 = vmatpush3.bf16.msra.mxu1 %v11059_v35  ;;  %v3914_v35 = vld [vmem:[#allocation2 + $0x70] sm:$0xf] }
 0x560   :  { %9491 = vmatprep.subr.bf16.mxu1 %v11060_v38  ;;  %v3987_v38 = vld [vmem:[#allocation2 + $0x150] sm:$0xf0]  ;;  %v3921_v39 = vrot.slane %v3914_v35, 4  ;;  %v4027_v35 = vld [vmem:[#allocation2 + $0x138] sm:$0xff] }
 0x561   :  { %v3993_v42 = vrot.slane %v3987_v38, 4 }
 0x562   :  { %v3922_v36 = vsel %vm3767_vm0, %v3919_v29, %v3921_v39 }
 0x563   :  { %9492 = vmatpush3.bf16.msra.mxu1 %v11061_v0  ;;  %v3995_v0 = vsel %vm3767_vm0, %v3993_v42, %v3994_v51 }
 0x564   :  { %9493 = vmatprep.subr.bf16.mxu1 %v11062_v43  ;;  %v13104_v43 = vld [vmem:[#allocation2 + $0x90] sm:$0xff] }
 0x565   :  { %v3934_v57 = vrot.slane %v13104_v43, 4 }
 0x566   :  { %5732 = vmatmul.mubr.bf16.gmra.mrb[124].mxu1 %v3892_v54 }
 0x567   :  { %5739 = vmatprep.mubr.bf16.mxu1 %v3965_v37  ;;  %9494 = vmatpush3.bf16.msra.mxu1 %v11063_v6  ;;  %v3996_v6 = vrot.slane %v3989_v48, 4  ;;  %v4011_v48 = vld [vmem:[#allocation2 + $0x70] sm:$0xff] }
 0x568   :  { %9495 = vmatprep.subr.bf16.mxu1 %v11064_v50  ;;  %v3933_v50 = vrot.slane %v3927_v3, 4  ;;  %v13184_v3 = vld [vmem:[#allocation2 + $0x158] sm:$0xff] }
 0x569   :  { %v9313_v18 = vpop.f32.mrb[56].mxu1  ;;  %v3997_v37 = vsel %vm3767_vm0, %v3994_v51, %v3996_v6  ;;  %v11091_v6 = vld [vmem:[%s14521_s3 + $0x280] sm:$0xff]  }
 0x56a   :  { %v9314_v27 = vpop.f32.mrb[57].mxu1  ;;  %v3935_v54 = vsel %vm3767_vm0, %v3933_v50, %v3934_v57  ;;  %v11092_v50 = vld [vmem:[%s14521_s3 + $0x2c8] sm:$0xff]  }
 0x56b   :  { %v13059_v49 = vadd.f32 %v9314_v27, %v9313_v18  ;;  %v9316_v8 = vpop.f32.mrb[58].mxu1  ;;  %9496 = vmatpush3.bf16.msra.mxu1 %v11065_v46  ;;  %v3936_v46 = vrot.slane %v3929_v11, 4 }
 0x56c   :  { %v9317_v19 = vpop.f32.mrb[59].mxu1  ;;  %9497 = vmatprep.subr.bf16.mxu1 %v11066_v24 }
 0x56d   :  { %v13067_v15 = vadd.f32 %v9317_v19, %v9316_v8  ;;  %v3937_v58 = vsel %vm3767_vm0, %v3934_v57, %v3936_v46  ;;  %v4050_v57 = vld [vmem:[#allocation2 + $0xf0] sm:$0xff] }
 0x56e   :  { %5740 = vmatmul.mubr.bf16.gmra.mrb[128].mxu1 %v3905_v63 }
 0x56f   :  { %5747 = vmatprep.mubr.bf16.mxu1 %v3967_v2  ;;  %9498 = vmatpush3.bf16.msra.mxu1 %v11067_v28  ;;  %v11076_v2 = vld [vmem:[%s14521_s3 + $0x248] sm:$0xff]  }
 0x570   :  { %9499 = vmatprep.subr.bf16.mxu1 %v11068_v60  ;;  %v11075_v60 = vld [vmem:[%s14521_s3 + $0x200] sm:$0xff]  }
 0x571   :  { %v9319_v25 = vpop.f32.mrb[60].mxu1 }
 0x572   :  { %v9320_v33 = vpop.f32.mrb[61].mxu1 }
 0x573   :  { %v13078_v13 = vadd.f32 %v9320_v33, %v9319_v25  ;;  %v9322_v30 = vpop.f32.mrb[62].mxu1  ;;  %9500 = vmatpush3.bf16.msra.mxu1 %v11069_v9  ;;  %v11078_v9 = vld [vmem:[%s14521_s3 + $0x250] sm:$0xff]   ;;  %v4003_v25 = vld [vmem:[#allocation2 + $0x20] sm:$0xff]  ;;  %v11081_v33 = vld [vmem:[%s14521_s3 + $0x218] sm:$0xff]  }
 0x574   :  { %v9323_v17 = vpop.f32.mrb[63].mxu1  ;;  %9501 = vmatprep.subr.bf16.mxu1 %v11070_v52  ;;  %v11079_v52 = vld [vmem:[%s14521_s3 + $0x210] sm:$0xff]  }
 0x575   :  { %v13086_v40 = vadd.f32 %v9323_v17, %v9322_v30  ;;  %v11084_v30 = vld [vmem:[%s14521_s3 + $0x268] sm:$0xff]  }
 0x576   :  { %5748 = vmatmul.mubr.bf16.gmra.mrb[132].mxu1 %v3907_v7  ;;  %v11085_v17 = vld [vmem:[%s14521_s3 + $0x228] sm:$0xff]   ;;  %v11087_v7 = vld [vmem:[%s14521_s3 + $0x230] sm:$0xff]  }
 0x577   :  { %5755 = vmatprep.mubr.bf16.mxu1 %v3980_v22  ;;  %9502 = vmatpush3.bf16.msra.mxu1 %v11071_v45  ;;  %v4023_v45 = vld [vmem:[#allocation2 + $0x110] sm:$0xff]  ;;  %v4007_v22 = vld [vmem:[#allocation2 + $0x48] sm:$0xff] }
 0x578   :  { %9503 = vmatprep.subr.bf16.mxu1 %v11072_v61  ;;  %v11086_v61 = vld [vmem:[%s14521_s3 + $0x270] sm:$0xff]  }
 0x57b   :  { %9504 = vmatpush3.bf16.msra.mxu1 %v11073_v14  ;;  %v11089_v14 = vld [vmem:[%s14521_s3 + $0x238] sm:$0xff]  }
 0x57c   :  { %9553 = vmatprep.subr.bf16.mxu1 %v11074_v23 }
 0x57e   :  { %5756 = vmatmul.mubr.bf16.gmra.mrb[136].mxu1 %v3920_v32 }
 0x57f   :  { %5763 = vmatprep.mubr.bf16.mxu1 %v3982_v4 }
 0x586   :  { %5764 = vmatmul.mubr.bf16.gmra.mrb[140].mxu1 %v3922_v36 }
 0x587   :  { %5771 = vmatprep.mubr.bf16.mxu1 %v3995_v0 }
 0x58e   :  { %5772 = vmatmul.mubr.bf16.gmra.mrb[144].mxu1 %v3935_v54  ;;  %v4034_v54 = vld [vmem:[#allocation2 + $0x28] sm:$0xff] }
 0x58f   :  { %5779 = vmatprep.mubr.bf16.mxu1 %v3997_v37  ;;  %v13195_v37 = vld [vmem:[#allocation2 + $0xf8] sm:$0xff] }
 0x591   :  { %v9325_v55 = vpop.f32.mrb[64].mxu1 }
 0x592   :  { %v9326_v21 = vpop.f32.mrb[65].mxu1 }
 0x593   :  { %v13109_v24 = vadd.f32 %v9326_v21, %v9325_v55  ;;  %v9328_v18 = vpop.f32.mrb[66].mxu1 }
 0x594   :  { %v9329_v56 = vpop.f32.mrb[67].mxu1 }
 0x595   :  { %v13111_v27 = vadd.f32 %v9329_v56, %v9328_v18  ;;  %v11095_v18 = vld [vmem:[%s14521_s3 + $0x290] sm:$0xff]  }
 0x596   :  { %5780 = vmatmul.mubr.bf16.gmra.mrb[148].mxu1 %v3937_v58  ;;  %v11096_v58 = vld [vmem:[%s14521_s3 + $0x2d8] sm:$0xff]  }
 0x597   :  { %5820 = vmatprep.mubr.bf16.mxu1 %v13019_v26  ;;  %v11077_v26 = vld [vmem:[%s14521_s3 + $0x208] sm:$0xff]  }
 0x599   :  { %v9331_v8 = vpop.f32.mrb[68].mxu1 }
 0x59a   :  { %v9332_v59 = vpop.f32.mrb[69].mxu1 }
 0x59b   :  { %v13115_v28 = vadd.f32 %v9332_v59, %v9331_v8  ;;  %v9334_v19 = vpop.f32.mrb[70].mxu1  ;;  %v13214_v59 = vld [vmem:[#allocation2 + $0x30] sm:$0xff] }
 0x59c   :  { %v9335_v63 = vpop.f32.mrb[71].mxu1 }
 0x59d   :  { %v13123_v5 = vadd.f32 %v9335_v63, %v9334_v19  ;;  %v4054_v19 = vld [vmem:[#allocation2 + $0x118] sm:$0xff]  ;;  %v11098_v63 = vld [vmem:[%s14521_s3 + $0x2e0] sm:$0xff]  }
 0x59e   :  { %5821 = vmatmul.mubr.bf16.vlgmr.msra.gmra.mrb[152].mxu1 %v13024_v1  ;;  %v11080_v1 = vld [vmem:[%s14521_s3 + $0x258] sm:$0xff]  }
 0x59f   :  { %5828 = vmatprep.mubr.bf16.mxu1 %v4019_v31  ;;  %9554 = vmatpush3.bf16.msra.mxu1 %v11075_v60  ;;  %v11097_v60 = vld [vmem:[%s14521_s3 + $0x298] sm:$0xff]  }
 0x5a0   :  { %9555 = vmatprep.subr.bf16.mxu1 %v11076_v2 }
 0x5a3   :  { %9556 = vmatpush3.bf16.msra.mxu1 %v11077_v26 }
 0x5a4   :  { %9557 = vmatprep.subr.bf16.mxu1 %v11078_v9 }
 0x5a6   :  { %5829 = vmatmul.mubr.bf16.gmra.mrb[156].mxu1 %v4003_v25  ;;  %v11100_v25 = vld [vmem:[%s14521_s3 + $0x2e8] sm:$0xff]  }
 0x5a7   :  { %5836 = vmatprep.mubr.bf16.mxu1 %v13138_v12  ;;  %9558 = vmatpush3.bf16.msra.mxu1 %v11079_v52  ;;  %v11099_v52 = vld [vmem:[%s14521_s3 + $0x2a0] sm:$0xff]  }
 0x5a8   :  { %9559 = vmatprep.subr.bf16.mxu1 %v11080_v1 }
 0x5ab   :  { %9560 = vmatpush3.bf16.msra.mxu1 %v11081_v33 }
 0x5ac   :  { %9561 = vmatprep.subr.bf16.mxu1 %v11082_v44  ;;  %v4038_v44 = vld [vmem:[#allocation2 + $0x50] sm:$0xff] }
 0x5ae   :  { %5837 = vmatmul.mubr.bf16.gmra.mrb[160].mxu1 %v13050_v10  ;;  %v11088_v10 = vld [vmem:[%s14521_s3 + $0x278] sm:$0xff]  }
 0x5af   :  { %5844 = vmatprep.mubr.bf16.mxu1 %v4023_v45  ;;  %9562 = vmatpush3.bf16.msra.mxu1 %v11083_v34  ;;  %v13233_v34 = vld [vmem:[#allocation2 + $0x120] sm:$0xff] }
 0x5b0   :  { %9563 = vmatprep.subr.bf16.mxu1 %v11084_v30  ;;  %v11101_v30 = vld [vmem:[%s14521_s3 + $0x2a8] sm:$0xff]   ;;  %v13242_v45 = vld [vmem:[%s14522_s4] ss:$0 sm:$0xff] }
 0x5b3   :  { %9564 = vmatpush3.bf16.msra.mxu1 %v11085_v17  ;;  %v11102_v17 = vld [vmem:[%s14521_s3 + $0x2f0] sm:$0xff]  }
 0x5b4   :  { %9565 = vmatprep.subr.bf16.mxu1 %v11086_v61 }
 0x5b6   :  { %5845 = vmatmul.mubr.bf16.gmra.mrb[164].mxu1 %v4007_v22 }
 0x5b7   :  { %5852 = vmatprep.mubr.bf16.mxu1 %v13166_v20  ;;  %9566 = vmatpush3.bf16.msra.mxu1 %v11087_v7 }
 0x5b8   :  { %9567 = vmatprep.subr.bf16.mxu1 %v11088_v10  ;;  %v5532_v10 = vadd.f32 %v13059_v49, %v13242_v45 }
 0x5b9   :  { %v9337_v23 = vpop.f32.mrb[72].mxu1 }
 0x5ba   :  { %v9338_v29 = vpop.f32.mrb[73].mxu1 }
 0x5bb   :  { %v13175_v62 = vadd.f32 %v9338_v29, %v9337_v23  ;;  %v9340_v16 = vpop.f32.mrb[74].mxu1  ;;  %9568 = vmatpush3.bf16.msra.mxu1 %v11089_v14  ;;  %v11104_v29 = vld [vmem:[%s14521_s3 + $0x2f8] sm:$0xff]  }
 0x5bc   :  { %v9341_v32 = vpop.f32.mrb[75].mxu1  ;;  %9617 = vmatprep.subr.bf16.mxu1 %v11090_v53  ;;  %v11103_v53 = vld [vmem:[%s14521_s3 + $0x2b0] sm:$0xff]  }
 0x5bd   :  { %v13177_v4 = vadd.f32 %v9341_v32, %v9340_v16  ;;  %v5535_v16 = vadd.f32 %v13067_v15, %v13242_v45  ;;  %v11106_v15 = vld [vmem:[%s14521_s3 + $0x340] sm:$0xff]  }
 0x5be   :  { %5853 = vmatmul.mubr.bf16.gmra.mrb[168].mxu1 %v13090_v47  ;;  %v4015_v47 = vld [vmem:[#allocation2 + $0x98] sm:$0xff] }
 0x5bf   :  { %5860 = vmatprep.mubr.bf16.mxu1 %v4027_v35  ;;  %v13257_v35 = vld [vmem:[#allocation2 + $0x58] sm:$0xff] }
 0x5c1   :  { %v9343_v38 = vpop.f32.mrb[76].mxu1 }
 0x5c2   :  { %v9344_v39 = vpop.f32.mrb[77].mxu1 }
 0x5c3   :  { %v13180_v42 = vadd.f32 %v9344_v39, %v9343_v38  ;;  %v9346_v51 = vpop.f32.mrb[78].mxu1  ;;  %v4058_v38 = vld [vmem:[#allocation2 + $0x140] sm:$0xff]  ;;  %v11105_v39 = vld [vmem:[%s14521_s3 + $0x2b8] sm:$0xff]  }
 0x5c4   :  { %v9347_v36 = vpop.f32.mrb[79].mxu1 }
 0x5c5   :  { %v13182_v0 = vadd.f32 %v9347_v36, %v9346_v51 }
 0x5c6   :  { %5861 = vmatmul.mubr.bf16.gmra.mrb[172].mxu1 %v4011_v48 }
 0x5c7   :  { %5868 = vmatprep.mubr.bf16.mxu1 %v13184_v3 }
 0x5ce   :  { %5869 = vmatmul.mubr.bf16.gmra.mrb[176].mxu1 %v13104_v43  ;;  %v11094_v43 = vld [vmem:[%s14521_s3 + $0x2d0] sm:$0xff]  }
 0x5cf   :  { %5876 = vmatprep.mubr.bf16.mxu1 %v12960_v41  ;;  %v11093_v41 = vld [vmem:[%s14521_s3 + $0x288] sm:$0xff]  }
 0x5d6   :  { %5877 = vmatmul.mubr.bf16.gmra.mrb[180].mxu1 %v4015_v47  ;;  %v5540_v47 = vadd.f32 %v13078_v13, %v13242_v45 }
 0x5d7   :  { %5917 = vmatprep.mubr.bf16.mxu1 %v4050_v57 }
 0x5de   :  { %5918 = vmatmul.mubr.bf16.vlgmr.msra.gmra.mrb[184].mxu1 %v4034_v54  ;;  %v5543_v54 = vadd.f32 %v13086_v40, %v13242_v45  ;;  %v5551_v40 = vadd.f32 %v13111_v27, %v13242_v45  ;;  %v5559_v27 = vadd.f32 %v13123_v5, %v13242_v45 }
 0x5df   :  { %5925 = vmatprep.mubr.bf16.mxu1 %v13195_v37  ;;  %9618 = vmatpush3.bf16.msra.mxu1 %v11091_v6 }
 0x5e0   :  { %9619 = vmatprep.subr.bf16.mxu1 %v11092_v50 }
 0x5e1   :  { %v9349_v11 = vpop.f32.mrb[80].mxu1 }
 0x5e2   :  { %v9350_v55 = vpop.f32.mrb[81].mxu1 }
 0x5e3   :  { %v13204_v46 = vadd.f32 %v9350_v55, %v9349_v11  ;;  %v9352_v21 = vpop.f32.mrb[82].mxu1  ;;  %9620 = vmatpush3.bf16.msra.mxu1 %v11093_v41  ;;  %v13276_v55 = vld [vmem:[#allocation2 + $0x148] sm:$0xff] }
 0x5e4   :  { %v9353_v56 = vpop.f32.mrb[83].mxu1  ;;  %9621 = vmatprep.subr.bf16.mxu1 %v11094_v43  ;;  %v4042_v43 = vld [vmem:[#allocation2 + $0x78] sm:$0xff] }
 0x5e5   :  { %v13212_v8 = vadd.f32 %v9353_v56, %v9352_v21  ;;  %v5548_v56 = vadd.f32 %v13109_v24, %v13242_v45  ;;  %v5556_v24 = vadd.f32 %v13115_v28, %v13242_v45 }
 0x5e6   :  { %5926 = vmatmul.mubr.bf16.gmra.mrb[188].mxu1 %v13214_v59 }
 0x5e7   :  { %5933 = vmatprep.mubr.bf16.mxu1 %v4054_v19  ;;  %9622 = vmatpush3.bf16.msra.mxu1 %v11095_v18 }
 0x5e8   :  { %9623 = vmatprep.subr.bf16.mxu1 %v11096_v58 }
 0x5e9   :  { %v9355_v2 = vpop.f32.mrb[84].mxu1 }
 0x5ea   :  { %v9356_v31 = vpop.f32.mrb[85].mxu1 }
 0x5eb   :  { %v13223_v26 = vadd.f32 %v9356_v31, %v9355_v2  ;;  %v9358_v9 = vpop.f32.mrb[86].mxu1  ;;  %9624 = vmatpush3.bf16.msra.mxu1 %v11097_v60  ;;  %v13285_v2 = vld [vmem:[#allocation2 + $0x80] sm:$0xff] }
 0x5ec   :  { %v9359_v1 = vpop.f32.mrb[87].mxu1  ;;  %9625 = vmatprep.subr.bf16.mxu1 %v11098_v63 }
 0x5ed   :  { %v13231_v33 = vadd.f32 %v9359_v1, %v9358_v9  ;;  %v4062_v9 = vld [vmem:[#allocation2 + $0x168] sm:$0xff] }
 0x5ee   :  { %5934 = vmatmul.mubr.bf16.gmra.mrb[192].mxu1 %v4038_v44 }
 0x5ef   :  { %5941 = vmatprep.mubr.bf16.mxu1 %v13233_v34  ;;  %9626 = vmatpush3.bf16.msra.mxu1 %v11099_v52 }
 0x5f0   :  { %9627 = vmatprep.subr.bf16.mxu1 %v11100_v25 }
 0x5f1   :  { %v9377_v61 = vpop.f32.mrb[88].mxu1 }
 0x5f2   :  { %v9378_v7 = vpop.f32.mrb[89].mxu1 }
 0x5f3   :  { %v9379_v22 = vadd.f32 %v9378_v7, %v9377_v61  ;;  %v9380_v14 = vpop.f32.mrb[90].mxu1  ;;  %9628 = vmatpush3.bf16.msra.mxu1 %v11101_v30  ;;  %v4046_v7 = vld [vmem:[#allocation2 + $0xa0] sm:$0xff] }
 0x5f4   :  { %v9381_v23 = vpop.f32.mrb[91].mxu1  ;;  %9629 = vmatprep.subr.bf16.mxu1 %v11102_v17 }
 0x5f5   :  { %v9382_v32 = vadd.f32 %v9381_v23, %v9380_v14  ;;  %v13259_v49 = vadd.f32 %v9379_v22, %v5532_v10  ;;  %v13298_v22 = vld [vmem:[#allocation2 + $0x170] sm:$0xff] }
 0x5f6   :  { %5942 = vmatmul.mubr.bf16.gmra.mrb[196].mxu1 %v13257_v35  ;;  %v4126_v23 = vld [vmem:[#allocation2 + $0xf0] sm:$0xf0] }
 0x5f7   :  { %5949 = vmatprep.mubr.bf16.mxu1 %v4058_v38  ;;  %9630 = vmatpush3.bf16.msra.mxu1 %v11103_v53  ;;  %v13265_v51 = vadd.f32 %v9382_v32, %v5535_v16  ;;  %v5564_v16 = vadd.f32 %v13175_v62, %v13242_v45  ;;  %v4066_v62 = vld [vmem:[#allocation2 + $0x28] sm:$0xf0] }
 0x5f8   :  { %9631 = vmatprep.subr.bf16.mxu1 %v11104_v29  ;;  %v4133_v29 = vrot.slane %v13195_v37, 4  ;;  %v4128_v37 = vld [vmem:[#allocation2 + $0x100] sm:$0xf] }
 0x5f9   :  { %v9383_v36 = vpop.f32.mrb[92].mxu1 }
 0x5fa   :  { %v9384_v48 = vpop.f32.mrb[93].mxu1 }
 0x5fb   :  { %v9385_v57 = vadd.f32 %v9384_v48, %v9383_v36  ;;  %v9386_v6 = vpop.f32.mrb[94].mxu1  ;;  %9632 = vmatpush3.bf16.msra.mxu1 %v11105_v39  ;;  %v4132_v39 = vrot.slane %v4126_v23, 4  ;;  %v13308_v48 = vld [vmem:[#allocation2 + $0xa8] sm:$0xff] }
 0x5fc   :  { %v9387_v50 = vpop.f32.mrb[95].mxu1  ;;  %9681 = vmatprep.subr.bf16.mxu1 %v11106_v15  ;;  %v5567_v15 = vadd.f32 %v13177_v4, %v13242_v45  ;;  %v5572_v4 = vadd.f32 %v13180_v42, %v13242_v45 }
 0x5fd   :  { %v9388_v41 = vadd.f32 %v9387_v50, %v9386_v6  ;;  %v13274_v11 = vadd.f32 %v9385_v57, %v5540_v47  ;;  %v4134_v57 = vsel %vm3767_vm0, %v4132_v39, %v4133_v29 }
 0x5fe   :  { %5950 = vmatmul.mubr.bf16.gmra.mrb[200].mxu1 %v4042_v43  ;;  %v4135_v43 = vrot.slane %v4128_v37, 4  ;;  %v4081_v37 = vld [vmem:[#allocation2 + $0x50] sm:$0xf0] }
 0x5ff   :  { %5957 = vmatprep.mubr.bf16.mxu1 %v13276_v55  ;;  %v13279_v21 = vadd.f32 %v9388_v41, %v5543_v54  ;;  %v4073_v54 = vrot.slane %v13214_v59, 4  ;;  %v5575_v59 = vadd.f32 %v13182_v0, %v13242_v45  ;;  %v11110_v0 = vld [vmem:[%s14521_s3 + $0x350] sm:$0xff]  }
 0x601   :  { %v9389_v13 = vpop.f32.mrb[96].mxu1 }
 0x602   :  { %v9390_v18 = vpop.f32.mrb[97].mxu1 }
 0x603   :  { %v9391_v58 = vadd.f32 %v9390_v18, %v9389_v13  ;;  %v9392_v19 = vpop.f32.mrb[98].mxu1 }
 0x604   :  { %v9393_v60 = vpop.f32.mrb[99].mxu1 }
 0x605   :  { %v9394_v63 = vadd.f32 %v9393_v60, %v9392_v19  ;;  %v13287_v31 = vadd.f32 %v9391_v58, %v5548_v56  ;;  %v4072_v56 = vrot.slane %v4066_v62, 4  ;;  %v11107_v58 = vld [vmem:[%s14521_s3 + $0x300] sm:$0xff]   ;;  %v11108_v60 = vld [vmem:[%s14521_s3 + $0x348] sm:$0xff]  }
 0x606   :  { %5958 = vmatmul.mubr.bf16.gmra.mrb[204].mxu1 %v13285_v2 }
 0x607   :  { %5965 = vmatprep.mubr.bf16.mxu1 %v4062_v9  ;;  %v13290_v52 = vadd.f32 %v9394_v63, %v5551_v40  ;;  %v4074_v42 = vsel %vm3767_vm0, %v4072_v56, %v4073_v54  ;;  %v4136_v9 = vsel %vm3767_vm0, %v4133_v29, %v4135_v43  ;;  %v5588_v43 = vadd.f32 %v13223_v26, %v13242_v45  ;;  %v11115_v56 = vld [vmem:[%s14521_s3 + $0x320] sm:$0xff]  }
 0x609   :  { %v9395_v1 = vpop.f32.mrb[100].mxu1 }
 0x60a   :  { %v9396_v25 = vpop.f32.mrb[101].mxu1 }
 0x60b   :  { %v9397_v44 = vadd.f32 %v9396_v25, %v9395_v1  ;;  %v9398_v30 = vpop.f32.mrb[102].mxu1  ;;  %v4068_v1 = vld [vmem:[#allocation2 + $0x38] sm:$0xf] }
 0x60c   :  { %v9399_v17 = vpop.f32.mrb[103].mxu1 }
 0x60d   :  { %v9400_v61 = vadd.f32 %v9399_v17, %v9398_v30  ;;  %v13296_v10 = vadd.f32 %v9397_v44, %v5556_v24  ;;  %v11109_v24 = vld [vmem:[%s14521_s3 + $0x308] sm:$0xff]   ;;  %v4075_v30 = vrot.slane %v4068_v1, 4  ;;  %v4141_v17 = vld [vmem:[#allocation2 + $0x118] sm:$0xf0] }
 0x60e   :  { %5966 = vmatmul.mubr.bf16.gmra.mrb[208].mxu1 %v4046_v7  ;;  %v5580_v7 = vadd.f32 %v13204_v46, %v13242_v45  ;;  %v11117_v1 = vld [vmem:[%s14521_s3 + $0x328] sm:$0xff]  }
 0x60f   :  { %5973 = vmatprep.mubr.bf16.mxu1 %v13298_v22  ;;  %v13301_v14 = vadd.f32 %v9400_v61, %v5559_v27  ;;  %v4148_v61 = vrot.slane %v13233_v34, 4  ;;  %v5583_v34 = vadd.f32 %v13212_v8, %v13242_v45  ;;  %v11114_v8 = vld [vmem:[%s14521_s3 + $0x360] sm:$0xff]  }
 0x611   :  { %v9401_v53 = vpop.f32.mrb[104].mxu1 }
 0x612   :  { %v9402_v28 = vpop.f32.mrb[105].mxu1 }
 0x613   :  { %v9403_v5 = vadd.f32 %v9402_v28, %v9401_v53  ;;  %v9404_v32 = vpop.f32.mrb[106].mxu1  ;;  %v11111_v28 = vld [vmem:[%s14521_s3 + $0x310] sm:$0xff]  }
 0x614   :  { %v9405_v38 = vpop.f32.mrb[107].mxu1 }
 0x615   :  { %v9406_v36 = vadd.f32 %v9405_v38, %v9404_v32  ;;  %v13310_v47 = vadd.f32 %v9403_v5, %v5564_v16  ;;  %v4147_v16 = vrot.slane %v4141_v17, 4  ;;  %v11112_v5 = vld [vmem:[%s14521_s3 + $0x358] sm:$0xff]   ;;  %v4076_v38 = vsel %vm3767_vm0, %v4073_v54, %v4075_v30 }
 0x616   :  { %5974 = vmatmul.mubr.bf16.gmra.mrb[212].mxu1 %v13308_v48  ;;  %v4163_v30 = vrot.slane %v13276_v55, 4 }
 0x617   :  { %6014 = vmatprep.mubr.bf16.mxu1 %v4134_v57  ;;  %v13314_v6 = vadd.f32 %v9406_v36, %v5567_v15  ;;  %v4149_v39 = vsel %vm3767_vm0, %v4147_v16, %v4148_v61  ;;  %v4143_v36 = vld [vmem:[#allocation2 + $0x128] sm:$0xf]  ;;  %v11113_v57 = vld [vmem:[%s14521_s3 + $0x318] sm:$0xff]  }
 0x619   :  { %v9407_v50 = vpop.f32.mrb[108].mxu1 }
 0x61a   :  { %v9408_v41 = vpop.f32.mrb[109].mxu1 }
 0x61b   :  { %v9409_v13 = vadd.f32 %v9408_v41, %v9407_v50  ;;  %v9410_v18 = vpop.f32.mrb[110].mxu1  ;;  %v4088_v50 = vrot.slane %v13257_v35, 4  ;;  %v4150_v41 = vrot.slane %v4143_v36, 4  ;;  %v4103_v36 = vrot.slane %v13285_v2, 4 }
 0x61c   :  { %v9411_v19 = vpop.f32.mrb[111].mxu1 }
 0x61d   :  { %v13325_v40 = vadd.f32 %v9409_v13, %v5572_v4  ;;  %v9412_v63 = vadd.f32 %v9411_v19, %v9410_v18  ;;  %v4087_v18 = vrot.slane %v4081_v37, 4  ;;  %v11116_v19 = vld [vmem:[%s14521_s3 + $0x368] sm:$0xff]  }
 0x61e   :  { %6015 = vmatmul.mubr.bf16.vlgmr.msra.gmra.mrb[216].mxu1 %v4074_v42  ;;  %v4083_v42 = vld [vmem:[#allocation2 + $0x60] sm:$0xf] }
 0x61f   :  { %v13331_v25 = vadd.f32 %v9412_v63, %v5575_v59  ;;  %6022 = vmatprep.mubr.bf16.mxu1 %v4136_v9  ;;  %9682 = vmatpush3.bf16.msra.mxu1 %v11107_v58  ;;  %v4089_v59 = vsel %vm3767_vm0, %v4087_v18, %v4088_v50  ;;  %v4151_v63 = vsel %vm3767_vm0, %v4148_v61, %v4150_v41  ;;  %v11119_v61 = vld [vmem:[%s14521_s3 + $0x330] sm:$0xff]  }
 0x620   :  { %9683 = vmatprep.subr.bf16.mxu1 %v11108_v60  ;;  %v5591_v60 = vadd.f32 %v13231_v33, %v13242_v45  ;;  %v11118_v33 = vld [vmem:[%s14521_s3 + $0x370] sm:$0xff]  }
 0x621   :  { %v9413_v44 = vpop.f32.mrb[112].mxu1 }
 0x622   :  { %v9414_v27 = vpop.f32.mrb[113].mxu1 }
 0x623   :  { %v9415_v53 = vadd.f32 %v9414_v27, %v9413_v44  ;;  %v9416_v23 = vpop.f32.mrb[114].mxu1  ;;  %9684 = vmatpush3.bf16.msra.mxu1 %v11109_v24  ;;  %v4090_v24 = vrot.slane %v4083_v42, 4 }
 0x624   :  { %v9417_v29 = vpop.f32.mrb[115].mxu1  ;;  %9685 = vmatprep.subr.bf16.mxu1 %v11110_v0  ;;  %v4156_v0 = vld [vmem:[#allocation2 + $0x140] sm:$0xf0] }
 0x625   :  { %v13348_v32 = vadd.f32 %v9415_v53, %v5580_v7  ;;  %v9418_v46 = vadd.f32 %v9417_v29, %v9416_v23  ;;  %v4162_v53 = vrot.slane %v4156_v0, 4  ;;  %v11120_v23 = vld [vmem:[%s14521_s3 + $0x378] sm:$0xff]   ;;  %v4091_v55 = vsel %vm3767_vm0, %v4088_v50, %v4090_v24  ;;  %v4111_v0 = vld [vmem:[#allocation2 + $0xa0] sm:$0xf0] }
 0x626   :  { %6023 = vmatmul.mubr.bf16.gmra.mrb[220].mxu1 %v4076_v38  ;;  %v4096_v38 = vld [vmem:[#allocation2 + $0x78] sm:$0xf0]  ;;  %v4173_v24 = vld [vmem:[#allocation2 + $0x178] sm:$0xf] }
 0x627   :  { %v13354_v15 = vadd.f32 %v9418_v46, %v5583_v34  ;;  %6030 = vmatprep.mubr.bf16.mxu1 %v4149_v39  ;;  %9686 = vmatpush3.bf16.msra.mxu1 %v11111_v28  ;;  %v4164_v16 = vsel %vm3767_vm0, %v4162_v53, %v4163_v30  ;;  %v4158_v34 = vld [vmem:[#allocation2 + $0x150] sm:$0xf]  ;;  %v11121_v46 = vld [vmem:[%s14521_s3 + $0x338] sm:$0xff]  }
 0x628   :  { %9687 = vmatprep.subr.bf16.mxu1 %v11112_v5  ;;  %v4165_v37 = vrot.slane %v4158_v34, 4 }
 0x629   :  { %v9419_v62 = vpop.f32.mrb[116].mxu1 }
 0x62a   :  { %v9420_v54 = vpop.f32.mrb[117].mxu1 }
 0x62b   :  { %v9421_v4 = vadd.f32 %v9420_v54, %v9419_v62  ;;  %v9422_v13 = vpop.f32.mrb[118].mxu1  ;;  %9688 = vmatpush3.bf16.msra.mxu1 %v11113_v57  ;;  %v4102_v62 = vrot.slane %v4096_v38, 4 }
 0x62c   :  { %v9423_v58 = vpop.f32.mrb[119].mxu1  ;;  %9689 = vmatprep.subr.bf16.mxu1 %v11114_v8 }
 0x62d   :  { %v13371_v35 = vadd.f32 %v9421_v4, %v5588_v43  ;;  %v9424_v26 = vadd.f32 %v9423_v58, %v9422_v13  ;;  %v4104_v43 = vsel %vm3767_vm0, %v4102_v62, %v4103_v36  ;;  %v4166_v4 = vsel %vm3767_vm0, %v4163_v30, %v4165_v37  ;;  %v4098_v13 = vld [vmem:[#allocation2 + $0x88] sm:$0xf]  ;;  %v4171_v58 = vld [vmem:[#allocation2 + $0x168] sm:$0xf0]  ;;  %v13439_v62 = vld [vmem:[#allocation2 + $0x40] sm:$0xff] }
 0x62e   :  { %6031 = vmatmul.mubr.bf16.gmra.mrb[224].mxu1 %v4089_v59 }
 0x62f   :  { %v13377_v9 = vadd.f32 %v9424_v26, %v5591_v60  ;;  %6038 = vmatprep.mubr.bf16.mxu1 %v4151_v63  ;;  %9690 = vmatpush3.bf16.msra.mxu1 %v11115_v56  ;;  %v4105_v56 = vrot.slane %v4098_v13, 4  ;;  %v4178_v60 = vrot.slane %v13298_v22, 4  ;;  %v4177_v63 = vrot.slane %v4171_v58, 4 }
 0x630   :  { %9691 = vmatprep.subr.bf16.mxu1 %v11116_v19 }
 0x631   :  { %v9441_v45 = vpop.f32.mrb[120].mxu1 }
 0x632   :  { %v9442_v44 = vpop.f32.mrb[121].mxu1 }
 0x633   :  { %v9443_v17 = vadd.f32 %v9442_v44, %v9441_v45  ;;  %v9444_v27 = vpop.f32.mrb[122].mxu1  ;;  %9692 = vmatpush3.bf16.msra.mxu1 %v11117_v1  ;;  %v4118_v44 = vrot.slane %v13308_v48, 4 }
 0x634   :  { %v9445_v7 = vpop.f32.mrb[123].mxu1  ;;  %9693 = vmatprep.subr.bf16.mxu1 %v11118_v33  ;;  %v4106_v33 = vsel %vm3767_vm0, %v4103_v36, %v4105_v56 }
 0x635   :  { %v13393_v28 = vadd.f32 %v9443_v17, %v13259_v49  ;;  %v9446_v29 = vadd.f32 %v9445_v7, %v9444_v27  ;;  %v11122_v49 = vld [vmem:[%s14521_s3 + $0x3c0] sm:$0xff]   ;;  %v4180_v17 = vrot.slane %v4173_v24, 4 }
 0x636   :  { %6039 = vmatmul.mubr.bf16.gmra.mrb[228].mxu1 %v4091_v55  ;;  %v4113_v55 = vld [vmem:[#allocation2 + $0xb0] sm:$0xf] }
 0x637   :  { %v13398_v5 = vadd.f32 %v9446_v29, %v13265_v51  ;;  %6046 = vmatprep.mubr.bf16.mxu1 %v4164_v16  ;;  %9694 = vmatpush3.bf16.msra.mxu1 %v11119_v61  ;;  %v4117_v61 = vrot.slane %v4111_v0, 4  ;;  %v4120_v34 = vrot.slane %v4113_v55, 4  ;;  %v13477_v55 = vld [vmem:[#allocation2 + $0x68] sm:$0xff] }
 0x638   :  { %9695 = vmatprep.subr.bf16.mxu1 %v11120_v23 }
 0x639   :  { %v9447_v39 = vpop.f32.mrb[124].mxu1  ;;  %v4119_v29 = vsel %vm3767_vm0, %v4117_v61, %v4118_v44 }
 0x63a   :  { %v9448_v57 = vpop.f32.mrb[125].mxu1 }
 0x63b   :  { %v9449_v51 = vadd.f32 %v9448_v57, %v9447_v39  ;;  %v9450_v8 = vpop.f32.mrb[126].mxu1  ;;  %9696 = vmatpush3.bf16.msra.mxu1 %v11121_v46  ;;  %v4246_v46 = vld [vmem:[#allocation2 + $0x100] sm:$0xf0] }
 0x63c   :  { %v9451_v50 = vpop.f32.mrb[127].mxu1  ;;  %9745 = vmatprep.subr.bf16.mxu1 %v11122_v49  ;;  %v4253_v49 = vrot.slane %v13138_v12, 4  ;;  %v4252_v57 = vrot.slane %v4246_v46, 4  ;;  %v4248_v12 = vld [vmem:[#allocation2 + $0x110] sm:$0xf]  ;;  %v11129_v46 = vld [vmem:[%s14521_s3 + $0x398] sm:$0xff]  }
 0x63d   :  { %v13408_v54 = vadd.f32 %v9449_v51, %v13274_v11  ;;  %v9452_v41 = vadd.f32 %v9451_v50, %v9450_v8  ;;  %v4121_v8 = vsel %vm3767_vm0, %v4118_v44, %v4120_v34  ;;  %v4263_v34 = vld [vmem:[#allocation2 + $0x138] sm:$0xf] }
 0x63e   :  { %6047 = vmatmul.mubr.bf16.gmra.mrb[232].mxu1 %v4104_v43 }
 0x63f   :  { %v13413_v2 = vadd.f32 %v9452_v41, %v13279_v21  ;;  %6054 = vmatprep.mubr.bf16.mxu1 %v4166_v4  ;;  %v4179_v21 = vsel %vm3767_vm0, %v4177_v63, %v4178_v60  ;;  %v4186_v41 = vld [vmem:[#allocation2 + $0x38] sm:$0xf0]  ;;  %v4193_v4 = vrot.slane %v13439_v62, 4 }
 0x640   :  { %v4192_v58 = vrot.slane %v4186_v41, 4 }
 0x641   :  { %v9453_v18 = vpop.f32.mrb[128].mxu1 }
 0x642   :  { %v9454_v19 = vpop.f32.mrb[129].mxu1 }
 0x643   :  { %v9455_v26 = vadd.f32 %v9454_v19, %v9453_v18  ;;  %v9456_v11 = vpop.f32.mrb[130].mxu1  ;;  %v11123_v19 = vld [vmem:[%s14521_s3 + $0x380] sm:$0xff]  }
 0x644   :  { %v9457_v59 = vpop.f32.mrb[131].mxu1 }
 0x645   :  { %v13417_v42 = vadd.f32 %v9455_v26, %v13287_v31  ;;  %v9458_v1 = vadd.f32 %v9457_v59, %v9456_v11  ;;  %v4194_v59 = vsel %vm3767_vm0, %v4192_v58, %v4193_v4 }
 0x646   :  { %6055 = vmatmul.mubr.bf16.gmra.mrb[236].mxu1 %v4106_v33 }
 0x647   :  { %v13422_v45 = vadd.f32 %v9458_v1, %v13290_v52  ;;  %6062 = vmatprep.mubr.bf16.mxu1 %v4179_v21  ;;  %v4181_v52 = vsel %vm3767_vm0, %v4178_v60, %v4180_v17  ;;  %v4188_v1 = vld [vmem:[#allocation2 + $0x48] sm:$0xf] }
 0x648   :  { %v11125_v21 = vld [vmem:[%s14521_s3 + $0x388] sm:$0xff]   ;;  %v4195_v0 = vrot.slane %v4188_v1, 4 }
 0x649   :  { %v9459_v22 = vpop.f32.mrb[132].mxu1 }
 0x64a   :  { %v9460_v30 = vpop.f32.mrb[133].mxu1 }
 0x64b   :  { %v9461_v27 = vadd.f32 %v9460_v30, %v9459_v22  ;;  %v9462_v31 = vpop.f32.mrb[134].mxu1  ;;  %v4261_v22 = vld [vmem:[#allocation2 + $0x128] sm:$0xf0]  ;;  %v4268_v30 = vrot.slane %v13166_v20, 4  ;;  %v4196_v20 = vsel %vm3767_vm0, %v4193_v4, %v4195_v0 }
 0x64c   :  { %v9463_v7 = vpop.f32.mrb[135].mxu1  ;;  %v4267_v61 = vrot.slane %v4261_v22, 4 }
 0x64d   :  { %v13426_v53 = vadd.f32 %v9461_v27, %v13296_v10  ;;  %v9464_v23 = vadd.f32 %v9463_v7, %v9462_v31  ;;  %v11127_v27 = vld [vmem:[%s14521_s3 + $0x390] sm:$0xff]   ;;  %v11128_v7 = vld [vmem:[%s14521_s3 + $0x3d8] sm:$0xff]  }
 0x64e   :  { %6063 = vmatmul.mubr.bf16.gmra.mrb[240].mxu1 %v4119_v29 }
 0x64f   :  { %v13431_v16 = vadd.f32 %v9464_v23, %v13301_v14  ;;  %6070 = vmatprep.mubr.bf16.mxu1 %v4181_v52  ;;  %v4254_v14 = vsel %vm3767_vm0, %v4252_v57, %v4253_v49  ;;  %v4269_v52 = vsel %vm3767_vm0, %v4267_v61, %v4268_v30 }
 0x651   :  { %v9465_v48 = vpop.f32.mrb[136].mxu1 }
 0x652   :  { %v9466_v38 = vpop.f32.mrb[137].mxu1 }
 0x653   :  { %v9467_v39 = vadd.f32 %v9466_v38, %v9465_v48  ;;  %v9468_v10 = vpop.f32.mrb[138].mxu1  ;;  %v11130_v38 = vld [vmem:[%s14521_s3 + $0x3e0] sm:$0xff]  }
 0x654   :  { %v9469_v36 = vpop.f32.mrb[139].mxu1 }
 0x655   :  { %v13435_v37 = vadd.f32 %v9467_v39, %v13310_v47  ;;  %v9470_v51 = vadd.f32 %v9469_v36, %v9468_v10  ;;  %v4255_v47 = vrot.slane %v4248_v12, 4  ;;  %v4208_v39 = vrot.slane %v13477_v55, 4  ;;  %v11132_v12 = vld [vmem:[%s14521_s3 + $0x3e8] sm:$0xff]  }
 0x656   :  { %6071 = vmatmul.mubr.bf16.gmra.mrb[244].mxu1 %v4121_v8  ;;  %v4270_v36 = vrot.slane %v4263_v34, 4  ;;  %v11131_v8 = vld [vmem:[%s14521_s3 + $0x3a0] sm:$0xff]  }
 0x657   :  { %v13442_v50 = vadd.f32 %v9470_v51, %v13314_v6  ;;  %6111 = vmatprep.mubr.bf16.mxu1 %v4254_v14  ;;  %v11124_v6 = vld [vmem:[%s14521_s3 + $0x3c8] sm:$0xff]   ;;  %v4256_v63 = vsel %vm3767_vm0, %v4253_v49, %v4255_v47  ;;  %v4203_v47 = vld [vmem:[#allocation2 + $0x70] sm:$0xf] }
 0x659   :  { %v9471_v43 = vpop.f32.mrb[140].mxu1 }
 0x65a   :  { %v9472_v13 = vpop.f32.mrb[141].mxu1 }
 0x65b   :  { %v9473_v18 = vadd.f32 %v9472_v13, %v9471_v43  ;;  %v9474_v56 = vpop.f32.mrb[142].mxu1  ;;  %v4271_v13 = vsel %vm3767_vm0, %v4268_v30, %v4270_v36 }
 0x65c   :  { %v9475_v60 = vpop.f32.mrb[143].mxu1 }
 0x65d   :  { %v13452_v26 = vadd.f32 %v9473_v18, %v13325_v40  ;;  %v9476_v11 = vadd.f32 %v9475_v60, %v9474_v56  ;;  %v11126_v40 = vld [vmem:[%s14521_s3 + $0x3d0] sm:$0xff]   ;;  %v11133_v56 = vld [vmem:[%s14521_s3 + $0x3a8] sm:$0xff]  }
 0x65e   :  { %6112 = vmatmul.mubr.bf16.vlgmr.msra.gmra.mrb[248].mxu1 %v4194_v59  ;;  %v4276_v60 = vld [vmem:[#allocation2 + $0x150] sm:$0xf0] }
 0x65f   :  { %v13457_v33 = vadd.f32 %v9476_v11, %v13331_v25  ;;  %6119 = vmatprep.mubr.bf16.mxu1 %v4256_v63  ;;  %9746 = vmatpush3.bf16.msra.mxu1 %v11123_v19  ;;  %v4210_v19 = vrot.slane %v4203_v47, 4  ;;  %v4283_v11 = vrot.slane %v13184_v3, 4  ;;  %v11135_v63 = vld [vmem:[%s14521_s3 + $0x3b0] sm:$0xff]  }
 0x660   :  { %9747 = vmatprep.subr.bf16.mxu1 %v11124_v6 }
 0x661   :  { %v9477_v24 = vpop.f32.mrb[144].mxu1  ;;  %v4211_v3 = vsel %vm3767_vm0, %v4208_v39, %v4210_v19  ;;  %v4231_v19 = vld [vmem:[#allocation2 + $0xb0] sm:$0xf0] }
 0x662   :  { %v9478_v44 = vpop.f32.mrb[145].mxu1 }
 0x663   :  { %v9479_v17 = vadd.f32 %v9478_v44, %v9477_v24  ;;  %v9480_v25 = vpop.f32.mrb[146].mxu1  ;;  %9748 = vmatpush3.bf16.msra.mxu1 %v11125_v21  ;;  %v4282_v21 = vrot.slane %v4276_v60, 4  ;;  %v13521_v44 = vld [vmem:[#allocation2 + $0x90] sm:$0xff] }
 0x664   :  { %v9481_v31 = vpop.f32.mrb[147].mxu1  ;;  %9749 = vmatprep.subr.bf16.mxu1 %v11126_v40  ;;  %v11136_v40 = vld [vmem:[%s14521_s3 + $0x3f8] sm:$0xff]  }
 0x665   :  { %v13473_v23 = vadd.f32 %v9479_v17, %v13348_v32  ;;  %v9482_v29 = vadd.f32 %v9481_v31, %v9480_v25  ;;  %v4201_v32 = vld [vmem:[#allocation2 + $0x60] sm:$0xf0]  ;;  %v4284_v22 = vsel %vm3767_vm0, %v4282_v21, %v4283_v11  ;;  %v4278_v17 = vld [vmem:[#allocation2 + $0x160] sm:$0xf]  ;;  %v11137_v25 = vld [vmem:[%s14521_s3 + $0x3b8] sm:$0xff]   ;;  %v4223_v31 = vrot.slane %v13521_v44, 4 }
 0x666   :  { %6120 = vmatmul.mubr.bf16.gmra.mrb[252].mxu1 %v4196_v20  ;;  %v4207_v51 = vrot.slane %v4201_v32, 4 }
 0x667   :  { %v13480_v48 = vadd.f32 %v9482_v29, %v13354_v15  ;;  %6127 = vmatprep.mubr.bf16.mxu1 %v4269_v52  ;;  %9750 = vmatpush3.bf16.msra.mxu1 %v11127_v27 }
 0x668   :  { %9751 = vmatprep.subr.bf16.mxu1 %v11128_v7  ;;  %v4209_v4 = vsel %vm3767_vm0, %v4207_v51, %v4208_v39  ;;  %v4285_v7 = vrot.slane %v4278_v17, 4 }
 0x669   :  { %v9483_v49 = vpop.f32.mrb[148].mxu1 }
 0x66a   :  { %v9484_v10 = vpop.f32.mrb[149].mxu1 }
 0x66b   :  { %v9485_v15 = vadd.f32 %v9484_v10, %v9483_v49  ;;  %v9486_v57 = vpop.f32.mrb[150].mxu1  ;;  %9752 = vmatpush3.bf16.msra.mxu1 %v11129_v46  ;;  %v4218_v49 = vld [vmem:[#allocation2 + $0x98] sm:$0xf]  ;;  %v13538_v10 = vld [vmem:[#allocation2 + $0x180] sm:$0xff] }
 0x66c   :  { %v9487_v14 = vpop.f32.mrb[151].mxu1  ;;  %9753 = vmatprep.subr.bf16.mxu1 %v11130_v38  ;;  %v4286_v38 = vsel %vm3767_vm0, %v4283_v11, %v4285_v7 }
 0x66d   :  { %v13496_v41 = vadd.f32 %v9485_v15, %v13371_v35  ;;  %v9488_v43 = vadd.f32 %v9487_v14, %v9486_v57  ;;  %v11134_v35 = vld [vmem:[%s14521_s3 + $0x3f0] sm:$0xff]   ;;  %v4225_v15 = vrot.slane %v4218_v49, 4  ;;  %v4291_v57 = vld [vmem:[#allocation2 + $0x178] sm:$0xf0] }
 0x66e   :  { %6128 = vmatmul.mubr.bf16.gmra.mrb[0].mxu1 %v4209_v4 }
 0x66f   :  { %v13501_v18 = vadd.f32 %v9488_v43, %v13377_v9  ;;  %6135 = vmatprep.mubr.bf16.mxu1 %v4271_v13  ;;  %9754 = vmatpush3.bf16.msra.mxu1 %v11131_v8  ;;  %v4297_v43 = vrot.slane %v4291_v57, 4 }
 0x670   :  { %9755 = vmatprep.subr.bf16.mxu1 %v11132_v12 }
 0x671   :  { %v9505_v58 = vpop.f32.mrb[152].mxu1 }
 0x672   :  { %v9506_v6 = vpop.f32.mrb[153].mxu1 }
 0x673   :  { %v9507_v59 = vadd.f32 %v9506_v6, %v9505_v58  ;;  %v9508_v9 = vpop.f32.mrb[154].mxu1  ;;  %9756 = vmatpush3.bf16.msra.mxu1 %v11133_v56  ;;  %v13546_v56 = vld [vmem:[#allocation2 + $0xb8] sm:$0xff]  ;;  %v4293_v58 = vld [vmem:[#allocation2 + $0x188] sm:$0xf] }
 0x674   :  { %v9509_v1 = vpop.f32.mrb[155].mxu1  ;;  %9757 = vmatprep.subr.bf16.mxu1 %v11134_v35  ;;  %v4238_v6 = vrot.slane %v13546_v56, 4 }
 0x675   :  { %v13517_v24 = vadd.f32 %v9507_v59, %v13393_v28  ;;  %v9510_v0 = vadd.f32 %v9509_v1, %v9508_v9  ;;  %v4216_v28 = vld [vmem:[#allocation2 + $0x88] sm:$0xf0] }
 0x676   :  { %6136 = vmatmul.mubr.bf16.gmra.mrb[4].mxu1 %v4211_v3  ;;  %v4222_v52 = vrot.slane %v4216_v28, 4  ;;  %v4233_v3 = vld [vmem:[#allocation2 + $0xc0] sm:$0xf] }
 0x677   :  { %v13524_v30 = vadd.f32 %v9510_v0, %v13398_v5  ;;  %6143 = vmatprep.mubr.bf16.mxu1 %v4284_v22  ;;  %9758 = vmatpush3.bf16.msra.mxu1 %v11135_v63  ;;  %v4237_v63 = vrot.slane %v4231_v19, 4 }
 0x678   :  { %9759 = vmatprep.subr.bf16.mxu1 %v11136_v40  ;;  %v4224_v32 = vsel %vm3767_vm0, %v4222_v52, %v4223_v31 }
 0x679   :  { %v9511_v27 = vpop.f32.mrb[156].mxu1  ;;  %v4239_v0 = vsel %vm3767_vm0, %v4237_v63, %v4238_v6 }
 0x67a   :  { %v9512_v61 = vpop.f32.mrb[157].mxu1 }
 0x67b   :  { %v9513_v29 = vadd.f32 %v9512_v61, %v9511_v27  ;;  %v9514_v20 = vpop.f32.mrb[158].mxu1  ;;  %9760 = vmatpush3.bf16.msra.mxu1 %v11137_v25  ;;  %v4240_v25 = vrot.slane %v4233_v3, 4 }
 0x67c   :  { %v9515_v5 = vpop.f32.mrb[159].mxu1 }
 0x67d   :  { %v13531_v34 = vadd.f32 %v9513_v29, %v13408_v54  ;;  %v9516_v46 = vadd.f32 %v9515_v5, %v9514_v20  ;;  %v4298_v54 = vrot.slane %v13538_v10, 4  ;;  %v4241_v29 = vsel %vm3767_vm0, %v4238_v6, %v4240_v25  ;;  %v4322_v20 = vld [vmem:[#allocation2 + $0x108] sm:$0xff] }
 0x67e   :  { %6144 = vmatmul.mubr.bf16.gmra.mrb[8].mxu1 %v4224_v32 }
 0x67f   :  { %v13536_v39 = vadd.f32 %v9516_v46, %v13413_v2  ;;  %6151 = vmatprep.mubr.bf16.mxu1 %v4286_v38  ;;  %v4226_v2 = vsel %vm3767_vm0, %v4223_v31, %v4225_v15  ;;  %v4299_v47 = vsel %vm3767_vm0, %v4297_v43, %v4298_v54  ;;  %v4307_v43 = vld [vmem:[#allocation2 + $0x48] sm:$0xff] }
 0x681   :  { %v9517_v36 = vpop.f32.mrb[160].mxu1 }
 0x682   :  { %v9518_v51 = vpop.f32.mrb[161].mxu1 }
 0x683   :  { %v9519_v8 = vadd.f32 %v9518_v51, %v9517_v36  ;;  %v9520_v14 = vpop.f32.mrb[162].mxu1 }
 0x684   :  { %v9521_v12 = vpop.f32.mrb[163].mxu1 }
 0x685   :  { %v13542_v4 = vadd.f32 %v9519_v8, %v13417_v42  ;;  %v9522_v13 = vadd.f32 %v9521_v12, %v9520_v14  ;;  %v4300_v42 = vrot.slane %v4293_v58, 4 }
 0x686   :  { %6152 = vmatmul.mubr.bf16.gmra.mrb[12].mxu1 %v4226_v2 }
 0x687   :  { %v13549_v35 = vadd.f32 %v9522_v13, %v13422_v45  ;;  %6159 = vmatprep.mubr.bf16.mxu1 %v4299_v47  ;;  %v4301_v45 = vsel %vm3767_vm0, %v4298_v54, %v4300_v42 }
 0x689   :  { %v9523_v60 = vpop.f32.mrb[164].mxu1 }
 0x68a   :  { %v9524_v11 = vpop.f32.mrb[165].mxu1 }
 0x68b   :  { %v9525_v59 = vadd.f32 %v9524_v11, %v9523_v60  ;;  %v9526_v9 = vpop.f32.mrb[166].mxu1 }
 0x68c   :  { %v9527_v1 = vpop.f32.mrb[167].mxu1 }
 0x68d   :  { %v13553_v21 = vadd.f32 %v9525_v59, %v13426_v53  ;;  %v9528_v40 = vadd.f32 %v9527_v1, %v9526_v9 }
 0x68e   :  { %6160 = vmatmul.mubr.bf16.gmra.mrb[16].mxu1 %v4239_v0 }
 0x68f   :  { %v13558_v22 = vadd.f32 %v9528_v40, %v13431_v16  ;;  %6167 = vmatprep.mubr.bf16.mxu1 %v4301_v45  ;;  %v4311_v40 = vld [vmem:[#allocation2 + $0x70] sm:$0xff] }
 0x691   :  { %v9529_v17 = vpop.f32.mrb[168].mxu1 }
 0x692   :  { %v9530_v28 = vpop.f32.mrb[169].mxu1 }
 0x693   :  { %v9531_v27 = vadd.f32 %v9530_v28, %v9529_v17  ;;  %v9532_v31 = vpop.f32.mrb[170].mxu1 }
 0x694   :  { %v9533_v61 = vpop.f32.mrb[171].mxu1 }
 0x695   :  { %v13561_v53 = vadd.f32 %v9531_v27, %v13435_v37  ;;  %v9534_v7 = vadd.f32 %v9533_v61, %v9532_v31  ;;  %v4323_v37 = vld [vmem:[#allocation2 + $0x110] sm:$0xff] }
 0x696   :  { %6168 = vmatmul.mubr.bf16.gmra.mrb[20].mxu1 %v4241_v29 }
 0x697   :  { %v13565_v52 = vadd.f32 %v9534_v7, %v13442_v50  ;;  %6208 = vmatprep.mubr.bf16.mxu1 %v4322_v20 }
 0x699   :  { %v9535_v16 = vpop.f32.mrb[172].mxu1 }
 0x69a   :  { %v9536_v5 = vpop.f32.mrb[173].mxu1 }
 0x69b   :  { %v9537_v46 = vadd.f32 %v9536_v5, %v9535_v16  ;;  %v9538_v32 = vpop.f32.mrb[174].mxu1  ;;  %v4315_v5 = vld [vmem:[#allocation2 + $0x98] sm:$0xff] }
 0x69c   :  { %v9539_v38 = vpop.f32.mrb[175].mxu1 }
 0x69d   :  { %v13568_v49 = vadd.f32 %v9537_v46, %v13452_v26  ;;  %v9540_v36 = vadd.f32 %v9539_v38, %v9538_v32  ;;  %v4326_v26 = vld [vmem:[#allocation2 + $0x130] sm:$0xff] }
 0x69e   :  { %6209 = vmatmul.mubr.bf16.vlgmr.msra.gmra.mrb[24].mxu1 %v13439_v62 }
 0x69f   :  { %v13572_v15 = vadd.f32 %v9540_v36, %v13457_v33  ;;  %6216 = vmatprep.mubr.bf16.mxu1 %v4323_v37 }
 0x6a1   :  { %v9541_v57 = vpop.f32.mrb[176].mxu1 }
 0x6a2   :  { %v9542_v50 = vpop.f32.mrb[177].mxu1 }
 0x6a3   :  { %v9543_v51 = vadd.f32 %v9542_v50, %v9541_v57  ;;  %v9544_v54 = vpop.f32.mrb[178].mxu1 }
 0x6a4   :  { %v9545_v8 = vpop.f32.mrb[179].mxu1 }
 0x6a5   :  { %v13575_v14 = vadd.f32 %v9543_v51, %v13473_v23  ;;  %v9546_v12 = vadd.f32 %v9545_v8, %v9544_v54  ;;  %v4327_v23 = vld [vmem:[#allocation2 + $0x138] sm:$0xff] }
 0x6a6   :  { %6217 = vmatmul.mubr.bf16.gmra.mrb[28].mxu1 %v4307_v43 }
 0x6a7   :  { %v13578_v13 = vadd.f32 %v9546_v12, %v13480_v48  ;;  %6224 = vmatprep.mubr.bf16.mxu1 %v4326_v26  ;;  %v4319_v12 = vld [vmem:[#allocation2 + $0xc0] sm:$0xff] }
 0x6a9   :  { %v9547_v62 = vpop.f32.mrb[180].mxu1 }
 0x6aa   :  { %v9548_v33 = vpop.f32.mrb[181].mxu1 }
 0x6ab   :  { %v9549_v2 = vadd.f32 %v9548_v33, %v9547_v62  ;;  %v9550_v47 = vpop.f32.mrb[182].mxu1  ;;  %v11140_v62 = vld [vmem:[%s14523_s5 + $0x48] sm:$0xff]  }
 0x6ac   :  { %v9551_v58 = vpop.f32.mrb[183].mxu1 }
 0x6ad   :  { %v13581_v19 = vadd.f32 %v9549_v2, %v13496_v41  ;;  %v9552_v60 = vadd.f32 %v9551_v58, %v9550_v47  ;;  %v4330_v41 = vld [vmem:[#allocation2 + $0x158] sm:$0xff] }
 0x6ae   :  { %6225 = vmatmul.mubr.bf16.gmra.mrb[32].mxu1 %v13477_v55 }
 0x6af   :  { %v13585_v6 = vadd.f32 %v9552_v60, %v13501_v18  ;;  %6232 = vmatprep.mubr.bf16.mxu1 %v4327_v23 }
 0x6b1   :  { %v9569_v11 = vpop.f32.mrb[184].mxu1 }
 0x6b2   :  { %v9570_v48 = vpop.f32.mrb[185].mxu1 }
 0x6b3   :  { %v9571_v42 = vadd.f32 %v9570_v48, %v9569_v11  ;;  %v9572_v59 = vpop.f32.mrb[186].mxu1  ;;  %v11142_v48 = vld [vmem:[%s14523_s5 + $0x50] sm:$0xff]  }
 0x6b4   :  { %v9573_v9 = vpop.f32.mrb[187].mxu1 }
 0x6b5   :  { %v13588_v63 = vadd.f32 %v9571_v42, %v13517_v24  ;;  %v9574_v1 = vadd.f32 %v9573_v9, %v9572_v59  ;;  %v4331_v24 = vld [vmem:[#allocation2 + $0x160] sm:$0xff] }
 0x6b6   :  { %6233 = vmatmul.mubr.bf16.gmra.mrb[36].mxu1 %v4311_v40 }
 0x6b7   :  { %v13591_v0 = vadd.f32 %v9574_v1, %v13524_v30  ;;  %6240 = vmatprep.mubr.bf16.mxu1 %v4330_v41 }
 0x6b9   :  { %v9575_v55 = vpop.f32.mrb[188].mxu1 }
 0x6ba   :  { %v9576_v18 = vpop.f32.mrb[189].mxu1 }
 0x6bb   :  { %v9577_v45 = vadd.f32 %v9576_v18, %v9575_v55  ;;  %v9578_v3 = vpop.f32.mrb[190].mxu1  ;;  %v11144_v18 = vld [vmem:[%s14523_s5 + $0x58] sm:$0xff]  }
 0x6bc   :  { %v9579_v17 = vpop.f32.mrb[191].mxu1 }
 0x6bd   :  { %v13594_v25 = vadd.f32 %v9577_v45, %v13531_v34  ;;  %v9580_v28 = vadd.f32 %v9579_v17, %v9578_v3 }
 0x6be   :  { %6241 = vmatmul.mubr.bf16.gmra.mrb[40].mxu1 %v13521_v44 }
 0x6bf   :  { %v13598_v27 = vadd.f32 %v9580_v28, %v13536_v39  ;;  %6248 = vmatprep.mubr.bf16.mxu1 %v4331_v24 }
 0x6c1   :  { %v9581_v31 = vpop.f32.mrb[192].mxu1 }
 0x6c2   :  { %v9582_v30 = vpop.f32.mrb[193].mxu1 }
 0x6c3   :  { %v9583_v61 = vadd.f32 %v9582_v30, %v9581_v31  ;;  %v9584_v7 = vpop.f32.mrb[194].mxu1 }
 0x6c4   :  { %v9585_v29 = vpop.f32.mrb[195].mxu1 }
 0x6c5   :  { %v13601_v20 = vadd.f32 %v9583_v61, %v13542_v4  ;;  %v9586_v16 = vadd.f32 %v9585_v29, %v9584_v7  ;;  %v4335_v4 = vld [vmem:[#allocation2 + $0x188] sm:$0xff]  ;;  %v11146_v61 = vld [vmem:[%s14523_s5 + $0x60] sm:$0xff]  }
 0x6c6   :  { %6249 = vmatmul.mubr.bf16.gmra.mrb[44].mxu1 %v4315_v5 }
 0x6c7   :  { %v13604_v34 = vadd.f32 %v9586_v16, %v13549_v35  ;;  %6256 = vmatprep.mubr.bf16.mxu1 %v13538_v10  ;;  %v11138_v10 = vld [vmem:[%s14523_s5 + $0x40] sm:$0xff]  }
 0x6c8   :  { %9809 = vmatprep.subr.bf16.mxu1 %v11138_v10  ;;  %v11149_v10 = vld [vmem:[%s14523_s5 + $0x28] sm:$0xff]  }
 0x6c9   :  { %v9587_v44 = vpop.f32.mrb[196].mxu1 }
 0x6ca   :  { %v9588_v39 = vpop.f32.mrb[197].mxu1 }
 0x6cb   :  { %v9589_v46 = vadd.f32 %v9588_v39, %v9587_v44  ;;  %v9590_v32 = vpop.f32.mrb[198].mxu1 }
 0x6cc   :  { %v9591_v38 = vpop.f32.mrb[199].mxu1 }
 0x6cd   :  { %v13608_v36 = vadd.f32 %v9589_v46, %v13553_v21  ;;  %v9592_v37 = vadd.f32 %v9591_v38, %v9590_v32 }
 0x6ce   :  { %6257 = vmatmul.mubr.bf16.gmra.mrb[48].mxu1 %v13546_v56 }
 0x6cf   :  { %v13612_v57 = vadd.f32 %v9592_v37, %v13558_v22  ;;  %6264 = vmatprep.mubr.bf16.mxu1 %v4335_v4  ;;  %v11139_v22 = vld [vmem:[%s14523_s5] sm:$0xff]  }
 0x6d0   :  { %9810 = vmatpush3.bf16.msra.mxu1 %v11139_v22 }
 0x6d1   :  { %v9593_v35 = vpop.f32.mrb[200].mxu1  ;;  %9811 = vmatprep.subr.bf16.mxu1 %v11140_v62  ;;  %v11151_v62 = vld [vmem:[%s14523_s5 + $0x30] sm:$0xff]  }
 0x6d2   :  { %v9594_v50 = vpop.f32.mrb[201].mxu1 }
 0x6d3   :  { %v9595_v51 = vadd.f32 %v9594_v50, %v9593_v35  ;;  %v9596_v54 = vpop.f32.mrb[202].mxu1 }
 0x6d4   :  { %v9597_v8 = vpop.f32.mrb[203].mxu1 }
 0x6d5   :  { %v13618_v21 = vadd.f32 %v9595_v51, %v13561_v53  ;;  %v9598_v56 = vadd.f32 %v9597_v8, %v9596_v54 }
 0x6d6   :  { %6265 = vmatmul.mubr.bf16.gmra.mrb[52].mxu1 %v4319_v12 }
 0x6d7   :  { %v13624_v43 = vadd.f32 %v9598_v56, %v13565_v52  ;;  %v11141_v52 = vld [vmem:[%s14523_s5 + $0x8] sm:$0xff]  }
 0x6d8   :  { %9812 = vmatpush3.bf16.msra.mxu1 %v11141_v52 }
 0x6d9   :  { %v9599_v26 = vpop.f32.mrb[204].mxu1  ;;  %9813 = vmatprep.subr.bf16.mxu1 %v11142_v48  ;;  %v11153_v48 = vld [vmem:[%s14523_s5 + $0x38] sm:$0xff]  }
 0x6da   :  { %v9600_v33 = vpop.f32.mrb[205].mxu1 }
 0x6db   :  { %v9601_v2 = vadd.f32 %v9600_v33, %v9599_v26  ;;  %v9602_v47 = vpop.f32.mrb[206].mxu1 }
 0x6dc   :  { %v9603_v53 = vpop.f32.mrb[207].mxu1 }
 0x6dd   :  { %v13630_v58 = vadd.f32 %v9601_v2, %v13568_v49  ;;  %v9604_v60 = vadd.f32 %v9603_v53, %v9602_v47 }
 0x6df   :  { %v13636_v23 = vadd.f32 %v9604_v60, %v13572_v15  ;;  %v11143_v15 = vld [vmem:[%s14523_s5 + $0x10] sm:$0xff]  }
 0x6e0   :  { %9814 = vmatpush3.bf16.msra.mxu1 %v11143_v15 }
 0x6e1   :  { %v9605_v11 = vpop.f32.mrb[208].mxu1  ;;  %9815 = vmatprep.subr.bf16.mxu1 %v11144_v18 }
 0x6e2   :  { %v9606_v42 = vpop.f32.mrb[209].mxu1 }
 0x6e3   :  { %v9607_v59 = vadd.f32 %v9606_v42, %v9605_v11  ;;  %v9608_v9 = vpop.f32.mrb[210].mxu1 }
 0x6e4   :  { %v9609_v49 = vpop.f32.mrb[211].mxu1 }
 0x6e5   :  { %v13642_v1 = vadd.f32 %v9607_v59, %v13575_v14  ;;  %v9610_v40 = vadd.f32 %v9609_v49, %v9608_v9 }
 0x6e7   :  { %v13648_v41 = vadd.f32 %v9610_v40, %v13578_v13  ;;  %v11145_v13 = vld [vmem:[%s14523_s5 + $0x18] sm:$0xff]  }
 0x6e8   :  { %9816 = vmatpush3.bf16.msra.mxu1 %v11145_v13 }
 0x6e9   :  { %v9611_v55 = vpop.f32.mrb[212].mxu1  ;;  %9817 = vmatprep.subr.bf16.mxu1 %v11146_v61 }
 0x6ea   :  { %v9612_v45 = vpop.f32.mrb[213].mxu1 }
 0x6eb   :  { %v9613_v3 = vadd.f32 %v9612_v45, %v9611_v55  ;;  %v9614_v17 = vpop.f32.mrb[214].mxu1 }
 0x6ec   :  { %v9615_v14 = vpop.f32.mrb[215].mxu1 }
 0x6ed   :  { %v13654_v28 = vadd.f32 %v9613_v3, %v13581_v19  ;;  %v9616_v24 = vadd.f32 %v9615_v14, %v9614_v17 }
 0x6ef   :  { %v13660_v31 = vadd.f32 %v9616_v24, %v13585_v6  ;;  %v11147_v6 = vld [vmem:[%s14523_s5 + $0x20] sm:$0xff]  }
 0x6f0   :  { %9818 = vmatpush3.bf16.msra.mxu1 %v11147_v6 }
 0x6f1   :  { %v9633_v30 = vpop.f32.mrb[216].mxu1 }
 0x6f2   :  { %v9634_v7 = vpop.f32.mrb[217].mxu1 }
 0x6f3   :  { %v9635_v29 = vadd.f32 %v9634_v7, %v9633_v30  ;;  %v9636_v16 = vpop.f32.mrb[218].mxu1 }
 0x6f4   :  { %v9637_v19 = vpop.f32.mrb[219].mxu1 }
 0x6f5   :  { %v13666_v5 = vadd.f32 %v9635_v29, %v13588_v63  ;;  %v9638_v44 = vadd.f32 %v9637_v19, %v9636_v16  ;;  %v11148_v63 = vld [vmem:[%s14523_s5 + $0x68] sm:$0xff]  }
 0x6f6   :  { %9819 = vmatprep.subr.bf16.mxu1 %v11148_v63 }
 0x6f7   :  { %v13669_v39 = vadd.f32 %v9638_v44, %v13591_v0  ;;  %9820 = vmatpush3.bf16.msra.mxu1 %v11149_v10 }
 0x6f9   :  { %v9639_v46 = vpop.f32.mrb[220].mxu1 }
 0x6fa   :  { %v9640_v32 = vpop.f32.mrb[221].mxu1 }
 0x6fb   :  { %v9641_v38 = vadd.f32 %v9640_v32, %v9639_v46  ;;  %v9642_v37 = vpop.f32.mrb[222].mxu1 }
 0x6fc   :  { %v9643_v4 = vpop.f32.mrb[223].mxu1 }
 0x6fd   :  { %v13675_v35 = vadd.f32 %v9641_v38, %v13594_v25  ;;  %v9644_v50 = vadd.f32 %v9643_v4, %v9642_v37 }
 0x6ff   :  { %v13681_v0 = vadd.f32 %v9644_v50, %v13598_v27  ;;  %v11150_v27 = vld [vmem:[%s14523_s5 + $0x70] sm:$0xff]  }
 0x700   :  { %9821 = vmatprep.subr.bf16.mxu1 %v11150_v27 }
 0x701   :  { %v9645_v51 = vpop.f32.mrb[224].mxu1  ;;  %9822 = vmatpush3.bf16.msra.mxu1 %v11151_v62 }
 0x702   :  { %v9646_v54 = vpop.f32.mrb[225].mxu1 }
 0x703   :  { %v9647_v8 = vadd.f32 %v9646_v54, %v9645_v51  ;;  %v9648_v12 = vpop.f32.mrb[226].mxu1 }
 0x704   :  { %v9649_v25 = vpop.f32.mrb[227].mxu1 }
 0x705   :  { %v13687_v56 = vadd.f32 %v9647_v8, %v13601_v20  ;;  %v9650_v22 = vadd.f32 %v9649_v25, %v9648_v12 }
 0x707   :  { %v13693_v26 = vadd.f32 %v9650_v22, %v13604_v34  ;;  %v11152_v34 = vld [vmem:[%s14523_s5 + $0x78] sm:$0xff]  }
 0x708   :  { %9823 = vmatprep.subr.bf16.mxu1 %v11152_v34 }
 0x709   :  { %v9651_v33 = vpop.f32.mrb[228].mxu1  ;;  %9824 = vmatpush3.bf16.msra.mxu1 %v11153_v48 }
 0x70a   :  { %v9652_v2 = vpop.f32.mrb[229].mxu1 }
 0x70b   :  { %v9653_v47 = vadd.f32 %v9652_v2, %v9651_v33  ;;  %v9654_v53 = vpop.f32.mrb[230].mxu1 }
 0x70c   :  { %v9655_v20 = vpop.f32.mrb[231].mxu1 }
 0x70d   :  { %v13699_v60 = vadd.f32 %v9653_v47, %v13608_v36  ;;  %v9656_v52 = vadd.f32 %v9655_v20, %v9654_v53 }
 0x70f   :  { %v13705_v11 = vadd.f32 %v9656_v52, %v13612_v57  ;;  %v11154_v57 = vld [vmem:[%s14523_s5 + $0xc0] sm:$0xff]  }
 0x710   :  { %9837 = vmatprep.subr.bf16.mxu1 %v11154_v57 }
 0x711   :  { %v9657_v42 = vpop.f32.mrb[232].mxu1 }
 0x712   :  { %v9658_v59 = vpop.f32.mrb[233].mxu1 }
 0x713   :  { %v9659_v9 = vadd.f32 %v9658_v59, %v9657_v42  ;;  %v9660_v49 = vpop.f32.mrb[234].mxu1 }
 0x714   :  { %v9661_v36 = vpop.f32.mrb[235].mxu1 }
 0x715   :  { %v13711_v40 = vadd.f32 %v9659_v9, %v13618_v21  ;;  %v9662_v15 = vadd.f32 %v9661_v36, %v9660_v49 }
 0x717   :  { %v13717_v55 = vadd.f32 %v9662_v15, %v13624_v43 }
 0x719   :  { %v9663_v18 = vpop.f32.mrb[236].mxu1 }
 0x71a   :  { %v9664_v45 = vpop.f32.mrb[237].mxu1 }
 0x71b   :  { %v9665_v3 = vadd.f32 %v9664_v45, %v9663_v18  ;;  %v9666_v17 = vpop.f32.mrb[238].mxu1 }
 0x71c   :  { %v9667_v14 = vpop.f32.mrb[239].mxu1 }
 0x71d   :  { %v13720_v24 = vadd.f32 %v9665_v3, %v13630_v58  ;;  %v9668_v13 = vadd.f32 %v9667_v14, %v9666_v17 }
 0x71f   :  { %v13723_v21 = vadd.f32 %v9668_v13, %v13636_v23 }
 0x721   :  { %v9669_v30 = vpop.f32.mrb[240].mxu1 }
 0x722   :  { %v9670_v61 = vpop.f32.mrb[241].mxu1 }
 0x723   :  { %v9671_v7 = vadd.f32 %v9670_v61, %v9669_v30  ;;  %v9672_v29 = vpop.f32.mrb[242].mxu1 }
 0x724   :  { %v9673_v16 = vpop.f32.mrb[243].mxu1 }
 0x725   :  { %v13726_v43 = vadd.f32 %v9671_v7, %v13642_v1  ;;  %v9674_v19 = vadd.f32 %v9673_v16, %v9672_v29 }
 0x727   :  { %v13729_v44 = vadd.f32 %v9674_v19, %v13648_v41 }
 0x729   :  { %v9675_v6 = vpop.f32.mrb[244].mxu1 }
 0x72a   :  { %v9676_v46 = vpop.f32.mrb[245].mxu1 }
 0x72b   :  { %v9677_v58 = vadd.f32 %v9676_v46, %v9675_v6  ;;  %v9678_v32 = vpop.f32.mrb[246].mxu1 }
 0x72c   :  { %v9679_v38 = vpop.f32.mrb[247].mxu1 }
 0x72d   :  { %v13732_v23 = vadd.f32 %v9677_v58, %v13654_v28  ;;  %v9680_v37 = vadd.f32 %v9679_v38, %v9678_v32 }
 0x72f   :  { %v13735_v4 = vadd.f32 %v9680_v37, %v13660_v31 }
 0x731   :  { %v9697_v50 = vpop.f32.mrb[248].mxu1 }
 0x732   :  { %v9698_v63 = vpop.f32.mrb[249].mxu1 }
 0x733   :  { %v9699_v1 = vadd.f32 %v9698_v63, %v9697_v50  ;;  %v9700_v10 = vpop.f32.mrb[250].mxu1 }
 0x734   :  { %v9701_v51 = vpop.f32.mrb[251].mxu1 }
 0x735   :  { %v13738_v41 = vadd.f32 %v9699_v1, %v13666_v5  ;;  %v9702_v54 = vadd.f32 %v9701_v51, %v9700_v10 }
 0x737   :  { %v13741_v8 = vadd.f32 %v9702_v54, %v13669_v39 }
 0x739   :  { %v9703_v12 = vpop.f32.mrb[252].mxu1 }
 0x73a   :  { %v9704_v25 = vpop.f32.mrb[253].mxu1 }
 0x73b   :  { %v9705_v28 = vadd.f32 %v9704_v25, %v9703_v12  ;;  %v9706_v22 = vpop.f32.mrb[254].mxu1 }
 0x73c   :  { %v9707_v27 = vpop.f32.mrb[255].mxu1 }
 0x73d   :  { %v13744_v31 = vadd.f32 %v9705_v28, %v13675_v35  ;;  %v9708_v62 = vadd.f32 %v9707_v27, %v9706_v22 }
 0x73f   :  { %v13747_v33 = vadd.f32 %v9708_v62, %v13681_v0 }
 0x741   :  { %v9709_v2 = vpop.f32.mrb[0].mxu1 }
 0x742   :  { %v9710_v47 = vpop.f32.mrb[1].mxu1 }
 0x743   :  { %v9711_v5 = vadd.f32 %v9710_v47, %v9709_v2  ;;  %v9712_v53 = vpop.f32.mrb[2].mxu1 }
 0x744   :  { %v9713_v20 = vpop.f32.mrb[3].mxu1 }
 0x745   :  { %v13750_v39 = vadd.f32 %v9711_v5, %v13687_v56  ;;  %v9714_v52 = vadd.f32 %v9713_v20, %v9712_v53 }
 0x747   :  { %v13753_v34 = vadd.f32 %v9714_v52, %v13693_v26 }
 0x749   :  { %v9715_v48 = vpop.f32.mrb[4].mxu1 }
 0x74a   :  { %v9716_v42 = vpop.f32.mrb[5].mxu1 }
 0x74b   :  { %v9717_v35 = vadd.f32 %v9716_v42, %v9715_v48  ;;  %v9718_v59 = vpop.f32.mrb[6].mxu1 }
 0x74c   :  { %v9719_v9 = vpop.f32.mrb[7].mxu1 }
 0x74d   :  { %v13756_v0 = vadd.f32 %v9717_v35, %v13699_v60  ;;  %v9720_v49 = vadd.f32 %v9719_v9, %v9718_v59 }
 0x74f   :  { %v13759_v36 = vadd.f32 %v9720_v49, %v13705_v11 }
 0x751   :  { %v9721_v15 = vpop.f32.mrb[8].mxu1 }
 0x752   :  { %v9722_v57 = vpop.f32.mrb[9].mxu1 }
 0x753   :  { %v9723_v56 = vadd.f32 %v9722_v57, %v9721_v15  ;;  %v9724_v18 = vpop.f32.mrb[10].mxu1 }
 0x754   :  { %v9725_v45 = vpop.f32.mrb[11].mxu1 }
 0x755   :  { %v13762_v26 = vadd.f32 %v9723_v56, %v13711_v40  ;;  %v9726_v3 = vadd.f32 %v9725_v45, %v9724_v18 }
 0x757   :  { %v13765_v17 = vadd.f32 %v9726_v3, %v13717_v55 }
 0x759   :  { %v9727_v14 = vpop.f32.mrb[12].mxu1 }
 0x75a   :  { %v9728_v13 = vpop.f32.mrb[13].mxu1 }
 0x75b   :  { %v9729_v60 = vadd.f32 %v9728_v13, %v9727_v14  ;;  %v9730_v30 = vpop.f32.mrb[14].mxu1 }
 0x75c   :  { %v9731_v61 = vpop.f32.mrb[15].mxu1 }
 0x75d   :  { %v13768_v11 = vadd.f32 %v9729_v60, %v13720_v24  ;;  %v9732_v7 = vadd.f32 %v9731_v61, %v9730_v30 }
 0x75f   :  { %v13771_v29 = vadd.f32 %v9732_v7, %v13723_v21 }
 0x761   :  { %v9733_v16 = vpop.f32.mrb[16].mxu1 }
 0x762   :  { %v9734_v19 = vpop.f32.mrb[17].mxu1 }
 0x763   :  { %v9735_v40 = vadd.f32 %v9734_v19, %v9733_v16  ;;  %v9736_v6 = vpop.f32.mrb[18].mxu1 }
 0x764   :  { %v9737_v46 = vpop.f32.mrb[19].mxu1 }
 0x765   :  { %v13774_v55 = vadd.f32 %v9735_v40, %v13726_v43  ;;  %v9738_v58 = vadd.f32 %v9737_v46, %v9736_v6 }
 0x767   :  { %v13777_v32 = vadd.f32 %v9738_v58, %v13729_v44  ;;  %v11156_v58 = vld [vmem:[%s14523_s5 + $0xc8] sm:$0xff]  }
 0x769   :  { %v9739_v38 = vpop.f32.mrb[20].mxu1 }
 0x76a   :  { %v9740_v37 = vpop.f32.mrb[21].mxu1 }
 0x76b   :  { %v9741_v24 = vadd.f32 %v9740_v37, %v9739_v38  ;;  %v9742_v50 = vpop.f32.mrb[22].mxu1 }
 0x76c   :  { %v9743_v63 = vpop.f32.mrb[23].mxu1 }
 0x76d   :  { %v13780_v21 = vadd.f32 %v9741_v24, %v13732_v23  ;;  %v9744_v1 = vadd.f32 %v9743_v63, %v9742_v50  ;;  %v11157_v50 = vld [vmem:[%s14523_s5 + $0x88] sm:$0xff]  }
 0x76f   :  { %v13783_v10 = vadd.f32 %v9744_v1, %v13735_v4 }
 0x771   :  { %v9761_v51 = vpop.f32.mrb[24].mxu1 }
 0x772   :  { %v9762_v54 = vpop.f32.mrb[25].mxu1 }
 0x773   :  { %v9763_v43 = vadd.f32 %v9762_v54, %v9761_v51  ;;  %v9764_v12 = vpop.f32.mrb[26].mxu1  ;;  %v11158_v51 = vld [vmem:[%s14523_s5 + $0xd0] sm:$0xff]  }
 0x774   :  { %v9765_v25 = vpop.f32.mrb[27].mxu1 }
 0x775   :  { %v6211_v44 = vadd.f32 %v9763_v43, %v13738_v41  ;;  %v9766_v28 = vadd.f32 %v9765_v25, %v9764_v12  ;;  %v11159_v25 = vld [vmem:[%s14523_s5 + $0x90] sm:$0xff]  }
 0x777   :  { %v6214_v22 = vadd.f32 %v9766_v28, %v13741_v8  ;;  %v6273_v27 = vmax.f32 %v6211_v44, 0.0  ;;  %v11160_v28 = vld [vmem:[%s14523_s5 + $0xd8] sm:$0xff]  }
 0x779   :  { %v6274_v62 = vmax.f32 %v6214_v22, 0.0  ;;  %v9767_v2 = vpop.f32.mrb[28].mxu1 }
 0x77a   :  { %v9768_v47 = vpop.f32.mrb[29].mxu1 }
 0x77b   :  { %v6289_v23 = vpack.c.bf16 %v6274_v62, %v6273_v27  ;;  %v9769_v5 = vadd.f32 %v9768_v47, %v9767_v2  ;;  %v9770_v53 = vpop.f32.mrb[30].mxu1 }
 0x77c   :  { %v9771_v20 = vpop.f32.mrb[31].mxu1 }
 0x77d   :  { %6297 = vst [vmem:[#allocation4] sm:$0xff] %v6289_v23  ;;  %v6219_v4 = vadd.f32 %v9769_v5, %v13744_v31  ;;  %v9772_v52 = vadd.f32 %v9771_v20, %v9770_v53 }
 0x77f   :  { %v6222_v48 = vadd.f32 %v9772_v52, %v13747_v33  ;;  %v6275_v42 = vmax.f32 %v6219_v4, 0.0 }
 0x781   :  { %v6276_v35 = vmax.f32 %v6222_v48, 0.0  ;;  %v9773_v41 = vpop.f32.mrb[32].mxu1 }
 0x782   :  { %v9774_v59 = vpop.f32.mrb[33].mxu1 }
 0x783   :  { %v13789_v9 = vpack.c.bf16 %v6276_v35, %v6275_v42  ;;  %v9775_v8 = vadd.f32 %v9774_v59, %v9773_v41  ;;  %v9776_v49 = vpop.f32.mrb[34].mxu1  ;;  %v11163_v41 = vld [vmem:[%s14523_s5 + $0xa0] sm:$0xff]  }
 0x784   :  { %v9777_v15 = vpop.f32.mrb[35].mxu1  ;;  %v6309_v14 = vld [vmem:[#allocation4] sm:$0xf0] }
 0x785   :  { %6298 = vst [vmem:[#allocation4 + $0x8] sm:$0xff] %v13789_v9  ;;  %v6227_v57 = vadd.f32 %v9775_v8, %v13750_v39  ;;  %v9778_v56 = vadd.f32 %v9777_v15, %v9776_v49  ;;  %v6313_v39 = vrot.slane %v6309_v14, 4  ;;  %v11164_v49 = vld [vmem:[%s14523_s5 + $0xe8] sm:$0xff]  }
 0x787   :  { %v6230_v18 = vadd.f32 %v9778_v56, %v13753_v34  ;;  %v6277_v31 = vmax.f32 %v6227_v57, 0.0  ;;  %v11155_v34 = vld [vmem:[%s14523_s5 + $0x80] sm:$0xff]  }
 0x789   :  { %v6278_v45 = vmax.f32 %v6230_v18, 0.0  ;;  %v9779_v3 = vpop.f32.mrb[36].mxu1 }
 0x78a   :  { %v9780_v33 = vpop.f32.mrb[37].mxu1 }
 0x78b   :  { %v13794_v13 = vpack.c.bf16 %v6278_v45, %v6277_v31  ;;  %v9781_v60 = vadd.f32 %v9780_v33, %v9779_v3  ;;  %v9782_v30 = vpop.f32.mrb[38].mxu1  ;;  %v11166_v3 = vld [vmem:[%s14523_s5 + $0xf0] sm:$0xff]  }
 0x78c   :  { %v9783_v61 = vpop.f32.mrb[39].mxu1  ;;  %v6310_v7 = vld [vmem:[#allocation4 + $0x8] sm:$0xf] }
 0x78d   :  { %6299 = vst [vmem:[#allocation4 + $0x10] sm:$0xff] %v13794_v13  ;;  %v6235_v16 = vadd.f32 %v9781_v60, %v13756_v0  ;;  %v9784_v19 = vadd.f32 %v9783_v61, %v9782_v30  ;;  %v6314_v40 = vrot.slane %v6310_v7, 4  ;;  %v11168_v61 = vld [vmem:[%s14523_s5 + $0xf8] sm:$0xff]  }
 0x78f   :  { %v6238_v6 = vadd.f32 %v9784_v19, %v13759_v36  ;;  %v6315_v46 = vsel %vm3767_vm0, %v6313_v39, %v6314_v40  ;;  %v6279_v38 = vmax.f32 %v6235_v16, 0.0 }
 0x790   :  { %7016 = vmatprep.mubr.bf16.mxu1 %v6315_v46 }
 0x791   :  { %v6280_v37 = vmax.f32 %v6238_v6, 0.0  ;;  %v9785_v24 = vpop.f32.mrb[40].mxu1  ;;  %7017 = vmatmul.mubr.bf16.vlgmr.msra.gmra.mrb[56].mxu1 %v6289_v23 }
 0x792   :  { %9838 = vmatpush3.bf16.msra.mxu1 %v11155_v34  ;;  %v9786_v0 = vpop.f32.mrb[41].mxu1 }
 0x793   :  { %v13809_v63 = vpack.c.bf16 %v6280_v37, %v6279_v38  ;;  %v9787_v36 = vadd.f32 %v9786_v0, %v9785_v24  ;;  %v9788_v1 = vpop.f32.mrb[42].mxu1  ;;  %9839 = vmatprep.subr.bf16.mxu1 %v11156_v58  ;;  %v11171_v37 = vld [vmem:[%s14523_s5 + $0x100] sm:$0xff]   ;;  %v11172_v0 = vld [vmem:[%s14523_s5 + $0x148] sm:$0xff]  }
 0x794   :  { %v9789_v54 = vpop.f32.mrb[43].mxu1  ;;  %v6318_v47 = vld [vmem:[#allocation4 + $0x10] sm:$0xf0] }
 0x795   :  { %6300 = vst [vmem:[#allocation4 + $0x18] sm:$0xff] %v13809_v63  ;;  %v6243_v43 = vadd.f32 %v9787_v36, %v13762_v26  ;;  %v9790_v12 = vadd.f32 %v9789_v54, %v9788_v1  ;;  %v11161_v26 = vld [vmem:[%s14523_s5 + $0x98] sm:$0xff]   ;;  %v6322_v42 = vrot.slane %v6318_v47, 4 }
 0x796   :  { %9840 = vmatpush3.bf16.msra.mxu1 %v11157_v50  ;;  %v11177_v54 = vld [vmem:[%s14523_s5 + $0x118] sm:$0xff]  }
 0x797   :  { %v6246_v44 = vadd.f32 %v9790_v12, %v13765_v17  ;;  %9841 = vmatprep.subr.bf16.mxu1 %v11158_v51  ;;  %v6281_v22 = vmax.f32 %v6243_v43, 0.0  ;;  %v11162_v17 = vld [vmem:[%s14523_s5 + $0xe0] sm:$0xff]   ;;  %v11176_v51 = vld [vmem:[%s14523_s5 + $0x158] sm:$0xff]  }
 0x798   :  { %v11178_v43 = vld [vmem:[%s14523_s5 + $0x160] sm:$0xff]  }
 0x799   :  { %v6282_v27 = vmax.f32 %v6246_v44, 0.0  ;;  %v9791_v62 = vpop.f32.mrb[44].mxu1  ;;  %v11179_v12 = vld [vmem:[%s14523_s5 + $0x120] sm:$0xff]   ;;  %v11182_v44 = vld [vmem:[%s14523_s5 + $0x170] sm:$0xff]  }
 0x79a   :  { %9842 = vmatpush3.bf16.msra.mxu1 %v11159_v25  ;;  %v9792_v2 = vpop.f32.mrb[45].mxu1  ;;  %v11180_v25 = vld [vmem:[%s14523_s5 + $0x168] sm:$0xff]  }
 0x79b   :  { %v13826_v23 = vpack.c.bf16 %v6282_v27, %v6281_v22  ;;  %v9793_v5 = vadd.f32 %v9792_v2, %v9791_v62  ;;  %v9794_v53 = vpop.f32.mrb[46].mxu1  ;;  %9843 = vmatprep.subr.bf16.mxu1 %v11160_v28  ;;  %v11183_v28 = vld [vmem:[%s14523_s5 + $0x130] sm:$0xff]   ;;  %v11184_v22 = vld [vmem:[%s14523_s5 + $0x178] sm:$0xff]   ;;  %v6335_v2 = vld [vmem:[#allocation4 + $0x10] sm:$0xf0] }
 0x79c   :  { %v9795_v20 = vpop.f32.mrb[47].mxu1  ;;  %v6319_v4 = vld [vmem:[#allocation4 + $0x18] sm:$0xf]  ;;  %v11185_v62 = vld [vmem:[%s14523_s5 + $0x138] sm:$0xff]  }
 0x79d   :  { %6301 = vst [vmem:[#allocation4 + $0x20] sm:$0xff] %v13826_v23  ;;  %v6251_v52 = vadd.f32 %v9793_v5, %v13768_v11  ;;  %v9796_v48 = vadd.f32 %v9795_v20, %v9794_v53  ;;  %v6323_v35 = vrot.slane %v6319_v4, 4  ;;  %v6336_v27 = vld [vmem:[#allocation4 + $0x18] sm:$0xf]  ;;  %v6339_v5 = vrot.slane %v6335_v2, 4  ;;  %v11187_v53 = vld [vmem:[%s14523_s5 + $0x180] sm:$0xff]  }
 0x79e   :  { %9844 = vmatpush3.bf16.msra.mxu1 %v11161_v26  ;;  %v11186_v26 = vld [vmem:[%s14523_s5 + $0x1c0] sm:$0xff]   ;;  %v6340_v47 = vrot.slane %v6336_v27, 4 }
 0x79f   :  { %v6254_v59 = vadd.f32 %v9796_v48, %v13771_v29  ;;  %v6324_v8 = vsel %vm3767_vm0, %v6322_v42, %v6323_v35  ;;  %9845 = vmatprep.subr.bf16.mxu1 %v11162_v17  ;;  %v6283_v15 = vmax.f32 %v6251_v52, 0.0  ;;  %v11165_v29 = vld [vmem:[%s14523_s5 + $0xa8] sm:$0xff]   ;;  %v11190_v35 = vld [vmem:[%s14523_s5 + $0x1d0] sm:$0xff]  }
 0x7a0   :  { %7024 = vmatprep.mubr.bf16.mxu1 %v6324_v8  ;;  %v11188_v17 = vld [vmem:[%s14523_s5 + $0x1c8] sm:$0xff]   ;;  %v6341_v20 = vsel %vm3767_vm0, %v6339_v5, %v6340_v47 }
 0x7a1   :  { %v6284_v11 = vmax.f32 %v6254_v59, 0.0  ;;  %v9797_v57 = vpop.f32.mrb[48].mxu1  ;;  %7025 = vmatmul.mubr.bf16.gmra.mrb[60].mxu1 %v13794_v13  ;;  %v11189_v52 = vld [vmem:[%s14523_s5 + $0x188] sm:$0xff]  }
 0x7a2   :  { %9846 = vmatpush3.bf16.msra.mxu1 %v11163_v41  ;;  %v9798_v56 = vpop.f32.mrb[49].mxu1  ;;  %7065 = vmatprep.mubr.bf16.mxu1 %v13794_v13  ;;  %v11167_v13 = vld [vmem:[%s14523_s5 + $0xb0] sm:$0xff]  }
 0x7a3   :  { %v13846_v18 = vpack.c.bf16 %v6284_v11, %v6283_v15  ;;  %v9799_v31 = vadd.f32 %v9798_v56, %v9797_v57  ;;  %v9800_v45 = vpop.f32.mrb[50].mxu1  ;;  %9847 = vmatprep.subr.bf16.mxu1 %v11164_v49  ;;  %v11191_v15 = vld [vmem:[%s14523_s5 + $0x190] sm:$0xff]   ;;  %v11192_v57 = vld [vmem:[%s14523_s5 + $0x1d8] sm:$0xff]  }
 0x7a4   :  { %v9801_v33 = vpop.f32.mrb[51].mxu1  ;;  %v6344_v42 = vld [vmem:[#allocation4 + $0x20] sm:$0xf0] }
 0x7a5   :  { %6302 = vst [vmem:[#allocation4 + $0x28] sm:$0xff] %v13846_v18  ;;  %v6259_v14 = vadd.f32 %v9799_v31, %v13774_v55  ;;  %v9802_v60 = vadd.f32 %v9801_v33, %v9800_v45  ;;  %v11169_v55 = vld [vmem:[%s14523_s5 + $0xb8] sm:$0xff]   ;;  %v6361_v59 = vld [vmem:[#allocation4 + $0x20] sm:$0xf0]  ;;  %v6348_v49 = vrot.slane %v6344_v42, 4  ;;  %v11194_v45 = vld [vmem:[%s14523_s5 + $0x1e0] sm:$0xff]  }
 0x7a6   :  { %9848 = vmatpush3.bf16.msra.mxu1 %v11165_v29  ;;  %v6365_v11 = vrot.slane %v6361_v59, 4  ;;  %v11193_v31 = vld [vmem:[%s14523_s5 + $0x198] sm:$0xff]   ;;  %v11196_v33 = vld [vmem:[%s14523_s5 + $0x1e8] sm:$0xff]   ;;  %v11244_v42 = vld [vmem:[%s14524_s7 + $0x144] ss:$16 sps:$4 sm:$0xff]  }
 0x7a7   :  { %v6262_v30 = vadd.f32 %v9802_v60, %v13777_v32  ;;  %9849 = vmatprep.subr.bf16.mxu1 %v11166_v3  ;;  %v6285_v7 = vmax.f32 %v6259_v14, 0.0  ;;  %v11170_v32 = vld [vmem:[%s14523_s5 + $0x140] sm:$0xff]   ;;  %v11197_v14 = vld [vmem:[%s14523_s5 + $0x1a8] sm:$0xff]   ;;  %v11198_v60 = vld [vmem:[%s14523_s5 + $0x1f0] sm:$0xff]  }
 0x7a8   :  { %v11195_v3 = vld [vmem:[%s14523_s5 + $0x1a0] sm:$0xff]  }
 0x7a9   :  { %v6286_v16 = vmax.f32 %v6262_v30, 0.0  ;;  %v9803_v19 = vpop.f32.mrb[52].mxu1  ;;  %v11200_v30 = vld [vmem:[%s14523_s5 + $0x1f8] sm:$0xff]   ;;  %v11247_v59 = vld [vmem:[%s14524_s7 + $0x164] ss:$16 sps:$4 sm:$0xff]  }
 0x7aa   :  { %9850 = vmatpush3.bf16.msra.mxu1 %v11167_v13  ;;  %v9804_v39 = vpop.f32.mrb[53].mxu1  ;;  %v11199_v13 = vld [vmem:[%s14523_s5 + $0x1b0] sm:$0xff]  }
 0x7ab   :  { %v13863_v40 = vpack.c.bf16 %v6286_v16, %v6285_v7  ;;  %v9805_v34 = vadd.f32 %v9804_v39, %v9803_v19  ;;  %v9806_v6 = vpop.f32.mrb[54].mxu1  ;;  %9851 = vmatprep.subr.bf16.mxu1 %v11168_v61  ;;  %v11201_v61 = vld [vmem:[%s14523_s5 + $0x1b8] sm:$0xff]   ;;  %v11202_v16 = vld [vmem:[%s14523_s5 + $0x200] sm:$0xff]  }
 0x7ac   :  { %v9807_v46 = vpop.f32.mrb[55].mxu1  ;;  %v6345_v4 = vld [vmem:[#allocation4 + $0x28] sm:$0xf] }
 0x7ad   :  { %6303 = vst [vmem:[#allocation4 + $0x30] sm:$0xff] %v13863_v40  ;;  %v6267_v58 = vadd.f32 %v9805_v34, %v13780_v21  ;;  %v9808_v38 = vadd.f32 %v9807_v46, %v9806_v6  ;;  %v11173_v21 = vld [vmem:[%s14523_s5 + $0x108] sm:$0xff]   ;;  %v6362_v48 = vld [vmem:[#allocation4 + $0x28] sm:$0xf]  ;;  %v6349_v41 = vrot.slane %v6345_v4, 4 }
 0x7ae   :  { %9852 = vmatpush3.bf16.msra.mxu1 %v11169_v55  ;;  %v6366_v8 = vrot.slane %v6362_v48, 4  ;;  %v11203_v34 = vld [vmem:[%s14523_s5 + $0x208] sm:$0xff]   ;;  %v11205_v46 = vld [vmem:[%s14523_s5 + $0x218] sm:$0xff]   ;;  %v11238_v4 = vld [vmem:[%s14524_s7 + $0x120] ss:$16 sps:$4 sm:$0xff]  }
 0x7af   :  { %v6270_v24 = vadd.f32 %v9808_v38, %v13783_v10  ;;  %9865 = vmatprep.subr.bf16.mxu1 %v11170_v32  ;;  %v6287_v50 = vmax.f32 %v6267_v58, 0.0  ;;  %v11174_v10 = vld [vmem:[%s14523_s5 + $0x150] sm:$0xff]   ;;  %v6350_v56 = vsel %vm3767_vm0, %v6348_v49, %v6349_v41  ;;  %v11207_v58 = vld [vmem:[%s14523_s5 + $0x228] sm:$0xff]  }
 0x7b0   :  { %v6367_v29 = vsel %vm3767_vm0, %v6365_v11, %v6366_v8  ;;  %v11204_v32 = vld [vmem:[%s14523_s5 + $0x210] sm:$0xff]  }
 0x7b1   :  { %v6288_v36 = vmax.f32 %v6270_v24, 0.0  ;;  %7066 = vmatmul.mubr.bf16.vlgmr.msra.gmra.mrb[64].mxu1 %v13789_v9  ;;  %v11175_v9 = vld [vmem:[%s14523_s5 + $0x110] sm:$0xff]  }
 0x7b2   :  { %7073 = vmatprep.mubr.bf16.mxu1 %v13826_v23  ;;  %9866 = vmatpush3.bf16.msra.mxu1 %v11171_v37  ;;  %v11210_v38 = vld [vmem:[%s14524_s7] ss:$16 sps:$4 sm:$0xff]   ;;  %v11212_v37 = vld [vmem:[%s14524_s7 + $0x4] ss:$16 sps:$4 sm:$0xff]  }
 0x7b3   :  { %v13882_v1 = vpack.c.bf16 %v6288_v36, %v6287_v50  ;;  %9867 = vmatprep.subr.bf16.mxu1 %v11172_v0  ;;  %v11213_v24 = vld [vmem:[%s14524_s7 + $0x20] ss:$16 sps:$4 sm:$0xff]   ;;  %v11215_v0 = vld [vmem:[%s14524_s7 + $0x24] ss:$16 sps:$4 sm:$0xff]  }
 0x7b4   :  { %v6370_v19 = vld [vmem:[#allocation4 + $0x30] sm:$0xf0]  ;;  %v11216_v50 = vld [vmem:[%s14524_s7 + $0x40] ss:$16 sps:$4 sm:$0xff]  }
 0x7b5   :  { %6304 = vst [vmem:[#allocation4 + $0x38] sm:$0xff] %v13882_v1  ;;  %v6374_v55 = vrot.slane %v6370_v19, 4  ;;  %v11218_v36 = vld [vmem:[%s14524_s7 + $0x44] ss:$16 sps:$4 sm:$0xff]   ;;  %v11242_v41 = vld [vmem:[%s14524_s7 + $0x140] ss:$16 sps:$4 sm:$0xff]  }
 0x7b6   :  { %9868 = vmatpush3.bf16.msra.mxu1 %v11173_v21  ;;  %v11219_v21 = vld [vmem:[%s14524_s7 + $0x60] ss:$16 sps:$4 sm:$0xff]   ;;  %v11250_v49 = vld [vmem:[%s14524_s7 + $0x184] ss:$16 sps:$4 sm:$0xff]  }
 0x7b7   :  { %9869 = vmatprep.subr.bf16.mxu1 %v11174_v10  ;;  %v11224_v10 = vld [vmem:[%s14524_s7 + $0x84] ss:$16 sps:$4 sm:$0xff]   ;;  %v11245_v8 = vld [vmem:[%s14524_s7 + $0x160] ss:$16 sps:$4 sm:$0xff]  }
 0x7b8   :  { %v11253_v11 = vld [vmem:[%s14524_s7 + $0x1a4] ss:$16 sps:$4 sm:$0xff]  }
 0x7b9   :  { %7074 = vmatmul.mubr.bf16.gmra.mrb[68].mxu1 %v13809_v63  ;;  %v11259_v19 = vld [vmem:[%s14524_s7 + $0x1e4] ss:$16 sps:$4 sm:$0xff]  }
 0x7ba   :  { %9870 = vmatpush3.bf16.msra.mxu1 %v11175_v9  ;;  %7114 = vmatprep.mubr.bf16.mxu1 %v13809_v63  ;;  %v11181_v63 = vld [vmem:[%s14523_s5 + $0x128] sm:$0xff]   ;;  %v11222_v9 = vld [vmem:[%s14524_s7 + $0x80] ss:$16 sps:$4 sm:$0xff]  }
 0x7bb   :  { %9871 = vmatprep.subr.bf16.mxu1 %v11176_v51  ;;  %v11227_v51 = vld [vmem:[%s14524_s7 + $0xa4] ss:$16 sps:$4 sm:$0xff]  }
 0x7bc   :  { %v6371_v7 = vld [vmem:[#allocation4 + $0x38] sm:$0xf] }
 0x7bd   :  { %v6375_v39 = vrot.slane %v6371_v7, 4  ;;  %v11254_v7 = vld [vmem:[%s14524_s7 + $0x1c0] ss:$16 sps:$4 sm:$0xff]  }
 0x7be   :  { %9872 = vmatpush3.bf16.msra.mxu1 %v11177_v54  ;;  %v11225_v54 = vld [vmem:[%s14524_s7 + $0xa0] ss:$16 sps:$4 sm:$0xff]  }
 0x7bf   :  { %9873 = vmatprep.subr.bf16.mxu1 %v11178_v43  ;;  %v6376_v6 = vsel %vm3767_vm0, %v6374_v55, %v6375_v39  ;;  %v11230_v43 = vld [vmem:[%s14524_s7 + $0xc4] ss:$16 sps:$4 sm:$0xff]  }
 0x7c2   :  { %9874 = vmatpush3.bf16.msra.mxu1 %v11179_v12  ;;  %v11228_v12 = vld [vmem:[%s14524_s7 + $0xc0] ss:$16 sps:$4 sm:$0xff]  }
 0x7c3   :  { %9875 = vmatprep.subr.bf16.mxu1 %v11180_v25  ;;  %v11233_v25 = vld [vmem:[%s14524_s7 + $0xe4] ss:$16 sps:$4 sm:$0xff]  }
 0x7c6   :  { %9876 = vmatpush3.bf16.msra.mxu1 %v11181_v63  ;;  %v11231_v63 = vld [vmem:[%s14524_s7 + $0xe0] ss:$16 sps:$4 sm:$0xff]  }
 0x7c7   :  { %9877 = vmatprep.subr.bf16.mxu1 %v11182_v44  ;;  %v11236_v44 = vld [vmem:[%s14524_s7 + $0x104] ss:$16 sps:$4 sm:$0xff]  }
 0x7ca   :  { %9878 = vmatpush3.bf16.msra.mxu1 %v11183_v28  ;;  %v11234_v28 = vld [vmem:[%s14524_s7 + $0x100] ss:$16 sps:$4 sm:$0xff]  }
 0x7cb   :  { %9879 = vmatprep.subr.bf16.mxu1 %v11184_v22 }
 0x7ce   :  { %9880 = vmatpush3.bf16.msra.mxu1 %v11185_v62 }
 0x7cf   :  { %9893 = vmatprep.subr.bf16.mxu1 %v11186_v26 }
 0x7d1   :  { %7115 = vmatmul.mubr.bf16.vlgmr.msra.gmra.mrb[72].mxu1 %v6341_v20 }
 0x7d2   :  { %7122 = vmatprep.mubr.bf16.mxu1 %v13846_v18  ;;  %9894 = vmatpush3.bf16.msra.mxu1 %v11187_v53 }
 0x7d3   :  { %9895 = vmatprep.subr.bf16.mxu1 %v11188_v17 }
 0x7d6   :  { %9896 = vmatpush3.bf16.msra.mxu1 %v11189_v52  ;;  %v11240_v52 = vld [vmem:[%s14524_s7 + $0x124] ss:$16 sps:$4 sm:$0xff]  }
 0x7d7   :  { %9897 = vmatprep.subr.bf16.mxu1 %v11190_v35 }
 0x7d9   :  { %7123 = vmatmul.mubr.bf16.gmra.mrb[76].mxu1 %v6350_v56 }
 0x7da   :  { %9898 = vmatpush3.bf16.msra.mxu1 %v11191_v15  ;;  %7163 = vmatprep.mubr.bf16.mxu1 %v6367_v29  ;;  %v11248_v15 = vld [vmem:[%s14524_s7 + $0x180] ss:$16 sps:$4 sm:$0xff]  }
 0x7db   :  { %9899 = vmatprep.subr.bf16.mxu1 %v11192_v57  ;;  %v9057_v57 = vld [vmem:[%s14525_s6] ss:$0 sm:$0xff] }
 0x7de   :  { %9900 = vmatpush3.bf16.msra.mxu1 %v11193_v31  ;;  %v11251_v31 = vld [vmem:[%s14524_s7 + $0x1a0] ss:$16 sps:$4 sm:$0xff]  }
 0x7df   :  { %9901 = vmatprep.subr.bf16.mxu1 %v11194_v45 }
 0x7e2   :  { %9902 = vmatpush3.bf16.msra.mxu1 %v11195_v3 }
 0x7e3   :  { %9903 = vmatprep.subr.bf16.mxu1 %v11196_v33 }
 0x7e6   :  { %9904 = vmatpush3.bf16.msra.mxu1 %v11197_v14  ;;  %v11256_v14 = vld [vmem:[%s14524_s7 + $0x1c4] ss:$16 sps:$4 sm:$0xff]  }
 0x7e7   :  { %9905 = vmatprep.subr.bf16.mxu1 %v11198_v60 }
 0x7ea   :  { %9906 = vmatpush3.bf16.msra.mxu1 %v11199_v13 }
 0x7eb   :  { %9907 = vmatprep.subr.bf16.mxu1 %v11200_v30 }
 0x7ee   :  { %9908 = vmatpush3.bf16.msra.mxu1 %v11201_v61 }
 0x7ef   :  { %9975 = vmatprep.subr.bf16.mxu1 %v11202_v16 }
 0x7f1   :  { %7164 = vmatmul.mubr.bf16.vlgmr.msra.gmra.mrb[80].mxu1 %v13826_v23  ;;  %v11206_v23 = vld [vmem:[%s14523_s5 + $0x220] sm:$0xff]  }
 0x7f2   :  { %7171 = vmatprep.mubr.bf16.mxu1 %v6376_v6  ;;  %9976 = vmatpush3.bf16.msra.mxu1 %v11202_v16 }
 0x7f3   :  { %9977 = vmatprep.subr.bf16.mxu1 %v11203_v34 }
 0x7f6   :  { %9978 = vmatpush3.bf16.msra.mxu1 %v11203_v34  ;;  %v11257_v34 = vld [vmem:[%s14524_s7 + $0x1e0] ss:$16 sps:$4 sm:$0xff]  }
 0x7f7   :  { %9979 = vmatprep.subr.bf16.mxu1 %v11204_v32 }
 0x7f9   :  { %7172 = vmatmul.mubr.bf16.gmra.mrb[84].mxu1 %v13863_v40  ;;  %v11208_v40 = vld [vmem:[%s14523_s5 + $0x230] sm:$0xff]  }
 0x7fa   :  { %9980 = vmatpush3.bf16.msra.mxu1 %v11204_v32  ;;  %9991 = vmatprep.mubr.bf16.mxu1 %v13846_v18  ;;  %v11209_v18 = vld [vmem:[%s14523_s5 + $0x238] sm:$0xff]  }
 0x7fb   :  { %9981 = vmatprep.subr.bf16.mxu1 %v11205_v46 }
 0x7fe   :  { %9982 = vmatpush3.bf16.msra.mxu1 %v11205_v46 }
 0x7ff   :  { %9983 = vmatprep.subr.bf16.mxu1 %v11206_v23 }
 0x802   :  { %9984 = vmatpush3.bf16.msra.mxu1 %v11206_v23  ;;  %v11264_v23 = vld [vmem:[%s14524_s7 + $0x204] ss:$16 sps:$4 sm:$0xff]  }
 0x803   :  { %9985 = vmatprep.subr.bf16.mxu1 %v11207_v58 }
 0x806   :  { %9986 = vmatpush3.bf16.msra.mxu1 %v11207_v58 }
 0x807   :  { %9987 = vmatprep.subr.bf16.mxu1 %v11208_v40 }
 0x80a   :  { %9988 = vmatpush3.bf16.msra.mxu1 %v11208_v40 }
 0x80b   :  { %9989 = vmatprep.subr.bf16.mxu1 %v11209_v18 }
 0x80e   :  { %9990 = vmatpush3.bf16.msra.mxu1 %v11209_v18 }
 0x80f   :  { %8059 = vmatprep.subr.bf16.mxu1 %v11212_v37 }
 0x811   :  { %9992 = vmatmul.mubr.bf16.vlgmr.msra.gmra.mrb[88].mxu1 %v13882_v1  ;;  %v11221_v1 = vld [vmem:[%s14524_s7 + $0x64] ss:$16 sps:$4 sm:$0xff]  }
 0x812   :  { %8060 = vmatpush1.bf16.msra.mxu1 %v11210_v38 }
 0x813   :  { %8061 = vmatprep.subr.bf16.mxu1 %v11215_v0 }
 0x816   :  { %8062 = vmatpush1.bf16.msra.mxu1 %v11213_v24 }
 0x817   :  { %8063 = vmatprep.subr.bf16.mxu1 %v11218_v36 }
 0x81a   :  { %8064 = vmatpush1.bf16.msra.mxu1 %v11216_v50 }
 0x81b   :  { %8065 = vmatprep.subr.bf16.mxu1 %v11221_v1 }
 0x81e   :  { %8066 = vmatpush1.bf16.msra.mxu1 %v11219_v21 }
 0x81f   :  { %8067 = vmatprep.subr.bf16.mxu1 %v11224_v10 }
 0x822   :  { %8068 = vmatpush1.bf16.msra.mxu1 %v11222_v9 }
 0x823   :  { %8069 = vmatprep.subr.bf16.mxu1 %v11227_v51 }
 0x826   :  { %8070 = vmatpush1.bf16.msra.mxu1 %v11225_v54 }
 0x827   :  { %8071 = vmatprep.subr.bf16.mxu1 %v11230_v43 }
 0x82a   :  { %8072 = vmatpush1.bf16.msra.mxu1 %v11228_v12 }
 0x82b   :  { %8073 = vmatprep.subr.bf16.mxu1 %v11233_v25 }
 0x82e   :  { %8074 = vmatpush1.bf16.msra.mxu1 %v11231_v63 }
 0x82f   :  { %8075 = vmatprep.subr.bf16.mxu1 %v11236_v44 }
 0x832   :  { %8076 = vmatpush1.bf16.msra.mxu1 %v11234_v28 }
 0x833   :  { %8077 = vmatprep.subr.bf16.mxu1 %v11240_v52 }
 0x836   :  { %8078 = vmatpush1.bf16.msra.mxu1 %v11238_v4 }
 0x837   :  { %8079 = vmatprep.subr.bf16.mxu1 %v11244_v42 }
 0x83a   :  { %8080 = vmatpush1.bf16.msra.mxu1 %v11242_v41 }
 0x83b   :  { %8081 = vmatprep.subr.bf16.mxu1 %v11247_v59 }
 0x83e   :  { %8082 = vmatpush1.bf16.msra.mxu1 %v11245_v8 }
 0x83f   :  { %8083 = vmatprep.subr.bf16.mxu1 %v11250_v49 }
 0x842   :  { %8084 = vmatpush1.bf16.msra.mxu1 %v11248_v15 }
 0x843   :  { %8085 = vmatprep.subr.bf16.mxu1 %v11253_v11 }
 0x846   :  { %8086 = vmatpush1.bf16.msra.mxu1 %v11251_v31 }
 0x847   :  { %8087 = vmatprep.subr.bf16.mxu1 %v11256_v14 }
 0x84a   :  { %8088 = vmatpush1.bf16.msra.mxu1 %v11254_v7 }
 0x84b   :  { %8089 = vmatprep.subr.bf16.mxu1 %v11259_v19 }
 0x84e   :  { %8090 = vmatpush1.bf16.msra.mxu1 %v11257_v34  ;;  %v11262_v34 = vld [vmem:[%s14524_s7 + $0x200] ss:$16 sps:$4 sm:$0xff]  }
 0x84f   :  { %8100 = vmatprep.subr.bf16.mxu1 %v11264_v23  ;;  %v11272_v23 = vld [vmem:[%s14524_s7 + $0x244] ss:$16 sps:$4 sm:$0xff]  }
 0x864   :  { %v9825_v22 = vpop.f32.mrb[56].mxu1 }
 0x865   :  { %v9826_v27 = vpop.f32.mrb[57].mxu1 }
 0x866   :  { %v9827_v62 = vadd.f32 %v9826_v27, %v9825_v22  ;;  %v9828_v2 = vpop.f32.mrb[58].mxu1 }
 0x867   :  { %v9829_v26 = vpop.f32.mrb[59].mxu1 }
 0x868   :  { %v9830_v47 = vadd.f32 %v9829_v26, %v9828_v2  ;;  %v7019_v45 = vadd.f32 %v9827_v62, %v9057_v57 }
 0x86a   :  { %v7022_v13 = vadd.f32 %v9830_v47, %v9057_v57 }
 0x874   :  { %v9831_v5 = vpop.f32.mrb[60].mxu1 }
 0x875   :  { %v9832_v53 = vpop.f32.mrb[61].mxu1 }
 0x876   :  { %v9833_v17 = vadd.f32 %v9832_v53, %v9831_v5  ;;  %v9834_v20 = vpop.f32.mrb[62].mxu1 }
 0x877   :  { %v9835_v48 = vpop.f32.mrb[63].mxu1 }
 0x878   :  { %v9836_v35 = vadd.f32 %v9835_v48, %v9834_v20  ;;  %v7027_v6 = vadd.f32 %v9833_v17, %v9057_v57 }
 0x87a   :  { %v7030_v40 = vadd.f32 %v9836_v35, %v9057_v57 }
 0x884   :  { %v9853_v56 = vpop.f32.mrb[64].mxu1 }
 0x885   :  { %v9854_v29 = vpop.f32.mrb[65].mxu1 }
 0x886   :  { %v9855_v3 = vadd.f32 %v9854_v29, %v9853_v56  ;;  %v9856_v33 = vpop.f32.mrb[66].mxu1 }
 0x887   :  { %v9857_v60 = vpop.f32.mrb[67].mxu1 }
 0x888   :  { %v7068_v30 = vadd.f32 %v9855_v3, %v7019_v45  ;;  %v9858_v61 = vadd.f32 %v9857_v60, %v9856_v33 }
 0x88a   :  { %v7071_v16 = vadd.f32 %v9858_v61, %v7022_v13 }
 0x88c   :  { %v9859_v39 = vpop.f32.mrb[68].mxu1 }
 0x88d   :  { %v9860_v55 = vpop.f32.mrb[69].mxu1 }
 0x88e   :  { %v9861_v32 = vadd.f32 %v9860_v55, %v9859_v39  ;;  %v9862_v46 = vpop.f32.mrb[70].mxu1 }
 0x88f   :  { %v9863_v58 = vpop.f32.mrb[71].mxu1 }
 0x890   :  { %v7076_v18 = vadd.f32 %v9861_v32, %v7027_v6  ;;  %v9864_v38 = vadd.f32 %v9863_v58, %v9862_v46  ;;  %v11269_v6 = vld [vmem:[%s14524_s7 + $0x224] ss:$16 sps:$4 sm:$0xff]   ;;  %v11267_v46 = vld [vmem:[%s14524_s7 + $0x220] ss:$16 sps:$4 sm:$0xff]  }
 0x891   :  { %v11270_v58 = vld [vmem:[%s14524_s7 + $0x240] ss:$16 sps:$4 sm:$0xff]  }
 0x892   :  { %v7079_v37 = vadd.f32 %v9864_v38, %v7030_v40  ;;  %v11275_v40 = vld [vmem:[%s14524_s7 + $0x264] ss:$16 sps:$4 sm:$0xff]  }
 0x893   :  { %v11278_v38 = vld [vmem:[%s14524_s7 + $0x284] ss:$16 sps:$4 sm:$0xff]  }
 0x8a4   :  { %v9881_v24 = vpop.f32.mrb[72].mxu1 }
 0x8a5   :  { %v9882_v0 = vpop.f32.mrb[73].mxu1 }
 0x8a6   :  { %v9883_v50 = vadd.f32 %v9882_v0, %v9881_v24  ;;  %v9884_v36 = vpop.f32.mrb[74].mxu1  ;;  %v11281_v24 = vld [vmem:[%s14524_s7 + $0x2a4] ss:$16 sps:$4 sm:$0xff]   ;;  %v11279_v0 = vld [vmem:[%s14524_s7 + $0x2a0] ss:$16 sps:$4 sm:$0xff]  }
 0x8a7   :  { %v9885_v21 = vpop.f32.mrb[75].mxu1 }
 0x8a8   :  { %v7117_v1 = vadd.f32 %v9883_v50, %v7068_v30  ;;  %v9886_v10 = vadd.f32 %v9885_v21, %v9884_v36  ;;  %v11284_v50 = vld [vmem:[%s14524_s7 + $0x2c4] ss:$16 sps:$4 sm:$0xff]   ;;  %v11282_v36 = vld [vmem:[%s14524_s7 + $0x2c0] ss:$16 sps:$4 sm:$0xff]  }
 0x8a9   :  { %v11287_v21 = vld [vmem:[%s14524_s7 + $0x2e4] ss:$16 sps:$4 sm:$0xff]  }
 0x8aa   :  { %v7120_v9 = vadd.f32 %v9886_v10, %v7071_v16  ;;  %v11290_v10 = vld [vmem:[%s14524_s7 + $0x304] ss:$16 sps:$4 sm:$0xff]  }
 0x8ac   :  { %v9887_v51 = vpop.f32.mrb[76].mxu1 }
 0x8ad   :  { %v9888_v54 = vpop.f32.mrb[77].mxu1 }
 0x8ae   :  { %v9889_v43 = vadd.f32 %v9888_v54, %v9887_v51  ;;  %v9890_v12 = vpop.f32.mrb[78].mxu1  ;;  %v11293_v51 = vld [vmem:[%s14524_s7 + $0x324] ss:$16 sps:$4 sm:$0xff]   ;;  %v11291_v54 = vld [vmem:[%s14524_s7 + $0x320] ss:$16 sps:$4 sm:$0xff]  }
 0x8af   :  { %v9891_v25 = vpop.f32.mrb[79].mxu1 }
 0x8b0   :  { %v7125_v63 = vadd.f32 %v9889_v43, %v7076_v18  ;;  %v9892_v44 = vadd.f32 %v9891_v25, %v9890_v12  ;;  %v11273_v18 = vld [vmem:[%s14524_s7 + $0x260] ss:$16 sps:$4 sm:$0xff]   ;;  %v11296_v43 = vld [vmem:[%s14524_s7 + $0x344] ss:$16 sps:$4 sm:$0xff]  }
 0x8b1   :  { %v11294_v12 = vld [vmem:[%s14524_s7 + $0x340] ss:$16 sps:$4 sm:$0xff]   ;;  %v11299_v25 = vld [vmem:[%s14524_s7 + $0x364] ss:$16 sps:$4 sm:$0xff]  }
 0x8b2   :  { %v7128_v28 = vadd.f32 %v9892_v44, %v7079_v37  ;;  %v11276_v37 = vld [vmem:[%s14524_s7 + $0x280] ss:$16 sps:$4 sm:$0xff]   ;;  %v11302_v44 = vld [vmem:[%s14524_s7 + $0x384] ss:$16 sps:$4 sm:$0xff]  }
 0x8c4   :  { %v9909_v22 = vpop.f32.mrb[80].mxu1 }
 0x8c5   :  { %v9910_v27 = vpop.f32.mrb[81].mxu1 }
 0x8c6   :  { %v9911_v62 = vadd.f32 %v9910_v27, %v9909_v22  ;;  %v9912_v2 = vpop.f32.mrb[82].mxu1  ;;  %v11305_v22 = vld [vmem:[%s14524_s7 + $0x3a4] ss:$16 sps:$4 sm:$0xff]   ;;  %v11303_v27 = vld [vmem:[%s14524_s7 + $0x3a0] ss:$16 sps:$4 sm:$0xff]  }
 0x8c7   :  { %v9913_v26 = vpop.f32.mrb[83].mxu1 }
 0x8c8   :  { %v9914_v47 = vadd.f32 %v9913_v26, %v9912_v2  ;;  %v7166_v5 = vadd.f32 %v9911_v62, %v7117_v1  ;;  %v11285_v1 = vld [vmem:[%s14524_s7 + $0x2e0] ss:$16 sps:$4 sm:$0xff]   ;;  %v11308_v62 = vld [vmem:[%s14524_s7 + $0x3c4] ss:$16 sps:$4 sm:$0xff]  }
 0x8c9   :  { %v11306_v2 = vld [vmem:[%s14524_s7 + $0x3c0] ss:$16 sps:$4 sm:$0xff]   ;;  %v11311_v26 = vld [vmem:[%s14524_s7 + $0x3e4] ss:$16 sps:$4 sm:$0xff]  }
 0x8ca   :  { %v7169_v53 = vadd.f32 %v9914_v47, %v7120_v9  ;;  %v11288_v9 = vld [vmem:[%s14524_s7 + $0x300] ss:$16 sps:$4 sm:$0xff]  }
 0x8cb   :  { %v11309_v47 = vld [vmem:[%s14524_s7 + $0x3e0] ss:$16 sps:$4 sm:$0xff]  }
 0x8cc   :  { %v9915_v17 = vpop.f32.mrb[84].mxu1 }
 0x8cd   :  { %v9916_v20 = vpop.f32.mrb[85].mxu1 }
 0x8ce   :  { %v9917_v4 = vadd.f32 %v9916_v20, %v9915_v17  ;;  %v9918_v52 = vpop.f32.mrb[86].mxu1  ;;  %v11317_v20 = vld [vmem:[%s14524_s7 + $0x2c] ss:$16 sps:$4 sm:$0xff]  }
 0x8cf   :  { %v9919_v48 = vpop.f32.mrb[87].mxu1 }
 0x8d0   :  { %v9920_v42 = vadd.f32 %v9919_v48, %v9918_v52  ;;  %v7174_v35 = vadd.f32 %v9917_v4, %v7125_v63  ;;  %v11297_v63 = vld [vmem:[%s14524_s7 + $0x360] ss:$16 sps:$4 sm:$0xff]   ;;  %v11315_v4 = vld [vmem:[%s14524_s7 + $0x28] ss:$16 sps:$4 sm:$0xff]   ;;  %v11320_v52 = vld [vmem:[%s14524_s7 + $0x4c] ss:$16 sps:$4 sm:$0xff]  }
 0x8d1   :  { %v11318_v48 = vld [vmem:[%s14524_s7 + $0x48] ss:$16 sps:$4 sm:$0xff]  }
 0x8d2   :  { %v7177_v41 = vadd.f32 %v9920_v42, %v7128_v28  ;;  %v11300_v28 = vld [vmem:[%s14524_s7 + $0x380] ss:$16 sps:$4 sm:$0xff]   ;;  %v11323_v42 = vld [vmem:[%s14524_s7 + $0x6c] ss:$16 sps:$4 sm:$0xff]  }
 0x8e4   :  { %v9993_v59 = vpop.f32.mrb[88].mxu1 }
 0x8e5   :  { %v7223_v8 = vadd.f32 %v9993_v59, %v7174_v35  ;;  %v7214_v49 = vpop.f32.mrb[89].mxu1  ;;  %v11321_v35 = vld [vmem:[%s14524_s7 + $0x68] ss:$16 sps:$4 sm:$0xff]  }
 0x8e6   :  { %v7215_v15 = vadd.f32 %v7214_v49, %v7166_v5  ;;  %v9994_v11 = vpop.f32.mrb[90].mxu1  ;;  %v11314_v5 = vld [vmem:[%s14524_s7 + $0xc] ss:$16 sps:$4 sm:$0xff]   ;;  %v11324_v59 = vld [vmem:[%s14524_s7 + $0x88] ss:$16 sps:$4 sm:$0xff]  }
 0x8e7   :  { %v7226_v57 = vadd.f32 %v9994_v11, %v7177_v41  ;;  %v7217_v56 = vpop.f32.mrb[91].mxu1  ;;  %v7231_v31 = vmax.f32 %v7223_v8, 0.0  ;;  %v11326_v41 = vld [vmem:[%s14524_s7 + $0x8c] ss:$16 sps:$4 sm:$0xff]   ;;  %v11327_v49 = vld [vmem:[%s14524_s7 + $0xa8] ss:$16 sps:$4 sm:$0xff]  }
 0x8e8   :  { %v7218_v29 = vadd.f32 %v7217_v56, %v7169_v53  ;;  %v7229_v3 = vmax.f32 %v7215_v15, 0.0  ;;  %v11312_v53 = vld [vmem:[%s14524_s7 + $0x8] ss:$16 sps:$4 sm:$0xff]   ;;  %v11329_v8 = vld [vmem:[%s14524_s7 + $0xac] ss:$16 sps:$4 sm:$0xff]  }
 0x8e9   :  { %v7232_v45 = vmax.f32 %v7226_v57, 0.0  ;;  %v11332_v15 = vld [vmem:[%s14524_s7 + $0xcc] ss:$16 sps:$4 sm:$0xff]   ;;  %v11330_v11 = vld [vmem:[%s14524_s7 + $0xc8] ss:$16 sps:$4 sm:$0xff]  }
 0x8ea   :  { %v7230_v33 = vmax.f32 %v7218_v29, 0.0  ;;  %v11335_v57 = vld [vmem:[%s14524_s7 + $0xec] ss:$16 sps:$4 sm:$0xff]   ;;  %v11333_v56 = vld [vmem:[%s14524_s7 + $0xe8] ss:$16 sps:$4 sm:$0xff]  }
 0x8eb   :  { %v7234_v14 = vpack.c.bf16 %v7232_v45, %v7231_v31  ;;  %v11338_v29 = vld [vmem:[%s14524_s7 + $0x10c] ss:$16 sps:$4 sm:$0xff]   ;;  %v11336_v31 = vld [vmem:[%s14524_s7 + $0x108] ss:$16 sps:$4 sm:$0xff]  }
 0x8ec   :  { %v7233_v60 = vpack.c.bf16 %v7230_v33, %v7229_v3  ;;  %v11341_v45 = vld [vmem:[%s14524_s7 + $0x12c] ss:$16 sps:$4 sm:$0xff]   ;;  %v11339_v3 = vld [vmem:[%s14524_s7 + $0x128] ss:$16 sps:$4 sm:$0xff]  }
 0x8ed   :  { %7236 = vst [vmem:[#allocation6 + $0x8] sm:$0xff] %v7234_v14  ;;  %v11344_v33 = vld [vmem:[%s14524_s7 + $0x14c] ss:$16 sps:$4 sm:$0xff]   ;;  %v11342_v14 = vld [vmem:[%s14524_s7 + $0x148] ss:$16 sps:$4 sm:$0xff]  }
 0x8ee   :  { %7235 = vst [vmem:[#allocation6] sm:$0xff] %v7233_v60  ;;  %v11347_v60 = vld [vmem:[%s14524_s7 + $0x16c] ss:$16 sps:$4 sm:$0xff]  }
 0x8f4   :  { %v7245_v13 = vld [vmem:[#allocation6 + $0x8] sm:$0xf]  ;;  %v11237_v30 = vld [vmem:[#allocation6 + $0xc] ss:$0 sps:$4 sm:$0xff]  }
 0x8f5   :  { %7246 = vst [vmem:[#allocation7 + $0x8] sm:$0xf] %v7245_v13  ;;  %v7237_v61 = vld [vmem:[#allocation6] sm:$0xf]  ;;  %v11241_v7 = vld [vmem:[#allocation6 + $0x4] ss:$0 sps:$4 sm:$0xff]  }
 0x8f6   :  { %7252 = vst [vmem:[#allocation7 + $0xc] sm:$0xf] %v11237_v30  ;;  %7238 = vst [vmem:[#allocation7] sm:$0xf] %v7237_v61  ;;  %v11345_v13 = vld [vmem:[%s14524_s7 + $0x168] ss:$16 sps:$4 sm:$0xff]  }
 0x8f7   :  { %7244 = vst [vmem:[#allocation7 + $0x4] sm:$0xf] %v11241_v7  ;;  %v11350_v30 = vld [vmem:[%s14524_s7 + $0x18c] ss:$16 sps:$4 sm:$0xff]   ;;  %v11348_v61 = vld [vmem:[%s14524_s7 + $0x188] ss:$16 sps:$4 sm:$0xff]  }
 0x8f8   :  { %v11353_v7 = vld [vmem:[%s14524_s7 + $0x1ac] ss:$16 sps:$4 sm:$0xff]  }
 0x8fd   :  { %v14106_v19 = vld [vmem:[#allocation7 + $0x8] sm:$0xff] }
 0x8fe   :  { %v7253_v16 = vld [vmem:[#allocation7] sm:$0xff]  ;;  %v14121_v32 = vcombine.high %v14106_v19, %v14106_v19  ;;  %v14220_v17 = vcombine.low %v14106_v19, %v14106_v19  ;;  %v11356_v19 = vld [vmem:[%s14524_s7 + $0x1cc] ss:$16 sps:$4 sm:$0xff]  }
 0x8ff   :  { %v14108_v39 = vcombine.low %v7253_v16, %v7253_v16  ;;  %v14110_v55 = vcombine.high %v7253_v16, %v7253_v16  ;;  %v11351_v16 = vld [vmem:[%s14524_s7 + $0x1a8] ss:$16 sps:$4 sm:$0xff]  }
 0x901   :  { %8091 = vmatprep.mubr.bf16.mxu1 %v14110_v55 }
 0x902   :  { %8092 = vmatmul.mubr.bf16.vlgmr.msra.gmra.mrb[92].mxu1 %v14108_v39 }
 0x903   :  { %8101 = vmatpush1.bf16.msra.mxu1 %v11262_v34  ;;  %8132 = vmatprep.mubr.bf16.mxu1 %v14121_v32  ;;  %v11359_v34 = vld [vmem:[%s14524_s7 + $0x1ec] ss:$16 sps:$4 sm:$0xff]  }
 0x904   :  { %8102 = vmatprep.subr.bf16.mxu1 %v11269_v6  ;;  %v11357_v6 = vld [vmem:[%s14524_s7 + $0x1e8] ss:$16 sps:$4 sm:$0xff]  }
 0x907   :  { %8103 = vmatpush1.bf16.msra.mxu1 %v11267_v46  ;;  %v11362_v46 = vld [vmem:[%s14524_s7 + $0x20c] ss:$16 sps:$4 sm:$0xff]  }
 0x908   :  { %8104 = vmatprep.subr.bf16.mxu1 %v11272_v23  ;;  %v11360_v23 = vld [vmem:[%s14524_s7 + $0x208] ss:$16 sps:$4 sm:$0xff]  }
 0x90b   :  { %8105 = vmatpush1.bf16.msra.mxu1 %v11270_v58  ;;  %v11365_v58 = vld [vmem:[%s14524_s7 + $0x22c] ss:$16 sps:$4 sm:$0xff]  }
 0x90c   :  { %8106 = vmatprep.subr.bf16.mxu1 %v11275_v40  ;;  %v11363_v40 = vld [vmem:[%s14524_s7 + $0x228] ss:$16 sps:$4 sm:$0xff]  }
 0x90f   :  { %8107 = vmatpush1.bf16.msra.mxu1 %v11273_v18  ;;  %v11368_v18 = vld [vmem:[%s14524_s7 + $0x24c] ss:$16 sps:$4 sm:$0xff]  }
 0x910   :  { %8108 = vmatprep.subr.bf16.mxu1 %v11278_v38  ;;  %v11366_v38 = vld [vmem:[%s14524_s7 + $0x248] ss:$16 sps:$4 sm:$0xff]  }
 0x913   :  { %8109 = vmatpush1.bf16.msra.mxu1 %v11276_v37  ;;  %v11374_v37 = vld [vmem:[%s14524_s7 + $0x28c] ss:$16 sps:$4 sm:$0xff]  }
 0x914   :  { %8110 = vmatprep.subr.bf16.mxu1 %v11281_v24  ;;  %v11372_v24 = vld [vmem:[%s14524_s7 + $0x288] ss:$16 sps:$4 sm:$0xff]  }
 0x917   :  { %8111 = vmatpush1.bf16.msra.mxu1 %v11279_v0  ;;  %v11377_v0 = vld [vmem:[%s14524_s7 + $0x2ac] ss:$16 sps:$4 sm:$0xff]  }
 0x918   :  { %8112 = vmatprep.subr.bf16.mxu1 %v11284_v50  ;;  %v11375_v50 = vld [vmem:[%s14524_s7 + $0x2a8] ss:$16 sps:$4 sm:$0xff]  }
 0x91b   :  { %8113 = vmatpush1.bf16.msra.mxu1 %v11282_v36  ;;  %v11380_v36 = vld [vmem:[%s14524_s7 + $0x2cc] ss:$16 sps:$4 sm:$0xff]  }
 0x91c   :  { %8114 = vmatprep.subr.bf16.mxu1 %v11287_v21  ;;  %v11378_v21 = vld [vmem:[%s14524_s7 + $0x2c8] ss:$16 sps:$4 sm:$0xff]  }
 0x91f   :  { %8115 = vmatpush1.bf16.msra.mxu1 %v11285_v1  ;;  %v11383_v1 = vld [vmem:[%s14524_s7 + $0x2ec] ss:$16 sps:$4 sm:$0xff]  }
 0x920   :  { %8116 = vmatprep.subr.bf16.mxu1 %v11290_v10  ;;  %v11381_v10 = vld [vmem:[%s14524_s7 + $0x2e8] ss:$16 sps:$4 sm:$0xff]  }
 0x923   :  { %8117 = vmatpush1.bf16.msra.mxu1 %v11288_v9  ;;  %v11386_v9 = vld [vmem:[%s14524_s7 + $0x30c] ss:$16 sps:$4 sm:$0xff]  }
 0x924   :  { %8118 = vmatprep.subr.bf16.mxu1 %v11293_v51  ;;  %v11384_v51 = vld [vmem:[%s14524_s7 + $0x308] ss:$16 sps:$4 sm:$0xff]  }
 0x927   :  { %8119 = vmatpush1.bf16.msra.mxu1 %v11291_v54  ;;  %v11389_v54 = vld [vmem:[%s14524_s7 + $0x32c] ss:$16 sps:$4 sm:$0xff]  }
 0x928   :  { %8120 = vmatprep.subr.bf16.mxu1 %v11296_v43  ;;  %v11387_v43 = vld [vmem:[%s14524_s7 + $0x328] ss:$16 sps:$4 sm:$0xff]  }
 0x92b   :  { %8121 = vmatpush1.bf16.msra.mxu1 %v11294_v12  ;;  %v11392_v12 = vld [vmem:[%s14524_s7 + $0x34c] ss:$16 sps:$4 sm:$0xff]  }
 0x92c   :  { %8122 = vmatprep.subr.bf16.mxu1 %v11299_v25  ;;  %v11390_v25 = vld [vmem:[%s14524_s7 + $0x348] ss:$16 sps:$4 sm:$0xff]  }
 0x92f   :  { %8123 = vmatpush1.bf16.msra.mxu1 %v11297_v63  ;;  %v11395_v63 = vld [vmem:[%s14524_s7 + $0x36c] ss:$16 sps:$4 sm:$0xff]  }
 0x930   :  { %8124 = vmatprep.subr.bf16.mxu1 %v11302_v44  ;;  %v11393_v44 = vld [vmem:[%s14524_s7 + $0x368] ss:$16 sps:$4 sm:$0xff]  }
 0x933   :  { %8125 = vmatpush1.bf16.msra.mxu1 %v11300_v28  ;;  %v11398_v28 = vld [vmem:[%s14524_s7 + $0x38c] ss:$16 sps:$4 sm:$0xff]  }
 0x934   :  { %8126 = vmatprep.subr.bf16.mxu1 %v11305_v22  ;;  %v11396_v22 = vld [vmem:[%s14524_s7 + $0x388] ss:$16 sps:$4 sm:$0xff]  }
 0x937   :  { %8127 = vmatpush1.bf16.msra.mxu1 %v11303_v27  ;;  %v11401_v27 = vld [vmem:[%s14524_s7 + $0x3ac] ss:$16 sps:$4 sm:$0xff]  }
 0x938   :  { %8128 = vmatprep.subr.bf16.mxu1 %v11308_v62  ;;  %v11399_v62 = vld [vmem:[%s14524_s7 + $0x3a8] ss:$16 sps:$4 sm:$0xff]  }
 0x93b   :  { %8129 = vmatpush1.bf16.msra.mxu1 %v11306_v2  ;;  %v11404_v2 = vld [vmem:[%s14524_s7 + $0x3cc] ss:$16 sps:$4 sm:$0xff]  }
 0x93c   :  { %8130 = vmatprep.subr.bf16.mxu1 %v11311_v26  ;;  %v11402_v26 = vld [vmem:[%s14524_s7 + $0x3c8] ss:$16 sps:$4 sm:$0xff]  }
 0x93f   :  { %8131 = vmatpush1.bf16.msra.mxu1 %v11309_v47  ;;  %v11407_v47 = vld [vmem:[%s14524_s7 + $0x3ec] ss:$16 sps:$4 sm:$0xff]  }
 0x940   :  { %8141 = vmatprep.subr.bf16.mxu1 %v11314_v5  ;;  %v11405_v5 = vld [vmem:[%s14524_s7 + $0x3e8] ss:$16 sps:$4 sm:$0xff]  }
 0x942   :  { %8133 = vmatmul.mubr.bf16.vlgmr.msra.gmra.mrb[92].mxu1 %v14220_v17 }
 0x943   :  { %8142 = vmatpush1.bf16.msra.mxu1 %v11312_v53  ;;  %8173 = vmatprep.mubr.bf16.mxu1 %v14110_v55  ;;  %v11354_v55 = vld [vmem:[%s14524_s7 + $0x1c8] ss:$16 sps:$4 sm:$0xff]   ;;  %v11408_v53 = vld [vmem:[%s14526_s9 + $0x40] sm:$0xff]  }
 0x944   :  { %8143 = vmatprep.subr.bf16.mxu1 %v11317_v20  ;;  %v11409_v20 = vld [vmem:[%s14526_s9] sm:$0xff]  }
 0x947   :  { %8144 = vmatpush1.bf16.msra.mxu1 %v11315_v4  ;;  %v11410_v4 = vld [vmem:[%s14526_s9 + $0x48] sm:$0xff]  }
 0x948   :  { %8145 = vmatprep.subr.bf16.mxu1 %v11320_v52  ;;  %v11411_v52 = vld [vmem:[%s14526_s9 + $0x8] sm:$0xff]  }
 0x94b   :  { %8146 = vmatpush1.bf16.msra.mxu1 %v11318_v48  ;;  %v11412_v48 = vld [vmem:[%s14526_s9 + $0x50] sm:$0xff]  }
 0x94c   :  { %8147 = vmatprep.subr.bf16.mxu1 %v11323_v42  ;;  %v11413_v42 = vld [vmem:[%s14526_s9 + $0x10] sm:$0xff]  }
 0x94f   :  { %8148 = vmatpush1.bf16.msra.mxu1 %v11321_v35  ;;  %v11415_v35 = vld [vmem:[%s14526_s9 + $0x18] sm:$0xff]  }
 0x950   :  { %8149 = vmatprep.subr.bf16.mxu1 %v11326_v41  ;;  %v11416_v41 = vld [vmem:[%s14526_s9 + $0x60] sm:$0xff]  }
 0x953   :  { %8150 = vmatpush1.bf16.msra.mxu1 %v11324_v59  ;;  %v11417_v59 = vld [vmem:[%s14526_s9 + $0x20] sm:$0xff]  }
 0x954   :  { %8151 = vmatprep.subr.bf16.mxu1 %v11329_v8  ;;  %v11418_v8 = vld [vmem:[%s14526_s9 + $0x68] sm:$0xff]  }
 0x957   :  { %8152 = vmatpush1.bf16.msra.mxu1 %v11327_v49  ;;  %v11419_v49 = vld [vmem:[%s14526_s9 + $0x28] sm:$0xff]  }
 0x958   :  { %8153 = vmatprep.subr.bf16.mxu1 %v11332_v15  ;;  %v11420_v15 = vld [vmem:[%s14526_s9 + $0x70] sm:$0xff]  }
 0x95b   :  { %8154 = vmatpush1.bf16.msra.mxu1 %v11330_v11  ;;  %v11421_v11 = vld [vmem:[%s14526_s9 + $0x30] sm:$0xff]  }
 0x95c   :  { %8155 = vmatprep.subr.bf16.mxu1 %v11335_v57  ;;  %v11422_v57 = vld [vmem:[%s14526_s9 + $0x78] sm:$0xff]  }
 0x95f   :  { %8156 = vmatpush1.bf16.msra.mxu1 %v11333_v56  ;;  %v11423_v56 = vld [vmem:[%s14526_s9 + $0x38] sm:$0xff]  }
 0x960   :  { %8157 = vmatprep.subr.bf16.mxu1 %v11338_v29  ;;  %v11424_v29 = vld [vmem:[%s14526_s9 + $0xc0] sm:$0xff]  }
 0x963   :  { %8158 = vmatpush1.bf16.msra.mxu1 %v11336_v31  ;;  %v7385_v31 = vlaneseq }
 0x964   :  { %8159 = vmatprep.subr.bf16.mxu1 %v11341_v45 }
 0x965   :  { %v7386_v45 = vshrl.u32 %v7385_v31, 7 }
 0x967   :  { %8160 = vmatpush1.bf16.msra.mxu1 %v11339_v3  ;;  %v7387_v3 = vsub.s32 0, %v7386_v45 }
 0x968   :  { %8161 = vmatprep.subr.bf16.mxu1 %v11344_v33  ;;  %v7383_v33 = vld [vmem:[%s14527_s8] sm:$0xf] }
 0x96b   :  { %8162 = vmatpush1.bf16.msra.mxu1 %v11342_v14  ;;  %v7391_v14 = vsub.s32 1, %v7386_v45 }
 0x96c   :  { %8163 = vmatprep.subr.bf16.mxu1 %v11347_v60  ;;  %v7388_v60 = vrot.slane %v7383_v33, %v7387_v3 }
 0x96f   :  { %8164 = vmatpush1.bf16.msra.mxu1 %v11345_v13  ;;  %v7392_v13 = vrot.slane %v7383_v33, %v7391_v14 }
 0x970   :  { %8165 = vmatprep.subr.bf16.mxu1 %v11350_v30 }
 0x973   :  { %8166 = vmatpush1.bf16.msra.mxu1 %v11348_v61 }
 0x974   :  { %8167 = vmatprep.subr.bf16.mxu1 %v11353_v7 }
 0x977   :  { %8168 = vmatpush1.bf16.msra.mxu1 %v11351_v16 }
 0x978   :  { %8169 = vmatprep.subr.bf16.mxu1 %v11356_v19 }
 0x97b   :  { %8170 = vmatpush1.bf16.msra.mxu1 %v11354_v55 }
 0x97c   :  { %8171 = vmatprep.subr.bf16.mxu1 %v11359_v34 }
 0x97f   :  { %8172 = vmatpush1.bf16.msra.mxu1 %v11357_v6 }
 0x980   :  { %8182 = vmatprep.subr.bf16.mxu1 %v11362_v46 }
 0x982   :  { %8174 = vmatmul.mubr.bf16.vlgmr.msra.gmra.mrb[96].mxu1 %v14108_v39  ;;  %v11371_v39 = vld [vmem:[%s14524_s7 + $0x26c] ss:$16 sps:$4 sm:$0xff]  }
 0x983   :  { %8183 = vmatpush1.bf16.msra.mxu1 %v11360_v23  ;;  %8214 = vmatprep.mubr.bf16.mxu1 %v14121_v32  ;;  %v11369_v32 = vld [vmem:[%s14524_s7 + $0x268] ss:$16 sps:$4 sm:$0xff]   ;;  %v11425_v23 = vld [vmem:[%s14526_s9 + $0x80] sm:$0xff]  }
 0x984   :  { %8184 = vmatprep.subr.bf16.mxu1 %v11365_v58 }
 0x987   :  { %8185 = vmatpush1.bf16.msra.mxu1 %v11363_v40  ;;  %v11426_v40 = vld [vmem:[%s14526_s9 + $0xc8] sm:$0xff]  }
 0x988   :  { %8186 = vmatprep.subr.bf16.mxu1 %v11368_v18  ;;  %v11427_v18 = vld [vmem:[%s14526_s9 + $0x88] sm:$0xff]  }
 0x98b   :  { %8187 = vmatpush1.bf16.msra.mxu1 %v11366_v38  ;;  %v11428_v38 = vld [vmem:[%s14526_s9 + $0xd0] sm:$0xff]  }
 0x98c   :  { %8188 = vmatprep.subr.bf16.mxu1 %v11371_v39  ;;  %v11429_v39 = vld [vmem:[%s14526_s9 + $0x90] sm:$0xff]  }
 0x98f   :  { %8189 = vmatpush1.bf16.msra.mxu1 %v11369_v32  ;;  %v11430_v32 = vld [vmem:[%s14526_s9 + $0xd8] sm:$0xff]  }
 0x990   :  { %8190 = vmatprep.subr.bf16.mxu1 %v11374_v37  ;;  %v11431_v37 = vld [vmem:[%s14526_s9 + $0x98] sm:$0xff]  }
 0x993   :  { %8191 = vmatpush1.bf16.msra.mxu1 %v11372_v24  ;;  %v11432_v24 = vld [vmem:[%s14526_s9 + $0xe0] sm:$0xff]  }
 0x994   :  { %8192 = vmatprep.subr.bf16.mxu1 %v11377_v0  ;;  %v11433_v0 = vld [vmem:[%s14526_s9 + $0xa0] sm:$0xff]  }
 0x997   :  { %8193 = vmatpush1.bf16.msra.mxu1 %v11375_v50  ;;  %v11434_v50 = vld [vmem:[%s14526_s9 + $0xe8] sm:$0xff]  }
 0x998   :  { %8194 = vmatprep.subr.bf16.mxu1 %v11380_v36  ;;  %v11435_v36 = vld [vmem:[%s14526_s9 + $0xa8] sm:$0xff]  }
 0x99b   :  { %8195 = vmatpush1.bf16.msra.mxu1 %v11378_v21  ;;  %v11436_v21 = vld [vmem:[%s14526_s9 + $0xf0] sm:$0xff]  }
 0x99c   :  { %8196 = vmatprep.subr.bf16.mxu1 %v11383_v1  ;;  %v11437_v1 = vld [vmem:[%s14526_s9 + $0xb0] sm:$0xff]  }
 0x99f   :  { %8197 = vmatpush1.bf16.msra.mxu1 %v11381_v10  ;;  %v11438_v10 = vld [vmem:[%s14526_s9 + $0xf8] sm:$0xff]  }
 0x9a0   :  { %8198 = vmatprep.subr.bf16.mxu1 %v11386_v9  ;;  %v11439_v9 = vld [vmem:[%s14526_s9 + $0xb8] sm:$0xff]  }
 0x9a3   :  { %8199 = vmatpush1.bf16.msra.mxu1 %v11384_v51  ;;  %v7395_v51 = vsub.s32 2, %v7386_v45 }
 0x9a4   :  { %8200 = vmatprep.subr.bf16.mxu1 %v11389_v54  ;;  %v7399_v54 = vsub.s32 3, %v7386_v45 }
 0x9a7   :  { %8201 = vmatpush1.bf16.msra.mxu1 %v11387_v43  ;;  %v7396_v43 = vrot.slane %v7383_v33, %v7395_v51 }
 0x9a8   :  { %8202 = vmatprep.subr.bf16.mxu1 %v11392_v12  ;;  %v7400_v12 = vrot.slane %v7383_v33, %v7399_v54 }
 0x9ab   :  { %8203 = vmatpush1.bf16.msra.mxu1 %v11390_v25 }
 0x9ac   :  { %8204 = vmatprep.subr.bf16.mxu1 %v11395_v63 }
 0x9af   :  { %8205 = vmatpush1.bf16.msra.mxu1 %v11393_v44 }
 0x9b0   :  { %8206 = vmatprep.subr.bf16.mxu1 %v11398_v28 }
 0x9b3   :  { %8207 = vmatpush1.bf16.msra.mxu1 %v11396_v22 }
 0x9b4   :  { %8208 = vmatprep.subr.bf16.mxu1 %v11401_v27 }
 0x9b7   :  { %8209 = vmatpush1.bf16.msra.mxu1 %v11399_v62 }
 0x9b8   :  { %8210 = vmatprep.subr.bf16.mxu1 %v11404_v2 }
 0x9bb   :  { %8211 = vmatpush1.bf16.msra.mxu1 %v11402_v26 }
 0x9bc   :  { %8212 = vmatprep.subr.bf16.mxu1 %v11407_v47 }
 0x9bf   :  { %8213 = vmatpush1.bf16.msra.mxu1 %v11405_v5 }
 0x9c0   :  { %9931 = vmatprep.subr.bf16.mxu1 %v11408_v53 }
 0x9c2   :  { %8215 = vmatmul.mubr.bf16.vlgmr.msra.gmra.mrb[96].mxu1 %v14220_v17  ;;  %v11414_v17 = vld [vmem:[%s14526_s9 + $0x58] sm:$0xff]  }
 0x9c3   :  { %9932 = vmatpush3.bf16.msra.mxu1 %v11409_v20 }
 0x9c4   :  { %9933 = vmatprep.subr.bf16.mxu1 %v11410_v4 }
 0x9c7   :  { %9934 = vmatpush3.bf16.msra.mxu1 %v11411_v52 }
 0x9c8   :  { %9935 = vmatprep.subr.bf16.mxu1 %v11412_v48  ;;  %v9264_v48 = vld [vmem:[%s14528_s10] ss:$0 sm:$0xff] }
 0x9cb   :  { %9936 = vmatpush3.bf16.msra.mxu1 %v11413_v42 }
 0x9cc   :  { %9937 = vmatprep.subr.bf16.mxu1 %v11414_v17 }
 0x9cf   :  { %9938 = vmatpush3.bf16.msra.mxu1 %v11415_v35 }
 0x9d0   :  { %9939 = vmatprep.subr.bf16.mxu1 %v11416_v41 }
 0x9d3   :  { %9940 = vmatpush3.bf16.msra.mxu1 %v11417_v59 }
 0x9d4   :  { %9941 = vmatprep.subr.bf16.mxu1 %v11418_v8 }
 0x9d7   :  { %9942 = vmatpush3.bf16.msra.mxu1 %v11419_v49 }
 0x9d8   :  { %9943 = vmatprep.subr.bf16.mxu1 %v11420_v15 }
 0x9db   :  { %9944 = vmatpush3.bf16.msra.mxu1 %v11421_v11 }
 0x9dc   :  { %9945 = vmatprep.subr.bf16.mxu1 %v11422_v57 }
 0x9df   :  { %9946 = vmatpush3.bf16.msra.mxu1 %v11423_v56 }
 0x9e0   :  { %9953 = vmatprep.subr.bf16.mxu1 %v11424_v29 }
 0xa15   :  { %v8134_v30 = vpop.f32.mrb[92].mxu1 }
 0xa16   :  { %v10155_v61 = vadd.f32 %v8134_v30, %v7388_v60  ;;  %v8136_v7 = vpop.f32.mrb[93].mxu1 }
 0xa17   :  { %v10156_v16 = vadd.f32 %v8136_v7, %v7392_v13  ;;  %v8138_v19 = vpop.f32.mrb[94].mxu1 }
 0xa18   :  { %v8223_v55 = vmax.f32 %v10155_v61, 0.0  ;;  %v8139_v34 = vpop.f32.mrb[95].mxu1 }
 0xa19   :  { %v8224_v6 = vmax.f32 %v10156_v16, 0.0 }
 0xa1a   :  { %v8227_v58 = vpack.c.bf16 %v8223_v55, %v8223_v55 }
 0xa1b   :  { %v8228_v46 = vpack.c.bf16 %v8224_v6, %v8224_v6 }
 0xa1d   :  { %8526 = vmatprep.mubr.bf16.mxu1 %v8228_v46 }
 0xa1e   :  { %8527 = vmatmul.mubr.bf16.vlgmr.msra.gmra.mrb[100].mxu1 %v8227_v58 }
 0xa1f   :  { %9954 = vmatpush3.bf16.msra.mxu1 %v11425_v23 }
 0xa20   :  { %9955 = vmatprep.subr.bf16.mxu1 %v11426_v40 }
 0xa23   :  { %9956 = vmatpush3.bf16.msra.mxu1 %v11427_v18 }
 0xa24   :  { %9957 = vmatprep.subr.bf16.mxu1 %v11428_v38 }
 0xa27   :  { %9958 = vmatpush3.bf16.msra.mxu1 %v11429_v39 }
 0xa28   :  { %9959 = vmatprep.subr.bf16.mxu1 %v11430_v32 }
 0xa2b   :  { %9960 = vmatpush3.bf16.msra.mxu1 %v11431_v37 }
 0xa2c   :  { %9961 = vmatprep.subr.bf16.mxu1 %v11432_v24 }
 0xa2f   :  { %9962 = vmatpush3.bf16.msra.mxu1 %v11433_v0 }
 0xa30   :  { %9963 = vmatprep.subr.bf16.mxu1 %v11434_v50 }
 0xa33   :  { %9964 = vmatpush3.bf16.msra.mxu1 %v11435_v36 }
 0xa34   :  { %9965 = vmatprep.subr.bf16.mxu1 %v11436_v21 }
 0xa37   :  { %9966 = vmatpush3.bf16.msra.mxu1 %v11437_v1 }
 0xa38   :  { %9967 = vmatprep.subr.bf16.mxu1 %v11438_v10 }
 0xa3b   :  { %9968 = vmatpush3.bf16.msra.mxu1 %v11439_v9 }
 0xa95   :  { %v8216_v25 = vpop.f32.mrb[96].mxu1 }
 0xa96   :  { %v10157_v63 = vadd.f32 %v8216_v25, %v7396_v43  ;;  %v8218_v44 = vpop.f32.mrb[97].mxu1 }
 0xa97   :  { %v10158_v28 = vadd.f32 %v8218_v44, %v7400_v12  ;;  %v8220_v22 = vpop.f32.mrb[98].mxu1 }
 0xa98   :  { %v8225_v27 = vmax.f32 %v10157_v63, 0.0  ;;  %v8221_v62 = vpop.f32.mrb[99].mxu1 }
 0xa99   :  { %v8226_v2 = vmax.f32 %v10158_v28, 0.0 }
 0xa9a   :  { %v8229_v47 = vpack.c.bf16 %v8225_v27, %v8225_v27 }
 0xa9b   :  { %v8230_v26 = vpack.c.bf16 %v8226_v2, %v8226_v2 }
 0xa9d   :  { %8566 = vmatprep.mubr.bf16.mxu1 %v8230_v26 }
 0xa9e   :  { %8567 = vmatmul.mubr.bf16.vlgmr.msra.gmra.mrb[104].mxu1 %v8229_v47 }
 0xaf1   :  { %v9947_v5 = vpop.f32.mrb[100].mxu1 }
 0xaf2   :  { %v9948_v53 = vpop.f32.mrb[101].mxu1 }
 0xaf3   :  { %v9949_v20 = vadd.f32 %v9948_v53, %v9947_v5  ;;  %v9950_v4 = vpop.f32.mrb[102].mxu1 }
 0xaf4   :  { %v9951_v52 = vpop.f32.mrb[103].mxu1 }
 0xaf5   :  { %v8529_v35 = vadd.f32 %v9949_v20, %v9264_v48 }
 0xb71   :  { %v9969_v42 = vpop.f32.mrb[104].mxu1 }
 0xb72   :  { %v9970_v17 = vpop.f32.mrb[105].mxu1 }
 0xb73   :  { %v9971_v41 = vadd.f32 %v9970_v17, %v9969_v42  ;;  %v9972_v59 = vpop.f32.mrb[106].mxu1 }
 0xb74   :  { %v9973_v8 = vpop.f32.mrb[107].mxu1 }
 0xb75   :  { %v8569_v49 = vadd.f32 %v9971_v41, %v8529_v35 }
 0xb77   :  { %8574 = vst [vmem:[%s14529_s11] sm:$0xff] %v8569_v49 }

</bundles_post_ra>
